<compile_context>
chip_gen: v6e
topology: v6e:2x2x1
jax: 0.10.0
libtpu: 0.0.40
codegen_flags: <defaults>
</compile_context>

<pallas_src>
import functools

import jax
import jax.numpy as jnp
from jax.experimental import pallas as pl
from jax.experimental.pallas import tpu as pltpu


# ---------------------------------------------------------------------------
# small helpers
# ---------------------------------------------------------------------------

def _gelu(x):
    # exact (erf-based) GELU, matching nn.GELU()
    return 0.5 * x * (1.0 + jax.lax.erf(x * 0.7071067811865476))


def _pick_tile(n, pref, base):
    # largest tile <= pref that divides n and is a multiple of `base`,
    # falling back to the full extent when n is small / not base-aligned.
    if n <= pref or n % base != 0:
        return n
    t = (pref // base) * base
    while n % t != 0:
        t -= base
    return max(t, base)


def _pick_div(n, target):
    # largest divisor of n that is <= target
    d = max(1, min(n, target))
    while n % d != 0:
        d -= 1
    return d


def _fullspec(shape):
    nd = len(shape)
    return pl.BlockSpec(tuple(shape), lambda *_: (0,) * nd)


def _cparams(*sem):
    return pltpu.CompilerParams(dimension_semantics=sem,
                                vmem_limit_bytes=64 * 1024 * 1024)


# ---------------------------------------------------------------------------
# Pallas kernels
# ---------------------------------------------------------------------------

def _matmul_kernel(*refs, has_bias, has_res, post_gelu, use_bf16):
    # o = [gelu]( a @ x + bias + res )
    i = 0
    a_ref = refs[i]; i += 1
    x_ref = refs[i]; i += 1
    bias_ref = None
    if has_bias:
        bias_ref = refs[i]; i += 1
    res_ref = None
    if has_res:
        res_ref = refs[i]; i += 1
    o_ref = refs[i]

    a = a_ref[...]
    x = x_ref[...]
    if use_bf16:
        a = a.astype(jnp.bfloat16)   # no-op when the weight is pre-cast bf16
        x = x.astype(jnp.bfloat16)
    acc = jnp.dot(a, x, preferred_element_type=jnp.float32)
    if has_bias:
        acc = acc + bias_ref[...]
    if has_res:
        acc = acc + res_ref[...]
    if post_gelu:
        acc = _gelu(acc)
    o_ref[...] = acc


def _group_norm_kernel(*refs, eps, post_gelu, has_res, has_affine):
    # x block: (Gb, Cg, B, HW); stats per (group, batch) over (Cg, HW)
    i = 0
    x_ref = refs[i]; i += 1
    g_ref = refs[i]; i += 1
    b_ref = refs[i]; i += 1
    r_ref = None
    if has_res:
        r_ref = refs[i]; i += 1
    sc_ref = sh_ref = None
    if has_affine:
        sc_ref = refs[i]; sh_ref = refs[i + 1]; i += 2
    o_ref = refs[i]

    x = x_ref[...]
    mu = jnp.mean(jnp.mean(x, axis=3, keepdims=True), axis=1, keepdims=True)
    xc = x - mu
    var = jnp.mean(jnp.mean(xc * xc, axis=3, keepdims=True), axis=1,
                   keepdims=True)
    y = xc * jax.lax.rsqrt(var + eps) * g_ref[...] + b_ref[...]
    if has_res:
        y = y + r_ref[...]
    if has_affine:
        y = y * sc_ref[...] + sh_ref[...]
    if post_gelu:
        y = _gelu(y)
    o_ref[...] = y


def _dw3x3_kernel(xp_ref, w_ref, b_ref, o_ref, *, Wp, M):
    # depthwise 3x3 on the flattened padded slab (no per-batch unroll;
    # cross-batch bleed only touches border pixels that the wrapper discards).
    # xp: (tc, B*Hp*Wp); w: (9, tc, 1); bias: (tc, 1); o: (tc, M)
    acc = jnp.zeros(o_ref.shape, jnp.float32)
    for k in range(9):
        ky, kx = divmod(k, 3)
        off = ky * Wp + kx
        acc = acc + xp_ref[:, off:off + M] * w_ref[k]
    o_ref[...] = acc + b_ref[...]


def _conv3x3_kernel(xp_ref, w_ref, b_ref, o_ref, *, Wp, M):
    # dense 3x3 conv: 9 MXU matmuls of (tco, Ci) @ (Ci, M)
    # xp: (Ci, B*Hp*Wp) (resident across output-channel tiles); w: (9, tco, Ci)
    xb = xp_ref[...].astype(jnp.bfloat16)
    acc = jnp.zeros(o_ref.shape, jnp.float32)
    for k in range(9):
        ky, kx = divmod(k, 3)
        off = ky * Wp + kx
        acc = acc + jnp.dot(w_ref[k], xb[:, off:off + M],
                            preferred_element_type=jnp.float32)
    o_ref[...] = acc + b_ref[...]


def _grouped3x3_kernel(xp_ref, w_ref, b_ref, o_ref, *, Wp, M, cg):
    # grouped 3x3 conv with cg(=4) in/out channels per group: VPU broadcast-MAC
    # (a 4x4 dot would use <2% of the MXU).  xp: (Gb, cg, B*Hp*Wp);
    # w: (Gb, cg, cg, 9); bias: (Gb, cg, 1); o: (Gb, cg, M)
    gb = xp_ref.shape[0]
    accs = [jnp.zeros((gb, M), jnp.float32) for _ in range(cg)]
    for ci in range(cg):
        for k in range(9):
            ky, kx = divmod(k, 3)
            off = ky * Wp + kx
            tap = xp_ref[:, ci, off:off + M]
            for co in range(cg):
                accs[co] = accs[co] + tap * w_ref[:, co, ci, k:k + 1]
    for co in range(cg):
        o_ref[:, co, :] = accs[co] + b_ref[:, co, :]


def _sk_fused_kernel(x_ref, dc_ref, dw1w_ref, dw1b_ref, pww_ref, pwb_ref,
                     convw_ref, convb_ref, fcw_ref, fcb_ref, fcsw_ref,
                     fcsb_ref, o_ref, *, B, HW, post_gelu):
    # Fused SKAttention tail: d1 = 1x1(dwconv_out), d2 = 1x1(x), U = 1x1(x),
    # S = mean+max over HW, Z = fc(S), L = fcs(Z), softmax over the 2 branches,
    # V = w1*d1 + w2*d2 (+ producer-side GELU).  U/S/Z/L never leave VMEM.
    C = x_ref.shape[0]
    xb = x_ref[...].astype(jnp.bfloat16)
    dcb = dc_ref[...].astype(jnp.bfloat16)
    d1 = jnp.dot(dw1w_ref[...], dcb,
                 preferred_element_type=jnp.float32) + dw1b_ref[...]
    d2 = jnp.dot(pww_ref[...], xb,
                 preferred_element_type=jnp.float32) + pwb_ref[...]
    u = jnp.dot(convw_ref[...], xb,
                preferred_element_type=jnp.float32) + convb_ref[...]
    fcw = fcw_ref[...]
    fcb = fcb_ref[...]
    fcsw = fcsw_ref[...]
    fcsb = fcsb_ref[...]
    for b in range(B):                         # B is small & static
        lo, hi = b * HW, (b + 1) * HW
        ub = u[:, lo:hi]
        s = (jnp.mean(ub, axis=1, keepdims=True)
             + jnp.max(ub, axis=1, keepdims=True))             # (C, 1)
        z = jnp.dot(fcw, s, preferred_element_type=jnp.float32) + fcb
        logit = jnp.dot(fcsw, z, preferred_element_type=jnp.float32) + fcsb
        l1, l2 = logit[:C], logit[C:]
        m = jnp.maximum(l1, l2)
        e1 = jnp.exp(l1 - m)
        e2 = jnp.exp(l2 - m)
        inv = 1.0 / (e1 + e2)
        v = (e1 * inv) * d1[:, lo:hi] + (e2 * inv) * d2[:, lo:hi]
        if post_gelu:
            v = _gelu(v)
        o_ref[:, lo:hi] = v


# ---------------------------------------------------------------------------
# pallas_call wrappers
# ---------------------------------------------------------------------------

def pl_matmul(a, x, bias=None, res=None, *, post_gelu=False, use_bf16=True,
              tile_m=256, tile_n=512):
    """out = [gelu]( a @ x + bias + res ); bias is (M, 1)."""
    M, K = a.shape
    _, N = x.shape
    tm = _pick_tile(M, tile_m, 8)
    tn = _pick_tile(N, tile_n, 128)
    if (M // tm) * (N // tn) == 1 and M % 16 == 0:
        tm = M // 2            # >=2 parallel steps so both TensorCores work
    grid = (M // tm, N // tn)

    in_specs = [pl.BlockSpec((tm, K), lambda i, j: (i, 0)),
                pl.BlockSpec((K, tn), lambda i, j: (0, j))]
    args = [a, x]
    if bias is not None:
        in_specs.append(pl.BlockSpec((tm, 1), lambda i, j: (i, 0)))
        args.append(bias)
    if res is not None:
        in_specs.append(pl.BlockSpec((tm, tn), lambda i, j: (i, j)))
        args.append(res)

    kernel = functools.partial(_matmul_kernel, has_bias=bias is not None,
                               has_res=res is not None, post_gelu=post_gelu,
                               use_bf16=use_bf16)
    return pl.pallas_call(
        kernel,
        grid=grid,
        in_specs=in_specs,
        out_specs=pl.BlockSpec((tm, tn), lambda i, j: (i, j)),
        out_shape=jax.ShapeDtypeStruct((M, N), jnp.float32),
        compiler_params=_cparams("parallel", "parallel"),
    )(*args)


def group_norm(x_slab, gamma, beta, num_groups, B, HW, *, eps=1e-5,
               post_gelu=False, res=None, post_scale=None, post_shift=None):
    C, N = x_slab.shape
    G = num_groups
    Cg = C // G
    xg = x_slab.reshape(G, Cg, B, HW)                     # pure reshape
    g4 = gamma.reshape(G, Cg, 1, 1)
    b4 = beta.reshape(G, Cg, 1, 1)
    Gb = _pick_div(G, max(1, G // 2))                     # several groups/step

    big = pl.BlockSpec((Gb, Cg, B, HW), lambda g: (g, 0, 0, 0))
    small = pl.BlockSpec((Gb, Cg, 1, 1), lambda g: (g, 0, 0, 0))
    args = [xg, g4, b4]
    specs = [big, small, small]
    has_res = res is not None
    if has_res:
        args.append(res.reshape(G, Cg, B, HW))
        specs.append(big)
    has_aff = post_scale is not None
    if has_aff:
        args += [post_scale.reshape(G, Cg, 1, 1),
                 post_shift.reshape(G, Cg, 1, 1)]
        specs += [small, small]

    kernel = functools.partial(_group_norm_kernel, eps=eps,
                               post_gelu=post_gelu, has_res=has_res,
                               has_affine=has_aff)
    out = pl.pallas_call(
        kernel,
        grid=(G // Gb,),
        in_specs=specs,
        out_specs=big,
        out_shape=jax.ShapeDtypeStruct((G, Cg, B, HW), jnp.float32),
        compiler_params=_cparams("parallel"),
    )(*args)
    return out.reshape(C, N)


def _pad_slab(x_slab, B, H, W):
    C = x_slab.shape[0]
    Hp, Wp = H + 2, W + 2
    xp = jnp.pad(x_slab.reshape(C, B, H, W), ((0, 0), (0, 0), (1, 1), (1, 1)))
    return xp.reshape(C, B * Hp * Wp), Hp, Wp


def _unpad_out(out_flat, C, B, H, W, Hp, Wp):
    # kernel output index q corresponds to padded flat position q + (Wp+1)
    Npad = B * Hp * Wp
    M = out_flat.shape[-1]
    full = jnp.pad(out_flat, ((0, 0), (0, Npad - M)))
    return full.reshape(C, B, Hp, Wp)[:, :, :H, :W].reshape(C, B * H * W)


def depthwise_conv3x3(x_slab, w9, bias, B, H, W):
    # nn.Conv2d(C, C, 3, padding=1, groups=C); w9: (9, C, 1)
    C, _ = x_slab.shape
    xp, Hp, Wp = _pad_slab(x_slab, B, H, W)
    Npad = B * Hp * Wp
    M = Npad - 2 * (Wp + 1)
    tc = C // 2 if C % 16 == 0 else C
    kernel = functools.partial(_dw3x3_kernel, Wp=Wp, M=M)
    out = pl.pallas_call(
        kernel,
        grid=(C // tc,),
        in_specs=[pl.BlockSpec((tc, Npad), lambda i: (i, 0)),
                  pl.BlockSpec((9, tc, 1), lambda i: (0, i, 0)),
                  pl.BlockSpec((tc, 1), lambda i: (i, 0))],
        out_specs=pl.BlockSpec((tc, M), lambda i: (i, 0)),
        out_shape=jax.ShapeDtypeStruct((C, M), jnp.float32),
        compiler_params=_cparams("parallel"),
    )(xp, w9, bias)
    return _unpad_out(out, C, B, H, W, Hp, Wp)


def conv3x3_dense(x_slab, w9, bias, B, H, W):
    # nn.Conv2d(Ci, Co, 3, padding=1); w9: (9, Co, Ci) bf16; bias: (Co, 1)
    Ci, _ = x_slab.shape
    Co = bias.shape[0]
    xp, Hp, Wp = _pad_slab(x_slab, B, H, W)
    Npad = B * Hp * Wp
    M = Npad - 2 * (Wp + 1)
    tco = Co // 2 if Co % 16 == 0 else Co
    kernel = functools.partial(_conv3x3_kernel, Wp=Wp, M=M)
    out = pl.pallas_call(
        kernel,
        grid=(Co // tco,),
        in_specs=[pl.BlockSpec((Ci, Npad), lambda i: (0, 0)),
                  pl.BlockSpec((9, tco, Ci), lambda i: (0, i, 0)),
                  pl.BlockSpec((tco, 1), lambda i: (i, 0))],
        out_specs=pl.BlockSpec((tco, M), lambda i: (i, 0)),
        out_shape=jax.ShapeDtypeStruct((Co, M), jnp.float32),
        compiler_params=_cparams("parallel"),
    )(xp, w9, bias)
    return _unpad_out(out, Co, B, H, W, Hp, Wp)


def grouped_dwconv3x3(x_slab, w, bias, B, H, W, group_num=4):
    # DWConv: nn.Conv2d(C, C, 3, padding=1, groups=C//4); w: (G, 4, 4, 9)
    C, _ = x_slab.shape
    cg = group_num
    G = C // cg
    xp, Hp, Wp = _pad_slab(x_slab, B, H, W)
    Npad = B * Hp * Wp
    M = Npad - 2 * (Wp + 1)
    xg = xp.reshape(G, cg, Npad)                          # pure reshape
    Gb = _pick_div(G, max(1, G // 2))
    kernel = functools.partial(_grouped3x3_kernel, Wp=Wp, M=M, cg=cg)
    out = pl.pallas_call(
        kernel,
        grid=(G // Gb,),
        in_specs=[pl.BlockSpec((Gb, cg, Npad), lambda i: (i, 0, 0)),
                  pl.BlockSpec((Gb, cg, cg, 9), lambda i: (i, 0, 0, 0)),
                  pl.BlockSpec((Gb, cg, 1), lambda i: (i, 0, 0))],
        out_specs=pl.BlockSpec((Gb, cg, M), lambda i: (i, 0, 0)),
        out_shape=jax.ShapeDtypeStruct((G, cg, M), jnp.float32),
        compiler_params=_cparams("parallel"),
    )(xg, w, bias)
    return _unpad_out(out.reshape(C, M), C, B, H, W, Hp, Wp)


# ---------------------------------------------------------------------------
# DCT / bilinear-upsample operators (matrix form)
# ---------------------------------------------------------------------------

# TODO(synk): the original repo imports dct/idct from an external torch_dct-
# style package; implemented here as the orthonormal DCT-II / DCT-III pair
# along the last (W) dim (exact inverse pair) -- verify the norm convention.
def _dct_matrix(n):
    k = jnp.arange(n, dtype=jnp.float32)[:, None]
    m = jnp.arange(n, dtype=jnp.float32)[None, :]
    mat = jnp.cos(jnp.pi * (m + 0.5) * k / n)
    scale = jnp.where(k == 0, jnp.sqrt(1.0 / n), jnp.sqrt(2.0 / n))
    return mat * scale


def _upsample_matrix(n_in, n_out):
    # 1-D bilinear, align_corners=True (as in the PyTorch Up module)
    i = jnp.arange(n_out, dtype=jnp.float32)
    src = i * (n_in - 1) / (n_out - 1)
    i0 = jnp.floor(src).astype(jnp.int32)
    i1 = jnp.minimum(i0 + 1, n_in - 1)
    frac = src - i0.astype(jnp.float32)
    A = jnp.zeros((n_out, n_in), jnp.float32)
    rows = jnp.arange(n_out)
    A = A.at[rows, i0].add(1.0 - frac)
    A = A.at[rows, i1].add(frac)
    return A


# ---------------------------------------------------------------------------
# Module forwards (activations are channel-major slabs (C, B*H*W))
# ---------------------------------------------------------------------------

def sk_attention(x_slab, p, B, H, W, *, post_gelu):
    C, N = x_slab.shape
    HW = H * W
    dconv = depthwise_conv3x3(x_slab, p["dw0_w"], p["dw0_b"], B, H, W)
    # TODO(synk): tile this fused kernel over HW for very large feature maps;
    # single-block here keeps the whole gating chain (U/S/Z/L) in VMEM.
    kernel = functools.partial(_sk_fused_kernel, B=B, HW=HW,
                               post_gelu=post_gelu)
    args = [x_slab, dconv, p["dw1_w"], p["dw1_b"], p["pw_w"], p["pw_b"],
            p["conv_w"], p["conv_b"], p["fc_w"], p["fc_b"],
            p["fcs_w"], p["fcs_b"]]
    return pl.pallas_call(
        kernel,
        grid=(1,),
        in_specs=[_fullspec(a.shape) for a in args],
        out_specs=_fullspec((C, N)),
        out_shape=jax.ShapeDtypeStruct((C, N), jnp.float32),
        compiler_params=_cparams("arbitrary"),
    )(*args)


def sp_block(x_slab, p, B, H, W):
    # returns x + SP(x) (residual fused into the final 1x1 conv matmul;
    # the GELU is applied producer-side on the IDCT / sk2 outputs)
    C, N = x_slab.shape
    Ch = C // 2
    xa, xb = x_slab[:Ch], x_slab[Ch:]
    D = _dct_matrix(W)
    s = pl_matmul(xa.reshape(Ch * B * H, W), D.T, use_bf16=False).reshape(Ch, N)
    s = sk_attention(s, p["sk1"], B, H, W, post_gelu=False)
    s = pl_matmul(s.reshape(Ch * B * H, W), D, use_bf16=False,
                  post_gelu=True).reshape(Ch, N)
    c = sk_attention(xb, p["sk2"], B, H, W, post_gelu=True)
    attn = jnp.concatenate([s, c], axis=0)
    return pl_matmul(p["conv_w"], attn, bias=p["conv_b"], res=x_slab)


def mlp_tail(x_slab, p, bn, B, H, W):
    # Mlp + second residual + BatchNorm(eval) + GELU (last three fused in gn3)
    C, N = x_slab.shape
    HW = H * W
    hidden = p["fc1_b"].shape[0]
    G = hidden // 4
    h = pl_matmul(p["fc1_w"], x_slab, bias=p["fc1_b"])
    h = group_norm(h, p["gn1_g"], p["gn1_b"], G, B, HW)
    h = grouped_dwconv3x3(h, p["dw_w"], p["dw_b"], B, H, W)
    h = group_norm(h, p["gn2_g"], p["gn2_b"], G, B, HW, post_gelu=True)
    h = pl_matmul(p["fc2_w"], h, bias=p["fc2_b"])
    eps_bn = 1e-5
    scale = bn["gamma"] * jax.lax.rsqrt(bn["var"] + eps_bn)
    shift = bn["beta"] - bn["mean"] * scale
    return group_norm(h, p["gn3_g"], p["gn3_b"], C // 4, B, HW,
                      res=x_slab, post_scale=scale, post_shift=shift,
                      post_gelu=True)


def fdconv_block(x0_slab, params, B, H, W):
    x1s = sp_block(x0_slab, params["sp"], B, H, W)        # x + sp(x)
    return mlp_tail(x1s, params["mlp"], params["bn"], B, H, W)


def up_forward(params, x2, x1):
    B, C2c, H, W = x2.shape
    _, C1c, h, w = x1.shape
    C = C2c + C1c
    N = B * H * W

    # separable bilinear x2 upsample (align_corners=True): W axis then H axis
    Uw = _upsample_matrix(w, 2 * w)
    Uh = _upsample_matrix(h, 2 * h)
    t = pl_matmul(x1.reshape(B * C1c * h, w), Uw.T, use_bf16=False)
    t = t.reshape(B * C1c, h, 2 * w).transpose(0, 2, 1)
    t = pl_matmul(t.reshape(B * C1c * 2 * w, h), Uh.T, use_bf16=False)
    x1u = t.reshape(B, C1c, 2 * w, 2 * h).transpose(0, 1, 3, 2)

    dy, dx = H - 2 * h, W - 2 * w
    if dy or dx:
        x1u = jnp.pad(x1u, ((0, 0), (0, 0),
                            (dy // 2, dy - dy // 2), (dx // 2, dx - dx // 2)))

    x = jnp.concatenate([x2, x1u], axis=1)                # NCHW
    x0 = jnp.transpose(x, (1, 0, 2, 3)).reshape(C, N)     # entry transpose

    feat = fdconv_block(x0, params, B, H, W)              # slab (C, N)

    out = conv3x3_dense(feat, params["convv_w"], params["convv_b"], B, H, W)
    Co = params["convv_b"].shape[0]
    return jnp.transpose(out.reshape(Co, B, H, W), (1, 0, 2, 3))


# ---------------------------------------------------------------------------
# Deterministic parameter init (kernel-friendly layouts; PyTorch-equivalent
# shapes noted in comments).  Matmul / dense-conv weights pre-cast to bf16.
# ---------------------------------------------------------------------------

def _init_sk(key, channel):
    d = max(32, channel // 16)
    ks = jax.random.split(key, 7)
    std = 0.05
    bf = jnp.bfloat16
    return {
        # depthwise 3x3 (PyTorch (C,1,3,3)) as tap-major (9, C, 1)
        "dw0_w": std * jax.random.normal(ks[0], (9, channel, 1), jnp.float32),
        "dw0_b": jnp.zeros((channel, 1), jnp.float32),
        "dw1_w": (std * jax.random.normal(ks[1], (channel, channel))).astype(bf),
        "dw1_b": jnp.zeros((channel, 1), jnp.float32),
        "pw_w": (std * jax.random.normal(ks[2], (channel, channel))).astype(bf),
        "pw_b": jnp.zeros((channel, 1), jnp.float32),
        "conv_w": (std * jax.random.normal(ks[3], (channel, channel))).astype(bf),
        "conv_b": jnp.zeros((channel, 1), jnp.float32),
        "fc_w": std * jax.random.normal(ks[4], (d, channel), jnp.float32),
        "fc_b": jnp.zeros((d, 1), jnp.float32),
        # fcs0 / fcs1 stacked: (2C, d)
        "fcs_w": std * jax.random.normal(ks[5], (2 * channel, d), jnp.float32),
        "fcs_b": jnp.zeros((2 * channel, 1), jnp.float32),
    }


def make_params(key, in_ch, out_ch):
    hidden = in_ch // 4
    G2 = hidden // 4
    ks = jax.random.split(key, 8)
    std = 0.05
    bf = jnp.bfloat16
    sp_p = {
        "sk1": _init_sk(ks[0], in_ch // 2),
        "sk2": _init_sk(ks[1], in_ch // 2),
        "conv_w": (std * jax.random.normal(ks[2], (in_ch, in_ch))).astype(bf),
        "conv_b": jnp.zeros((in_ch, 1), jnp.float32),
    }
    mlp_p = {
        "fc1_w": (std * jax.random.normal(ks[3], (hidden, in_ch))).astype(bf),
        "fc1_b": jnp.zeros((hidden, 1), jnp.float32),
        "gn1_g": jnp.ones((hidden,)), "gn1_b": jnp.zeros((hidden,)),
        # grouped 3x3 (PyTorch (hidden, 4, 3, 3), groups=hidden//4) as (G,4,4,9)
        "dw_w": std * jax.random.normal(ks[4], (G2, 4, 4, 9), jnp.float32),
        "dw_b": jnp.zeros((G2, 4, 1), jnp.float32),
        "gn2_g": jnp.ones((hidden,)), "gn2_b": jnp.zeros((hidden,)),
        "fc2_w": (std * jax.random.normal(ks[5], (in_ch, hidden))).astype(bf),
        "fc2_b": jnp.zeros((in_ch, 1), jnp.float32),
        "gn3_g": jnp.ones((in_ch,)), "gn3_b": jnp.zeros((in_ch,)),
    }
    bn_p = {"gamma": jnp.ones((in_ch,)), "beta": jnp.zeros((in_ch,)),
            "mean": jnp.zeros((in_ch,)), "var": jnp.ones((in_ch,))}
    return {
        "sp": sp_p,
        "mlp": mlp_p,
        "bn": bn_p,
        # dense 3x3 (PyTorch (Co, Ci, 3, 3)) as tap-major (9, Co, Ci)
        "convv_w": (std * jax.random.normal(ks[6], (9, out_ch, in_ch))).astype(bf),
        "convv_b": jnp.zeros((out_ch, 1), jnp.float32),
    }


if __name__ == "__main__":
    B, in_ch, out_ch, H, W = 2, 32, 16, 8, 8
    key = jax.random.PRNGKey(0)
    kx2, kx1, kp = jax.random.split(key, 3)
    # skip connection x2 at full resolution, x1 from the deeper stage (half res)
    x2 = jax.random.normal(kx2, (B, in_ch // 2, H, W), dtype=jnp.float32)
    x1 = jax.random.normal(kx1, (B, in_ch // 2, H // 2, W // 2),
                           dtype=jnp.float32)
    params = make_params(kp, in_ch, out_ch)

    out = jax.jit(up_forward)(params, x2, x1)
    jax.block_until_ready(out)
    assert out.shape == (B, out_ch, H, W) and out.dtype == jnp.float32
    print("KERNEL_OK")
</pallas_src>

<mosaic_0001>
module attributes {stable_mosaic.version = 11 : i64} {
  func.func private @main(%arg0: i32) attributes {dimension_semantics = [#tpu.dimension_semantics<core_parallel>], iteration_bounds = array<i64: 2>, tpu.core_type = #tpu.core_type<sc_scalar_subcore>, window_params = []} {
    return
  }
}

module attributes {stable_mosaic.version = 11 : i64} {
  func.func private @main(%arg0: i32) attributes {dimension_semantics = [#tpu.dimension_semantics<core_parallel>], iteration_bounds = array<i64: 2>, tpu.core_type = #tpu.core_type<sc_scalar_subcore>, window_params = []} {
    return
  }
}

module attributes {stable_mosaic.version = 11 : i64} {
  func.func @_matmul_kernel(%arg0: i32, %arg1: i32, %arg2: memref<64x4xf32, #tpu.memory_space<vmem>>, %arg3: memref<4x8xf32, #tpu.memory_space<vmem>>, %arg4: memref<64x8xf32, #tpu.memory_space<vmem>>) attributes {dimension_semantics = [#tpu.dimension_semantics<parallel>, #tpu.dimension_semantics<parallel>], iteration_bounds = array<i64: 2, 1>, scalar_prefetch = 0 : i64, scratch_operands = 0 : i64, tpu.core_type = #tpu.core_type<tc>, window_params = [{transform_indices = @transform_0, window_bounds = array<i64: 64, 4>}, {transform_indices = @transform_1, window_bounds = array<i64: 4, 8>}, {transform_indices = @transform_2, window_bounds = array<i64: 64, 8>}]} {
    %c0 = arith.constant 0 : index
    %c0_0 = arith.constant 0 : index
    %0 = vector.load %arg2[%c0, %c0_0] : memref<64x4xf32, #tpu.memory_space<vmem>>, vector<64x4xf32>
    %c0_1 = arith.constant 0 : index
    %c0_2 = arith.constant 0 : index
    %1 = vector.load %arg3[%c0_1, %c0_2] : memref<4x8xf32, #tpu.memory_space<vmem>>, vector<4x8xf32>
    %cst = arith.constant dense<0.000000e+00> : vector<64x8xf32>
    %2 = tpu.matmul %0, %1, %cst {dimension_numbers = #tpu.dot_dimension_numbers<[1], [0], [0], [1], [0, 0, 1, 1], [], []>} : vector<64x4xf32>, vector<4x8xf32>, vector<64x8xf32> -> vector<64x8xf32>
    %c0_3 = arith.constant 0 : index
    %c0_4 = arith.constant 0 : index
    %3 = vector.load %arg4[%c0_3, %c0_4] : memref<64x8xf32, #tpu.memory_space<vmem>>, vector<64x8xf32>
    tpu.vector_store %arg4[%c0_3, %c0_4], %2 {strides = array<i32>} : memref<64x8xf32, #tpu.memory_space<vmem>>, vector<64x8xf32>,
    return
  }
  func.func @transform_0(%arg0: i32, %arg1: i32) -> (i32, i32) {
    %c0_i32 = arith.constant 0 : i32
    %c0_i32_0 = arith.constant 0 : i32
    return %arg0, %c0_i32 : i32, i32
  }
  func.func @transform_1(%arg0: i32, %arg1: i32) -> (i32, i32) {
    %c0_i32 = arith.constant 0 : i32
    %c0_i32_0 = arith.constant 0 : i32
    return %c0_i32, %arg1 : i32, i32
  }
  func.func @transform_2(%arg0: i32, %arg1: i32) -> (i32, i32) {
    %c0_i32 = arith.constant 0 : i32
    return %arg0, %arg1 : i32, i32
  }
}

module attributes {stable_mosaic.version = 11 : i64} {
  func.func @_matmul_kernel(%arg0: i32, %arg1: i32, %arg2: memref<128x4xf32, #tpu.memory_space<vmem>>, %arg3: memref<4x8xf32, #tpu.memory_space<vmem>>, %arg4: memref<128x8xf32, #tpu.memory_space<vmem>>) attributes {dimension_semantics = [#tpu.dimension_semantics<parallel>, #tpu.dimension_semantics<parallel>], iteration_bounds = array<i64: 2, 1>, scalar_prefetch = 0 : i64, scratch_operands = 0 : i64, tpu.core_type = #tpu.core_type<tc>, window_params = [{transform_indices = @transform_0, window_bounds = array<i64: 128, 4>}, {transform_indices = @transform_1, window_bounds = array<i64: 4, 8>}, {transform_indices = @transform_2, window_bounds = array<i64: 128, 8>}]} {
    %c0 = arith.constant 0 : index
    %c0_0 = arith.constant 0 : index
    %0 = vector.load %arg2[%c0, %c0_0] : memref<128x4xf32, #tpu.memory_space<vmem>>, vector<128x4xf32>
    %c0_1 = arith.constant 0 : index
    %c0_2 = arith.constant 0 : index
    %1 = vector.load %arg3[%c0_1, %c0_2] : memref<4x8xf32, #tpu.memory_space<vmem>>, vector<4x8xf32>
    %cst = arith.constant dense<0.000000e+00> : vector<128x8xf32>
    %2 = tpu.matmul %0, %1, %cst {dimension_numbers = #tpu.dot_dimension_numbers<[1], [0], [0], [1], [0, 0, 1, 1], [], []>} : vector<128x4xf32>, vector<4x8xf32>, vector<128x8xf32> -> vector<128x8xf32>
    %c0_3 = arith.constant 0 : index
    %c0_4 = arith.constant 0 : index
    %3 = vector.load %arg4[%c0_3, %c0_4] : memref<128x8xf32, #tpu.memory_space<vmem>>, vector<128x8xf32>
    tpu.vector_store %arg4[%c0_3, %c0_4], %2 {strides = array<i32>} : memref<128x8xf32, #tpu.memory_space<vmem>>, vector<128x8xf32>,
    return
  }
  func.func @transform_0(%arg0: i32, %arg1: i32) -> (i32, i32) {
    %c0_i32 = arith.constant 0 : i32
    %c0_i32_0 = arith.constant 0 : i32
    return %arg0, %c0_i32 : i32, i32
  }
  func.func @transform_1(%arg0: i32, %arg1: i32) -> (i32, i32) {
    %c0_i32 = arith.constant 0 : i32
    %c0_i32_0 = arith.constant 0 : i32
    return %c0_i32, %arg1 : i32, i32
  }
  func.func @transform_2(%arg0: i32, %arg1: i32) -> (i32, i32) {
    %c0_i32 = arith.constant 0 : i32
    return %arg0, %arg1 : i32, i32
  }
}

module attributes {stable_mosaic.version = 11 : i64} {
  func.func @_matmul_kernel(%arg0: i32, %arg1: i32, %arg2: memref<128x8xf32, #tpu.memory_space<vmem>>, %arg3: memref<8x8xf32, #tpu.memory_space<vmem>>, %arg4: memref<128x8xf32, #tpu.memory_space<vmem>>) attributes {dimension_semantics = [#tpu.dimension_semantics<parallel>, #tpu.dimension_semantics<parallel>], iteration_bounds = array<i64: 2, 1>, scalar_prefetch = 0 : i64, scratch_operands = 0 : i64, tpu.core_type = #tpu.core_type<tc>, window_params = [{transform_indices = @transform_0, window_bounds = array<i64: 128, 8>}, {transform_indices = @transform_1, window_bounds = array<i64: 8, 8>}, {transform_indices = @transform_2, window_bounds = array<i64: 128, 8>}]} {
    %c0 = arith.constant 0 : index
    %c0_0 = arith.constant 0 : index
    %0 = vector.load %arg2[%c0, %c0_0] : memref<128x8xf32, #tpu.memory_space<vmem>>, vector<128x8xf32>
    %c0_1 = arith.constant 0 : index
    %c0_2 = arith.constant 0 : index
    %1 = vector.load %arg3[%c0_1, %c0_2] : memref<8x8xf32, #tpu.memory_space<vmem>>, vector<8x8xf32>
    %cst = arith.constant dense<0.000000e+00> : vector<128x8xf32>
    %2 = tpu.matmul %0, %1, %cst {dimension_numbers = #tpu.dot_dimension_numbers<[1], [0], [0], [1], [0, 0, 1, 1], [], []>} : vector<128x8xf32>, vector<8x8xf32>, vector<128x8xf32> -> vector<128x8xf32>
    %c0_3 = arith.constant 0 : index
    %c0_4 = arith.constant 0 : index
    %3 = vector.load %arg4[%c0_3, %c0_4] : memref<128x8xf32, #tpu.memory_space<vmem>>, vector<128x8xf32>
    tpu.vector_store %arg4[%c0_3, %c0_4], %2 {strides = array<i32>} : memref<128x8xf32, #tpu.memory_space<vmem>>, vector<128x8xf32>,
    return
  }
  func.func @transform_0(%arg0: i32, %arg1: i32) -> (i32, i32) {
    %c0_i32 = arith.constant 0 : i32
    %c0_i32_0 = arith.constant 0 : i32
    return %arg0, %c0_i32 : i32, i32
  }
  func.func @transform_1(%arg0: i32, %arg1: i32) -> (i32, i32) {
    %c0_i32 = arith.constant 0 : i32
    %c0_i32_0 = arith.constant 0 : i32
    return %c0_i32, %arg1 : i32, i32
  }
  func.func @transform_2(%arg0: i32, %arg1: i32) -> (i32, i32) {
    %c0_i32 = arith.constant 0 : i32
    return %arg0, %arg1 : i32, i32
  }
}

module attributes {stable_mosaic.version = 11 : i64} {
  func.func @_dw3x3_kernel(%arg0: i32, %arg1: memref<8x200xf32, #tpu.memory_space<vmem>>, %arg2: memref<9x8x1xf32, #tpu.memory_space<vmem>>, %arg3: memref<8x1xf32, #tpu.memory_space<vmem>>, %arg4: memref<8x178xf32, #tpu.memory_space<vmem>>) attributes {dimension_semantics = [#tpu.dimension_semantics<parallel>], iteration_bounds = array<i64: 2>, scalar_prefetch = 0 : i64, scratch_operands = 0 : i64, tpu.core_type = #tpu.core_type<tc>, window_params = [{transform_indices = @transform_0, window_bounds = array<i64: 8, 200>}, {transform_indices = @transform_1, window_bounds = array<i64: 9, 8, 1>}, {transform_indices = @transform_2, window_bounds = array<i64: 8, 1>}, {transform_indices = @transform_3, window_bounds = array<i64: 8, 178>}]} {
    %cst = arith.constant 0.000000e+00 : f32
    %0 = vector.broadcast %cst : f32 to vector<8x178xf32>
    %c0 = arith.constant 0 : index
    %c0_0 = arith.constant 0 : index
    %1 = vector.load %arg1[%c0, %c0_0] : memref<8x200xf32, #tpu.memory_space<vmem>>, vector<8x178xf32>
    %c0_1 = arith.constant 0 : index
    %c0_2 = arith.constant 0 : index
    %c0_3 = arith.constant 0 : index
    %2 = vector.load %arg2[%c0_1, %c0_2, %c0_3] : memref<9x8x1xf32, #tpu.memory_space<vmem>>, vector<1x8x1xf32>
    %3 = vector.shape_cast %2 : vector<1x8x1xf32> to vector<8x1xf32>
    %4 = vector.broadcast %3 : vector<8x1xf32> to vector<8x178xf32>
    %5 = arith.mulf %1, %4 : vector<8x178xf32>
    %6 = arith.addf %0, %5 : vector<8x178xf32>
    %c0_4 = arith.constant 0 : index
    %c1 = arith.constant 1 : index
    %7 = vector.load %arg1[%c0_4, %c1] : memref<8x200xf32, #tpu.memory_space<vmem>>, vector<8x178xf32>
    %c1_5 = arith.constant 1 : index
    %c0_6 = arith.constant 0 : index
    %c0_7 = arith.constant 0 : index
    %8 = vector.load %arg2[%c1_5, %c0_6, %c0_7] : memref<9x8x1xf32, #tpu.memory_space<vmem>>, vector<1x8x1xf32>
    %9 = vector.shape_cast %8 : vector<1x8x1xf32> to vector<8x1xf32>
    %10 = vector.broadcast %9 : vector<8x1xf32> to vector<8x178xf32>
    %11 = arith.mulf %7, %10 : vector<8x178xf32>
    %12 = arith.addf %6, %11 : vector<8x178xf32>
    %c0_8 = arith.constant 0 : index
    %c2 = arith.constant 2 : index
    %13 = vector.load %arg1[%c0_8, %c2] : memref<8x200xf32, #tpu.memory_space<vmem>>, vector<8x178xf32>
    %c2_9 = arith.constant 2 : index
    %c0_10 = arith.constant 0 : index
    %c0_11 = arith.constant 0 : index
    %14 = vector.load %arg2[%c2_9, %c0_10, %c0_11] : memref<9x8x1xf32, #tpu.memory_space<vmem>>, vector<1x8x1xf32>
    %15 = vector.shape_cast %14 : vector<1x8x1xf32> to vector<8x1xf32>
    %16 = vector.broadcast %15 : vector<8x1xf32> to vector<8x178xf32>
    %17 = arith.mulf %13, %16 : vector<8x178xf32>
    %18 = arith.addf %12, %17 : vector<8x178xf32>
    %c0_12 = arith.constant 0 : index
    %c10 = arith.constant 10 : index
    %19 = vector.load %arg1[%c0_12, %c10] : memref<8x200xf32, #tpu.memory_space<vmem>>, vector<8x178xf32>
    %c3 = arith.constant 3 : index
    %c0_13 = arith.constant 0 : index
    %c0_14 = arith.constant 0 : index
    %20 = vector.load %arg2[%c3, %c0_13, %c0_14] : memref<9x8x1xf32, #tpu.memory_space<vmem>>, vector<1x8x1xf32>
    %21 = vector.shape_cast %20 : vector<1x8x1xf32> to vector<8x1xf32>
    %22 = vector.broadcast %21 : vector<8x1xf32> to vector<8x178xf32>
    %23 = arith.mulf %19, %22 : vector<8x178xf32>
    %24 = arith.addf %18, %23 : vector<8x178xf32>
    %c0_15 = arith.constant 0 : index
    %c11 = arith.constant 11 : index
    %25 = vector.load %arg1[%c0_15, %c11] : memref<8x200xf32, #tpu.memory_space<vmem>>, vector<8x178xf32>
    %c4 = arith.constant 4 : index
    %c0_16 = arith.constant 0 : index
    %c0_17 = arith.constant 0 : index
    %26 = vector.load %arg2[%c4, %c0_16, %c0_17] : memref<9x8x1xf32, #tpu.memory_space<vmem>>, vector<1x8x1xf32>
    %27 = vector.shape_cast %26 : vector<1x8x1xf32> to vector<8x1xf32>
    %28 = vector.broadcast %27 : vector<8x1xf32> to vector<8x178xf32>
    %29 = arith.mulf %25, %28 : vector<8x178xf32>
    %30 = arith.addf %24, %29 : vector<8x178xf32>
    %c0_18 = arith.constant 0 : index
    %c12 = arith.constant 12 : index
    %31 = vector.load %arg1[%c0_18, %c12] : memref<8x200xf32, #tpu.memory_space<vmem>>, vector<8x178xf32>
    %c5 = arith.constant 5 : index
    %c0_19 = arith.constant 0 : index
    %c0_20 = arith.constant 0 : index
    %32 = vector.load %arg2[%c5, %c0_19, %c0_20] : memref<9x8x1xf32, #tpu.memory_space<vmem>>, vector<1x8x1xf32>
    %33 = vector.shape_cast %32 : vector<1x8x1xf32> to vector<8x1xf32>
    %34 = vector.broadcast %33 : vector<8x1xf32> to vector<8x178xf32>
    %35 = arith.mulf %31, %34 : vector<8x178xf32>
    %36 = arith.addf %30, %35 : vector<8x178xf32>
    %c0_21 = arith.constant 0 : index
    %c20 = arith.constant 20 : index
    %37 = vector.load %arg1[%c0_21, %c20] : memref<8x200xf32, #tpu.memory_space<vmem>>, vector<8x178xf32>
    %c6 = arith.constant 6 : index
    %c0_22 = arith.constant 0 : index
    %c0_23 = arith.constant 0 : index
    %38 = vector.load %arg2[%c6, %c0_22, %c0_23] : memref<9x8x1xf32, #tpu.memory_space<vmem>>, vector<1x8x1xf32>
    %39 = vector.shape_cast %38 : vector<1x8x1xf32> to vector<8x1xf32>
    %40 = vector.broadcast %39 : vector<8x1xf32> to vector<8x178xf32>
    %41 = arith.mulf %37, %40 : vector<8x178xf32>
    %42 = arith.addf %36, %41 : vector<8x178xf32>
    %c0_24 = arith.constant 0 : index
    %c21 = arith.constant 21 : index
    %43 = vector.load %arg1[%c0_24, %c21] : memref<8x200xf32, #tpu.memory_space<vmem>>, vector<8x178xf32>
    %c7 = arith.constant 7 : index
    %c0_25 = arith.constant 0 : index
    %c0_26 = arith.constant 0 : index
    %44 = vector.load %arg2[%c7, %c0_25, %c0_26] : memref<9x8x1xf32, #tpu.memory_space<vmem>>, vector<1x8x1xf32>
    %45 = vector.shape_cast %44 : vector<1x8x1xf32> to vector<8x1xf32>
    %46 = vector.broadcast %45 : vector<8x1xf32> to vector<8x178xf32>
    %47 = arith.mulf %43, %46 : vector<8x178xf32>
    %48 = arith.addf %42, %47 : vector<8x178xf32>
    %c0_27 = arith.constant 0 : index
    %c22 = arith.constant 22 : index
    %49 = vector.load %arg1[%c0_27, %c22] : memref<8x200xf32, #tpu.memory_space<vmem>>, vector<8x178xf32>
    %c8 = arith.constant 8 : index
    %c0_28 = arith.constant 0 : index
    %c0_29 = arith.constant 0 : index
    %50 = vector.load %arg2[%c8, %c0_28, %c0_29] : memref<9x8x1xf32, #tpu.memory_space<vmem>>, vector<1x8x1xf32>
    %51 = vector.shape_cast %50 : vector<1x8x1xf32> to vector<8x1xf32>
    %52 = vector.broadcast %51 : vector<8x1xf32> to vector<8x178xf32>
    %53 = arith.mulf %49, %52 : vector<8x178xf32>
    %54 = arith.addf %48, %53 : vector<8x178xf32>
    %c0_30 = arith.constant 0 : index
    %c0_31 = arith.constant 0 : index
    %55 = vector.load %arg3[%c0_30, %c0_31] : memref<8x1xf32, #tpu.memory_space<vmem>>, vector<8x1xf32>
    %56 = vector.broadcast %55 : vector<8x1xf32> to vector<8x178xf32>
    %57 = arith.addf %54, %56 : vector<8x178xf32>
    %c0_32 = arith.constant 0 : index
    %c0_33 = arith.constant 0 : index
    %58 = vector.load %arg4[%c0_32, %c0_33] : memref<8x178xf32, #tpu.memory_space<vmem>>, vector<8x178xf32>
    tpu.vector_store %arg4[%c0_32, %c0_33], %57 {strides = array<i32>} : memref<8x178xf32, #tpu.memory_space<vmem>>, vector<8x178xf32>,
    return
  }
  func.func @transform_0(%arg0: i32) -> (i32, i32) {
    %c0_i32 = arith.constant 0 : i32
    %c0_i32_0 = arith.constant 0 : i32
    return %arg0, %c0_i32 : i32, i32
  }
  func.func @transform_1(%arg0: i32) -> (i32, i32, i32) {
    %c0_i32 = arith.constant 0 : i32
    %c0_i32_0 = arith.constant 0 : i32
    %c0_i32_1 = arith.constant 0 : i32
    return %c0_i32, %arg0, %c0_i32_0 : i32, i32, i32
  }
  func.func @transform_2(%arg0: i32) -> (i32, i32) {
    %c0_i32 = arith.constant 0 : i32
    %c0_i32_0 = arith.constant 0 : i32
    return %arg0, %c0_i32 : i32, i32
  }
  func.func @transform_3(%arg0: i32) -> (i32, i32) {
    %c0_i32 = arith.constant 0 : i32
    %c0_i32_0 = arith.constant 0 : i32
    return %arg0, %c0_i32 : i32, i32
  }
}

module attributes {stable_mosaic.version = 11 : i64} {
  func.func @_matmul_kernel(%arg0: i32, %arg1: i32, %arg2: memref<128x8xf32, #tpu.memory_space<vmem>>, %arg3: memref<8x8xf32, #tpu.memory_space<vmem>>, %arg4: memref<128x8xf32, #tpu.memory_space<vmem>>) attributes {dimension_semantics = [#tpu.dimension_semantics<parallel>, #tpu.dimension_semantics<parallel>], iteration_bounds = array<i64: 2, 1>, scalar_prefetch = 0 : i64, scratch_operands = 0 : i64, tpu.core_type = #tpu.core_type<tc>, window_params = [{transform_indices = @transform_0, window_bounds = array<i64: 128, 8>}, {transform_indices = @transform_1, window_bounds = array<i64: 8, 8>}, {transform_indices = @transform_2, window_bounds = array<i64: 128, 8>}]} {
    %c0 = arith.constant 0 : index
    %c0_0 = arith.constant 0 : index
    %0 = vector.load %arg2[%c0, %c0_0] : memref<128x8xf32, #tpu.memory_space<vmem>>, vector<128x8xf32>
    %c0_1 = arith.constant 0 : index
    %c0_2 = arith.constant 0 : index
    %1 = vector.load %arg3[%c0_1, %c0_2] : memref<8x8xf32, #tpu.memory_space<vmem>>, vector<8x8xf32>
    %cst = arith.constant dense<0.000000e+00> : vector<128x8xf32>
    %2 = tpu.matmul %0, %1, %cst {dimension_numbers = #tpu.dot_dimension_numbers<[1], [0], [0], [1], [0, 0, 1, 1], [], []>} : vector<128x8xf32>, vector<8x8xf32>, vector<128x8xf32> -> vector<128x8xf32>
    %cst_3 = arith.constant 5.000000e-01 : f32
    %3 = vector.broadcast %cst_3 : f32 to vector<128x8xf32>
    %4 = arith.mulf %3, %2 : vector<128x8xf32>
    %cst_4 = arith.constant 0.707106769 : f32
    %5 = vector.broadcast %cst_4 : f32 to vector<128x8xf32>
    %6 = arith.mulf %2, %5 : vector<128x8xf32>
    %7 = math.erf %6 : vector<128x8xf32>
    %cst_5 = arith.constant 1.000000e+00 : f32
    %8 = vector.broadcast %cst_5 : f32 to vector<128x8xf32>
    %9 = arith.addf %8, %7 : vector<128x8xf32>
    %10 = arith.mulf %4, %9 : vector<128x8xf32>
    %c0_6 = arith.constant 0 : index
    %c0_7 = arith.constant 0 : index
    %11 = vector.load %arg4[%c0_6, %c0_7] : memref<128x8xf32, #tpu.memory_space<vmem>>, vector<128x8xf32>
    tpu.vector_store %arg4[%c0_6, %c0_7], %10 {strides = array<i32>} : memref<128x8xf32, #tpu.memory_space<vmem>>, vector<128x8xf32>,
    return
  }
  func.func @transform_0(%arg0: i32, %arg1: i32) -> (i32, i32) {
    %c0_i32 = arith.constant 0 : i32
    %c0_i32_0 = arith.constant 0 : i32
    return %arg0, %c0_i32 : i32, i32
  }
  func.func @transform_1(%arg0: i32, %arg1: i32) -> (i32, i32) {
    %c0_i32 = arith.constant 0 : i32
    %c0_i32_0 = arith.constant 0 : i32
    return %c0_i32, %arg1 : i32, i32
  }
  func.func @transform_2(%arg0: i32, %arg1: i32) -> (i32, i32) {
    %c0_i32 = arith.constant 0 : i32
    return %arg0, %arg1 : i32, i32
  }
}

module attributes {stable_mosaic.version = 11 : i64} {
  func.func @_sk_fused_kernel(%arg0: i32, %arg1: memref<16x128xf32, #tpu.memory_space<vmem>>, %arg2: memref<16x128xf32, #tpu.memory_space<vmem>>, %arg3: memref<16x16xbf16, #tpu.memory_space<vmem>>, %arg4: memref<16x1xf32, #tpu.memory_space<vmem>>, %arg5: memref<16x16xbf16, #tpu.memory_space<vmem>>, %arg6: memref<16x1xf32, #tpu.memory_space<vmem>>, %arg7: memref<16x16xbf16, #tpu.memory_space<vmem>>, %arg8: memref<16x1xf32, #tpu.memory_space<vmem>>, %arg9: memref<32x16xf32, #tpu.memory_space<vmem>>, %arg10: memref<32x1xf32, #tpu.memory_space<vmem>>, %arg11: memref<32x32xf32, #tpu.memory_space<vmem>>, %arg12: memref<32x1xf32, #tpu.memory_space<vmem>>, %arg13: memref<16x128xf32, #tpu.memory_space<vmem>>) attributes {dimension_semantics = [#tpu.dimension_semantics<arbitrary>], iteration_bounds = array<i64: 1>, scalar_prefetch = 0 : i64, scratch_operands = 0 : i64, tpu.core_type = #tpu.core_type<tc>, window_params = [{pipeline_mode = #tpu.pipeline_mode<synchronous>, transform_indices = @transform_0, window_bounds = array<i64: 16, 128>}, {pipeline_mode = #tpu.pipeline_mode<synchronous>, transform_indices = @transform_1, window_bounds = array<i64: 16, 128>}, {pipeline_mode = #tpu.pipeline_mode<synchronous>, transform_indices = @transform_2, window_bounds = array<i64: 16, 16>}, {pipeline_mode = #tpu.pipeline_mode<synchronous>, transform_indices = @transform_3, window_bounds = array<i64: 16, 1>}, {pipeline_mode = #tpu.pipeline_mode<synchronous>, transform_indices = @transform_4, window_bounds = array<i64: 16, 16>}, {pipeline_mode = #tpu.pipeline_mode<synchronous>, transform_indices = @transform_5, window_bounds = array<i64: 16, 1>}, {pipeline_mode = #tpu.pipeline_mode<synchronous>, transform_indices = @transform_6, window_bounds = array<i64: 16, 16>}, {pipeline_mode = #tpu.pipeline_mode<synchronous>, transform_indices = @transform_7, window_bounds = array<i64: 16, 1>}, {pipeline_mode = #tpu.pipeline_mode<synchronous>, transform_indices = @transform_8, window_bounds = array<i64: 32, 16>}, {pipeline_mode = #tpu.pipeline_mode<synchronous>, transform_indices = @transform_9, window_bounds = array<i64: 32, 1>}, {pipeline_mode = #tpu.pipeline_mode<synchronous>, transform_indices = @transform_10, window_bounds = array<i64: 32, 32>}, {pipeline_mode = #tpu.pipeline_mode<synchronous>, transform_indices = @transform_11, window_bounds = array<i64: 32, 1>}, {pipeline_mode = #tpu.pipeline_mode<synchronous>, transform_indices = @transform_12, window_bounds = array<i64: 16, 128>}]} {
    %c0 = arith.constant 0 : index
    %c0_0 = arith.constant 0 : index
    %0 = vector.load %arg1[%c0, %c0_0] : memref<16x128xf32, #tpu.memory_space<vmem>>, vector<16x128xf32>
    %1 = arith.truncf %0 : vector<16x128xf32> to vector<16x128xbf16>
    %c0_1 = arith.constant 0 : index
    %c0_2 = arith.constant 0 : index
    %2 = vector.load %arg2[%c0_1, %c0_2] : memref<16x128xf32, #tpu.memory_space<vmem>>, vector<16x128xf32>
    %3 = arith.truncf %2 : vector<16x128xf32> to vector<16x128xbf16>
    %c0_3 = arith.constant 0 : index
    %c0_4 = arith.constant 0 : index
    %4 = vector.load %arg3[%c0_3, %c0_4] : memref<16x16xbf16, #tpu.memory_space<vmem>>, vector<16x16xbf16>
    %cst = arith.constant dense<0.000000e+00> : vector<16x128xf32>
    %5 = tpu.matmul %4, %3, %cst {dimension_numbers = #tpu.dot_dimension_numbers<[1], [0], [0], [1], [0, 0, 1, 1], [], []>} : vector<16x16xbf16>, vector<16x128xbf16>, vector<16x128xf32> -> vector<16x128xf32>
    %c0_5 = arith.constant 0 : index
    %c0_6 = arith.constant 0 : index
    %6 = vector.load %arg4[%c0_5, %c0_6] : memref<16x1xf32, #tpu.memory_space<vmem>>, vector<16x1xf32>
    %7 = vector.broadcast %6 : vector<16x1xf32> to vector<16x128xf32>
    %8 = arith.addf %5, %7 : vector<16x128xf32>
    %c0_7 = arith.constant 0 : index
    %c0_8 = arith.constant 0 : index
    %9 = vector.load %arg5[%c0_7, %c0_8] : memref<16x16xbf16, #tpu.memory_space<vmem>>, vector<16x16xbf16>
    %cst_9 = arith.constant dense<0.000000e+00> : vector<16x128xf32>
    %10 = tpu.matmul %9, %1, %cst_9 {dimension_numbers = #tpu.dot_dimension_numbers<[1], [0], [0], [1], [0, 0, 1, 1], [], []>} : vector<16x16xbf16>, vector<16x128xbf16>, vector<16x128xf32> -> vector<16x128xf32>
    %c0_10 = arith.constant 0 : index
    %c0_11 = arith.constant 0 : index
    %11 = vector.load %arg6[%c0_10, %c0_11] : memref<16x1xf32, #tpu.memory_space<vmem>>, vector<16x1xf32>
    %12 = vector.broadcast %11 : vector<16x1xf32> to vector<16x128xf32>
    %13 = arith.addf %10, %12 : vector<16x128xf32>
    %c0_12 = arith.constant 0 : index
    %c0_13 = arith.constant 0 : index
    %14 = vector.load %arg7[%c0_12, %c0_13] : memref<16x16xbf16, #tpu.memory_space<vmem>>, vector<16x16xbf16>
    %cst_14 = arith.constant dense<0.000000e+00> : vector<16x128xf32>
    %15 = tpu.matmul %14, %1, %cst_14 {dimension_numbers = #tpu.dot_dimension_numbers<[1], [0], [0], [1], [0, 0, 1, 1], [], []>} : vector<16x16xbf16>, vector<16x128xbf16>, vector<16x128xf32> -> vector<16x128xf32>
    %c0_15 = arith.constant 0 : index
    %c0_16 = arith.constant 0 : index
    %16 = vector.load %arg8[%c0_15, %c0_16] : memref<16x1xf32, #tpu.memory_space<vmem>>, vector<16x1xf32>
    %17 = vector.broadcast %16 : vector<16x1xf32> to vector<16x128xf32>
    %18 = arith.addf %15, %17 : vector<16x128xf32>
    %c0_17 = arith.constant 0 : index
    %c0_18 = arith.constant 0 : index
    %19 = vector.load %arg9[%c0_17, %c0_18] : memref<32x16xf32, #tpu.memory_space<vmem>>, vector<32x16xf32>
    %c0_19 = arith.constant 0 : index
    %c0_20 = arith.constant 0 : index
    %20 = vector.load %arg10[%c0_19, %c0_20] : memref<32x1xf32, #tpu.memory_space<vmem>>, vector<32x1xf32>
    %c0_21 = arith.constant 0 : index
    %c0_22 = arith.constant 0 : index
    %21 = vector.load %arg11[%c0_21, %c0_22] : memref<32x32xf32, #tpu.memory_space<vmem>>, vector<32x32xf32>
    %c0_23 = arith.constant 0 : index
    %c0_24 = arith.constant 0 : index
    %22 = vector.load %arg12[%c0_23, %c0_24] : memref<32x1xf32, #tpu.memory_space<vmem>>, vector<32x1xf32>
    %23 = vector.extract_strided_slice %18 {offsets = [0, 0], sizes = [16, 64], strides = [1, 1]} : vector<16x128xf32> to vector<16x64xf32>
    %cst_25 = arith.constant dense<0.000000e+00> : vector<16xf32>
    %24 = vector.multi_reduction <add>, %23, %cst_25 [1] : vector<16x64xf32> to vector<16xf32>
    %25 = vector.shape_cast %24 : vector<16xf32> to vector<16x1xf32>
    %cst_26 = arith.constant 6.400000e+01 : f32
    %26 = vector.broadcast %cst_26 : f32 to vector<16x1xf32>
    %27 = arith.divf %25, %26 : vector<16x1xf32>
    %cst_27 = arith.constant dense<0xFF800000> : vector<16xf32>
    %28 = vector.multi_reduction <maximumf>, %23, %cst_27 [1] : vector<16x64xf32> to vector<16xf32>
    %29 = vector.shape_cast %28 : vector<16xf32> to vector<16x1xf32>
    %30 = arith.addf %27, %29 : vector<16x1xf32>
    %cst_28 = arith.constant dense<0.000000e+00> : vector<32x1xf32>
    %31 = tpu.matmul %19, %30, %cst_28 {dimension_numbers = #tpu.dot_dimension_numbers<[1], [0], [0], [1], [0, 0, 1, 1], [], []>} : vector<32x16xf32>, vector<16x1xf32>, vector<32x1xf32> -> vector<32x1xf32>
    %32 = arith.addf %31, %20 : vector<32x1xf32>
    %cst_29 = arith.constant dense<0.000000e+00> : vector<32x1xf32>
    %33 = tpu.matmul %21, %32, %cst_29 {dimension_numbers = #tpu.dot_dimension_numbers<[1], [0], [0], [1], [0, 0, 1, 1], [], []>} : vector<32x32xf32>, vector<32x1xf32>, vector<32x1xf32> -> vector<32x1xf32>
    %34 = arith.addf %33, %22 : vector<32x1xf32>
    %35 = vector.extract_strided_slice %34 {offsets = [0, 0], sizes = [16, 1], strides = [1, 1]} : vector<32x1xf32> to vector<16x1xf32>
    %36 = vector.extract_strided_slice %34 {offsets = [16, 0], sizes = [16, 1], strides = [1, 1]} : vector<32x1xf32> to vector<16x1xf32>
    %37 = arith.maximumf %35, %36 : vector<16x1xf32>
    %38 = arith.subf %35, %37 : vector<16x1xf32>
    %39 = math.exp %38 : vector<16x1xf32>
    %40 = arith.subf %36, %37 : vector<16x1xf32>
    %41 = math.exp %40 : vector<16x1xf32>
    %42 = arith.addf %39, %41 : vector<16x1xf32>
    %cst_30 = arith.constant 1.000000e+00 : f32
    %43 = vector.broadcast %cst_30 : f32 to vector<16x1xf32>
    %44 = arith.divf %43, %42 : vector<16x1xf32>
    %45 = arith.mulf %39, %44 : vector<16x1xf32>
    %46 = vector.extract_strided_slice %8 {offsets = [0, 0], sizes = [16, 64], strides = [1, 1]} : vector<16x128xf32> to vector<16x64xf32>
    %47 = vector.broadcast %45 : vector<16x1xf32> to vector<16x64xf32>
    %48 = arith.mulf %47, %46 : vector<16x64xf32>
    %49 = arith.mulf %41, %44 : vector<16x1xf32>
    %50 = vector.extract_strided_slice %13 {offsets = [0, 0], sizes = [16, 64], strides = [1, 1]} : vector<16x128xf32> to vector<16x64xf32>
    %51 = vector.broadcast %49 : vector<16x1xf32> to vector<16x64xf32>
    %52 = arith.mulf %51, %50 : vector<16x64xf32>
    %53 = arith.addf %48, %52 : vector<16x64xf32>
    %c0_31 = arith.constant 0 : index
    %c0_32 = arith.constant 0 : index
    %54 = vector.load %arg13[%c0_31, %c0_32] : memref<16x128xf32, #tpu.memory_space<vmem>>, vector<16x64xf32>
    tpu.vector_store %arg13[%c0_31, %c0_32], %53 {strides = array<i32>} : memref<16x128xf32, #tpu.memory_space<vmem>>, vector<16x64xf32>,
    %55 = vector.extract_strided_slice %18 {offsets = [0, 64], sizes = [16, 64], strides = [1, 1]} : vector<16x128xf32> to vector<16x64xf32>
    %cst_33 = arith.constant dense<0.000000e+00> : vector<16xf32>
    %56 = vector.multi_reduction <add>, %55, %cst_33 [1] : vector<16x64xf32> to vector<16xf32>
    %57 = vector.shape_cast %56 : vector<16xf32> to vector<16x1xf32>
    %cst_34 = arith.constant 6.400000e+01 : f32
    %58 = vector.broadcast %cst_34 : f32 to vector<16x1xf32>
    %59 = arith.divf %57, %58 : vector<16x1xf32>
    %cst_35 = arith.constant dense<0xFF800000> : vector<16xf32>
    %60 = vector.multi_reduction <maximumf>, %55, %cst_35 [1] : vector<16x64xf32> to vector<16xf32>
    %61 = vector.shape_cast %60 : vector<16xf32> to vector<16x1xf32>
    %62 = arith.addf %59, %61 : vector<16x1xf32>
    %cst_36 = arith.constant dense<0.000000e+00> : vector<32x1xf32>
    %63 = tpu.matmul %19, %62, %cst_36 {dimension_numbers = #tpu.dot_dimension_numbers<[1], [0], [0], [1], [0, 0, 1, 1], [], []>} : vector<32x16xf32>, vector<16x1xf32>, vector<32x1xf32> -> vector<32x1xf32>
    %64 = arith.addf %63, %20 : vector<32x1xf32>
    %cst_37 = arith.constant dense<0.000000e+00> : vector<32x1xf32>
    %65 = tpu.matmul %21, %64, %cst_37 {dimension_numbers = #tpu.dot_dimension_numbers<[1], [0], [0], [1], [0, 0, 1, 1], [], []>} : vector<32x32xf32>, vector<32x1xf32>, vector<32x1xf32> -> vector<32x1xf32>
    %66 = arith.addf %65, %22 : vector<32x1xf32>
    %67 = vector.extract_strided_slice %66 {offsets = [0, 0], sizes = [16, 1], strides = [1, 1]} : vector<32x1xf32> to vector<16x1xf32>
    %68 = vector.extract_strided_slice %66 {offsets = [16, 0], sizes = [16, 1], strides = [1, 1]} : vector<32x1xf32> to vector<16x1xf32>
    %69 = arith.maximumf %67, %68 : vector<16x1xf32>
    %70 = arith.subf %67, %69 : vector<16x1xf32>
    %71 = math.exp %70 : vector<16x1xf32>
    %72 = arith.subf %68, %69 : vector<16x1xf32>
    %73 = math.exp %72 : vector<16x1xf32>
    %74 = arith.addf %71, %73 : vector<16x1xf32>
    %cst_38 = arith.constant 1.000000e+00 : f32
    %75 = vector.broadcast %cst_38 : f32 to vector<16x1xf32>
    %76 = arith.divf %75, %74 : vector<16x1xf32>
    %77 = arith.mulf %71, %76 : vector<16x1xf32>
    %78 = vector.extract_strided_slice %8 {offsets = [0, 64], sizes = [16, 64], strides = [1, 1]} : vector<16x128xf32> to vector<16x64xf32>
    %79 = vector.broadcast %77 : vector<16x1xf32> to vector<16x64xf32>
    %80 = arith.mulf %79, %78 : vector<16x64xf32>
    %81 = arith.mulf %73, %76 : vector<16x1xf32>
    %82 = vector.extract_strided_slice %13 {offsets = [0, 64], sizes = [16, 64], strides = [1, 1]} : vector<16x128xf32> to vector<16x64xf32>
    %83 = vector.broadcast %81 : vector<16x1xf32> to vector<16x64xf32>
    %84 = arith.mulf %83, %82 : vector<16x64xf32>
    %85 = arith.addf %80, %84 : vector<16x64xf32>
    %c0_39 = arith.constant 0 : index
    %c64 = arith.constant 64 : index
    %86 = vector.load %arg13[%c0_39, %c64] : memref<16x128xf32, #tpu.memory_space<vmem>>, vector<16x64xf32>
    tpu.vector_store %arg13[%c0_39, %c64], %85 {strides = array<i32>} : memref<16x128xf32, #tpu.memory_space<vmem>>, vector<16x64xf32>,
    return
  }
  func.func @transform_0(%arg0: i32) -> (i32, i32) {
    %c0_i32 = arith.constant 0 : i32
    %c0_i32_0 = arith.constant 0 : i32
    %c0_i32_1 = arith.constant 0 : i32
    return %c0_i32, %c0_i32_0 : i32, i32
  }
  func.func @transform_1(%arg0: i32) -> (i32, i32) {
    %c0_i32 = arith.constant 0 : i32
    %c0_i32_0 = arith.constant 0 : i32
    %c0_i32_1 = arith.constant 0 : i32
    return %c0_i32, %c0_i32_0 : i32, i32
  }
  func.func @transform_2(%arg0: i32) -> (i32, i32) {
    %c0_i32 = arith.constant 0 : i32
    %c0_i32_0 = arith.constant 0 : i32
    %c0_i32_1 = arith.constant 0 : i32
    return %c0_i32, %c0_i32_0 : i32, i32
  }
  func.func @transform_3(%arg0: i32) -> (i32, i32) {
    %c0_i32 = arith.constant 0 : i32
    %c0_i32_0 = arith.constant 0 : i32
    %c0_i32_1 = arith.constant 0 : i32
    return %c0_i32, %c0_i32_0 : i32, i32
  }
  func.func @transform_4(%arg0: i32) -> (i32, i32) {
    %c0_i32 = arith.constant 0 : i32
    %c0_i32_0 = arith.constant 0 : i32
    %c0_i32_1 = arith.constant 0 : i32
    return %c0_i32, %c0_i32_0 : i32, i32
  }
  func.func @transform_5(%arg0: i32) -> (i32, i32) {
    %c0_i32 = arith.constant 0 : i32
    %c0_i32_0 = arith.constant 0 : i32
    %c0_i32_1 = arith.constant 0 : i32
    return %c0_i32, %c0_i32_0 : i32, i32
  }
  func.func @transform_6(%arg0: i32) -> (i32, i32) {
    %c0_i32 = arith.constant 0 : i32
    %c0_i32_0 = arith.constant 0 : i32
    %c0_i32_1 = arith.constant 0 : i32
    return %c0_i32, %c0_i32_0 : i32, i32
  }
  func.func @transform_7(%arg0: i32) -> (i32, i32) {
    %c0_i32 = arith.constant 0 : i32
    %c0_i32_0 = arith.constant 0 : i32
    %c0_i32_1 = arith.constant 0 : i32
    return %c0_i32, %c0_i32_0 : i32, i32
  }
  func.func @transform_8(%arg0: i32) -> (i32, i32) {
    %c0_i32 = arith.constant 0 : i32
    %c0_i32_0 = arith.constant 0 : i32
    %c0_i32_1 = arith.constant 0 : i32
    return %c0_i32, %c0_i32_0 : i32, i32
  }
  func.func @transform_9(%arg0: i32) -> (i32, i32) {
    %c0_i32 = arith.constant 0 : i32
    %c0_i32_0 = arith.constant 0 : i32
    %c0_i32_1 = arith.constant 0 : i32
    return %c0_i32, %c0_i32_0 : i32, i32
  }
  func.func @transform_10(%arg0: i32) -> (i32, i32) {
    %c0_i32 = arith.constant 0 : i32
    %c0_i32_0 = arith.constant 0 : i32
    %c0_i32_1 = arith.constant 0 : i32
    return %c0_i32, %c0_i32_0 : i32, i32
  }
  func.func @transform_11(%arg0: i32) -> (i32, i32) {
    %c0_i32 = arith.constant 0 : i32
    %c0_i32_0 = arith.constant 0 : i32
    %c0_i32_1 = arith.constant 0 : i32
    return %c0_i32, %c0_i32_0 : i32, i32
  }
  func.func @transform_12(%arg0: i32) -> (i32, i32) {
    %c0_i32 = arith.constant 0 : i32
    %c0_i32_0 = arith.constant 0 : i32
    %c0_i32_1 = arith.constant 0 : i32
    return %c0_i32, %c0_i32_0 : i32, i32
  }
}

module attributes {stable_mosaic.version = 11 : i64} {
  func.func @_sk_fused_kernel(%arg0: i32, %arg1: memref<16x128xf32, #tpu.memory_space<vmem>>, %arg2: memref<16x128xf32, #tpu.memory_space<vmem>>, %arg3: memref<16x16xbf16, #tpu.memory_space<vmem>>, %arg4: memref<16x1xf32, #tpu.memory_space<vmem>>, %arg5: memref<16x16xbf16, #tpu.memory_space<vmem>>, %arg6: memref<16x1xf32, #tpu.memory_space<vmem>>, %arg7: memref<16x16xbf16, #tpu.memory_space<vmem>>, %arg8: memref<16x1xf32, #tpu.memory_space<vmem>>, %arg9: memref<32x16xf32, #tpu.memory_space<vmem>>, %arg10: memref<32x1xf32, #tpu.memory_space<vmem>>, %arg11: memref<32x32xf32, #tpu.memory_space<vmem>>, %arg12: memref<32x1xf32, #tpu.memory_space<vmem>>, %arg13: memref<16x128xf32, #tpu.memory_space<vmem>>) attributes {dimension_semantics = [#tpu.dimension_semantics<arbitrary>], iteration_bounds = array<i64: 1>, scalar_prefetch = 0 : i64, scratch_operands = 0 : i64, tpu.core_type = #tpu.core_type<tc>, window_params = [{pipeline_mode = #tpu.pipeline_mode<synchronous>, transform_indices = @transform_0, window_bounds = array<i64: 16, 128>}, {pipeline_mode = #tpu.pipeline_mode<synchronous>, transform_indices = @transform_1, window_bounds = array<i64: 16, 128>}, {pipeline_mode = #tpu.pipeline_mode<synchronous>, transform_indices = @transform_2, window_bounds = array<i64: 16, 16>}, {pipeline_mode = #tpu.pipeline_mode<synchronous>, transform_indices = @transform_3, window_bounds = array<i64: 16, 1>}, {pipeline_mode = #tpu.pipeline_mode<synchronous>, transform_indices = @transform_4, window_bounds = array<i64: 16, 16>}, {pipeline_mode = #tpu.pipeline_mode<synchronous>, transform_indices = @transform_5, window_bounds = array<i64: 16, 1>}, {pipeline_mode = #tpu.pipeline_mode<synchronous>, transform_indices = @transform_6, window_bounds = array<i64: 16, 16>}, {pipeline_mode = #tpu.pipeline_mode<synchronous>, transform_indices = @transform_7, window_bounds = array<i64: 16, 1>}, {pipeline_mode = #tpu.pipeline_mode<synchronous>, transform_indices = @transform_8, window_bounds = array<i64: 32, 16>}, {pipeline_mode = #tpu.pipeline_mode<synchronous>, transform_indices = @transform_9, window_bounds = array<i64: 32, 1>}, {pipeline_mode = #tpu.pipeline_mode<synchronous>, transform_indices = @transform_10, window_bounds = array<i64: 32, 32>}, {pipeline_mode = #tpu.pipeline_mode<synchronous>, transform_indices = @transform_11, window_bounds = array<i64: 32, 1>}, {pipeline_mode = #tpu.pipeline_mode<synchronous>, transform_indices = @transform_12, window_bounds = array<i64: 16, 128>}]} {
    %c0 = arith.constant 0 : index
    %c0_0 = arith.constant 0 : index
    %0 = vector.load %arg1[%c0, %c0_0] : memref<16x128xf32, #tpu.memory_space<vmem>>, vector<16x128xf32>
    %1 = arith.truncf %0 : vector<16x128xf32> to vector<16x128xbf16>
    %c0_1 = arith.constant 0 : index
    %c0_2 = arith.constant 0 : index
    %2 = vector.load %arg2[%c0_1, %c0_2] : memref<16x128xf32, #tpu.memory_space<vmem>>, vector<16x128xf32>
    %3 = arith.truncf %2 : vector<16x128xf32> to vector<16x128xbf16>
    %c0_3 = arith.constant 0 : index
    %c0_4 = arith.constant 0 : index
    %4 = vector.load %arg3[%c0_3, %c0_4] : memref<16x16xbf16, #tpu.memory_space<vmem>>, vector<16x16xbf16>
    %cst = arith.constant dense<0.000000e+00> : vector<16x128xf32>
    %5 = tpu.matmul %4, %3, %cst {dimension_numbers = #tpu.dot_dimension_numbers<[1], [0], [0], [1], [0, 0, 1, 1], [], []>} : vector<16x16xbf16>, vector<16x128xbf16>, vector<16x128xf32> -> vector<16x128xf32>
    %c0_5 = arith.constant 0 : index
    %c0_6 = arith.constant 0 : index
    %6 = vector.load %arg4[%c0_5, %c0_6] : memref<16x1xf32, #tpu.memory_space<vmem>>, vector<16x1xf32>
    %7 = vector.broadcast %6 : vector<16x1xf32> to vector<16x128xf32>
    %8 = arith.addf %5, %7 : vector<16x128xf32>
    %c0_7 = arith.constant 0 : index
    %c0_8 = arith.constant 0 : index
    %9 = vector.load %arg5[%c0_7, %c0_8] : memref<16x16xbf16, #tpu.memory_space<vmem>>, vector<16x16xbf16>
    %cst_9 = arith.constant dense<0.000000e+00> : vector<16x128xf32>
    %10 = tpu.matmul %9, %1, %cst_9 {dimension_numbers = #tpu.dot_dimension_numbers<[1], [0], [0], [1], [0, 0, 1, 1], [], []>} : vector<16x16xbf16>, vector<16x128xbf16>, vector<16x128xf32> -> vector<16x128xf32>
    %c0_10 = arith.constant 0 : index
    %c0_11 = arith.constant 0 : index
    %11 = vector.load %arg6[%c0_10, %c0_11] : memref<16x1xf32, #tpu.memory_space<vmem>>, vector<16x1xf32>
    %12 = vector.broadcast %11 : vector<16x1xf32> to vector<16x128xf32>
    %13 = arith.addf %10, %12 : vector<16x128xf32>
    %c0_12 = arith.constant 0 : index
    %c0_13 = arith.constant 0 : index
    %14 = vector.load %arg7[%c0_12, %c0_13] : memref<16x16xbf16, #tpu.memory_space<vmem>>, vector<16x16xbf16>
    %cst_14 = arith.constant dense<0.000000e+00> : vector<16x128xf32>
    %15 = tpu.matmul %14, %1, %cst_14 {dimension_numbers = #tpu.dot_dimension_numbers<[1], [0], [0], [1], [0, 0, 1, 1], [], []>} : vector<16x16xbf16>, vector<16x128xbf16>, vector<16x128xf32> -> vector<16x128xf32>
    %c0_15 = arith.constant 0 : index
    %c0_16 = arith.constant 0 : index
    %16 = vector.load %arg8[%c0_15, %c0_16] : memref<16x1xf32, #tpu.memory_space<vmem>>, vector<16x1xf32>
    %17 = vector.broadcast %16 : vector<16x1xf32> to vector<16x128xf32>
    %18 = arith.addf %15, %17 : vector<16x128xf32>
    %c0_17 = arith.constant 0 : index
    %c0_18 = arith.constant 0 : index
    %19 = vector.load %arg9[%c0_17, %c0_18] : memref<32x16xf32, #tpu.memory_space<vmem>>, vector<32x16xf32>
    %c0_19 = arith.constant 0 : index
    %c0_20 = arith.constant 0 : index
    %20 = vector.load %arg10[%c0_19, %c0_20] : memref<32x1xf32, #tpu.memory_space<vmem>>, vector<32x1xf32>
    %c0_21 = arith.constant 0 : index
    %c0_22 = arith.constant 0 : index
    %21 = vector.load %arg11[%c0_21, %c0_22] : memref<32x32xf32, #tpu.memory_space<vmem>>, vector<32x32xf32>
    %c0_23 = arith.constant 0 : index
    %c0_24 = arith.constant 0 : index
    %22 = vector.load %arg12[%c0_23, %c0_24] : memref<32x1xf32, #tpu.memory_space<vmem>>, vector<32x1xf32>
    %23 = vector.extract_strided_slice %18 {offsets = [0, 0], sizes = [16, 64], strides = [1, 1]} : vector<16x128xf32> to vector<16x64xf32>
    %cst_25 = arith.constant dense<0.000000e+00> : vector<16xf32>
    %24 = vector.multi_reduction <add>, %23, %cst_25 [1] : vector<16x64xf32> to vector<16xf32>
    %25 = vector.shape_cast %24 : vector<16xf32> to vector<16x1xf32>
    %cst_26 = arith.constant 6.400000e+01 : f32
    %26 = vector.broadcast %cst_26 : f32 to vector<16x1xf32>
    %27 = arith.divf %25, %26 : vector<16x1xf32>
    %cst_27 = arith.constant dense<0xFF800000> : vector<16xf32>
    %28 = vector.multi_reduction <maximumf>, %23, %cst_27 [1] : vector<16x64xf32> to vector<16xf32>
    %29 = vector.shape_cast %28 : vector<16xf32> to vector<16x1xf32>
    %30 = arith.addf %27, %29 : vector<16x1xf32>
    %cst_28 = arith.constant dense<0.000000e+00> : vector<32x1xf32>
    %31 = tpu.matmul %19, %30, %cst_28 {dimension_numbers = #tpu.dot_dimension_numbers<[1], [0], [0], [1], [0, 0, 1, 1], [], []>} : vector<32x16xf32>, vector<16x1xf32>, vector<32x1xf32> -> vector<32x1xf32>
    %32 = arith.addf %31, %20 : vector<32x1xf32>
    %cst_29 = arith.constant dense<0.000000e+00> : vector<32x1xf32>
    %33 = tpu.matmul %21, %32, %cst_29 {dimension_numbers = #tpu.dot_dimension_numbers<[1], [0], [0], [1], [0, 0, 1, 1], [], []>} : vector<32x32xf32>, vector<32x1xf32>, vector<32x1xf32> -> vector<32x1xf32>
    %34 = arith.addf %33, %22 : vector<32x1xf32>
    %35 = vector.extract_strided_slice %34 {offsets = [0, 0], sizes = [16, 1], strides = [1, 1]} : vector<32x1xf32> to vector<16x1xf32>
    %36 = vector.extract_strided_slice %34 {offsets = [16, 0], sizes = [16, 1], strides = [1, 1]} : vector<32x1xf32> to vector<16x1xf32>
    %37 = arith.maximumf %35, %36 : vector<16x1xf32>
    %38 = arith.subf %35, %37 : vector<16x1xf32>
    %39 = math.exp %38 : vector<16x1xf32>
    %40 = arith.subf %36, %37 : vector<16x1xf32>
    %41 = math.exp %40 : vector<16x1xf32>
    %42 = arith.addf %39, %41 : vector<16x1xf32>
    %cst_30 = arith.constant 1.000000e+00 : f32
    %43 = vector.broadcast %cst_30 : f32 to vector<16x1xf32>
    %44 = arith.divf %43, %42 : vector<16x1xf32>
    %45 = arith.mulf %39, %44 : vector<16x1xf32>
    %46 = vector.extract_strided_slice %8 {offsets = [0, 0], sizes = [16, 64], strides = [1, 1]} : vector<16x128xf32> to vector<16x64xf32>
    %47 = vector.broadcast %45 : vector<16x1xf32> to vector<16x64xf32>
    %48 = arith.mulf %47, %46 : vector<16x64xf32>
    %49 = arith.mulf %41, %44 : vector<16x1xf32>
    %50 = vector.extract_strided_slice %13 {offsets = [0, 0], sizes = [16, 64], strides = [1, 1]} : vector<16x128xf32> to vector<16x64xf32>
    %51 = vector.broadcast %49 : vector<16x1xf32> to vector<16x64xf32>
    %52 = arith.mulf %51, %50 : vector<16x64xf32>
    %53 = arith.addf %48, %52 : vector<16x64xf32>
    %cst_31 = arith.constant 5.000000e-01 : f32
    %54 = vector.broadcast %cst_31 : f32 to vector<16x64xf32>
    %55 = arith.mulf %54, %53 : vector<16x64xf32>
    %cst_32 = arith.constant 0.707106769 : f32
    %56 = vector.broadcast %cst_32 : f32 to vector<16x64xf32>
    %57 = arith.mulf %53, %56 : vector<16x64xf32>
    %58 = math.erf %57 : vector<16x64xf32>
    %cst_33 = arith.constant 1.000000e+00 : f32
    %59 = vector.broadcast %cst_33 : f32 to vector<16x64xf32>
    %60 = arith.addf %59, %58 : vector<16x64xf32>
    %61 = arith.mulf %55, %60 : vector<16x64xf32>
    %c0_34 = arith.constant 0 : index
    %c0_35 = arith.constant 0 : index
    %62 = vector.load %arg13[%c0_34, %c0_35] : memref<16x128xf32, #tpu.memory_space<vmem>>, vector<16x64xf32>
    tpu.vector_store %arg13[%c0_34, %c0_35], %61 {strides = array<i32>} : memref<16x128xf32, #tpu.memory_space<vmem>>, vector<16x64xf32>,
    %63 = vector.extract_strided_slice %18 {offsets = [0, 64], sizes = [16, 64], strides = [1, 1]} : vector<16x128xf32> to vector<16x64xf32>
    %cst_36 = arith.constant dense<0.000000e+00> : vector<16xf32>
    %64 = vector.multi_reduction <add>, %63, %cst_36 [1] : vector<16x64xf32> to vector<16xf32>
    %65 = vector.shape_cast %64 : vector<16xf32> to vector<16x1xf32>
    %cst_37 = arith.constant 6.400000e+01 : f32
    %66 = vector.broadcast %cst_37 : f32 to vector<16x1xf32>
    %67 = arith.divf %65, %66 : vector<16x1xf32>
    %cst_38 = arith.constant dense<0xFF800000> : vector<16xf32>
    %68 = vector.multi_reduction <maximumf>, %63, %cst_38 [1] : vector<16x64xf32> to vector<16xf32>
    %69 = vector.shape_cast %68 : vector<16xf32> to vector<16x1xf32>
    %70 = arith.addf %67, %69 : vector<16x1xf32>
    %cst_39 = arith.constant dense<0.000000e+00> : vector<32x1xf32>
    %71 = tpu.matmul %19, %70, %cst_39 {dimension_numbers = #tpu.dot_dimension_numbers<[1], [0], [0], [1], [0, 0, 1, 1], [], []>} : vector<32x16xf32>, vector<16x1xf32>, vector<32x1xf32> -> vector<32x1xf32>
    %72 = arith.addf %71, %20 : vector<32x1xf32>
    %cst_40 = arith.constant dense<0.000000e+00> : vector<32x1xf32>
    %73 = tpu.matmul %21, %72, %cst_40 {dimension_numbers = #tpu.dot_dimension_numbers<[1], [0], [0], [1], [0, 0, 1, 1], [], []>} : vector<32x32xf32>, vector<32x1xf32>, vector<32x1xf32> -> vector<32x1xf32>
    %74 = arith.addf %73, %22 : vector<32x1xf32>
    %75 = vector.extract_strided_slice %74 {offsets = [0, 0], sizes = [16, 1], strides = [1, 1]} : vector<32x1xf32> to vector<16x1xf32>
    %76 = vector.extract_strided_slice %74 {offsets = [16, 0], sizes = [16, 1], strides = [1, 1]} : vector<32x1xf32> to vector<16x1xf32>
    %77 = arith.maximumf %75, %76 : vector<16x1xf32>
    %78 = arith.subf %75, %77 : vector<16x1xf32>
    %79 = math.exp %78 : vector<16x1xf32>
    %80 = arith.subf %76, %77 : vector<16x1xf32>
    %81 = math.exp %80 : vector<16x1xf32>
    %82 = arith.addf %79, %81 : vector<16x1xf32>
    %cst_41 = arith.constant 1.000000e+00 : f32
    %83 = vector.broadcast %cst_41 : f32 to vector<16x1xf32>
    %84 = arith.divf %83, %82 : vector<16x1xf32>
    %85 = arith.mulf %79, %84 : vector<16x1xf32>
    %86 = vector.extract_strided_slice %8 {offsets = [0, 64], sizes = [16, 64], strides = [1, 1]} : vector<16x128xf32> to vector<16x64xf32>
    %87 = vector.broadcast %85 : vector<16x1xf32> to vector<16x64xf32>
    %88 = arith.mulf %87, %86 : vector<16x64xf32>
    %89 = arith.mulf %81, %84 : vector<16x1xf32>
    %90 = vector.extract_strided_slice %13 {offsets = [0, 64], sizes = [16, 64], strides = [1, 1]} : vector<16x128xf32> to vector<16x64xf32>
    %91 = vector.broadcast %89 : vector<16x1xf32> to vector<16x64xf32>
    %92 = arith.mulf %91, %90 : vector<16x64xf32>
    %93 = arith.addf %88, %92 : vector<16x64xf32>
    %cst_42 = arith.constant 5.000000e-01 : f32
    %94 = vector.broadcast %cst_42 : f32 to vector<16x64xf32>
    %95 = arith.mulf %94, %93 : vector<16x64xf32>
    %cst_43 = arith.constant 0.707106769 : f32
    %96 = vector.broadcast %cst_43 : f32 to vector<16x64xf32>
    %97 = arith.mulf %93, %96 : vector<16x64xf32>
    %98 = math.erf %97 : vector<16x64xf32>
    %cst_44 = arith.constant 1.000000e+00 : f32
    %99 = vector.broadcast %cst_44 : f32 to vector<16x64xf32>
    %100 = arith.addf %99, %98 : vector<16x64xf32>
    %101 = arith.mulf %95, %100 : vector<16x64xf32>
    %c0_45 = arith.constant 0 : index
    %c64 = arith.constant 64 : index
    %102 = vector.load %arg13[%c0_45, %c64] : memref<16x128xf32, #tpu.memory_space<vmem>>, vector<16x64xf32>
    tpu.vector_store %arg13[%c0_45, %c64], %101 {strides = array<i32>} : memref<16x128xf32, #tpu.memory_space<vmem>>, vector<16x64xf32>,
    return
  }
  func.func @transform_0(%arg0: i32) -> (i32, i32) {
    %c0_i32 = arith.constant 0 : i32
    %c0_i32_0 = arith.constant 0 : i32
    %c0_i32_1 = arith.constant 0 : i32
    return %c0_i32, %c0_i32_0 : i32, i32
  }
  func.func @transform_1(%arg0: i32) -> (i32, i32) {
    %c0_i32 = arith.constant 0 : i32
    %c0_i32_0 = arith.constant 0 : i32
    %c0_i32_1 = arith.constant 0 : i32
    return %c0_i32, %c0_i32_0 : i32, i32
  }
  func.func @transform_2(%arg0: i32) -> (i32, i32) {
    %c0_i32 = arith.constant 0 : i32
    %c0_i32_0 = arith.constant 0 : i32
    %c0_i32_1 = arith.constant 0 : i32
    return %c0_i32, %c0_i32_0 : i32, i32
  }
  func.func @transform_3(%arg0: i32) -> (i32, i32) {
    %c0_i32 = arith.constant 0 : i32
    %c0_i32_0 = arith.constant 0 : i32
    %c0_i32_1 = arith.constant 0 : i32
    return %c0_i32, %c0_i32_0 : i32, i32
  }
  func.func @transform_4(%arg0: i32) -> (i32, i32) {
    %c0_i32 = arith.constant 0 : i32
    %c0_i32_0 = arith.constant 0 : i32
    %c0_i32_1 = arith.constant 0 : i32
    return %c0_i32, %c0_i32_0 : i32, i32
  }
  func.func @transform_5(%arg0: i32) -> (i32, i32) {
    %c0_i32 = arith.constant 0 : i32
    %c0_i32_0 = arith.constant 0 : i32
    %c0_i32_1 = arith.constant 0 : i32
    return %c0_i32, %c0_i32_0 : i32, i32
  }
  func.func @transform_6(%arg0: i32) -> (i32, i32) {
    %c0_i32 = arith.constant 0 : i32
    %c0_i32_0 = arith.constant 0 : i32
    %c0_i32_1 = arith.constant 0 : i32
    return %c0_i32, %c0_i32_0 : i32, i32
  }
  func.func @transform_7(%arg0: i32) -> (i32, i32) {
    %c0_i32 = arith.constant 0 : i32
    %c0_i32_0 = arith.constant 0 : i32
    %c0_i32_1 = arith.constant 0 : i32
    return %c0_i32, %c0_i32_0 : i32, i32
  }
  func.func @transform_8(%arg0: i32) -> (i32, i32) {
    %c0_i32 = arith.constant 0 : i32
    %c0_i32_0 = arith.constant 0 : i32
    %c0_i32_1 = arith.constant 0 : i32
    return %c0_i32, %c0_i32_0 : i32, i32
  }
  func.func @transform_9(%arg0: i32) -> (i32, i32) {
    %c0_i32 = arith.constant 0 : i32
    %c0_i32_0 = arith.constant 0 : i32
    %c0_i32_1 = arith.constant 0 : i32
    return %c0_i32, %c0_i32_0 : i32, i32
  }
  func.func @transform_10(%arg0: i32) -> (i32, i32) {
    %c0_i32 = arith.constant 0 : i32
    %c0_i32_0 = arith.constant 0 : i32
    %c0_i32_1 = arith.constant 0 : i32
    return %c0_i32, %c0_i32_0 : i32, i32
  }
  func.func @transform_11(%arg0: i32) -> (i32, i32) {
    %c0_i32 = arith.constant 0 : i32
    %c0_i32_0 = arith.constant 0 : i32
    %c0_i32_1 = arith.constant 0 : i32
    return %c0_i32, %c0_i32_0 : i32, i32
  }
  func.func @transform_12(%arg0: i32) -> (i32, i32) {
    %c0_i32 = arith.constant 0 : i32
    %c0_i32_0 = arith.constant 0 : i32
    %c0_i32_1 = arith.constant 0 : i32
    return %c0_i32, %c0_i32_0 : i32, i32
  }
}

module attributes {stable_mosaic.version = 11 : i64} {
  func.func @_matmul_kernel(%arg0: i32, %arg1: i32, %arg2: memref<16x32xbf16, #tpu.memory_space<vmem>>, %arg3: memref<32x128xf32, #tpu.memory_space<vmem>>, %arg4: memref<16x1xf32, #tpu.memory_space<vmem>>, %arg5: memref<16x128xf32, #tpu.memory_space<vmem>>, %arg6: memref<16x128xf32, #tpu.memory_space<vmem>>) attributes {dimension_semantics = [#tpu.dimension_semantics<parallel>, #tpu.dimension_semantics<parallel>], iteration_bounds = array<i64: 2, 1>, scalar_prefetch = 0 : i64, scratch_operands = 0 : i64, tpu.core_type = #tpu.core_type<tc>, window_params = [{transform_indices = @transform_0, window_bounds = array<i64: 16, 32>}, {transform_indices = @transform_1, window_bounds = array<i64: 32, 128>}, {transform_indices = @transform_2, window_bounds = array<i64: 16, 1>}, {transform_indices = @transform_3, window_bounds = array<i64: 16, 128>}, {transform_indices = @transform_4, window_bounds = array<i64: 16, 128>}]} {
    %c0 = arith.constant 0 : index
    %c0_0 = arith.constant 0 : index
    %0 = vector.load %arg2[%c0, %c0_0] : memref<16x32xbf16, #tpu.memory_space<vmem>>, vector<16x32xbf16>
    %c0_1 = arith.constant 0 : index
    %c0_2 = arith.constant 0 : index
    %1 = vector.load %arg3[%c0_1, %c0_2] : memref<32x128xf32, #tpu.memory_space<vmem>>, vector<32x128xf32>
    %2 = arith.truncf %1 : vector<32x128xf32> to vector<32x128xbf16>
    %cst = arith.constant dense<0.000000e+00> : vector<16x128xf32>
    %3 = tpu.matmul %0, %2, %cst {dimension_numbers = #tpu.dot_dimension_numbers<[1], [0], [0], [1], [0, 0, 1, 1], [], []>} : vector<16x32xbf16>, vector<32x128xbf16>, vector<16x128xf32> -> vector<16x128xf32>
    %c0_3 = arith.constant 0 : index
    %c0_4 = arith.constant 0 : index
    %4 = vector.load %arg4[%c0_3, %c0_4] : memref<16x1xf32, #tpu.memory_space<vmem>>, vector<16x1xf32>
    %5 = vector.broadcast %4 : vector<16x1xf32> to vector<16x128xf32>
    %6 = arith.addf %3, %5 : vector<16x128xf32>
    %c0_5 = arith.constant 0 : index
    %c0_6 = arith.constant 0 : index
    %7 = vector.load %arg5[%c0_5, %c0_6] : memref<16x128xf32, #tpu.memory_space<vmem>>, vector<16x128xf32>
    %8 = arith.addf %6, %7 : vector<16x128xf32>
    %c0_7 = arith.constant 0 : index
    %c0_8 = arith.constant 0 : index
    %9 = vector.load %arg6[%c0_7, %c0_8] : memref<16x128xf32, #tpu.memory_space<vmem>>, vector<16x128xf32>
    tpu.vector_store %arg6[%c0_7, %c0_8], %8 {strides = array<i32>} : memref<16x128xf32, #tpu.memory_space<vmem>>, vector<16x128xf32>,
    return
  }
  func.func @transform_0(%arg0: i32, %arg1: i32) -> (i32, i32) {
    %c0_i32 = arith.constant 0 : i32
    %c0_i32_0 = arith.constant 0 : i32
    return %arg0, %c0_i32 : i32, i32
  }
  func.func @transform_1(%arg0: i32, %arg1: i32) -> (i32, i32) {
    %c0_i32 = arith.constant 0 : i32
    %c0_i32_0 = arith.constant 0 : i32
    return %c0_i32, %arg1 : i32, i32
  }
  func.func @transform_2(%arg0: i32, %arg1: i32) -> (i32, i32) {
    %c0_i32 = arith.constant 0 : i32
    %c0_i32_0 = arith.constant 0 : i32
    return %arg0, %c0_i32 : i32, i32
  }
  func.func @transform_3(%arg0: i32, %arg1: i32) -> (i32, i32) {
    %c0_i32 = arith.constant 0 : i32
    return %arg0, %arg1 : i32, i32
  }
  func.func @transform_4(%arg0: i32, %arg1: i32) -> (i32, i32) {
    %c0_i32 = arith.constant 0 : i32
    return %arg0, %arg1 : i32, i32
  }
}

module attributes {stable_mosaic.version = 11 : i64} {
  func.func @_matmul_kernel(%arg0: i32, %arg1: i32, %arg2: memref<8x32xbf16, #tpu.memory_space<vmem>>, %arg3: memref<32x128xf32, #tpu.memory_space<vmem>>, %arg4: memref<8x1xf32, #tpu.memory_space<vmem>>, %arg5: memref<8x128xf32, #tpu.memory_space<vmem>>) attributes {dimension_semantics = [#tpu.dimension_semantics<parallel>, #tpu.dimension_semantics<parallel>], iteration_bounds = array<i64: 1, 1>, scalar_prefetch = 0 : i64, scratch_operands = 0 : i64, tpu.core_type = #tpu.core_type<tc>, window_params = [{transform_indices = @transform_0, window_bounds = array<i64: 8, 32>}, {transform_indices = @transform_1, window_bounds = array<i64: 32, 128>}, {transform_indices = @transform_2, window_bounds = array<i64: 8, 1>}, {transform_indices = @transform_3, window_bounds = array<i64: 8, 128>}]} {
    %c0 = arith.constant 0 : index
    %c0_0 = arith.constant 0 : index
    %0 = vector.load %arg2[%c0, %c0_0] : memref<8x32xbf16, #tpu.memory_space<vmem>>, vector<8x32xbf16>
    %c0_1 = arith.constant 0 : index
    %c0_2 = arith.constant 0 : index
    %1 = vector.load %arg3[%c0_1, %c0_2] : memref<32x128xf32, #tpu.memory_space<vmem>>, vector<32x128xf32>
    %2 = arith.truncf %1 : vector<32x128xf32> to vector<32x128xbf16>
    %cst = arith.constant dense<0.000000e+00> : vector<8x128xf32>
    %3 = tpu.matmul %0, %2, %cst {dimension_numbers = #tpu.dot_dimension_numbers<[1], [0], [0], [1], [0, 0, 1, 1], [], []>} : vector<8x32xbf16>, vector<32x128xbf16>, vector<8x128xf32> -> vector<8x128xf32>
    %c0_3 = arith.constant 0 : index
    %c0_4 = arith.constant 0 : index
    %4 = vector.load %arg4[%c0_3, %c0_4] : memref<8x1xf32, #tpu.memory_space<vmem>>, vector<8x1xf32>
    %5 = vector.broadcast %4 : vector<8x1xf32> to vector<8x128xf32>
    %6 = arith.addf %3, %5 : vector<8x128xf32>
    %c0_5 = arith.constant 0 : index
    %c0_6 = arith.constant 0 : index
    %7 = vector.load %arg5[%c0_5, %c0_6] : memref<8x128xf32, #tpu.memory_space<vmem>>, vector<8x128xf32>
    tpu.vector_store %arg5[%c0_5, %c0_6], %6 {strides = array<i32>} : memref<8x128xf32, #tpu.memory_space<vmem>>, vector<8x128xf32>,
    return
  }
  func.func @transform_0(%arg0: i32, %arg1: i32) -> (i32, i32) {
    %c0_i32 = arith.constant 0 : i32
    %c0_i32_0 = arith.constant 0 : i32
    return %arg0, %c0_i32 : i32, i32
  }
  func.func @transform_1(%arg0: i32, %arg1: i32) -> (i32, i32) {
    %c0_i32 = arith.constant 0 : i32
    %c0_i32_0 = arith.constant 0 : i32
    return %c0_i32, %arg1 : i32, i32
  }
  func.func @transform_2(%arg0: i32, %arg1: i32) -> (i32, i32) {
    %c0_i32 = arith.constant 0 : i32
    %c0_i32_0 = arith.constant 0 : i32
    return %arg0, %c0_i32 : i32, i32
  }
  func.func @transform_3(%arg0: i32, %arg1: i32) -> (i32, i32) {
    %c0_i32 = arith.constant 0 : i32
    return %arg0, %arg1 : i32, i32
  }
}

module attributes {stable_mosaic.version = 11 : i64} {
  func.func @_group_norm_kernel(%arg0: i32, %arg1: memref<1x4x2x64xf32, #tpu.memory_space<vmem>>, %arg2: memref<1x4x1x1xf32, #tpu.memory_space<vmem>>, %arg3: memref<1x4x1x1xf32, #tpu.memory_space<vmem>>, %arg4: memref<1x4x2x64xf32, #tpu.memory_space<vmem>>) attributes {dimension_semantics = [#tpu.dimension_semantics<parallel>], iteration_bounds = array<i64: 2>, scalar_prefetch = 0 : i64, scratch_operands = 0 : i64, tpu.core_type = #tpu.core_type<tc>, window_params = [{transform_indices = @transform_0, window_bounds = array<i64: 1, 4, 2, 64>}, {transform_indices = @transform_1, window_bounds = array<i64: 1, 4, 1, 1>}, {transform_indices = @transform_2, window_bounds = array<i64: 1, 4, 1, 1>}, {transform_indices = @transform_3, window_bounds = array<i64: 1, 4, 2, 64>}]} {
    %c0 = arith.constant 0 : index
    %c0_0 = arith.constant 0 : index
    %c0_1 = arith.constant 0 : index
    %c0_2 = arith.constant 0 : index
    %0 = vector.load %arg1[%c0, %c0_0, %c0_1, %c0_2] : memref<1x4x2x64xf32, #tpu.memory_space<vmem>>, vector<1x4x2x64xf32>
    %cst = arith.constant dense<0.000000e+00> : vector<1x4x2xf32>
    %1 = vector.multi_reduction <add>, %0, %cst [3] : vector<1x4x2x64xf32> to vector<1x4x2xf32>
    %2 = vector.shape_cast %1 : vector<1x4x2xf32> to vector<1x4x2x1xf32>
    %cst_3 = arith.constant 6.400000e+01 : f32
    %3 = vector.broadcast %cst_3 : f32 to vector<1x4x2x1xf32>
    %4 = arith.divf %2, %3 : vector<1x4x2x1xf32>
    %cst_4 = arith.constant dense<0.000000e+00> : vector<1x2x1xf32>
    %5 = vector.multi_reduction <add>, %4, %cst_4 [1] : vector<1x4x2x1xf32> to vector<1x2x1xf32>
    %6 = vector.shape_cast %5 : vector<1x2x1xf32> to vector<1x1x2x1xf32>
    %cst_5 = arith.constant 4.000000e+00 : f32
    %7 = vector.broadcast %cst_5 : f32 to vector<1x1x2x1xf32>
    %8 = arith.divf %6, %7 : vector<1x1x2x1xf32>
    %9 = vector.broadcast %8 : vector<1x1x2x1xf32> to vector<1x4x2x64xf32>
    %10 = arith.subf %0, %9 : vector<1x4x2x64xf32>
    %11 = arith.mulf %10, %10 : vector<1x4x2x64xf32>
    %cst_6 = arith.constant dense<0.000000e+00> : vector<1x4x2xf32>
    %12 = vector.multi_reduction <add>, %11, %cst_6 [3] : vector<1x4x2x64xf32> to vector<1x4x2xf32>
    %13 = vector.shape_cast %12 : vector<1x4x2xf32> to vector<1x4x2x1xf32>
    %cst_7 = arith.constant 6.400000e+01 : f32
    %14 = vector.broadcast %cst_7 : f32 to vector<1x4x2x1xf32>
    %15 = arith.divf %13, %14 : vector<1x4x2x1xf32>
    %cst_8 = arith.constant dense<0.000000e+00> : vector<1x2x1xf32>
    %16 = vector.multi_reduction <add>, %15, %cst_8 [1] : vector<1x4x2x1xf32> to vector<1x2x1xf32>
    %17 = vector.shape_cast %16 : vector<1x2x1xf32> to vector<1x1x2x1xf32>
    %cst_9 = arith.constant 4.000000e+00 : f32
    %18 = vector.broadcast %cst_9 : f32 to vector<1x1x2x1xf32>
    %19 = arith.divf %17, %18 : vector<1x1x2x1xf32>
    %cst_10 = arith.constant 9.99999974E-6 : f32
    %20 = vector.broadcast %cst_10 : f32 to vector<1x1x2x1xf32>
    %21 = arith.addf %19, %20 : vector<1x1x2x1xf32>
    %22 = math.rsqrt %21 : vector<1x1x2x1xf32>
    %23 = vector.broadcast %22 : vector<1x1x2x1xf32> to vector<1x4x2x64xf32>
    %24 = arith.mulf %10, %23 : vector<1x4x2x64xf32>
    %c0_11 = arith.constant 0 : index
    %c0_12 = arith.constant 0 : index
    %c0_13 = arith.constant 0 : index
    %c0_14 = arith.constant 0 : index
    %25 = vector.load %arg2[%c0_11, %c0_12, %c0_13, %c0_14] : memref<1x4x1x1xf32, #tpu.memory_space<vmem>>, vector<1x4x1x1xf32>
    %26 = vector.broadcast %25 : vector<1x4x1x1xf32> to vector<1x4x2x64xf32>
    %27 = arith.mulf %24, %26 : vector<1x4x2x64xf32>
    %c0_15 = arith.constant 0 : index
    %c0_16 = arith.constant 0 : index
    %c0_17 = arith.constant 0 : index
    %c0_18 = arith.constant 0 : index
    %28 = vector.load %arg3[%c0_15, %c0_16, %c0_17, %c0_18] : memref<1x4x1x1xf32, #tpu.memory_space<vmem>>, vector<1x4x1x1xf32>
    %29 = vector.broadcast %28 : vector<1x4x1x1xf32> to vector<1x4x2x64xf32>
    %30 = arith.addf %27, %29 : vector<1x4x2x64xf32>
    %c0_19 = arith.constant 0 : index
    %c0_20 = arith.constant 0 : index
    %c0_21 = arith.constant 0 : index
    %c0_22 = arith.constant 0 : index
    %31 = vector.load %arg4[%c0_19, %c0_20, %c0_21, %c0_22] : memref<1x4x2x64xf32, #tpu.memory_space<vmem>>, vector<1x4x2x64xf32>
    tpu.vector_store %arg4[%c0_19, %c0_20, %c0_21, %c0_22], %30 {strides = array<i32>} : memref<1x4x2x64xf32, #tpu.memory_space<vmem>>, vector<1x4x2x64xf32>,
    return
  }
  func.func @transform_0(%arg0: i32) -> (i32, i32, i32, i32) {
    %c0_i32 = arith.constant 0 : i32
    %c0_i32_0 = arith.constant 0 : i32
    %c0_i32_1 = arith.constant 0 : i32
    %c0_i32_2 = arith.constant 0 : i32
    return %arg0, %c0_i32, %c0_i32_0, %c0_i32_1 : i32, i32, i32, i32
  }
  func.func @transform_1(%arg0: i32) -> (i32, i32, i32, i32) {
    %c0_i32 = arith.constant 0 : i32
    %c0_i32_0 = arith.constant 0 : i32
    %c0_i32_1 = arith.constant 0 : i32
    %c0_i32_2 = arith.constant 0 : i32
    return %arg0, %c0_i32, %c0_i32_0, %c0_i32_1 : i32, i32, i32, i32
  }
  func.func @transform_2(%arg0: i32) -> (i32, i32, i32, i32) {
    %c0_i32 = arith.constant 0 : i32
    %c0_i32_0 = arith.constant 0 : i32
    %c0_i32_1 = arith.constant 0 : i32
    %c0_i32_2 = arith.constant 0 : i32
    return %arg0, %c0_i32, %c0_i32_0, %c0_i32_1 : i32, i32, i32, i32
  }
  func.func @transform_3(%arg0: i32) -> (i32, i32, i32, i32) {
    %c0_i32 = arith.constant 0 : i32
    %c0_i32_0 = arith.constant 0 : i32
    %c0_i32_1 = arith.constant 0 : i32
    %c0_i32_2 = arith.constant 0 : i32
    return %arg0, %c0_i32, %c0_i32_0, %c0_i32_1 : i32, i32, i32, i32
  }
}

module attributes {stable_mosaic.version = 11 : i64} {
  func.func @_grouped3x3_kernel(%arg0: i32, %arg1: memref<1x4x200xf32, #tpu.memory_space<vmem>>, %arg2: memref<1x4x4x9xf32, #tpu.memory_space<vmem>>, %arg3: memref<1x4x1xf32, #tpu.memory_space<vmem>>, %arg4: memref<1x4x178xf32, #tpu.memory_space<vmem>>) attributes {dimension_semantics = [#tpu.dimension_semantics<parallel>], iteration_bounds = array<i64: 2>, scalar_prefetch = 0 : i64, scratch_operands = 0 : i64, tpu.core_type = #tpu.core_type<tc>, window_params = [{transform_indices = @transform_0, window_bounds = array<i64: 1, 4, 200>}, {transform_indices = @transform_1, window_bounds = array<i64: 1, 4, 4, 9>}, {transform_indices = @transform_2, window_bounds = array<i64: 1, 4, 1>}, {transform_indices = @transform_3, window_bounds = array<i64: 1, 4, 178>}]} {
    %cst = arith.constant 0.000000e+00 : f32
    %0 = vector.broadcast %cst : f32 to vector<1x178xf32>
    %cst_0 = arith.constant 0.000000e+00 : f32
    %1 = vector.broadcast %cst_0 : f32 to vector<1x178xf32>
    %cst_1 = arith.constant 0.000000e+00 : f32
    %2 = vector.broadcast %cst_1 : f32 to vector<1x178xf32>
    %cst_2 = arith.constant 0.000000e+00 : f32
    %3 = vector.broadcast %cst_2 : f32 to vector<1x178xf32>
    %c0 = arith.constant 0 : index
    %c0_3 = arith.constant 0 : index
    %c0_4 = arith.constant 0 : index
    %4 = vector.load %arg1[%c0, %c0_3, %c0_4] : memref<1x4x200xf32, #tpu.memory_space<vmem>>, vector<1x1x178xf32>
    %5 = vector.shape_cast %4 : vector<1x1x178xf32> to vector<1x178xf32>
    %c0_5 = arith.constant 0 : index
    %c0_6 = arith.constant 0 : index
    %c0_7 = arith.constant 0 : index
    %c0_8 = arith.constant 0 : index
    %6 = vector.load %arg2[%c0_5, %c0_6, %c0_7, %c0_8] : memref<1x4x4x9xf32, #tpu.memory_space<vmem>>, vector<1x1x1x1xf32>
    %7 = vector.shape_cast %6 : vector<1x1x1x1xf32> to vector<1x1xf32>
    %8 = vector.broadcast %7 : vector<1x1xf32> to vector<1x178xf32>
    %9 = arith.mulf %5, %8 : vector<1x178xf32>
    %10 = arith.addf %0, %9 : vector<1x178xf32>
    %c0_9 = arith.constant 0 : index
    %c1 = arith.constant 1 : index
    %c0_10 = arith.constant 0 : index
    %c0_11 = arith.constant 0 : index
    %11 = vector.load %arg2[%c0_9, %c1, %c0_10, %c0_11] : memref<1x4x4x9xf32, #tpu.memory_space<vmem>>, vector<1x1x1x1xf32>
    %12 = vector.shape_cast %11 : vector<1x1x1x1xf32> to vector<1x1xf32>
    %13 = vector.broadcast %12 : vector<1x1xf32> to vector<1x178xf32>
    %14 = arith.mulf %5, %13 : vector<1x178xf32>
    %15 = arith.addf %1, %14 : vector<1x178xf32>
    %c0_12 = arith.constant 0 : index
    %c2 = arith.constant 2 : index
    %c0_13 = arith.constant 0 : index
    %c0_14 = arith.constant 0 : index
    %16 = vector.load %arg2[%c0_12, %c2, %c0_13, %c0_14] : memref<1x4x4x9xf32, #tpu.memory_space<vmem>>, vector<1x1x1x1xf32>
    %17 = vector.shape_cast %16 : vector<1x1x1x1xf32> to vector<1x1xf32>
    %18 = vector.broadcast %17 : vector<1x1xf32> to vector<1x178xf32>
    %19 = arith.mulf %5, %18 : vector<1x178xf32>
    %20 = arith.addf %2, %19 : vector<1x178xf32>
    %c0_15 = arith.constant 0 : index
    %c3 = arith.constant 3 : index
    %c0_16 = arith.constant 0 : index
    %c0_17 = arith.constant 0 : index
    %21 = vector.load %arg2[%c0_15, %c3, %c0_16, %c0_17] : memref<1x4x4x9xf32, #tpu.memory_space<vmem>>, vector<1x1x1x1xf32>
    %22 = vector.shape_cast %21 : vector<1x1x1x1xf32> to vector<1x1xf32>
    %23 = vector.broadcast %22 : vector<1x1xf32> to vector<1x178xf32>
    %24 = arith.mulf %5, %23 : vector<1x178xf32>
    %25 = arith.addf %3, %24 : vector<1x178xf32>
    %c0_18 = arith.constant 0 : index
    %c0_19 = arith.constant 0 : index
    %c1_20 = arith.constant 1 : index
    %26 = vector.load %arg1[%c0_18, %c0_19, %c1_20] : memref<1x4x200xf32, #tpu.memory_space<vmem>>, vector<1x1x178xf32>
    %27 = vector.shape_cast %26 : vector<1x1x178xf32> to vector<1x178xf32>
    %c0_21 = arith.constant 0 : index
    %c0_22 = arith.constant 0 : index
    %c0_23 = arith.constant 0 : index
    %c1_24 = arith.constant 1 : index
    %28 = vector.load %arg2[%c0_21, %c0_22, %c0_23, %c1_24] : memref<1x4x4x9xf32, #tpu.memory_space<vmem>>, vector<1x1x1x1xf32>
    %29 = vector.shape_cast %28 : vector<1x1x1x1xf32> to vector<1x1xf32>
    %30 = vector.broadcast %29 : vector<1x1xf32> to vector<1x178xf32>
    %31 = arith.mulf %27, %30 : vector<1x178xf32>
    %32 = arith.addf %10, %31 : vector<1x178xf32>
    %c0_25 = arith.constant 0 : index
    %c1_26 = arith.constant 1 : index
    %c0_27 = arith.constant 0 : index
    %c1_28 = arith.constant 1 : index
    %33 = vector.load %arg2[%c0_25, %c1_26, %c0_27, %c1_28] : memref<1x4x4x9xf32, #tpu.memory_space<vmem>>, vector<1x1x1x1xf32>
    %34 = vector.shape_cast %33 : vector<1x1x1x1xf32> to vector<1x1xf32>
    %35 = vector.broadcast %34 : vector<1x1xf32> to vector<1x178xf32>
    %36 = arith.mulf %27, %35 : vector<1x178xf32>
    %37 = arith.addf %15, %36 : vector<1x178xf32>
    %c0_29 = arith.constant 0 : index
    %c2_30 = arith.constant 2 : index
    %c0_31 = arith.constant 0 : index
    %c1_32 = arith.constant 1 : index
    %38 = vector.load %arg2[%c0_29, %c2_30, %c0_31, %c1_32] : memref<1x4x4x9xf32, #tpu.memory_space<vmem>>, vector<1x1x1x1xf32>
    %39 = vector.shape_cast %38 : vector<1x1x1x1xf32> to vector<1x1xf32>
    %40 = vector.broadcast %39 : vector<1x1xf32> to vector<1x178xf32>
    %41 = arith.mulf %27, %40 : vector<1x178xf32>
    %42 = arith.addf %20, %41 : vector<1x178xf32>
    %c0_33 = arith.constant 0 : index
    %c3_34 = arith.constant 3 : index
    %c0_35 = arith.constant 0 : index
    %c1_36 = arith.constant 1 : index
    %43 = vector.load %arg2[%c0_33, %c3_34, %c0_35, %c1_36] : memref<1x4x4x9xf32, #tpu.memory_space<vmem>>, vector<1x1x1x1xf32>
    %44 = vector.shape_cast %43 : vector<1x1x1x1xf32> to vector<1x1xf32>
    %45 = vector.broadcast %44 : vector<1x1xf32> to vector<1x178xf32>
    %46 = arith.mulf %27, %45 : vector<1x178xf32>
    %47 = arith.addf %25, %46 : vector<1x178xf32>
    %c0_37 = arith.constant 0 : index
    %c0_38 = arith.constant 0 : index
    %c2_39 = arith.constant 2 : index
    %48 = vector.load %arg1[%c0_37, %c0_38, %c2_39] : memref<1x4x200xf32, #tpu.memory_space<vmem>>, vector<1x1x178xf32>
    %49 = vector.shape_cast %48 : vector<1x1x178xf32> to vector<1x178xf32>
    %c0_40 = arith.constant 0 : index
    %c0_41 = arith.constant 0 : index
    %c0_42 = arith.constant 0 : index
    %c2_43 = arith.constant 2 : index
    %50 = vector.load %arg2[%c0_40, %c0_41, %c0_42, %c2_43] : memref<1x4x4x9xf32, #tpu.memory_space<vmem>>, vector<1x1x1x1xf32>
    %51 = vector.shape_cast %50 : vector<1x1x1x1xf32> to vector<1x1xf32>
    %52 = vector.broadcast %51 : vector<1x1xf32> to vector<1x178xf32>
    %53 = arith.mulf %49, %52 : vector<1x178xf32>
    %54 = arith.addf %32, %53 : vector<1x178xf32>
    %c0_44 = arith.constant 0 : index
    %c1_45 = arith.constant 1 : index
    %c0_46 = arith.constant 0 : index
    %c2_47 = arith.constant 2 : index
    %55 = vector.load %arg2[%c0_44, %c1_45, %c0_46, %c2_47] : memref<1x4x4x9xf32, #tpu.memory_space<vmem>>, vector<1x1x1x1xf32>
    %56 = vector.shape_cast %55 : vector<1x1x1x1xf32> to vector<1x1xf32>
    %57 = vector.broadcast %56 : vector<1x1xf32> to vector<1x178xf32>
    %58 = arith.mulf %49, %57 : vector<1x178xf32>
    %59 = arith.addf %37, %58 : vector<1x178xf32>
    %c0_48 = arith.constant 0 : index
    %c2_49 = arith.constant 2 : index
    %c0_50 = arith.constant 0 : index
    %c2_51 = arith.constant 2 : index
    %60 = vector.load %arg2[%c0_48, %c2_49, %c0_50, %c2_51] : memref<1x4x4x9xf32, #tpu.memory_space<vmem>>, vector<1x1x1x1xf32>
    %61 = vector.shape_cast %60 : vector<1x1x1x1xf32> to vector<1x1xf32>
    %62 = vector.broadcast %61 : vector<1x1xf32> to vector<1x178xf32>
    %63 = arith.mulf %49, %62 : vector<1x178xf32>
    %64 = arith.addf %42, %63 : vector<1x178xf32>
    %c0_52 = arith.constant 0 : index
    %c3_53 = arith.constant 3 : index
    %c0_54 = arith.constant 0 : index
    %c2_55 = arith.constant 2 : index
    %65 = vector.load %arg2[%c0_52, %c3_53, %c0_54, %c2_55] : memref<1x4x4x9xf32, #tpu.memory_space<vmem>>, vector<1x1x1x1xf32>
    %66 = vector.shape_cast %65 : vector<1x1x1x1xf32> to vector<1x1xf32>
    %67 = vector.broadcast %66 : vector<1x1xf32> to vector<1x178xf32>
    %68 = arith.mulf %49, %67 : vector<1x178xf32>
    %69 = arith.addf %47, %68 : vector<1x178xf32>
    %c0_56 = arith.constant 0 : index
    %c0_57 = arith.constant 0 : index
    %c10 = arith.constant 10 : index
    %70 = vector.load %arg1[%c0_56, %c0_57, %c10] : memref<1x4x200xf32, #tpu.memory_space<vmem>>, vector<1x1x178xf32>
    %71 = vector.shape_cast %70 : vector<1x1x178xf32> to vector<1x178xf32>
    %c0_58 = arith.constant 0 : index
    %c0_59 = arith.constant 0 : index
    %c0_60 = arith.constant 0 : index
    %c3_61 = arith.constant 3 : index
    %72 = vector.load %arg2[%c0_58, %c0_59, %c0_60, %c3_61] : memref<1x4x4x9xf32, #tpu.memory_space<vmem>>, vector<1x1x1x1xf32>
    %73 = vector.shape_cast %72 : vector<1x1x1x1xf32> to vector<1x1xf32>
    %74 = vector.broadcast %73 : vector<1x1xf32> to vector<1x178xf32>
    %75 = arith.mulf %71, %74 : vector<1x178xf32>
    %76 = arith.addf %54, %75 : vector<1x178xf32>
    %c0_62 = arith.constant 0 : index
    %c1_63 = arith.constant 1 : index
    %c0_64 = arith.constant 0 : index
    %c3_65 = arith.constant 3 : index
    %77 = vector.load %arg2[%c0_62, %c1_63, %c0_64, %c3_65] : memref<1x4x4x9xf32, #tpu.memory_space<vmem>>, vector<1x1x1x1xf32>
    %78 = vector.shape_cast %77 : vector<1x1x1x1xf32> to vector<1x1xf32>
    %79 = vector.broadcast %78 : vector<1x1xf32> to vector<1x178xf32>
    %80 = arith.mulf %71, %79 : vector<1x178xf32>
    %81 = arith.addf %59, %80 : vector<1x178xf32>
    %c0_66 = arith.constant 0 : index
    %c2_67 = arith.constant 2 : index
    %c0_68 = arith.constant 0 : index
    %c3_69 = arith.constant 3 : index
    %82 = vector.load %arg2[%c0_66, %c2_67, %c0_68, %c3_69] : memref<1x4x4x9xf32, #tpu.memory_space<vmem>>, vector<1x1x1x1xf32>
    %83 = vector.shape_cast %82 : vector<1x1x1x1xf32> to vector<1x1xf32>
    %84 = vector.broadcast %83 : vector<1x1xf32> to vector<1x178xf32>
    %85 = arith.mulf %71, %84 : vector<1x178xf32>
    %86 = arith.addf %64, %85 : vector<1x178xf32>
    %c0_70 = arith.constant 0 : index
    %c3_71 = arith.constant 3 : index
    %c0_72 = arith.constant 0 : index
    %c3_73 = arith.constant 3 : index
    %87 = vector.load %arg2[%c0_70, %c3_71, %c0_72, %c3_73] : memref<1x4x4x9xf32, #tpu.memory_space<vmem>>, vector<1x1x1x1xf32>
    %88 = vector.shape_cast %87 : vector<1x1x1x1xf32> to vector<1x1xf32>
    %89 = vector.broadcast %88 : vector<1x1xf32> to vector<1x178xf32>
    %90 = arith.mulf %71, %89 : vector<1x178xf32>
    %91 = arith.addf %69, %90 : vector<1x178xf32>
    %c0_74 = arith.constant 0 : index
    %c0_75 = arith.constant 0 : index
    %c11 = arith.constant 11 : index
    %92 = vector.load %arg1[%c0_74, %c0_75, %c11] : memref<1x4x200xf32, #tpu.memory_space<vmem>>, vector<1x1x178xf32>
    %93 = vector.shape_cast %92 : vector<1x1x178xf32> to vector<1x178xf32>
    %c0_76 = arith.constant 0 : index
    %c0_77 = arith.constant 0 : index
    %c0_78 = arith.constant 0 : index
    %c4 = arith.constant 4 : index
    %94 = vector.load %arg2[%c0_76, %c0_77, %c0_78, %c4] : memref<1x4x4x9xf32, #tpu.memory_space<vmem>>, vector<1x1x1x1xf32>
    %95 = vector.shape_cast %94 : vector<1x1x1x1xf32> to vector<1x1xf32>
    %96 = vector.broadcast %95 : vector<1x1xf32> to vector<1x178xf32>
    %97 = arith.mulf %93, %96 : vector<1x178xf32>
    %98 = arith.addf %76, %97 : vector<1x178xf32>
    %c0_79 = arith.constant 0 : index
    %c1_80 = arith.constant 1 : index
    %c0_81 = arith.constant 0 : index
    %c4_82 = arith.constant 4 : index
    %99 = vector.load %arg2[%c0_79, %c1_80, %c0_81, %c4_82] : memref<1x4x4x9xf32, #tpu.memory_space<vmem>>, vector<1x1x1x1xf32>
    %100 = vector.shape_cast %99 : vector<1x1x1x1xf32> to vector<1x1xf32>
    %101 = vector.broadcast %100 : vector<1x1xf32> to vector<1x178xf32>
    %102 = arith.mulf %93, %101 : vector<1x178xf32>
    %103 = arith.addf %81, %102 : vector<1x178xf32>
    %c0_83 = arith.constant 0 : index
    %c2_84 = arith.constant 2 : index
    %c0_85 = arith.constant 0 : index
    %c4_86 = arith.constant 4 : index
    %104 = vector.load %arg2[%c0_83, %c2_84, %c0_85, %c4_86] : memref<1x4x4x9xf32, #tpu.memory_space<vmem>>, vector<1x1x1x1xf32>
    %105 = vector.shape_cast %104 : vector<1x1x1x1xf32> to vector<1x1xf32>
    %106 = vector.broadcast %105 : vector<1x1xf32> to vector<1x178xf32>
    %107 = arith.mulf %93, %106 : vector<1x178xf32>
    %108 = arith.addf %86, %107 : vector<1x178xf32>
    %c0_87 = arith.constant 0 : index
    %c3_88 = arith.constant 3 : index
    %c0_89 = arith.constant 0 : index
    %c4_90 = arith.constant 4 : index
    %109 = vector.load %arg2[%c0_87, %c3_88, %c0_89, %c4_90] : memref<1x4x4x9xf32, #tpu.memory_space<vmem>>, vector<1x1x1x1xf32>
    %110 = vector.shape_cast %109 : vector<1x1x1x1xf32> to vector<1x1xf32>
    %111 = vector.broadcast %110 : vector<1x1xf32> to vector<1x178xf32>
    %112 = arith.mulf %93, %111 : vector<1x178xf32>
    %113 = arith.addf %91, %112 : vector<1x178xf32>
    %c0_91 = arith.constant 0 : index
    %c0_92 = arith.constant 0 : index
    %c12 = arith.constant 12 : index
    %114 = vector.load %arg1[%c0_91, %c0_92, %c12] : memref<1x4x200xf32, #tpu.memory_space<vmem>>, vector<1x1x178xf32>
    %115 = vector.shape_cast %114 : vector<1x1x178xf32> to vector<1x178xf32>
    %c0_93 = arith.constant 0 : index
    %c0_94 = arith.constant 0 : index
    %c0_95 = arith.constant 0 : index
    %c5 = arith.constant 5 : index
    %116 = vector.load %arg2[%c0_93, %c0_94, %c0_95, %c5] : memref<1x4x4x9xf32, #tpu.memory_space<vmem>>, vector<1x1x1x1xf32>
    %117 = vector.shape_cast %116 : vector<1x1x1x1xf32> to vector<1x1xf32>
    %118 = vector.broadcast %117 : vector<1x1xf32> to vector<1x178xf32>
    %119 = arith.mulf %115, %118 : vector<1x178xf32>
    %120 = arith.addf %98, %119 : vector<1x178xf32>
    %c0_96 = arith.constant 0 : index
    %c1_97 = arith.constant 1 : index
    %c0_98 = arith.constant 0 : index
    %c5_99 = arith.constant 5 : index
    %121 = vector.load %arg2[%c0_96, %c1_97, %c0_98, %c5_99] : memref<1x4x4x9xf32, #tpu.memory_space<vmem>>, vector<1x1x1x1xf32>
    %122 = vector.shape_cast %121 : vector<1x1x1x1xf32> to vector<1x1xf32>
    %123 = vector.broadcast %122 : vector<1x1xf32> to vector<1x178xf32>
    %124 = arith.mulf %115, %123 : vector<1x178xf32>
    %125 = arith.addf %103, %124 : vector<1x178xf32>
    %c0_100 = arith.constant 0 : index
    %c2_101 = arith.constant 2 : index
    %c0_102 = arith.constant 0 : index
    %c5_103 = arith.constant 5 : index
    %126 = vector.load %arg2[%c0_100, %c2_101, %c0_102, %c5_103] : memref<1x4x4x9xf32, #tpu.memory_space<vmem>>, vector<1x1x1x1xf32>
    %127 = vector.shape_cast %126 : vector<1x1x1x1xf32> to vector<1x1xf32>
    %128 = vector.broadcast %127 : vector<1x1xf32> to vector<1x178xf32>
    %129 = arith.mulf %115, %128 : vector<1x178xf32>
    %130 = arith.addf %108, %129 : vector<1x178xf32>
    %c0_104 = arith.constant 0 : index
    %c3_105 = arith.constant 3 : index
    %c0_106 = arith.constant 0 : index
    %c5_107 = arith.constant 5 : index
    %131 = vector.load %arg2[%c0_104, %c3_105, %c0_106, %c5_107] : memref<1x4x4x9xf32, #tpu.memory_space<vmem>>, vector<1x1x1x1xf32>
    %132 = vector.shape_cast %131 : vector<1x1x1x1xf32> to vector<1x1xf32>
    %133 = vector.broadcast %132 : vector<1x1xf32> to vector<1x178xf32>
    %134 = arith.mulf %115, %133 : vector<1x178xf32>
    %135 = arith.addf %113, %134 : vector<1x178xf32>
    %c0_108 = arith.constant 0 : index
    %c0_109 = arith.constant 0 : index
    %c20 = arith.constant 20 : index
    %136 = vector.load %arg1[%c0_108, %c0_109, %c20] : memref<1x4x200xf32, #tpu.memory_space<vmem>>, vector<1x1x178xf32>
    %137 = vector.shape_cast %136 : vector<1x1x178xf32> to vector<1x178xf32>
    %c0_110 = arith.constant 0 : index
    %c0_111 = arith.constant 0 : index
    %c0_112 = arith.constant 0 : index
    %c6 = arith.constant 6 : index
    %138 = vector.load %arg2[%c0_110, %c0_111, %c0_112, %c6] : memref<1x4x4x9xf32, #tpu.memory_space<vmem>>, vector<1x1x1x1xf32>
    %139 = vector.shape_cast %138 : vector<1x1x1x1xf32> to vector<1x1xf32>
    %140 = vector.broadcast %139 : vector<1x1xf32> to vector<1x178xf32>
    %141 = arith.mulf %137, %140 : vector<1x178xf32>
    %142 = arith.addf %120, %141 : vector<1x178xf32>
    %c0_113 = arith.constant 0 : index
    %c1_114 = arith.constant 1 : index
    %c0_115 = arith.constant 0 : index
    %c6_116 = arith.constant 6 : index
    %143 = vector.load %arg2[%c0_113, %c1_114, %c0_115, %c6_116] : memref<1x4x4x9xf32, #tpu.memory_space<vmem>>, vector<1x1x1x1xf32>
    %144 = vector.shape_cast %143 : vector<1x1x1x1xf32> to vector<1x1xf32>
    %145 = vector.broadcast %144 : vector<1x1xf32> to vector<1x178xf32>
    %146 = arith.mulf %137, %145 : vector<1x178xf32>
    %147 = arith.addf %125, %146 : vector<1x178xf32>
    %c0_117 = arith.constant 0 : index
    %c2_118 = arith.constant 2 : index
    %c0_119 = arith.constant 0 : index
    %c6_120 = arith.constant 6 : index
    %148 = vector.load %arg2[%c0_117, %c2_118, %c0_119, %c6_120] : memref<1x4x4x9xf32, #tpu.memory_space<vmem>>, vector<1x1x1x1xf32>
    %149 = vector.shape_cast %148 : vector<1x1x1x1xf32> to vector<1x1xf32>
    %150 = vector.broadcast %149 : vector<1x1xf32> to vector<1x178xf32>
    %151 = arith.mulf %137, %150 : vector<1x178xf32>
    %152 = arith.addf %130, %151 : vector<1x178xf32>
    %c0_121 = arith.constant 0 : index
    %c3_122 = arith.constant 3 : index
    %c0_123 = arith.constant 0 : index
    %c6_124 = arith.constant 6 : index
    %153 = vector.load %arg2[%c0_121, %c3_122, %c0_123, %c6_124] : memref<1x4x4x9xf32, #tpu.memory_space<vmem>>, vector<1x1x1x1xf32>
    %154 = vector.shape_cast %153 : vector<1x1x1x1xf32> to vector<1x1xf32>
    %155 = vector.broadcast %154 : vector<1x1xf32> to vector<1x178xf32>
    %156 = arith.mulf %137, %155 : vector<1x178xf32>
    %157 = arith.addf %135, %156 : vector<1x178xf32>
    %c0_125 = arith.constant 0 : index
    %c0_126 = arith.constant 0 : index
    %c21 = arith.constant 21 : index
    %158 = vector.load %arg1[%c0_125, %c0_126, %c21] : memref<1x4x200xf32, #tpu.memory_space<vmem>>, vector<1x1x178xf32>
    %159 = vector.shape_cast %158 : vector<1x1x178xf32> to vector<1x178xf32>
    %c0_127 = arith.constant 0 : index
    %c0_128 = arith.constant 0 : index
    %c0_129 = arith.constant 0 : index
    %c7 = arith.constant 7 : index
    %160 = vector.load %arg2[%c0_127, %c0_128, %c0_129, %c7] : memref<1x4x4x9xf32, #tpu.memory_space<vmem>>, vector<1x1x1x1xf32>
    %161 = vector.shape_cast %160 : vector<1x1x1x1xf32> to vector<1x1xf32>
    %162 = vector.broadcast %161 : vector<1x1xf32> to vector<1x178xf32>
    %163 = arith.mulf %159, %162 : vector<1x178xf32>
    %164 = arith.addf %142, %163 : vector<1x178xf32>
    %c0_130 = arith.constant 0 : index
    %c1_131 = arith.constant 1 : index
    %c0_132 = arith.constant 0 : index
    %c7_133 = arith.constant 7 : index
    %165 = vector.load %arg2[%c0_130, %c1_131, %c0_132, %c7_133] : memref<1x4x4x9xf32, #tpu.memory_space<vmem>>, vector<1x1x1x1xf32>
    %166 = vector.shape_cast %165 : vector<1x1x1x1xf32> to vector<1x1xf32>
    %167 = vector.broadcast %166 : vector<1x1xf32> to vector<1x178xf32>
    %168 = arith.mulf %159, %167 : vector<1x178xf32>
    %169 = arith.addf %147, %168 : vector<1x178xf32>
    %c0_134 = arith.constant 0 : index
    %c2_135 = arith.constant 2 : index
    %c0_136 = arith.constant 0 : index
    %c7_137 = arith.constant 7 : index
    %170 = vector.load %arg2[%c0_134, %c2_135, %c0_136, %c7_137] : memref<1x4x4x9xf32, #tpu.memory_space<vmem>>, vector<1x1x1x1xf32>
    %171 = vector.shape_cast %170 : vector<1x1x1x1xf32> to vector<1x1xf32>
    %172 = vector.broadcast %171 : vector<1x1xf32> to vector<1x178xf32>
    %173 = arith.mulf %159, %172 : vector<1x178xf32>
    %174 = arith.addf %152, %173 : vector<1x178xf32>
    %c0_138 = arith.constant 0 : index
    %c3_139 = arith.constant 3 : index
    %c0_140 = arith.constant 0 : index
    %c7_141 = arith.constant 7 : index
    %175 = vector.load %arg2[%c0_138, %c3_139, %c0_140, %c7_141] : memref<1x4x4x9xf32, #tpu.memory_space<vmem>>, vector<1x1x1x1xf32>
    %176 = vector.shape_cast %175 : vector<1x1x1x1xf32> to vector<1x1xf32>
    %177 = vector.broadcast %176 : vector<1x1xf32> to vector<1x178xf32>
    %178 = arith.mulf %159, %177 : vector<1x178xf32>
    %179 = arith.addf %157, %178 : vector<1x178xf32>
    %c0_142 = arith.constant 0 : index
    %c0_143 = arith.constant 0 : index
    %c22 = arith.constant 22 : index
    %180 = vector.load %arg1[%c0_142, %c0_143, %c22] : memref<1x4x200xf32, #tpu.memory_space<vmem>>, vector<1x1x178xf32>
    %181 = vector.shape_cast %180 : vector<1x1x178xf32> to vector<1x178xf32>
    %c0_144 = arith.constant 0 : index
    %c0_145 = arith.constant 0 : index
    %c0_146 = arith.constant 0 : index
    %c8 = arith.constant 8 : index
    %182 = vector.load %arg2[%c0_144, %c0_145, %c0_146, %c8] : memref<1x4x4x9xf32, #tpu.memory_space<vmem>>, vector<1x1x1x1xf32>
    %183 = vector.shape_cast %182 : vector<1x1x1x1xf32> to vector<1x1xf32>
    %184 = vector.broadcast %183 : vector<1x1xf32> to vector<1x178xf32>
    %185 = arith.mulf %181, %184 : vector<1x178xf32>
    %186 = arith.addf %164, %185 : vector<1x178xf32>
    %c0_147 = arith.constant 0 : index
    %c1_148 = arith.constant 1 : index
    %c0_149 = arith.constant 0 : index
    %c8_150 = arith.constant 8 : index
    %187 = vector.load %arg2[%c0_147, %c1_148, %c0_149, %c8_150] : memref<1x4x4x9xf32, #tpu.memory_space<vmem>>, vector<1x1x1x1xf32>
    %188 = vector.shape_cast %187 : vector<1x1x1x1xf32> to vector<1x1xf32>
    %189 = vector.broadcast %188 : vector<1x1xf32> to vector<1x178xf32>
    %190 = arith.mulf %181, %189 : vector<1x178xf32>
    %191 = arith.addf %169, %190 : vector<1x178xf32>
    %c0_151 = arith.constant 0 : index
    %c2_152 = arith.constant 2 : index
    %c0_153 = arith.constant 0 : index
    %c8_154 = arith.constant 8 : index
    %192 = vector.load %arg2[%c0_151, %c2_152, %c0_153, %c8_154] : memref<1x4x4x9xf32, #tpu.memory_space<vmem>>, vector<1x1x1x1xf32>
    %193 = vector.shape_cast %192 : vector<1x1x1x1xf32> to vector<1x1xf32>
    %194 = vector.broadcast %193 : vector<1x1xf32> to vector<1x178xf32>
    %195 = arith.mulf %181, %194 : vector<1x178xf32>
    %196 = arith.addf %174, %195 : vector<1x178xf32>
    %c0_155 = arith.constant 0 : index
    %c3_156 = arith.constant 3 : index
    %c0_157 = arith.constant 0 : index
    %c8_158 = arith.constant 8 : index
    %197 = vector.load %arg2[%c0_155, %c3_156, %c0_157, %c8_158] : memref<1x4x4x9xf32, #tpu.memory_space<vmem>>, vector<1x1x1x1xf32>
    %198 = vector.shape_cast %197 : vector<1x1x1x1xf32> to vector<1x1xf32>
    %199 = vector.broadcast %198 : vector<1x1xf32> to vector<1x178xf32>
    %200 = arith.mulf %181, %199 : vector<1x178xf32>
    %201 = arith.addf %179, %200 : vector<1x178xf32>
    %c0_159 = arith.constant 0 : index
    %c1_160 = arith.constant 1 : index
    %c0_161 = arith.constant 0 : index
    %202 = vector.load %arg1[%c0_159, %c1_160, %c0_161] : memref<1x4x200xf32, #tpu.memory_space<vmem>>, vector<1x1x178xf32>
    %203 = vector.shape_cast %202 : vector<1x1x178xf32> to vector<1x178xf32>
    %c0_162 = arith.constant 0 : index
    %c0_163 = arith.constant 0 : index
    %c1_164 = arith.constant 1 : index
    %c0_165 = arith.constant 0 : index
    %204 = vector.load %arg2[%c0_162, %c0_163, %c1_164, %c0_165] : memref<1x4x4x9xf32, #tpu.memory_space<vmem>>, vector<1x1x1x1xf32>
    %205 = vector.shape_cast %204 : vector<1x1x1x1xf32> to vector<1x1xf32>
    %206 = vector.broadcast %205 : vector<1x1xf32> to vector<1x178xf32>
    %207 = arith.mulf %203, %206 : vector<1x178xf32>
    %208 = arith.addf %186, %207 : vector<1x178xf32>
    %c0_166 = arith.constant 0 : index
    %c1_167 = arith.constant 1 : index
    %c1_168 = arith.constant 1 : index
    %c0_169 = arith.constant 0 : index
    %209 = vector.load %arg2[%c0_166, %c1_167, %c1_168, %c0_169] : memref<1x4x4x9xf32, #tpu.memory_space<vmem>>, vector<1x1x1x1xf32>
    %210 = vector.shape_cast %209 : vector<1x1x1x1xf32> to vector<1x1xf32>
    %211 = vector.broadcast %210 : vector<1x1xf32> to vector<1x178xf32>
    %212 = arith.mulf %203, %211 : vector<1x178xf32>
    %213 = arith.addf %191, %212 : vector<1x178xf32>
    %c0_170 = arith.constant 0 : index
    %c2_171 = arith.constant 2 : index
    %c1_172 = arith.constant 1 : index
    %c0_173 = arith.constant 0 : index
    %214 = vector.load %arg2[%c0_170, %c2_171, %c1_172, %c0_173] : memref<1x4x4x9xf32, #tpu.memory_space<vmem>>, vector<1x1x1x1xf32>
    %215 = vector.shape_cast %214 : vector<1x1x1x1xf32> to vector<1x1xf32>
    %216 = vector.broadcast %215 : vector<1x1xf32> to vector<1x178xf32>
    %217 = arith.mulf %203, %216 : vector<1x178xf32>
    %218 = arith.addf %196, %217 : vector<1x178xf32>
    %c0_174 = arith.constant 0 : index
    %c3_175 = arith.constant 3 : index
    %c1_176 = arith.constant 1 : index
    %c0_177 = arith.constant 0 : index
    %219 = vector.load %arg2[%c0_174, %c3_175, %c1_176, %c0_177] : memref<1x4x4x9xf32, #tpu.memory_space<vmem>>, vector<1x1x1x1xf32>
    %220 = vector.shape_cast %219 : vector<1x1x1x1xf32> to vector<1x1xf32>
    %221 = vector.broadcast %220 : vector<1x1xf32> to vector<1x178xf32>
    %222 = arith.mulf %203, %221 : vector<1x178xf32>
    %223 = arith.addf %201, %222 : vector<1x178xf32>
    %c0_178 = arith.constant 0 : index
    %c1_179 = arith.constant 1 : index
    %c1_180 = arith.constant 1 : index
    %224 = vector.load %arg1[%c0_178, %c1_179, %c1_180] : memref<1x4x200xf32, #tpu.memory_space<vmem>>, vector<1x1x178xf32>
    %225 = vector.shape_cast %224 : vector<1x1x178xf32> to vector<1x178xf32>
    %c0_181 = arith.constant 0 : index
    %c0_182 = arith.constant 0 : index
    %c1_183 = arith.constant 1 : index
    %c1_184 = arith.constant 1 : index
    %226 = vector.load %arg2[%c0_181, %c0_182, %c1_183, %c1_184] : memref<1x4x4x9xf32, #tpu.memory_space<vmem>>, vector<1x1x1x1xf32>
    %227 = vector.shape_cast %226 : vector<1x1x1x1xf32> to vector<1x1xf32>
    %228 = vector.broadcast %227 : vector<1x1xf32> to vector<1x178xf32>
    %229 = arith.mulf %225, %228 : vector<1x178xf32>
    %230 = arith.addf %208, %229 : vector<1x178xf32>
    %c0_185 = arith.constant 0 : index
    %c1_186 = arith.constant 1 : index
    %c1_187 = arith.constant 1 : index
    %c1_188 = arith.constant 1 : index
    %231 = vector.load %arg2[%c0_185, %c1_186, %c1_187, %c1_188] : memref<1x4x4x9xf32, #tpu.memory_space<vmem>>, vector<1x1x1x1xf32>
    %232 = vector.shape_cast %231 : vector<1x1x1x1xf32> to vector<1x1xf32>
    %233 = vector.broadcast %232 : vector<1x1xf32> to vector<1x178xf32>
    %234 = arith.mulf %225, %233 : vector<1x178xf32>
    %235 = arith.addf %213, %234 : vector<1x178xf32>
    %c0_189 = arith.constant 0 : index
    %c2_190 = arith.constant 2 : index
    %c1_191 = arith.constant 1 : index
    %c1_192 = arith.constant 1 : index
    %236 = vector.load %arg2[%c0_189, %c2_190, %c1_191, %c1_192] : memref<1x4x4x9xf32, #tpu.memory_space<vmem>>, vector<1x1x1x1xf32>
    %237 = vector.shape_cast %236 : vector<1x1x1x1xf32> to vector<1x1xf32>
    %238 = vector.broadcast %237 : vector<1x1xf32> to vector<1x178xf32>
    %239 = arith.mulf %225, %238 : vector<1x178xf32>
    %240 = arith.addf %218, %239 : vector<1x178xf32>
    %c0_193 = arith.constant 0 : index
    %c3_194 = arith.constant 3 : index
    %c1_195 = arith.constant 1 : index
    %c1_196 = arith.constant 1 : index
    %241 = vector.load %arg2[%c0_193, %c3_194, %c1_195, %c1_196] : memref<1x4x4x9xf32, #tpu.memory_space<vmem>>, vector<1x1x1x1xf32>
    %242 = vector.shape_cast %241 : vector<1x1x1x1xf32> to vector<1x1xf32>
    %243 = vector.broadcast %242 : vector<1x1xf32> to vector<1x178xf32>
    %244 = arith.mulf %225, %243 : vector<1x178xf32>
    %245 = arith.addf %223, %244 : vector<1x178xf32>
    %c0_197 = arith.constant 0 : index
    %c1_198 = arith.constant 1 : index
    %c2_199 = arith.constant 2 : index
    %246 = vector.load %arg1[%c0_197, %c1_198, %c2_199] : memref<1x4x200xf32, #tpu.memory_space<vmem>>, vector<1x1x178xf32>
    %247 = vector.shape_cast %246 : vector<1x1x178xf32> to vector<1x178xf32>
    %c0_200 = arith.constant 0 : index
    %c0_201 = arith.constant 0 : index
    %c1_202 = arith.constant 1 : index
    %c2_203 = arith.constant 2 : index
    %248 = vector.load %arg2[%c0_200, %c0_201, %c1_202, %c2_203] : memref<1x4x4x9xf32, #tpu.memory_space<vmem>>, vector<1x1x1x1xf32>
    %249 = vector.shape_cast %248 : vector<1x1x1x1xf32> to vector<1x1xf32>
    %250 = vector.broadcast %249 : vector<1x1xf32> to vector<1x178xf32>
    %251 = arith.mulf %247, %250 : vector<1x178xf32>
    %252 = arith.addf %230, %251 : vector<1x178xf32>
    %c0_204 = arith.constant 0 : index
    %c1_205 = arith.constant 1 : index
    %c1_206 = arith.constant 1 : index
    %c2_207 = arith.constant 2 : index
    %253 = vector.load %arg2[%c0_204, %c1_205, %c1_206, %c2_207] : memref<1x4x4x9xf32, #tpu.memory_space<vmem>>, vector<1x1x1x1xf32>
    %254 = vector.shape_cast %253 : vector<1x1x1x1xf32> to vector<1x1xf32>
    %255 = vector.broadcast %254 : vector<1x1xf32> to vector<1x178xf32>
    %256 = arith.mulf %247, %255 : vector<1x178xf32>
    %257 = arith.addf %235, %256 : vector<1x178xf32>
    %c0_208 = arith.constant 0 : index
    %c2_209 = arith.constant 2 : index
    %c1_210 = arith.constant 1 : index
    %c2_211 = arith.constant 2 : index
    %258 = vector.load %arg2[%c0_208, %c2_209, %c1_210, %c2_211] : memref<1x4x4x9xf32, #tpu.memory_space<vmem>>, vector<1x1x1x1xf32>
    %259 = vector.shape_cast %258 : vector<1x1x1x1xf32> to vector<1x1xf32>
    %260 = vector.broadcast %259 : vector<1x1xf32> to vector<1x178xf32>
    %261 = arith.mulf %247, %260 : vector<1x178xf32>
    %262 = arith.addf %240, %261 : vector<1x178xf32>
    %c0_212 = arith.constant 0 : index
    %c3_213 = arith.constant 3 : index
    %c1_214 = arith.constant 1 : index
    %c2_215 = arith.constant 2 : index
    %263 = vector.load %arg2[%c0_212, %c3_213, %c1_214, %c2_215] : memref<1x4x4x9xf32, #tpu.memory_space<vmem>>, vector<1x1x1x1xf32>
    %264 = vector.shape_cast %263 : vector<1x1x1x1xf32> to vector<1x1xf32>
    %265 = vector.broadcast %264 : vector<1x1xf32> to vector<1x178xf32>
    %266 = arith.mulf %247, %265 : vector<1x178xf32>
    %267 = arith.addf %245, %266 : vector<1x178xf32>
    %c0_216 = arith.constant 0 : index
    %c1_217 = arith.constant 1 : index
    %c10_218 = arith.constant 10 : index
    %268 = vector.load %arg1[%c0_216, %c1_217, %c10_218] : memref<1x4x200xf32, #tpu.memory_space<vmem>>, vector<1x1x178xf32>
    %269 = vector.shape_cast %268 : vector<1x1x178xf32> to vector<1x178xf32>
    %c0_219 = arith.constant 0 : index
    %c0_220 = arith.constant 0 : index
    %c1_221 = arith.constant 1 : index
    %c3_222 = arith.constant 3 : index
    %270 = vector.load %arg2[%c0_219, %c0_220, %c1_221, %c3_222] : memref<1x4x4x9xf32, #tpu.memory_space<vmem>>, vector<1x1x1x1xf32>
    %271 = vector.shape_cast %270 : vector<1x1x1x1xf32> to vector<1x1xf32>
    %272 = vector.broadcast %271 : vector<1x1xf32> to vector<1x178xf32>
    %273 = arith.mulf %269, %272 : vector<1x178xf32>
    %274 = arith.addf %252, %273 : vector<1x178xf32>
    %c0_223 = arith.constant 0 : index
    %c1_224 = arith.constant 1 : index
    %c1_225 = arith.constant 1 : index
    %c3_226 = arith.constant 3 : index
    %275 = vector.load %arg2[%c0_223, %c1_224, %c1_225, %c3_226] : memref<1x4x4x9xf32, #tpu.memory_space<vmem>>, vector<1x1x1x1xf32>
    %276 = vector.shape_cast %275 : vector<1x1x1x1xf32> to vector<1x1xf32>
    %277 = vector.broadcast %276 : vector<1x1xf32> to vector<1x178xf32>
    %278 = arith.mulf %269, %277 : vector<1x178xf32>
    %279 = arith.addf %257, %278 : vector<1x178xf32>
    %c0_227 = arith.constant 0 : index
    %c2_228 = arith.constant 2 : index
    %c1_229 = arith.constant 1 : index
    %c3_230 = arith.constant 3 : index
    %280 = vector.load %arg2[%c0_227, %c2_228, %c1_229, %c3_230] : memref<1x4x4x9xf32, #tpu.memory_space<vmem>>, vector<1x1x1x1xf32>
    %281 = vector.shape_cast %280 : vector<1x1x1x1xf32> to vector<1x1xf32>
    %282 = vector.broadcast %281 : vector<1x1xf32> to vector<1x178xf32>
    %283 = arith.mulf %269, %282 : vector<1x178xf32>
    %284 = arith.addf %262, %283 : vector<1x178xf32>
    %c0_231 = arith.constant 0 : index
    %c3_232 = arith.constant 3 : index
    %c1_233 = arith.constant 1 : index
    %c3_234 = arith.constant 3 : index
    %285 = vector.load %arg2[%c0_231, %c3_232, %c1_233, %c3_234] : memref<1x4x4x9xf32, #tpu.memory_space<vmem>>, vector<1x1x1x1xf32>
    %286 = vector.shape_cast %285 : vector<1x1x1x1xf32> to vector<1x1xf32>
    %287 = vector.broadcast %286 : vector<1x1xf32> to vector<1x178xf32>
    %288 = arith.mulf %269, %287 : vector<1x178xf32>
    %289 = arith.addf %267, %288 : vector<1x178xf32>
    %c0_235 = arith.constant 0 : index
    %c1_236 = arith.constant 1 : index
    %c11_237 = arith.constant 11 : index
    %290 = vector.load %arg1[%c0_235, %c1_236, %c11_237] : memref<1x4x200xf32, #tpu.memory_space<vmem>>, vector<1x1x178xf32>
    %291 = vector.shape_cast %290 : vector<1x1x178xf32> to vector<1x178xf32>
    %c0_238 = arith.constant 0 : index
    %c0_239 = arith.constant 0 : index
    %c1_240 = arith.constant 1 : index
    %c4_241 = arith.constant 4 : index
    %292 = vector.load %arg2[%c0_238, %c0_239, %c1_240, %c4_241] : memref<1x4x4x9xf32, #tpu.memory_space<vmem>>, vector<1x1x1x1xf32>
    %293 = vector.shape_cast %292 : vector<1x1x1x1xf32> to vector<1x1xf32>
    %294 = vector.broadcast %293 : vector<1x1xf32> to vector<1x178xf32>
    %295 = arith.mulf %291, %294 : vector<1x178xf32>
    %296 = arith.addf %274, %295 : vector<1x178xf32>
    %c0_242 = arith.constant 0 : index
    %c1_243 = arith.constant 1 : index
    %c1_244 = arith.constant 1 : index
    %c4_245 = arith.constant 4 : index
    %297 = vector.load %arg2[%c0_242, %c1_243, %c1_244, %c4_245] : memref<1x4x4x9xf32, #tpu.memory_space<vmem>>, vector<1x1x1x1xf32>
    %298 = vector.shape_cast %297 : vector<1x1x1x1xf32> to vector<1x1xf32>
    %299 = vector.broadcast %298 : vector<1x1xf32> to vector<1x178xf32>
    %300 = arith.mulf %291, %299 : vector<1x178xf32>
    %301 = arith.addf %279, %300 : vector<1x178xf32>
    %c0_246 = arith.constant 0 : index
    %c2_247 = arith.constant 2 : index
    %c1_248 = arith.constant 1 : index
    %c4_249 = arith.constant 4 : index
    %302 = vector.load %arg2[%c0_246, %c2_247, %c1_248, %c4_249] : memref<1x4x4x9xf32, #tpu.memory_space<vmem>>, vector<1x1x1x1xf32>
    %303 = vector.shape_cast %302 : vector<1x1x1x1xf32> to vector<1x1xf32>
    %304 = vector.broadcast %303 : vector<1x1xf32> to vector<1x178xf32>
    %305 = arith.mulf %291, %304 : vector<1x178xf32>
    %306 = arith.addf %284, %305 : vector<1x178xf32>
    %c0_250 = arith.constant 0 : index
    %c3_251 = arith.constant 3 : index
    %c1_252 = arith.constant 1 : index
    %c4_253 = arith.constant 4 : index
    %307 = vector.load %arg2[%c0_250, %c3_251, %c1_252, %c4_253] : memref<1x4x4x9xf32, #tpu.memory_space<vmem>>, vector<1x1x1x1xf32>
    %308 = vector.shape_cast %307 : vector<1x1x1x1xf32> to vector<1x1xf32>
    %309 = vector.broadcast %308 : vector<1x1xf32> to vector<1x178xf32>
    %310 = arith.mulf %291, %309 : vector<1x178xf32>
    %311 = arith.addf %289, %310 : vector<1x178xf32>
    %c0_254 = arith.constant 0 : index
    %c1_255 = arith.constant 1 : index
    %c12_256 = arith.constant 12 : index
    %312 = vector.load %arg1[%c0_254, %c1_255, %c12_256] : memref<1x4x200xf32, #tpu.memory_space<vmem>>, vector<1x1x178xf32>
    %313 = vector.shape_cast %312 : vector<1x1x178xf32> to vector<1x178xf32>
    %c0_257 = arith.constant 0 : index
    %c0_258 = arith.constant 0 : index
    %c1_259 = arith.constant 1 : index
    %c5_260 = arith.constant 5 : index
    %314 = vector.load %arg2[%c0_257, %c0_258, %c1_259, %c5_260] : memref<1x4x4x9xf32, #tpu.memory_space<vmem>>, vector<1x1x1x1xf32>
    %315 = vector.shape_cast %314 : vector<1x1x1x1xf32> to vector<1x1xf32>
    %316 = vector.broadcast %315 : vector<1x1xf32> to vector<1x178xf32>
    %317 = arith.mulf %313, %316 : vector<1x178xf32>
    %318 = arith.addf %296, %317 : vector<1x178xf32>
    %c0_261 = arith.constant 0 : index
    %c1_262 = arith.constant 1 : index
    %c1_263 = arith.constant 1 : index
    %c5_264 = arith.constant 5 : index
    %319 = vector.load %arg2[%c0_261, %c1_262, %c1_263, %c5_264] : memref<1x4x4x9xf32, #tpu.memory_space<vmem>>, vector<1x1x1x1xf32>
    %320 = vector.shape_cast %319 : vector<1x1x1x1xf32> to vector<1x1xf32>
    %321 = vector.broadcast %320 : vector<1x1xf32> to vector<1x178xf32>
    %322 = arith.mulf %313, %321 : vector<1x178xf32>
    %323 = arith.addf %301, %322 : vector<1x178xf32>
    %c0_265 = arith.constant 0 : index
    %c2_266 = arith.constant 2 : index
    %c1_267 = arith.constant 1 : index
    %c5_268 = arith.constant 5 : index
    %324 = vector.load %arg2[%c0_265, %c2_266, %c1_267, %c5_268] : memref<1x4x4x9xf32, #tpu.memory_space<vmem>>, vector<1x1x1x1xf32>
    %325 = vector.shape_cast %324 : vector<1x1x1x1xf32> to vector<1x1xf32>
    %326 = vector.broadcast %325 : vector<1x1xf32> to vector<1x178xf32>
    %327 = arith.mulf %313, %326 : vector<1x178xf32>
    %328 = arith.addf %306, %327 : vector<1x178xf32>
    %c0_269 = arith.constant 0 : index
    %c3_270 = arith.constant 3 : index
    %c1_271 = arith.constant 1 : index
    %c5_272 = arith.constant 5 : index
    %329 = vector.load %arg2[%c0_269, %c3_270, %c1_271, %c5_272] : memref<1x4x4x9xf32, #tpu.memory_space<vmem>>, vector<1x1x1x1xf32>
    %330 = vector.shape_cast %329 : vector<1x1x1x1xf32> to vector<1x1xf32>
    %331 = vector.broadcast %330 : vector<1x1xf32> to vector<1x178xf32>
    %332 = arith.mulf %313, %331 : vector<1x178xf32>
    %333 = arith.addf %311, %332 : vector<1x178xf32>
    %c0_273 = arith.constant 0 : index
    %c1_274 = arith.constant 1 : index
    %c20_275 = arith.constant 20 : index
    %334 = vector.load %arg1[%c0_273, %c1_274, %c20_275] : memref<1x4x200xf32, #tpu.memory_space<vmem>>, vector<1x1x178xf32>
    %335 = vector.shape_cast %334 : vector<1x1x178xf32> to vector<1x178xf32>
    %c0_276 = arith.constant 0 : index
    %c0_277 = arith.constant 0 : index
    %c1_278 = arith.constant 1 : index
    %c6_279 = arith.constant 6 : index
    %336 = vector.load %arg2[%c0_276, %c0_277, %c1_278, %c6_279] : memref<1x4x4x9xf32, #tpu.memory_space<vmem>>, vector<1x1x1x1xf32>
    %337 = vector.shape_cast %336 : vector<1x1x1x1xf32> to vector<1x1xf32>
    %338 = vector.broadcast %337 : vector<1x1xf32> to vector<1x178xf32>
    %339 = arith.mulf %335, %338 : vector<1x178xf32>
    %340 = arith.addf %318, %339 : vector<1x178xf32>
    %c0_280 = arith.constant 0 : index
    %c1_281 = arith.constant 1 : index
    %c1_282 = arith.constant 1 : index
    %c6_283 = arith.constant 6 : index
    %341 = vector.load %arg2[%c0_280, %c1_281, %c1_282, %c6_283] : memref<1x4x4x9xf32, #tpu.memory_space<vmem>>, vector<1x1x1x1xf32>
    %342 = vector.shape_cast %341 : vector<1x1x1x1xf32> to vector<1x1xf32>
    %343 = vector.broadcast %342 : vector<1x1xf32> to vector<1x178xf32>
    %344 = arith.mulf %335, %343 : vector<1x178xf32>
    %345 = arith.addf %323, %344 : vector<1x178xf32>
    %c0_284 = arith.constant 0 : index
    %c2_285 = arith.constant 2 : index
    %c1_286 = arith.constant 1 : index
    %c6_287 = arith.constant 6 : index
    %346 = vector.load %arg2[%c0_284, %c2_285, %c1_286, %c6_287] : memref<1x4x4x9xf32, #tpu.memory_space<vmem>>, vector<1x1x1x1xf32>
    %347 = vector.shape_cast %346 : vector<1x1x1x1xf32> to vector<1x1xf32>
    %348 = vector.broadcast %347 : vector<1x1xf32> to vector<1x178xf32>
    %349 = arith.mulf %335, %348 : vector<1x178xf32>
    %350 = arith.addf %328, %349 : vector<1x178xf32>
    %c0_288 = arith.constant 0 : index
    %c3_289 = arith.constant 3 : index
    %c1_290 = arith.constant 1 : index
    %c6_291 = arith.constant 6 : index
    %351 = vector.load %arg2[%c0_288, %c3_289, %c1_290, %c6_291] : memref<1x4x4x9xf32, #tpu.memory_space<vmem>>, vector<1x1x1x1xf32>
    %352 = vector.shape_cast %351 : vector<1x1x1x1xf32> to vector<1x1xf32>
    %353 = vector.broadcast %352 : vector<1x1xf32> to vector<1x178xf32>
    %354 = arith.mulf %335, %353 : vector<1x178xf32>
    %355 = arith.addf %333, %354 : vector<1x178xf32>
    %c0_292 = arith.constant 0 : index
    %c1_293 = arith.constant 1 : index
    %c21_294 = arith.constant 21 : index
    %356 = vector.load %arg1[%c0_292, %c1_293, %c21_294] : memref<1x4x200xf32, #tpu.memory_space<vmem>>, vector<1x1x178xf32>
    %357 = vector.shape_cast %356 : vector<1x1x178xf32> to vector<1x178xf32>
    %c0_295 = arith.constant 0 : index
    %c0_296 = arith.constant 0 : index
    %c1_297 = arith.constant 1 : index
    %c7_298 = arith.constant 7 : index
    %358 = vector.load %arg2[%c0_295, %c0_296, %c1_297, %c7_298] : memref<1x4x4x9xf32, #tpu.memory_space<vmem>>, vector<1x1x1x1xf32>
    %359 = vector.shape_cast %358 : vector<1x1x1x1xf32> to vector<1x1xf32>
    %360 = vector.broadcast %359 : vector<1x1xf32> to vector<1x178xf32>
    %361 = arith.mulf %357, %360 : vector<1x178xf32>
    %362 = arith.addf %340, %361 : vector<1x178xf32>
    %c0_299 = arith.constant 0 : index
    %c1_300 = arith.constant 1 : index
    %c1_301 = arith.constant 1 : index
    %c7_302 = arith.constant 7 : index
    %363 = vector.load %arg2[%c0_299, %c1_300, %c1_301, %c7_302] : memref<1x4x4x9xf32, #tpu.memory_space<vmem>>, vector<1x1x1x1xf32>
    %364 = vector.shape_cast %363 : vector<1x1x1x1xf32> to vector<1x1xf32>
    %365 = vector.broadcast %364 : vector<1x1xf32> to vector<1x178xf32>
    %366 = arith.mulf %357, %365 : vector<1x178xf32>
    %367 = arith.addf %345, %366 : vector<1x178xf32>
    %c0_303 = arith.constant 0 : index
    %c2_304 = arith.constant 2 : index
    %c1_305 = arith.constant 1 : index
    %c7_306 = arith.constant 7 : index
    %368 = vector.load %arg2[%c0_303, %c2_304, %c1_305, %c7_306] : memref<1x4x4x9xf32, #tpu.memory_space<vmem>>, vector<1x1x1x1xf32>
    %369 = vector.shape_cast %368 : vector<1x1x1x1xf32> to vector<1x1xf32>
    %370 = vector.broadcast %369 : vector<1x1xf32> to vector<1x178xf32>
    %371 = arith.mulf %357, %370 : vector<1x178xf32>
    %372 = arith.addf %350, %371 : vector<1x178xf32>
    %c0_307 = arith.constant 0 : index
    %c3_308 = arith.constant 3 : index
    %c1_309 = arith.constant 1 : index
    %c7_310 = arith.constant 7 : index
    %373 = vector.load %arg2[%c0_307, %c3_308, %c1_309, %c7_310] : memref<1x4x4x9xf32, #tpu.memory_space<vmem>>, vector<1x1x1x1xf32>
    %374 = vector.shape_cast %373 : vector<1x1x1x1xf32> to vector<1x1xf32>
    %375 = vector.broadcast %374 : vector<1x1xf32> to vector<1x178xf32>
    %376 = arith.mulf %357, %375 : vector<1x178xf32>
    %377 = arith.addf %355, %376 : vector<1x178xf32>
    %c0_311 = arith.constant 0 : index
    %c1_312 = arith.constant 1 : index
    %c22_313 = arith.constant 22 : index
    %378 = vector.load %arg1[%c0_311, %c1_312, %c22_313] : memref<1x4x200xf32, #tpu.memory_space<vmem>>, vector<1x1x178xf32>
    %379 = vector.shape_cast %378 : vector<1x1x178xf32> to vector<1x178xf32>
    %c0_314 = arith.constant 0 : index
    %c0_315 = arith.constant 0 : index
    %c1_316 = arith.constant 1 : index
    %c8_317 = arith.constant 8 : index
    %380 = vector.load %arg2[%c0_314, %c0_315, %c1_316, %c8_317] : memref<1x4x4x9xf32, #tpu.memory_space<vmem>>, vector<1x1x1x1xf32>
    %381 = vector.shape_cast %380 : vector<1x1x1x1xf32> to vector<1x1xf32>
    %382 = vector.broadcast %381 : vector<1x1xf32> to vector<1x178xf32>
    %383 = arith.mulf %379, %382 : vector<1x178xf32>
    %384 = arith.addf %362, %383 : vector<1x178xf32>
    %c0_318 = arith.constant 0 : index
    %c1_319 = arith.constant 1 : index
    %c1_320 = arith.constant 1 : index
    %c8_321 = arith.constant 8 : index
    %385 = vector.load %arg2[%c0_318, %c1_319, %c1_320, %c8_321] : memref<1x4x4x9xf32, #tpu.memory_space<vmem>>, vector<1x1x1x1xf32>
    %386 = vector.shape_cast %385 : vector<1x1x1x1xf32> to vector<1x1xf32>
    %387 = vector.broadcast %386 : vector<1x1xf32> to vector<1x178xf32>
    %388 = arith.mulf %379, %387 : vector<1x178xf32>
    %389 = arith.addf %367, %388 : vector<1x178xf32>
    %c0_322 = arith.constant 0 : index
    %c2_323 = arith.constant 2 : index
    %c1_324 = arith.constant 1 : index
    %c8_325 = arith.constant 8 : index
    %390 = vector.load %arg2[%c0_322, %c2_323, %c1_324, %c8_325] : memref<1x4x4x9xf32, #tpu.memory_space<vmem>>, vector<1x1x1x1xf32>
    %391 = vector.shape_cast %390 : vector<1x1x1x1xf32> to vector<1x1xf32>
    %392 = vector.broadcast %391 : vector<1x1xf32> to vector<1x178xf32>
    %393 = arith.mulf %379, %392 : vector<1x178xf32>
    %394 = arith.addf %372, %393 : vector<1x178xf32>
    %c0_326 = arith.constant 0 : index
    %c3_327 = arith.constant 3 : index
    %c1_328 = arith.constant 1 : index
    %c8_329 = arith.constant 8 : index
    %395 = vector.load %arg2[%c0_326, %c3_327, %c1_328, %c8_329] : memref<1x4x4x9xf32, #tpu.memory_space<vmem>>, vector<1x1x1x1xf32>
    %396 = vector.shape_cast %395 : vector<1x1x1x1xf32> to vector<1x1xf32>
    %397 = vector.broadcast %396 : vector<1x1xf32> to vector<1x178xf32>
    %398 = arith.mulf %379, %397 : vector<1x178xf32>
    %399 = arith.addf %377, %398 : vector<1x178xf32>
    %c0_330 = arith.constant 0 : index
    %c2_331 = arith.constant 2 : index
    %c0_332 = arith.constant 0 : index
    %400 = vector.load %arg1[%c0_330, %c2_331, %c0_332] : memref<1x4x200xf32, #tpu.memory_space<vmem>>, vector<1x1x178xf32>
    %401 = vector.shape_cast %400 : vector<1x1x178xf32> to vector<1x178xf32>
    %c0_333 = arith.constant 0 : index
    %c0_334 = arith.constant 0 : index
    %c2_335 = arith.constant 2 : index
    %c0_336 = arith.constant 0 : index
    %402 = vector.load %arg2[%c0_333, %c0_334, %c2_335, %c0_336] : memref<1x4x4x9xf32, #tpu.memory_space<vmem>>, vector<1x1x1x1xf32>
    %403 = vector.shape_cast %402 : vector<1x1x1x1xf32> to vector<1x1xf32>
    %404 = vector.broadcast %403 : vector<1x1xf32> to vector<1x178xf32>
    %405 = arith.mulf %401, %404 : vector<1x178xf32>
    %406 = arith.addf %384, %405 : vector<1x178xf32>
    %c0_337 = arith.constant 0 : index
    %c1_338 = arith.constant 1 : index
    %c2_339 = arith.constant 2 : index
    %c0_340 = arith.constant 0 : index
    %407 = vector.load %arg2[%c0_337, %c1_338, %c2_339, %c0_340] : memref<1x4x4x9xf32, #tpu.memory_space<vmem>>, vector<1x1x1x1xf32>
    %408 = vector.shape_cast %407 : vector<1x1x1x1xf32> to vector<1x1xf32>
    %409 = vector.broadcast %408 : vector<1x1xf32> to vector<1x178xf32>
    %410 = arith.mulf %401, %409 : vector<1x178xf32>
    %411 = arith.addf %389, %410 : vector<1x178xf32>
    %c0_341 = arith.constant 0 : index
    %c2_342 = arith.constant 2 : index
    %c2_343 = arith.constant 2 : index
    %c0_344 = arith.constant 0 : index
    %412 = vector.load %arg2[%c0_341, %c2_342, %c2_343, %c0_344] : memref<1x4x4x9xf32, #tpu.memory_space<vmem>>, vector<1x1x1x1xf32>
    %413 = vector.shape_cast %412 : vector<1x1x1x1xf32> to vector<1x1xf32>
    %414 = vector.broadcast %413 : vector<1x1xf32> to vector<1x178xf32>
    %415 = arith.mulf %401, %414 : vector<1x178xf32>
    %416 = arith.addf %394, %415 : vector<1x178xf32>
    %c0_345 = arith.constant 0 : index
    %c3_346 = arith.constant 3 : index
    %c2_347 = arith.constant 2 : index
    %c0_348 = arith.constant 0 : index
    %417 = vector.load %arg2[%c0_345, %c3_346, %c2_347, %c0_348] : memref<1x4x4x9xf32, #tpu.memory_space<vmem>>, vector<1x1x1x1xf32>
    %418 = vector.shape_cast %417 : vector<1x1x1x1xf32> to vector<1x1xf32>
    %419 = vector.broadcast %418 : vector<1x1xf32> to vector<1x178xf32>
    %420 = arith.mulf %401, %419 : vector<1x178xf32>
    %421 = arith.addf %399, %420 : vector<1x178xf32>
    %c0_349 = arith.constant 0 : index
    %c2_350 = arith.constant 2 : index
    %c1_351 = arith.constant 1 : index
    %422 = vector.load %arg1[%c0_349, %c2_350, %c1_351] : memref<1x4x200xf32, #tpu.memory_space<vmem>>, vector<1x1x178xf32>
    %423 = vector.shape_cast %422 : vector<1x1x178xf32> to vector<1x178xf32>
    %c0_352 = arith.constant 0 : index
    %c0_353 = arith.constant 0 : index
    %c2_354 = arith.constant 2 : index
    %c1_355 = arith.constant 1 : index
    %424 = vector.load %arg2[%c0_352, %c0_353, %c2_354, %c1_355] : memref<1x4x4x9xf32, #tpu.memory_space<vmem>>, vector<1x1x1x1xf32>
    %425 = vector.shape_cast %424 : vector<1x1x1x1xf32> to vector<1x1xf32>
    %426 = vector.broadcast %425 : vector<1x1xf32> to vector<1x178xf32>
    %427 = arith.mulf %423, %426 : vector<1x178xf32>
    %428 = arith.addf %406, %427 : vector<1x178xf32>
    %c0_356 = arith.constant 0 : index
    %c1_357 = arith.constant 1 : index
    %c2_358 = arith.constant 2 : index
    %c1_359 = arith.constant 1 : index
    %429 = vector.load %arg2[%c0_356, %c1_357, %c2_358, %c1_359] : memref<1x4x4x9xf32, #tpu.memory_space<vmem>>, vector<1x1x1x1xf32>
    %430 = vector.shape_cast %429 : vector<1x1x1x1xf32> to vector<1x1xf32>
    %431 = vector.broadcast %430 : vector<1x1xf32> to vector<1x178xf32>
    %432 = arith.mulf %423, %431 : vector<1x178xf32>
    %433 = arith.addf %411, %432 : vector<1x178xf32>
    %c0_360 = arith.constant 0 : index
    %c2_361 = arith.constant 2 : index
    %c2_362 = arith.constant 2 : index
    %c1_363 = arith.constant 1 : index
    %434 = vector.load %arg2[%c0_360, %c2_361, %c2_362, %c1_363] : memref<1x4x4x9xf32, #tpu.memory_space<vmem>>, vector<1x1x1x1xf32>
    %435 = vector.shape_cast %434 : vector<1x1x1x1xf32> to vector<1x1xf32>
    %436 = vector.broadcast %435 : vector<1x1xf32> to vector<1x178xf32>
    %437 = arith.mulf %423, %436 : vector<1x178xf32>
    %438 = arith.addf %416, %437 : vector<1x178xf32>
    %c0_364 = arith.constant 0 : index
    %c3_365 = arith.constant 3 : index
    %c2_366 = arith.constant 2 : index
    %c1_367 = arith.constant 1 : index
    %439 = vector.load %arg2[%c0_364, %c3_365, %c2_366, %c1_367] : memref<1x4x4x9xf32, #tpu.memory_space<vmem>>, vector<1x1x1x1xf32>
    %440 = vector.shape_cast %439 : vector<1x1x1x1xf32> to vector<1x1xf32>
    %441 = vector.broadcast %440 : vector<1x1xf32> to vector<1x178xf32>
    %442 = arith.mulf %423, %441 : vector<1x178xf32>
    %443 = arith.addf %421, %442 : vector<1x178xf32>
    %c0_368 = arith.constant 0 : index
    %c2_369 = arith.constant 2 : index
    %c2_370 = arith.constant 2 : index
    %444 = vector.load %arg1[%c0_368, %c2_369, %c2_370] : memref<1x4x200xf32, #tpu.memory_space<vmem>>, vector<1x1x178xf32>
    %445 = vector.shape_cast %444 : vector<1x1x178xf32> to vector<1x178xf32>
    %c0_371 = arith.constant 0 : index
    %c0_372 = arith.constant 0 : index
    %c2_373 = arith.constant 2 : index
    %c2_374 = arith.constant 2 : index
    %446 = vector.load %arg2[%c0_371, %c0_372, %c2_373, %c2_374] : memref<1x4x4x9xf32, #tpu.memory_space<vmem>>, vector<1x1x1x1xf32>
    %447 = vector.shape_cast %446 : vector<1x1x1x1xf32> to vector<1x1xf32>
    %448 = vector.broadcast %447 : vector<1x1xf32> to vector<1x178xf32>
    %449 = arith.mulf %445, %448 : vector<1x178xf32>
    %450 = arith.addf %428, %449 : vector<1x178xf32>
    %c0_375 = arith.constant 0 : index
    %c1_376 = arith.constant 1 : index
    %c2_377 = arith.constant 2 : index
    %c2_378 = arith.constant 2 : index
    %451 = vector.load %arg2[%c0_375, %c1_376, %c2_377, %c2_378] : memref<1x4x4x9xf32, #tpu.memory_space<vmem>>, vector<1x1x1x1xf32>
    %452 = vector.shape_cast %451 : vector<1x1x1x1xf32> to vector<1x1xf32>
    %453 = vector.broadcast %452 : vector<1x1xf32> to vector<1x178xf32>
    %454 = arith.mulf %445, %453 : vector<1x178xf32>
    %455 = arith.addf %433, %454 : vector<1x178xf32>
    %c0_379 = arith.constant 0 : index
    %c2_380 = arith.constant 2 : index
    %c2_381 = arith.constant 2 : index
    %c2_382 = arith.constant 2 : index
    %456 = vector.load %arg2[%c0_379, %c2_380, %c2_381, %c2_382] : memref<1x4x4x9xf32, #tpu.memory_space<vmem>>, vector<1x1x1x1xf32>
    %457 = vector.shape_cast %456 : vector<1x1x1x1xf32> to vector<1x1xf32>
    %458 = vector.broadcast %457 : vector<1x1xf32> to vector<1x178xf32>
    %459 = arith.mulf %445, %458 : vector<1x178xf32>
    %460 = arith.addf %438, %459 : vector<1x178xf32>
    %c0_383 = arith.constant 0 : index
    %c3_384 = arith.constant 3 : index
    %c2_385 = arith.constant 2 : index
    %c2_386 = arith.constant 2 : index
    %461 = vector.load %arg2[%c0_383, %c3_384, %c2_385, %c2_386] : memref<1x4x4x9xf32, #tpu.memory_space<vmem>>, vector<1x1x1x1xf32>
    %462 = vector.shape_cast %461 : vector<1x1x1x1xf32> to vector<1x1xf32>
    %463 = vector.broadcast %462 : vector<1x1xf32> to vector<1x178xf32>
    %464 = arith.mulf %445, %463 : vector<1x178xf32>
    %465 = arith.addf %443, %464 : vector<1x178xf32>
    %c0_387 = arith.constant 0 : index
    %c2_388 = arith.constant 2 : index
    %c10_389 = arith.constant 10 : index
    %466 = vector.load %arg1[%c0_387, %c2_388, %c10_389] : memref<1x4x200xf32, #tpu.memory_space<vmem>>, vector<1x1x178xf32>
    %467 = vector.shape_cast %466 : vector<1x1x178xf32> to vector<1x178xf32>
    %c0_390 = arith.constant 0 : index
    %c0_391 = arith.constant 0 : index
    %c2_392 = arith.constant 2 : index
    %c3_393 = arith.constant 3 : index
    %468 = vector.load %arg2[%c0_390, %c0_391, %c2_392, %c3_393] : memref<1x4x4x9xf32, #tpu.memory_space<vmem>>, vector<1x1x1x1xf32>
    %469 = vector.shape_cast %468 : vector<1x1x1x1xf32> to vector<1x1xf32>
    %470 = vector.broadcast %469 : vector<1x1xf32> to vector<1x178xf32>
    %471 = arith.mulf %467, %470 : vector<1x178xf32>
    %472 = arith.addf %450, %471 : vector<1x178xf32>
    %c0_394 = arith.constant 0 : index
    %c1_395 = arith.constant 1 : index
    %c2_396 = arith.constant 2 : index
    %c3_397 = arith.constant 3 : index
    %473 = vector.load %arg2[%c0_394, %c1_395, %c2_396, %c3_397] : memref<1x4x4x9xf32, #tpu.memory_space<vmem>>, vector<1x1x1x1xf32>
    %474 = vector.shape_cast %473 : vector<1x1x1x1xf32> to vector<1x1xf32>
    %475 = vector.broadcast %474 : vector<1x1xf32> to vector<1x178xf32>
    %476 = arith.mulf %467, %475 : vector<1x178xf32>
    %477 = arith.addf %455, %476 : vector<1x178xf32>
    %c0_398 = arith.constant 0 : index
    %c2_399 = arith.constant 2 : index
    %c2_400 = arith.constant 2 : index
    %c3_401 = arith.constant 3 : index
    %478 = vector.load %arg2[%c0_398, %c2_399, %c2_400, %c3_401] : memref<1x4x4x9xf32, #tpu.memory_space<vmem>>, vector<1x1x1x1xf32>
    %479 = vector.shape_cast %478 : vector<1x1x1x1xf32> to vector<1x1xf32>
    %480 = vector.broadcast %479 : vector<1x1xf32> to vector<1x178xf32>
    %481 = arith.mulf %467, %480 : vector<1x178xf32>
    %482 = arith.addf %460, %481 : vector<1x178xf32>
    %c0_402 = arith.constant 0 : index
    %c3_403 = arith.constant 3 : index
    %c2_404 = arith.constant 2 : index
    %c3_405 = arith.constant 3 : index
    %483 = vector.load %arg2[%c0_402, %c3_403, %c2_404, %c3_405] : memref<1x4x4x9xf32, #tpu.memory_space<vmem>>, vector<1x1x1x1xf32>
    %484 = vector.shape_cast %483 : vector<1x1x1x1xf32> to vector<1x1xf32>
    %485 = vector.broadcast %484 : vector<1x1xf32> to vector<1x178xf32>
    %486 = arith.mulf %467, %485 : vector<1x178xf32>
    %487 = arith.addf %465, %486 : vector<1x178xf32>
    %c0_406 = arith.constant 0 : index
    %c2_407 = arith.constant 2 : index
    %c11_408 = arith.constant 11 : index
    %488 = vector.load %arg1[%c0_406, %c2_407, %c11_408] : memref<1x4x200xf32, #tpu.memory_space<vmem>>, vector<1x1x178xf32>
    %489 = vector.shape_cast %488 : vector<1x1x178xf32> to vector<1x178xf32>
    %c0_409 = arith.constant 0 : index
    %c0_410 = arith.constant 0 : index
    %c2_411 = arith.constant 2 : index
    %c4_412 = arith.constant 4 : index
    %490 = vector.load %arg2[%c0_409, %c0_410, %c2_411, %c4_412] : memref<1x4x4x9xf32, #tpu.memory_space<vmem>>, vector<1x1x1x1xf32>
    %491 = vector.shape_cast %490 : vector<1x1x1x1xf32> to vector<1x1xf32>
    %492 = vector.broadcast %491 : vector<1x1xf32> to vector<1x178xf32>
    %493 = arith.mulf %489, %492 : vector<1x178xf32>
    %494 = arith.addf %472, %493 : vector<1x178xf32>
    %c0_413 = arith.constant 0 : index
    %c1_414 = arith.constant 1 : index
    %c2_415 = arith.constant 2 : index
    %c4_416 = arith.constant 4 : index
    %495 = vector.load %arg2[%c0_413, %c1_414, %c2_415, %c4_416] : memref<1x4x4x9xf32, #tpu.memory_space<vmem>>, vector<1x1x1x1xf32>
    %496 = vector.shape_cast %495 : vector<1x1x1x1xf32> to vector<1x1xf32>
    %497 = vector.broadcast %496 : vector<1x1xf32> to vector<1x178xf32>
    %498 = arith.mulf %489, %497 : vector<1x178xf32>
    %499 = arith.addf %477, %498 : vector<1x178xf32>
    %c0_417 = arith.constant 0 : index
    %c2_418 = arith.constant 2 : index
    %c2_419 = arith.constant 2 : index
    %c4_420 = arith.constant 4 : index
    %500 = vector.load %arg2[%c0_417, %c2_418, %c2_419, %c4_420] : memref<1x4x4x9xf32, #tpu.memory_space<vmem>>, vector<1x1x1x1xf32>
    %501 = vector.shape_cast %500 : vector<1x1x1x1xf32> to vector<1x1xf32>
    %502 = vector.broadcast %501 : vector<1x1xf32> to vector<1x178xf32>
    %503 = arith.mulf %489, %502 : vector<1x178xf32>
    %504 = arith.addf %482, %503 : vector<1x178xf32>
    %c0_421 = arith.constant 0 : index
    %c3_422 = arith.constant 3 : index
    %c2_423 = arith.constant 2 : index
    %c4_424 = arith.constant 4 : index
    %505 = vector.load %arg2[%c0_421, %c3_422, %c2_423, %c4_424] : memref<1x4x4x9xf32, #tpu.memory_space<vmem>>, vector<1x1x1x1xf32>
    %506 = vector.shape_cast %505 : vector<1x1x1x1xf32> to vector<1x1xf32>
    %507 = vector.broadcast %506 : vector<1x1xf32> to vector<1x178xf32>
    %508 = arith.mulf %489, %507 : vector<1x178xf32>
    %509 = arith.addf %487, %508 : vector<1x178xf32>
    %c0_425 = arith.constant 0 : index
    %c2_426 = arith.constant 2 : index
    %c12_427 = arith.constant 12 : index
    %510 = vector.load %arg1[%c0_425, %c2_426, %c12_427] : memref<1x4x200xf32, #tpu.memory_space<vmem>>, vector<1x1x178xf32>
    %511 = vector.shape_cast %510 : vector<1x1x178xf32> to vector<1x178xf32>
    %c0_428 = arith.constant 0 : index
    %c0_429 = arith.constant 0 : index
    %c2_430 = arith.constant 2 : index
    %c5_431 = arith.constant 5 : index
    %512 = vector.load %arg2[%c0_428, %c0_429, %c2_430, %c5_431] : memref<1x4x4x9xf32, #tpu.memory_space<vmem>>, vector<1x1x1x1xf32>
    %513 = vector.shape_cast %512 : vector<1x1x1x1xf32> to vector<1x1xf32>
    %514 = vector.broadcast %513 : vector<1x1xf32> to vector<1x178xf32>
    %515 = arith.mulf %511, %514 : vector<1x178xf32>
    %516 = arith.addf %494, %515 : vector<1x178xf32>
    %c0_432 = arith.constant 0 : index
    %c1_433 = arith.constant 1 : index
    %c2_434 = arith.constant 2 : index
    %c5_435 = arith.constant 5 : index
    %517 = vector.load %arg2[%c0_432, %c1_433, %c2_434, %c5_435] : memref<1x4x4x9xf32, #tpu.memory_space<vmem>>, vector<1x1x1x1xf32>
    %518 = vector.shape_cast %517 : vector<1x1x1x1xf32> to vector<1x1xf32>
    %519 = vector.broadcast %518 : vector<1x1xf32> to vector<1x178xf32>
    %520 = arith.mulf %511, %519 : vector<1x178xf32>
    %521 = arith.addf %499, %520 : vector<1x178xf32>
    %c0_436 = arith.constant 0 : index
    %c2_437 = arith.constant 2 : index
    %c2_438 = arith.constant 2 : index
    %c5_439 = arith.constant 5 : index
    %522 = vector.load %arg2[%c0_436, %c2_437, %c2_438, %c5_439] : memref<1x4x4x9xf32, #tpu.memory_space<vmem>>, vector<1x1x1x1xf32>
    %523 = vector.shape_cast %522 : vector<1x1x1x1xf32> to vector<1x1xf32>
    %524 = vector.broadcast %523 : vector<1x1xf32> to vector<1x178xf32>
    %525 = arith.mulf %511, %524 : vector<1x178xf32>
    %526 = arith.addf %504, %525 : vector<1x178xf32>
    %c0_440 = arith.constant 0 : index
    %c3_441 = arith.constant 3 : index
    %c2_442 = arith.constant 2 : index
    %c5_443 = arith.constant 5 : index
    %527 = vector.load %arg2[%c0_440, %c3_441, %c2_442, %c5_443] : memref<1x4x4x9xf32, #tpu.memory_space<vmem>>, vector<1x1x1x1xf32>
    %528 = vector.shape_cast %527 : vector<1x1x1x1xf32> to vector<1x1xf32>
    %529 = vector.broadcast %528 : vector<1x1xf32> to vector<1x178xf32>
    %530 = arith.mulf %511, %529 : vector<1x178xf32>
    %531 = arith.addf %509, %530 : vector<1x178xf32>
    %c0_444 = arith.constant 0 : index
    %c2_445 = arith.constant 2 : index
    %c20_446 = arith.constant 20 : index
    %532 = vector.load %arg1[%c0_444, %c2_445, %c20_446] : memref<1x4x200xf32, #tpu.memory_space<vmem>>, vector<1x1x178xf32>
    %533 = vector.shape_cast %532 : vector<1x1x178xf32> to vector<1x178xf32>
    %c0_447 = arith.constant 0 : index
    %c0_448 = arith.constant 0 : index
    %c2_449 = arith.constant 2 : index
    %c6_450 = arith.constant 6 : index
    %534 = vector.load %arg2[%c0_447, %c0_448, %c2_449, %c6_450] : memref<1x4x4x9xf32, #tpu.memory_space<vmem>>, vector<1x1x1x1xf32>
    %535 = vector.shape_cast %534 : vector<1x1x1x1xf32> to vector<1x1xf32>
    %536 = vector.broadcast %535 : vector<1x1xf32> to vector<1x178xf32>
    %537 = arith.mulf %533, %536 : vector<1x178xf32>
    %538 = arith.addf %516, %537 : vector<1x178xf32>
    %c0_451 = arith.constant 0 : index
    %c1_452 = arith.constant 1 : index
    %c2_453 = arith.constant 2 : index
    %c6_454 = arith.constant 6 : index
    %539 = vector.load %arg2[%c0_451, %c1_452, %c2_453, %c6_454] : memref<1x4x4x9xf32, #tpu.memory_space<vmem>>, vector<1x1x1x1xf32>
    %540 = vector.shape_cast %539 : vector<1x1x1x1xf32> to vector<1x1xf32>
    %541 = vector.broadcast %540 : vector<1x1xf32> to vector<1x178xf32>
    %542 = arith.mulf %533, %541 : vector<1x178xf32>
    %543 = arith.addf %521, %542 : vector<1x178xf32>
    %c0_455 = arith.constant 0 : index
    %c2_456 = arith.constant 2 : index
    %c2_457 = arith.constant 2 : index
    %c6_458 = arith.constant 6 : index
    %544 = vector.load %arg2[%c0_455, %c2_456, %c2_457, %c6_458] : memref<1x4x4x9xf32, #tpu.memory_space<vmem>>, vector<1x1x1x1xf32>
    %545 = vector.shape_cast %544 : vector<1x1x1x1xf32> to vector<1x1xf32>
    %546 = vector.broadcast %545 : vector<1x1xf32> to vector<1x178xf32>
    %547 = arith.mulf %533, %546 : vector<1x178xf32>
    %548 = arith.addf %526, %547 : vector<1x178xf32>
    %c0_459 = arith.constant 0 : index
    %c3_460 = arith.constant 3 : index
    %c2_461 = arith.constant 2 : index
    %c6_462 = arith.constant 6 : index
    %549 = vector.load %arg2[%c0_459, %c3_460, %c2_461, %c6_462] : memref<1x4x4x9xf32, #tpu.memory_space<vmem>>, vector<1x1x1x1xf32>
    %550 = vector.shape_cast %549 : vector<1x1x1x1xf32> to vector<1x1xf32>
    %551 = vector.broadcast %550 : vector<1x1xf32> to vector<1x178xf32>
    %552 = arith.mulf %533, %551 : vector<1x178xf32>
    %553 = arith.addf %531, %552 : vector<1x178xf32>
    %c0_463 = arith.constant 0 : index
    %c2_464 = arith.constant 2 : index
    %c21_465 = arith.constant 21 : index
    %554 = vector.load %arg1[%c0_463, %c2_464, %c21_465] : memref<1x4x200xf32, #tpu.memory_space<vmem>>, vector<1x1x178xf32>
    %555 = vector.shape_cast %554 : vector<1x1x178xf32> to vector<1x178xf32>
    %c0_466 = arith.constant 0 : index
    %c0_467 = arith.constant 0 : index
    %c2_468 = arith.constant 2 : index
    %c7_469 = arith.constant 7 : index
    %556 = vector.load %arg2[%c0_466, %c0_467, %c2_468, %c7_469] : memref<1x4x4x9xf32, #tpu.memory_space<vmem>>, vector<1x1x1x1xf32>
    %557 = vector.shape_cast %556 : vector<1x1x1x1xf32> to vector<1x1xf32>
    %558 = vector.broadcast %557 : vector<1x1xf32> to vector<1x178xf32>
    %559 = arith.mulf %555, %558 : vector<1x178xf32>
    %560 = arith.addf %538, %559 : vector<1x178xf32>
    %c0_470 = arith.constant 0 : index
    %c1_471 = arith.constant 1 : index
    %c2_472 = arith.constant 2 : index
    %c7_473 = arith.constant 7 : index
    %561 = vector.load %arg2[%c0_470, %c1_471, %c2_472, %c7_473] : memref<1x4x4x9xf32, #tpu.memory_space<vmem>>, vector<1x1x1x1xf32>
    %562 = vector.shape_cast %561 : vector<1x1x1x1xf32> to vector<1x1xf32>
    %563 = vector.broadcast %562 : vector<1x1xf32> to vector<1x178xf32>
    %564 = arith.mulf %555, %563 : vector<1x178xf32>
    %565 = arith.addf %543, %564 : vector<1x178xf32>
    %c0_474 = arith.constant 0 : index
    %c2_475 = arith.constant 2 : index
    %c2_476 = arith.constant 2 : index
    %c7_477 = arith.constant 7 : index
    %566 = vector.load %arg2[%c0_474, %c2_475, %c2_476, %c7_477] : memref<1x4x4x9xf32, #tpu.memory_space<vmem>>, vector<1x1x1x1xf32>
    %567 = vector.shape_cast %566 : vector<1x1x1x1xf32> to vector<1x1xf32>
    %568 = vector.broadcast %567 : vector<1x1xf32> to vector<1x178xf32>
    %569 = arith.mulf %555, %568 : vector<1x178xf32>
    %570 = arith.addf %548, %569 : vector<1x178xf32>
    %c0_478 = arith.constant 0 : index
    %c3_479 = arith.constant 3 : index
    %c2_480 = arith.constant 2 : index
    %c7_481 = arith.constant 7 : index
    %571 = vector.load %arg2[%c0_478, %c3_479, %c2_480, %c7_481] : memref<1x4x4x9xf32, #tpu.memory_space<vmem>>, vector<1x1x1x1xf32>
    %572 = vector.shape_cast %571 : vector<1x1x1x1xf32> to vector<1x1xf32>
    %573 = vector.broadcast %572 : vector<1x1xf32> to vector<1x178xf32>
    %574 = arith.mulf %555, %573 : vector<1x178xf32>
    %575 = arith.addf %553, %574 : vector<1x178xf32>
    %c0_482 = arith.constant 0 : index
    %c2_483 = arith.constant 2 : index
    %c22_484 = arith.constant 22 : index
    %576 = vector.load %arg1[%c0_482, %c2_483, %c22_484] : memref<1x4x200xf32, #tpu.memory_space<vmem>>, vector<1x1x178xf32>
    %577 = vector.shape_cast %576 : vector<1x1x178xf32> to vector<1x178xf32>
    %c0_485 = arith.constant 0 : index
    %c0_486 = arith.constant 0 : index
    %c2_487 = arith.constant 2 : index
    %c8_488 = arith.constant 8 : index
    %578 = vector.load %arg2[%c0_485, %c0_486, %c2_487, %c8_488] : memref<1x4x4x9xf32, #tpu.memory_space<vmem>>, vector<1x1x1x1xf32>
    %579 = vector.shape_cast %578 : vector<1x1x1x1xf32> to vector<1x1xf32>
    %580 = vector.broadcast %579 : vector<1x1xf32> to vector<1x178xf32>
    %581 = arith.mulf %577, %580 : vector<1x178xf32>
    %582 = arith.addf %560, %581 : vector<1x178xf32>
    %c0_489 = arith.constant 0 : index
    %c1_490 = arith.constant 1 : index
    %c2_491 = arith.constant 2 : index
    %c8_492 = arith.constant 8 : index
    %583 = vector.load %arg2[%c0_489, %c1_490, %c2_491, %c8_492] : memref<1x4x4x9xf32, #tpu.memory_space<vmem>>, vector<1x1x1x1xf32>
    %584 = vector.shape_cast %583 : vector<1x1x1x1xf32> to vector<1x1xf32>
    %585 = vector.broadcast %584 : vector<1x1xf32> to vector<1x178xf32>
    %586 = arith.mulf %577, %585 : vector<1x178xf32>
    %587 = arith.addf %565, %586 : vector<1x178xf32>
    %c0_493 = arith.constant 0 : index
    %c2_494 = arith.constant 2 : index
    %c2_495 = arith.constant 2 : index
    %c8_496 = arith.constant 8 : index
    %588 = vector.load %arg2[%c0_493, %c2_494, %c2_495, %c8_496] : memref<1x4x4x9xf32, #tpu.memory_space<vmem>>, vector<1x1x1x1xf32>
    %589 = vector.shape_cast %588 : vector<1x1x1x1xf32> to vector<1x1xf32>
    %590 = vector.broadcast %589 : vector<1x1xf32> to vector<1x178xf32>
    %591 = arith.mulf %577, %590 : vector<1x178xf32>
    %592 = arith.addf %570, %591 : vector<1x178xf32>
    %c0_497 = arith.constant 0 : index
    %c3_498 = arith.constant 3 : index
    %c2_499 = arith.constant 2 : index
    %c8_500 = arith.constant 8 : index
    %593 = vector.load %arg2[%c0_497, %c3_498, %c2_499, %c8_500] : memref<1x4x4x9xf32, #tpu.memory_space<vmem>>, vector<1x1x1x1xf32>
    %594 = vector.shape_cast %593 : vector<1x1x1x1xf32> to vector<1x1xf32>
    %595 = vector.broadcast %594 : vector<1x1xf32> to vector<1x178xf32>
    %596 = arith.mulf %577, %595 : vector<1x178xf32>
    %597 = arith.addf %575, %596 : vector<1x178xf32>
    %c0_501 = arith.constant 0 : index
    %c3_502 = arith.constant 3 : index
    %c0_503 = arith.constant 0 : index
    %598 = vector.load %arg1[%c0_501, %c3_502, %c0_503] : memref<1x4x200xf32, #tpu.memory_space<vmem>>, vector<1x1x178xf32>
    %599 = vector.shape_cast %598 : vector<1x1x178xf32> to vector<1x178xf32>
    %c0_504 = arith.constant 0 : index
    %c0_505 = arith.constant 0 : index
    %c3_506 = arith.constant 3 : index
    %c0_507 = arith.constant 0 : index
    %600 = vector.load %arg2[%c0_504, %c0_505, %c3_506, %c0_507] : memref<1x4x4x9xf32, #tpu.memory_space<vmem>>, vector<1x1x1x1xf32>
    %601 = vector.shape_cast %600 : vector<1x1x1x1xf32> to vector<1x1xf32>
    %602 = vector.broadcast %601 : vector<1x1xf32> to vector<1x178xf32>
    %603 = arith.mulf %599, %602 : vector<1x178xf32>
    %604 = arith.addf %582, %603 : vector<1x178xf32>
    %c0_508 = arith.constant 0 : index
    %c1_509 = arith.constant 1 : index
    %c3_510 = arith.constant 3 : index
    %c0_511 = arith.constant 0 : index
    %605 = vector.load %arg2[%c0_508, %c1_509, %c3_510, %c0_511] : memref<1x4x4x9xf32, #tpu.memory_space<vmem>>, vector<1x1x1x1xf32>
    %606 = vector.shape_cast %605 : vector<1x1x1x1xf32> to vector<1x1xf32>
    %607 = vector.broadcast %606 : vector<1x1xf32> to vector<1x178xf32>
    %608 = arith.mulf %599, %607 : vector<1x178xf32>
    %609 = arith.addf %587, %608 : vector<1x178xf32>
    %c0_512 = arith.constant 0 : index
    %c2_513 = arith.constant 2 : index
    %c3_514 = arith.constant 3 : index
    %c0_515 = arith.constant 0 : index
    %610 = vector.load %arg2[%c0_512, %c2_513, %c3_514, %c0_515] : memref<1x4x4x9xf32, #tpu.memory_space<vmem>>, vector<1x1x1x1xf32>
    %611 = vector.shape_cast %610 : vector<1x1x1x1xf32> to vector<1x1xf32>
    %612 = vector.broadcast %611 : vector<1x1xf32> to vector<1x178xf32>
    %613 = arith.mulf %599, %612 : vector<1x178xf32>
    %614 = arith.addf %592, %613 : vector<1x178xf32>
    %c0_516 = arith.constant 0 : index
    %c3_517 = arith.constant 3 : index
    %c3_518 = arith.constant 3 : index
    %c0_519 = arith.constant 0 : index
    %615 = vector.load %arg2[%c0_516, %c3_517, %c3_518, %c0_519] : memref<1x4x4x9xf32, #tpu.memory_space<vmem>>, vector<1x1x1x1xf32>
    %616 = vector.shape_cast %615 : vector<1x1x1x1xf32> to vector<1x1xf32>
    %617 = vector.broadcast %616 : vector<1x1xf32> to vector<1x178xf32>
    %618 = arith.mulf %599, %617 : vector<1x178xf32>
    %619 = arith.addf %597, %618 : vector<1x178xf32>
    %c0_520 = arith.constant 0 : index
    %c3_521 = arith.constant 3 : index
    %c1_522 = arith.constant 1 : index
    %620 = vector.load %arg1[%c0_520, %c3_521, %c1_522] : memref<1x4x200xf32, #tpu.memory_space<vmem>>, vector<1x1x178xf32>
    %621 = vector.shape_cast %620 : vector<1x1x178xf32> to vector<1x178xf32>
    %c0_523 = arith.constant 0 : index
    %c0_524 = arith.constant 0 : index
    %c3_525 = arith.constant 3 : index
    %c1_526 = arith.constant 1 : index
    %622 = vector.load %arg2[%c0_523, %c0_524, %c3_525, %c1_526] : memref<1x4x4x9xf32, #tpu.memory_space<vmem>>, vector<1x1x1x1xf32>
    %623 = vector.shape_cast %622 : vector<1x1x1x1xf32> to vector<1x1xf32>
    %624 = vector.broadcast %623 : vector<1x1xf32> to vector<1x178xf32>
    %625 = arith.mulf %621, %624 : vector<1x178xf32>
    %626 = arith.addf %604, %625 : vector<1x178xf32>
    %c0_527 = arith.constant 0 : index
    %c1_528 = arith.constant 1 : index
    %c3_529 = arith.constant 3 : index
    %c1_530 = arith.constant 1 : index
    %627 = vector.load %arg2[%c0_527, %c1_528, %c3_529, %c1_530] : memref<1x4x4x9xf32, #tpu.memory_space<vmem>>, vector<1x1x1x1xf32>
    %628 = vector.shape_cast %627 : vector<1x1x1x1xf32> to vector<1x1xf32>
    %629 = vector.broadcast %628 : vector<1x1xf32> to vector<1x178xf32>
    %630 = arith.mulf %621, %629 : vector<1x178xf32>
    %631 = arith.addf %609, %630 : vector<1x178xf32>
    %c0_531 = arith.constant 0 : index
    %c2_532 = arith.constant 2 : index
    %c3_533 = arith.constant 3 : index
    %c1_534 = arith.constant 1 : index
    %632 = vector.load %arg2[%c0_531, %c2_532, %c3_533, %c1_534] : memref<1x4x4x9xf32, #tpu.memory_space<vmem>>, vector<1x1x1x1xf32>
    %633 = vector.shape_cast %632 : vector<1x1x1x1xf32> to vector<1x1xf32>
    %634 = vector.broadcast %633 : vector<1x1xf32> to vector<1x178xf32>
    %635 = arith.mulf %621, %634 : vector<1x178xf32>
    %636 = arith.addf %614, %635 : vector<1x178xf32>
    %c0_535 = arith.constant 0 : index
    %c3_536 = arith.constant 3 : index
    %c3_537 = arith.constant 3 : index
    %c1_538 = arith.constant 1 : index
    %637 = vector.load %arg2[%c0_535, %c3_536, %c3_537, %c1_538] : memref<1x4x4x9xf32, #tpu.memory_space<vmem>>, vector<1x1x1x1xf32>
    %638 = vector.shape_cast %637 : vector<1x1x1x1xf32> to vector<1x1xf32>
    %639 = vector.broadcast %638 : vector<1x1xf32> to vector<1x178xf32>
    %640 = arith.mulf %621, %639 : vector<1x178xf32>
    %641 = arith.addf %619, %640 : vector<1x178xf32>
    %c0_539 = arith.constant 0 : index
    %c3_540 = arith.constant 3 : index
    %c2_541 = arith.constant 2 : index
    %642 = vector.load %arg1[%c0_539, %c3_540, %c2_541] : memref<1x4x200xf32, #tpu.memory_space<vmem>>, vector<1x1x178xf32>
    %643 = vector.shape_cast %642 : vector<1x1x178xf32> to vector<1x178xf32>
    %c0_542 = arith.constant 0 : index
    %c0_543 = arith.constant 0 : index
    %c3_544 = arith.constant 3 : index
    %c2_545 = arith.constant 2 : index
    %644 = vector.load %arg2[%c0_542, %c0_543, %c3_544, %c2_545] : memref<1x4x4x9xf32, #tpu.memory_space<vmem>>, vector<1x1x1x1xf32>
    %645 = vector.shape_cast %644 : vector<1x1x1x1xf32> to vector<1x1xf32>
    %646 = vector.broadcast %645 : vector<1x1xf32> to vector<1x178xf32>
    %647 = arith.mulf %643, %646 : vector<1x178xf32>
    %648 = arith.addf %626, %647 : vector<1x178xf32>
    %c0_546 = arith.constant 0 : index
    %c1_547 = arith.constant 1 : index
    %c3_548 = arith.constant 3 : index
    %c2_549 = arith.constant 2 : index
    %649 = vector.load %arg2[%c0_546, %c1_547, %c3_548, %c2_549] : memref<1x4x4x9xf32, #tpu.memory_space<vmem>>, vector<1x1x1x1xf32>
    %650 = vector.shape_cast %649 : vector<1x1x1x1xf32> to vector<1x1xf32>
    %651 = vector.broadcast %650 : vector<1x1xf32> to vector<1x178xf32>
    %652 = arith.mulf %643, %651 : vector<1x178xf32>
    %653 = arith.addf %631, %652 : vector<1x178xf32>
    %c0_550 = arith.constant 0 : index
    %c2_551 = arith.constant 2 : index
    %c3_552 = arith.constant 3 : index
    %c2_553 = arith.constant 2 : index
    %654 = vector.load %arg2[%c0_550, %c2_551, %c3_552, %c2_553] : memref<1x4x4x9xf32, #tpu.memory_space<vmem>>, vector<1x1x1x1xf32>
    %655 = vector.shape_cast %654 : vector<1x1x1x1xf32> to vector<1x1xf32>
    %656 = vector.broadcast %655 : vector<1x1xf32> to vector<1x178xf32>
    %657 = arith.mulf %643, %656 : vector<1x178xf32>
    %658 = arith.addf %636, %657 : vector<1x178xf32>
    %c0_554 = arith.constant 0 : index
    %c3_555 = arith.constant 3 : index
    %c3_556 = arith.constant 3 : index
    %c2_557 = arith.constant 2 : index
    %659 = vector.load %arg2[%c0_554, %c3_555, %c3_556, %c2_557] : memref<1x4x4x9xf32, #tpu.memory_space<vmem>>, vector<1x1x1x1xf32>
    %660 = vector.shape_cast %659 : vector<1x1x1x1xf32> to vector<1x1xf32>
    %661 = vector.broadcast %660 : vector<1x1xf32> to vector<1x178xf32>
    %662 = arith.mulf %643, %661 : vector<1x178xf32>
    %663 = arith.addf %641, %662 : vector<1x178xf32>
    %c0_558 = arith.constant 0 : index
    %c3_559 = arith.constant 3 : index
    %c10_560 = arith.constant 10 : index
    %664 = vector.load %arg1[%c0_558, %c3_559, %c10_560] : memref<1x4x200xf32, #tpu.memory_space<vmem>>, vector<1x1x178xf32>
    %665 = vector.shape_cast %664 : vector<1x1x178xf32> to vector<1x178xf32>
    %c0_561 = arith.constant 0 : index
    %c0_562 = arith.constant 0 : index
    %c3_563 = arith.constant 3 : index
    %c3_564 = arith.constant 3 : index
    %666 = vector.load %arg2[%c0_561, %c0_562, %c3_563, %c3_564] : memref<1x4x4x9xf32, #tpu.memory_space<vmem>>, vector<1x1x1x1xf32>
    %667 = vector.shape_cast %666 : vector<1x1x1x1xf32> to vector<1x1xf32>
    %668 = vector.broadcast %667 : vector<1x1xf32> to vector<1x178xf32>
    %669 = arith.mulf %665, %668 : vector<1x178xf32>
    %670 = arith.addf %648, %669 : vector<1x178xf32>
    %c0_565 = arith.constant 0 : index
    %c1_566 = arith.constant 1 : index
    %c3_567 = arith.constant 3 : index
    %c3_568 = arith.constant 3 : index
    %671 = vector.load %arg2[%c0_565, %c1_566, %c3_567, %c3_568] : memref<1x4x4x9xf32, #tpu.memory_space<vmem>>, vector<1x1x1x1xf32>
    %672 = vector.shape_cast %671 : vector<1x1x1x1xf32> to vector<1x1xf32>
    %673 = vector.broadcast %672 : vector<1x1xf32> to vector<1x178xf32>
    %674 = arith.mulf %665, %673 : vector<1x178xf32>
    %675 = arith.addf %653, %674 : vector<1x178xf32>
    %c0_569 = arith.constant 0 : index
    %c2_570 = arith.constant 2 : index
    %c3_571 = arith.constant 3 : index
    %c3_572 = arith.constant 3 : index
    %676 = vector.load %arg2[%c0_569, %c2_570, %c3_571, %c3_572] : memref<1x4x4x9xf32, #tpu.memory_space<vmem>>, vector<1x1x1x1xf32>
    %677 = vector.shape_cast %676 : vector<1x1x1x1xf32> to vector<1x1xf32>
    %678 = vector.broadcast %677 : vector<1x1xf32> to vector<1x178xf32>
    %679 = arith.mulf %665, %678 : vector<1x178xf32>
    %680 = arith.addf %658, %679 : vector<1x178xf32>
    %c0_573 = arith.constant 0 : index
    %c3_574 = arith.constant 3 : index
    %c3_575 = arith.constant 3 : index
    %c3_576 = arith.constant 3 : index
    %681 = vector.load %arg2[%c0_573, %c3_574, %c3_575, %c3_576] : memref<1x4x4x9xf32, #tpu.memory_space<vmem>>, vector<1x1x1x1xf32>
    %682 = vector.shape_cast %681 : vector<1x1x1x1xf32> to vector<1x1xf32>
    %683 = vector.broadcast %682 : vector<1x1xf32> to vector<1x178xf32>
    %684 = arith.mulf %665, %683 : vector<1x178xf32>
    %685 = arith.addf %663, %684 : vector<1x178xf32>
    %c0_577 = arith.constant 0 : index
    %c3_578 = arith.constant 3 : index
    %c11_579 = arith.constant 11 : index
    %686 = vector.load %arg1[%c0_577, %c3_578, %c11_579] : memref<1x4x200xf32, #tpu.memory_space<vmem>>, vector<1x1x178xf32>
    %687 = vector.shape_cast %686 : vector<1x1x178xf32> to vector<1x178xf32>
    %c0_580 = arith.constant 0 : index
    %c0_581 = arith.constant 0 : index
    %c3_582 = arith.constant 3 : index
    %c4_583 = arith.constant 4 : index
    %688 = vector.load %arg2[%c0_580, %c0_581, %c3_582, %c4_583] : memref<1x4x4x9xf32, #tpu.memory_space<vmem>>, vector<1x1x1x1xf32>
    %689 = vector.shape_cast %688 : vector<1x1x1x1xf32> to vector<1x1xf32>
    %690 = vector.broadcast %689 : vector<1x1xf32> to vector<1x178xf32>
    %691 = arith.mulf %687, %690 : vector<1x178xf32>
    %692 = arith.addf %670, %691 : vector<1x178xf32>
    %c0_584 = arith.constant 0 : index
    %c1_585 = arith.constant 1 : index
    %c3_586 = arith.constant 3 : index
    %c4_587 = arith.constant 4 : index
    %693 = vector.load %arg2[%c0_584, %c1_585, %c3_586, %c4_587] : memref<1x4x4x9xf32, #tpu.memory_space<vmem>>, vector<1x1x1x1xf32>
    %694 = vector.shape_cast %693 : vector<1x1x1x1xf32> to vector<1x1xf32>
    %695 = vector.broadcast %694 : vector<1x1xf32> to vector<1x178xf32>
    %696 = arith.mulf %687, %695 : vector<1x178xf32>
    %697 = arith.addf %675, %696 : vector<1x178xf32>
    %c0_588 = arith.constant 0 : index
    %c2_589 = arith.constant 2 : index
    %c3_590 = arith.constant 3 : index
    %c4_591 = arith.constant 4 : index
    %698 = vector.load %arg2[%c0_588, %c2_589, %c3_590, %c4_591] : memref<1x4x4x9xf32, #tpu.memory_space<vmem>>, vector<1x1x1x1xf32>
    %699 = vector.shape_cast %698 : vector<1x1x1x1xf32> to vector<1x1xf32>
    %700 = vector.broadcast %699 : vector<1x1xf32> to vector<1x178xf32>
    %701 = arith.mulf %687, %700 : vector<1x178xf32>
    %702 = arith.addf %680, %701 : vector<1x178xf32>
    %c0_592 = arith.constant 0 : index
    %c3_593 = arith.constant 3 : index
    %c3_594 = arith.constant 3 : index
    %c4_595 = arith.constant 4 : index
    %703 = vector.load %arg2[%c0_592, %c3_593, %c3_594, %c4_595] : memref<1x4x4x9xf32, #tpu.memory_space<vmem>>, vector<1x1x1x1xf32>
    %704 = vector.shape_cast %703 : vector<1x1x1x1xf32> to vector<1x1xf32>
    %705 = vector.broadcast %704 : vector<1x1xf32> to vector<1x178xf32>
    %706 = arith.mulf %687, %705 : vector<1x178xf32>
    %707 = arith.addf %685, %706 : vector<1x178xf32>
    %c0_596 = arith.constant 0 : index
    %c3_597 = arith.constant 3 : index
    %c12_598 = arith.constant 12 : index
    %708 = vector.load %arg1[%c0_596, %c3_597, %c12_598] : memref<1x4x200xf32, #tpu.memory_space<vmem>>, vector<1x1x178xf32>
    %709 = vector.shape_cast %708 : vector<1x1x178xf32> to vector<1x178xf32>
    %c0_599 = arith.constant 0 : index
    %c0_600 = arith.constant 0 : index
    %c3_601 = arith.constant 3 : index
    %c5_602 = arith.constant 5 : index
    %710 = vector.load %arg2[%c0_599, %c0_600, %c3_601, %c5_602] : memref<1x4x4x9xf32, #tpu.memory_space<vmem>>, vector<1x1x1x1xf32>
    %711 = vector.shape_cast %710 : vector<1x1x1x1xf32> to vector<1x1xf32>
    %712 = vector.broadcast %711 : vector<1x1xf32> to vector<1x178xf32>
    %713 = arith.mulf %709, %712 : vector<1x178xf32>
    %714 = arith.addf %692, %713 : vector<1x178xf32>
    %c0_603 = arith.constant 0 : index
    %c1_604 = arith.constant 1 : index
    %c3_605 = arith.constant 3 : index
    %c5_606 = arith.constant 5 : index
    %715 = vector.load %arg2[%c0_603, %c1_604, %c3_605, %c5_606] : memref<1x4x4x9xf32, #tpu.memory_space<vmem>>, vector<1x1x1x1xf32>
    %716 = vector.shape_cast %715 : vector<1x1x1x1xf32> to vector<1x1xf32>
    %717 = vector.broadcast %716 : vector<1x1xf32> to vector<1x178xf32>
    %718 = arith.mulf %709, %717 : vector<1x178xf32>
    %719 = arith.addf %697, %718 : vector<1x178xf32>
    %c0_607 = arith.constant 0 : index
    %c2_608 = arith.constant 2 : index
    %c3_609 = arith.constant 3 : index
    %c5_610 = arith.constant 5 : index
    %720 = vector.load %arg2[%c0_607, %c2_608, %c3_609, %c5_610] : memref<1x4x4x9xf32, #tpu.memory_space<vmem>>, vector<1x1x1x1xf32>
    %721 = vector.shape_cast %720 : vector<1x1x1x1xf32> to vector<1x1xf32>
    %722 = vector.broadcast %721 : vector<1x1xf32> to vector<1x178xf32>
    %723 = arith.mulf %709, %722 : vector<1x178xf32>
    %724 = arith.addf %702, %723 : vector<1x178xf32>
    %c0_611 = arith.constant 0 : index
    %c3_612 = arith.constant 3 : index
    %c3_613 = arith.constant 3 : index
    %c5_614 = arith.constant 5 : index
    %725 = vector.load %arg2[%c0_611, %c3_612, %c3_613, %c5_614] : memref<1x4x4x9xf32, #tpu.memory_space<vmem>>, vector<1x1x1x1xf32>
    %726 = vector.shape_cast %725 : vector<1x1x1x1xf32> to vector<1x1xf32>
    %727 = vector.broadcast %726 : vector<1x1xf32> to vector<1x178xf32>
    %728 = arith.mulf %709, %727 : vector<1x178xf32>
    %729 = arith.addf %707, %728 : vector<1x178xf32>
    %c0_615 = arith.constant 0 : index
    %c3_616 = arith.constant 3 : index
    %c20_617 = arith.constant 20 : index
    %730 = vector.load %arg1[%c0_615, %c3_616, %c20_617] : memref<1x4x200xf32, #tpu.memory_space<vmem>>, vector<1x1x178xf32>
    %731 = vector.shape_cast %730 : vector<1x1x178xf32> to vector<1x178xf32>
    %c0_618 = arith.constant 0 : index
    %c0_619 = arith.constant 0 : index
    %c3_620 = arith.constant 3 : index
    %c6_621 = arith.constant 6 : index
    %732 = vector.load %arg2[%c0_618, %c0_619, %c3_620, %c6_621] : memref<1x4x4x9xf32, #tpu.memory_space<vmem>>, vector<1x1x1x1xf32>
    %733 = vector.shape_cast %732 : vector<1x1x1x1xf32> to vector<1x1xf32>
    %734 = vector.broadcast %733 : vector<1x1xf32> to vector<1x178xf32>
    %735 = arith.mulf %731, %734 : vector<1x178xf32>
    %736 = arith.addf %714, %735 : vector<1x178xf32>
    %c0_622 = arith.constant 0 : index
    %c1_623 = arith.constant 1 : index
    %c3_624 = arith.constant 3 : index
    %c6_625 = arith.constant 6 : index
    %737 = vector.load %arg2[%c0_622, %c1_623, %c3_624, %c6_625] : memref<1x4x4x9xf32, #tpu.memory_space<vmem>>, vector<1x1x1x1xf32>
    %738 = vector.shape_cast %737 : vector<1x1x1x1xf32> to vector<1x1xf32>
    %739 = vector.broadcast %738 : vector<1x1xf32> to vector<1x178xf32>
    %740 = arith.mulf %731, %739 : vector<1x178xf32>
    %741 = arith.addf %719, %740 : vector<1x178xf32>
    %c0_626 = arith.constant 0 : index
    %c2_627 = arith.constant 2 : index
    %c3_628 = arith.constant 3 : index
    %c6_629 = arith.constant 6 : index
    %742 = vector.load %arg2[%c0_626, %c2_627, %c3_628, %c6_629] : memref<1x4x4x9xf32, #tpu.memory_space<vmem>>, vector<1x1x1x1xf32>
    %743 = vector.shape_cast %742 : vector<1x1x1x1xf32> to vector<1x1xf32>
    %744 = vector.broadcast %743 : vector<1x1xf32> to vector<1x178xf32>
    %745 = arith.mulf %731, %744 : vector<1x178xf32>
    %746 = arith.addf %724, %745 : vector<1x178xf32>
    %c0_630 = arith.constant 0 : index
    %c3_631 = arith.constant 3 : index
    %c3_632 = arith.constant 3 : index
    %c6_633 = arith.constant 6 : index
    %747 = vector.load %arg2[%c0_630, %c3_631, %c3_632, %c6_633] : memref<1x4x4x9xf32, #tpu.memory_space<vmem>>, vector<1x1x1x1xf32>
    %748 = vector.shape_cast %747 : vector<1x1x1x1xf32> to vector<1x1xf32>
    %749 = vector.broadcast %748 : vector<1x1xf32> to vector<1x178xf32>
    %750 = arith.mulf %731, %749 : vector<1x178xf32>
    %751 = arith.addf %729, %750 : vector<1x178xf32>
    %c0_634 = arith.constant 0 : index
    %c3_635 = arith.constant 3 : index
    %c21_636 = arith.constant 21 : index
    %752 = vector.load %arg1[%c0_634, %c3_635, %c21_636] : memref<1x4x200xf32, #tpu.memory_space<vmem>>, vector<1x1x178xf32>
    %753 = vector.shape_cast %752 : vector<1x1x178xf32> to vector<1x178xf32>
    %c0_637 = arith.constant 0 : index
    %c0_638 = arith.constant 0 : index
    %c3_639 = arith.constant 3 : index
    %c7_640 = arith.constant 7 : index
    %754 = vector.load %arg2[%c0_637, %c0_638, %c3_639, %c7_640] : memref<1x4x4x9xf32, #tpu.memory_space<vmem>>, vector<1x1x1x1xf32>
    %755 = vector.shape_cast %754 : vector<1x1x1x1xf32> to vector<1x1xf32>
    %756 = vector.broadcast %755 : vector<1x1xf32> to vector<1x178xf32>
    %757 = arith.mulf %753, %756 : vector<1x178xf32>
    %758 = arith.addf %736, %757 : vector<1x178xf32>
    %c0_641 = arith.constant 0 : index
    %c1_642 = arith.constant 1 : index
    %c3_643 = arith.constant 3 : index
    %c7_644 = arith.constant 7 : index
    %759 = vector.load %arg2[%c0_641, %c1_642, %c3_643, %c7_644] : memref<1x4x4x9xf32, #tpu.memory_space<vmem>>, vector<1x1x1x1xf32>
    %760 = vector.shape_cast %759 : vector<1x1x1x1xf32> to vector<1x1xf32>
    %761 = vector.broadcast %760 : vector<1x1xf32> to vector<1x178xf32>
    %762 = arith.mulf %753, %761 : vector<1x178xf32>
    %763 = arith.addf %741, %762 : vector<1x178xf32>
    %c0_645 = arith.constant 0 : index
    %c2_646 = arith.constant 2 : index
    %c3_647 = arith.constant 3 : index
    %c7_648 = arith.constant 7 : index
    %764 = vector.load %arg2[%c0_645, %c2_646, %c3_647, %c7_648] : memref<1x4x4x9xf32, #tpu.memory_space<vmem>>, vector<1x1x1x1xf32>
    %765 = vector.shape_cast %764 : vector<1x1x1x1xf32> to vector<1x1xf32>
    %766 = vector.broadcast %765 : vector<1x1xf32> to vector<1x178xf32>
    %767 = arith.mulf %753, %766 : vector<1x178xf32>
    %768 = arith.addf %746, %767 : vector<1x178xf32>
    %c0_649 = arith.constant 0 : index
    %c3_650 = arith.constant 3 : index
    %c3_651 = arith.constant 3 : index
    %c7_652 = arith.constant 7 : index
    %769 = vector.load %arg2[%c0_649, %c3_650, %c3_651, %c7_652] : memref<1x4x4x9xf32, #tpu.memory_space<vmem>>, vector<1x1x1x1xf32>
    %770 = vector.shape_cast %769 : vector<1x1x1x1xf32> to vector<1x1xf32>
    %771 = vector.broadcast %770 : vector<1x1xf32> to vector<1x178xf32>
    %772 = arith.mulf %753, %771 : vector<1x178xf32>
    %773 = arith.addf %751, %772 : vector<1x178xf32>
    %c0_653 = arith.constant 0 : index
    %c3_654 = arith.constant 3 : index
    %c22_655 = arith.constant 22 : index
    %774 = vector.load %arg1[%c0_653, %c3_654, %c22_655] : memref<1x4x200xf32, #tpu.memory_space<vmem>>, vector<1x1x178xf32>
    %775 = vector.shape_cast %774 : vector<1x1x178xf32> to vector<1x178xf32>
    %c0_656 = arith.constant 0 : index
    %c0_657 = arith.constant 0 : index
    %c3_658 = arith.constant 3 : index
    %c8_659 = arith.constant 8 : index
    %776 = vector.load %arg2[%c0_656, %c0_657, %c3_658, %c8_659] : memref<1x4x4x9xf32, #tpu.memory_space<vmem>>, vector<1x1x1x1xf32>
    %777 = vector.shape_cast %776 : vector<1x1x1x1xf32> to vector<1x1xf32>
    %778 = vector.broadcast %777 : vector<1x1xf32> to vector<1x178xf32>
    %779 = arith.mulf %775, %778 : vector<1x178xf32>
    %780 = arith.addf %758, %779 : vector<1x178xf32>
    %c0_660 = arith.constant 0 : index
    %c1_661 = arith.constant 1 : index
    %c3_662 = arith.constant 3 : index
    %c8_663 = arith.constant 8 : index
    %781 = vector.load %arg2[%c0_660, %c1_661, %c3_662, %c8_663] : memref<1x4x4x9xf32, #tpu.memory_space<vmem>>, vector<1x1x1x1xf32>
    %782 = vector.shape_cast %781 : vector<1x1x1x1xf32> to vector<1x1xf32>
    %783 = vector.broadcast %782 : vector<1x1xf32> to vector<1x178xf32>
    %784 = arith.mulf %775, %783 : vector<1x178xf32>
    %785 = arith.addf %763, %784 : vector<1x178xf32>
    %c0_664 = arith.constant 0 : index
    %c2_665 = arith.constant 2 : index
    %c3_666 = arith.constant 3 : index
    %c8_667 = arith.constant 8 : index
    %786 = vector.load %arg2[%c0_664, %c2_665, %c3_666, %c8_667] : memref<1x4x4x9xf32, #tpu.memory_space<vmem>>, vector<1x1x1x1xf32>
    %787 = vector.shape_cast %786 : vector<1x1x1x1xf32> to vector<1x1xf32>
    %788 = vector.broadcast %787 : vector<1x1xf32> to vector<1x178xf32>
    %789 = arith.mulf %775, %788 : vector<1x178xf32>
    %790 = arith.addf %768, %789 : vector<1x178xf32>
    %c0_668 = arith.constant 0 : index
    %c3_669 = arith.constant 3 : index
    %c3_670 = arith.constant 3 : index
    %c8_671 = arith.constant 8 : index
    %791 = vector.load %arg2[%c0_668, %c3_669, %c3_670, %c8_671] : memref<1x4x4x9xf32, #tpu.memory_space<vmem>>, vector<1x1x1x1xf32>
    %792 = vector.shape_cast %791 : vector<1x1x1x1xf32> to vector<1x1xf32>
    %793 = vector.broadcast %792 : vector<1x1xf32> to vector<1x178xf32>
    %794 = arith.mulf %775, %793 : vector<1x178xf32>
    %795 = arith.addf %773, %794 : vector<1x178xf32>
    %c0_672 = arith.constant 0 : index
    %c0_673 = arith.constant 0 : index
    %c0_674 = arith.constant 0 : index
    %796 = vector.load %arg3[%c0_672, %c0_673, %c0_674] : memref<1x4x1xf32, #tpu.memory_space<vmem>>, vector<1x1x1xf32>
    %797 = vector.shape_cast %796 : vector<1x1x1xf32> to vector<1x1xf32>
    %798 = vector.broadcast %797 : vector<1x1xf32> to vector<1x178xf32>
    %799 = arith.addf %780, %798 : vector<1x178xf32>
    %c0_675 = arith.constant 0 : index
    %c0_676 = arith.constant 0 : index
    %c0_677 = arith.constant 0 : index
    %800 = vector.load %arg4[%c0_675, %c0_676, %c0_677] : memref<1x4x178xf32, #tpu.memory_space<vmem>>, vector<1x1x178xf32>
    %801 = vector.shape_cast %800 : vector<1x1x178xf32> to vector<1x178xf32>
    %802 = vector.shape_cast %799 : vector<1x178xf32> to vector<1x1x178xf32>
    tpu.vector_store %arg4[%c0_675, %c0_676, %c0_677], %802 {strides = array<i32>} : memref<1x4x178xf32, #tpu.memory_space<vmem>>, vector<1x1x178xf32>,
    %c0_678 = arith.constant 0 : index
    %c1_679 = arith.constant 1 : index
    %c0_680 = arith.constant 0 : index
    %803 = vector.load %arg3[%c0_678, %c1_679, %c0_680] : memref<1x4x1xf32, #tpu.memory_space<vmem>>, vector<1x1x1xf32>
    %804 = vector.shape_cast %803 : vector<1x1x1xf32> to vector<1x1xf32>
    %805 = vector.broadcast %804 : vector<1x1xf32> to vector<1x178xf32>
    %806 = arith.addf %785, %805 : vector<1x178xf32>
    %c0_681 = arith.constant 0 : index
    %c1_682 = arith.constant 1 : index
    %c0_683 = arith.constant 0 : index
    %807 = vector.load %arg4[%c0_681, %c1_682, %c0_683] : memref<1x4x178xf32, #tpu.memory_space<vmem>>, vector<1x1x178xf32>
    %808 = vector.shape_cast %807 : vector<1x1x178xf32> to vector<1x178xf32>
    %809 = vector.shape_cast %806 : vector<1x178xf32> to vector<1x1x178xf32>
    tpu.vector_store %arg4[%c0_681, %c1_682, %c0_683], %809 {strides = array<i32>} : memref<1x4x178xf32, #tpu.memory_space<vmem>>, vector<1x1x178xf32>,
    %c0_684 = arith.constant 0 : index
    %c2_685 = arith.constant 2 : index
    %c0_686 = arith.constant 0 : index
    %810 = vector.load %arg3[%c0_684, %c2_685, %c0_686] : memref<1x4x1xf32, #tpu.memory_space<vmem>>, vector<1x1x1xf32>
    %811 = vector.shape_cast %810 : vector<1x1x1xf32> to vector<1x1xf32>
    %812 = vector.broadcast %811 : vector<1x1xf32> to vector<1x178xf32>
    %813 = arith.addf %790, %812 : vector<1x178xf32>
    %c0_687 = arith.constant 0 : index
    %c2_688 = arith.constant 2 : index
    %c0_689 = arith.constant 0 : index
    %814 = vector.load %arg4[%c0_687, %c2_688, %c0_689] : memref<1x4x178xf32, #tpu.memory_space<vmem>>, vector<1x1x178xf32>
    %815 = vector.shape_cast %814 : vector<1x1x178xf32> to vector<1x178xf32>
    %816 = vector.shape_cast %813 : vector<1x178xf32> to vector<1x1x178xf32>
    tpu.vector_store %arg4[%c0_687, %c2_688, %c0_689], %816 {strides = array<i32>} : memref<1x4x178xf32, #tpu.memory_space<vmem>>, vector<1x1x178xf32>,
    %c0_690 = arith.constant 0 : index
    %c3_691 = arith.constant 3 : index
    %c0_692 = arith.constant 0 : index
    %817 = vector.load %arg3[%c0_690, %c3_691, %c0_692] : memref<1x4x1xf32, #tpu.memory_space<vmem>>, vector<1x1x1xf32>
    %818 = vector.shape_cast %817 : vector<1x1x1xf32> to vector<1x1xf32>
    %819 = vector.broadcast %818 : vector<1x1xf32> to vector<1x178xf32>
    %820 = arith.addf %795, %819 : vector<1x178xf32>
    %c0_693 = arith.constant 0 : index
    %c3_694 = arith.constant 3 : index
    %c0_695 = arith.constant 0 : index
    %821 = vector.load %arg4[%c0_693, %c3_694, %c0_695] : memref<1x4x178xf32, #tpu.memory_space<vmem>>, vector<1x1x178xf32>
    %822 = vector.shape_cast %821 : vector<1x1x178xf32> to vector<1x178xf32>
    %823 = vector.shape_cast %820 : vector<1x178xf32> to vector<1x1x178xf32>
    tpu.vector_store %arg4[%c0_693, %c3_694, %c0_695], %823 {strides = array<i32>} : memref<1x4x178xf32, #tpu.memory_space<vmem>>, vector<1x1x178xf32>,
    return
  }
  func.func @transform_0(%arg0: i32) -> (i32, i32, i32) {
    %c0_i32 = arith.constant 0 : i32
    %c0_i32_0 = arith.constant 0 : i32
    %c0_i32_1 = arith.constant 0 : i32
    return %arg0, %c0_i32, %c0_i32_0 : i32, i32, i32
  }
  func.func @transform_1(%arg0: i32) -> (i32, i32, i32, i32) {
    %c0_i32 = arith.constant 0 : i32
    %c0_i32_0 = arith.constant 0 : i32
    %c0_i32_1 = arith.constant 0 : i32
    %c0_i32_2 = arith.constant 0 : i32
    return %arg0, %c0_i32, %c0_i32_0, %c0_i32_1 : i32, i32, i32, i32
  }
  func.func @transform_2(%arg0: i32) -> (i32, i32, i32) {
    %c0_i32 = arith.constant 0 : i32
    %c0_i32_0 = arith.constant 0 : i32
    %c0_i32_1 = arith.constant 0 : i32
    return %arg0, %c0_i32, %c0_i32_0 : i32, i32, i32
  }
  func.func @transform_3(%arg0: i32) -> (i32, i32, i32) {
    %c0_i32 = arith.constant 0 : i32
    %c0_i32_0 = arith.constant 0 : i32
    %c0_i32_1 = arith.constant 0 : i32
    return %arg0, %c0_i32, %c0_i32_0 : i32, i32, i32
  }
}

module attributes {stable_mosaic.version = 11 : i64} {
  func.func @_group_norm_kernel(%arg0: i32, %arg1: memref<1x4x2x64xf32, #tpu.memory_space<vmem>>, %arg2: memref<1x4x1x1xf32, #tpu.memory_space<vmem>>, %arg3: memref<1x4x1x1xf32, #tpu.memory_space<vmem>>, %arg4: memref<1x4x2x64xf32, #tpu.memory_space<vmem>>) attributes {dimension_semantics = [#tpu.dimension_semantics<parallel>], iteration_bounds = array<i64: 2>, scalar_prefetch = 0 : i64, scratch_operands = 0 : i64, tpu.core_type = #tpu.core_type<tc>, window_params = [{transform_indices = @transform_0, window_bounds = array<i64: 1, 4, 2, 64>}, {transform_indices = @transform_1, window_bounds = array<i64: 1, 4, 1, 1>}, {transform_indices = @transform_2, window_bounds = array<i64: 1, 4, 1, 1>}, {transform_indices = @transform_3, window_bounds = array<i64: 1, 4, 2, 64>}]} {
    %c0 = arith.constant 0 : index
    %c0_0 = arith.constant 0 : index
    %c0_1 = arith.constant 0 : index
    %c0_2 = arith.constant 0 : index
    %0 = vector.load %arg1[%c0, %c0_0, %c0_1, %c0_2] : memref<1x4x2x64xf32, #tpu.memory_space<vmem>>, vector<1x4x2x64xf32>
    %cst = arith.constant dense<0.000000e+00> : vector<1x4x2xf32>
    %1 = vector.multi_reduction <add>, %0, %cst [3] : vector<1x4x2x64xf32> to vector<1x4x2xf32>
    %2 = vector.shape_cast %1 : vector<1x4x2xf32> to vector<1x4x2x1xf32>
    %cst_3 = arith.constant 6.400000e+01 : f32
    %3 = vector.broadcast %cst_3 : f32 to vector<1x4x2x1xf32>
    %4 = arith.divf %2, %3 : vector<1x4x2x1xf32>
    %cst_4 = arith.constant dense<0.000000e+00> : vector<1x2x1xf32>
    %5 = vector.multi_reduction <add>, %4, %cst_4 [1] : vector<1x4x2x1xf32> to vector<1x2x1xf32>
    %6 = vector.shape_cast %5 : vector<1x2x1xf32> to vector<1x1x2x1xf32>
    %cst_5 = arith.constant 4.000000e+00 : f32
    %7 = vector.broadcast %cst_5 : f32 to vector<1x1x2x1xf32>
    %8 = arith.divf %6, %7 : vector<1x1x2x1xf32>
    %9 = vector.broadcast %8 : vector<1x1x2x1xf32> to vector<1x4x2x64xf32>
    %10 = arith.subf %0, %9 : vector<1x4x2x64xf32>
    %11 = arith.mulf %10, %10 : vector<1x4x2x64xf32>
    %cst_6 = arith.constant dense<0.000000e+00> : vector<1x4x2xf32>
    %12 = vector.multi_reduction <add>, %11, %cst_6 [3] : vector<1x4x2x64xf32> to vector<1x4x2xf32>
    %13 = vector.shape_cast %12 : vector<1x4x2xf32> to vector<1x4x2x1xf32>
    %cst_7 = arith.constant 6.400000e+01 : f32
    %14 = vector.broadcast %cst_7 : f32 to vector<1x4x2x1xf32>
    %15 = arith.divf %13, %14 : vector<1x4x2x1xf32>
    %cst_8 = arith.constant dense<0.000000e+00> : vector<1x2x1xf32>
    %16 = vector.multi_reduction <add>, %15, %cst_8 [1] : vector<1x4x2x1xf32> to vector<1x2x1xf32>
    %17 = vector.shape_cast %16 : vector<1x2x1xf32> to vector<1x1x2x1xf32>
    %cst_9 = arith.constant 4.000000e+00 : f32
    %18 = vector.broadcast %cst_9 : f32 to vector<1x1x2x1xf32>
    %19 = arith.divf %17, %18 : vector<1x1x2x1xf32>
    %cst_10 = arith.constant 9.99999974E-6 : f32
    %20 = vector.broadcast %cst_10 : f32 to vector<1x1x2x1xf32>
    %21 = arith.addf %19, %20 : vector<1x1x2x1xf32>
    %22 = math.rsqrt %21 : vector<1x1x2x1xf32>
    %23 = vector.broadcast %22 : vector<1x1x2x1xf32> to vector<1x4x2x64xf32>
    %24 = arith.mulf %10, %23 : vector<1x4x2x64xf32>
    %c0_11 = arith.constant 0 : index
    %c0_12 = arith.constant 0 : index
    %c0_13 = arith.constant 0 : index
    %c0_14 = arith.constant 0 : index
    %25 = vector.load %arg2[%c0_11, %c0_12, %c0_13, %c0_14] : memref<1x4x1x1xf32, #tpu.memory_space<vmem>>, vector<1x4x1x1xf32>
    %26 = vector.broadcast %25 : vector<1x4x1x1xf32> to vector<1x4x2x64xf32>
    %27 = arith.mulf %24, %26 : vector<1x4x2x64xf32>
    %c0_15 = arith.constant 0 : index
    %c0_16 = arith.constant 0 : index
    %c0_17 = arith.constant 0 : index
    %c0_18 = arith.constant 0 : index
    %28 = vector.load %arg3[%c0_15, %c0_16, %c0_17, %c0_18] : memref<1x4x1x1xf32, #tpu.memory_space<vmem>>, vector<1x4x1x1xf32>
    %29 = vector.broadcast %28 : vector<1x4x1x1xf32> to vector<1x4x2x64xf32>
    %30 = arith.addf %27, %29 : vector<1x4x2x64xf32>
    %cst_19 = arith.constant 5.000000e-01 : f32
    %31 = vector.broadcast %cst_19 : f32 to vector<1x4x2x64xf32>
    %32 = arith.mulf %31, %30 : vector<1x4x2x64xf32>
    %cst_20 = arith.constant 0.707106769 : f32
    %33 = vector.broadcast %cst_20 : f32 to vector<1x4x2x64xf32>
    %34 = arith.mulf %30, %33 : vector<1x4x2x64xf32>
    %35 = math.erf %34 : vector<1x4x2x64xf32>
    %cst_21 = arith.constant 1.000000e+00 : f32
    %36 = vector.broadcast %cst_21 : f32 to vector<1x4x2x64xf32>
    %37 = arith.addf %36, %35 : vector<1x4x2x64xf32>
    %38 = arith.mulf %32, %37 : vector<1x4x2x64xf32>
    %c0_22 = arith.constant 0 : index
    %c0_23 = arith.constant 0 : index
    %c0_24 = arith.constant 0 : index
    %c0_25 = arith.constant 0 : index
    %39 = vector.load %arg4[%c0_22, %c0_23, %c0_24, %c0_25] : memref<1x4x2x64xf32, #tpu.memory_space<vmem>>, vector<1x4x2x64xf32>
    tpu.vector_store %arg4[%c0_22, %c0_23, %c0_24, %c0_25], %38 {strides = array<i32>} : memref<1x4x2x64xf32, #tpu.memory_space<vmem>>, vector<1x4x2x64xf32>,
    return
  }
  func.func @transform_0(%arg0: i32) -> (i32, i32, i32, i32) {
    %c0_i32 = arith.constant 0 : i32
    %c0_i32_0 = arith.constant 0 : i32
    %c0_i32_1 = arith.constant 0 : i32
    %c0_i32_2 = arith.constant 0 : i32
    return %arg0, %c0_i32, %c0_i32_0, %c0_i32_1 : i32, i32, i32, i32
  }
  func.func @transform_1(%arg0: i32) -> (i32, i32, i32, i32) {
    %c0_i32 = arith.constant 0 : i32
    %c0_i32_0 = arith.constant 0 : i32
    %c0_i32_1 = arith.constant 0 : i32
    %c0_i32_2 = arith.constant 0 : i32
    return %arg0, %c0_i32, %c0_i32_0, %c0_i32_1 : i32, i32, i32, i32
  }
  func.func @transform_2(%arg0: i32) -> (i32, i32, i32, i32) {
    %c0_i32 = arith.constant 0 : i32
    %c0_i32_0 = arith.constant 0 : i32
    %c0_i32_1 = arith.constant 0 : i32
    %c0_i32_2 = arith.constant 0 : i32
    return %arg0, %c0_i32, %c0_i32_0, %c0_i32_1 : i32, i32, i32, i32
  }
  func.func @transform_3(%arg0: i32) -> (i32, i32, i32, i32) {
    %c0_i32 = arith.constant 0 : i32
    %c0_i32_0 = arith.constant 0 : i32
    %c0_i32_1 = arith.constant 0 : i32
    %c0_i32_2 = arith.constant 0 : i32
    return %arg0, %c0_i32, %c0_i32_0, %c0_i32_1 : i32, i32, i32, i32
  }
}

module attributes {stable_mosaic.version = 11 : i64} {
  func.func @_matmul_kernel(%arg0: i32, %arg1: i32, %arg2: memref<16x8xbf16, #tpu.memory_space<vmem>>, %arg3: memref<8x128xf32, #tpu.memory_space<vmem>>, %arg4: memref<16x1xf32, #tpu.memory_space<vmem>>, %arg5: memref<16x128xf32, #tpu.memory_space<vmem>>) attributes {dimension_semantics = [#tpu.dimension_semantics<parallel>, #tpu.dimension_semantics<parallel>], iteration_bounds = array<i64: 2, 1>, scalar_prefetch = 0 : i64, scratch_operands = 0 : i64, tpu.core_type = #tpu.core_type<tc>, window_params = [{transform_indices = @transform_0, window_bounds = array<i64: 16, 8>}, {transform_indices = @transform_1, window_bounds = array<i64: 8, 128>}, {transform_indices = @transform_2, window_bounds = array<i64: 16, 1>}, {transform_indices = @transform_3, window_bounds = array<i64: 16, 128>}]} {
    %c0 = arith.constant 0 : index
    %c0_0 = arith.constant 0 : index
    %0 = vector.load %arg2[%c0, %c0_0] : memref<16x8xbf16, #tpu.memory_space<vmem>>, vector<16x8xbf16>
    %c0_1 = arith.constant 0 : index
    %c0_2 = arith.constant 0 : index
    %1 = vector.load %arg3[%c0_1, %c0_2] : memref<8x128xf32, #tpu.memory_space<vmem>>, vector<8x128xf32>
    %2 = arith.truncf %1 : vector<8x128xf32> to vector<8x128xbf16>
    %cst = arith.constant dense<0.000000e+00> : vector<16x128xf32>
    %3 = tpu.matmul %0, %2, %cst {dimension_numbers = #tpu.dot_dimension_numbers<[1], [0], [0], [1], [0, 0, 1, 1], [], []>} : vector<16x8xbf16>, vector<8x128xbf16>, vector<16x128xf32> -> vector<16x128xf32>
    %c0_3 = arith.constant 0 : index
    %c0_4 = arith.constant 0 : index
    %4 = vector.load %arg4[%c0_3, %c0_4] : memref<16x1xf32, #tpu.memory_space<vmem>>, vector<16x1xf32>
    %5 = vector.broadcast %4 : vector<16x1xf32> to vector<16x128xf32>
    %6 = arith.addf %3, %5 : vector<16x128xf32>
    %c0_5 = arith.constant 0 : index
    %c0_6 = arith.constant 0 : index
    %7 = vector.load %arg5[%c0_5, %c0_6] : memref<16x128xf32, #tpu.memory_space<vmem>>, vector<16x128xf32>
    tpu.vector_store %arg5[%c0_5, %c0_6], %6 {strides = array<i32>} : memref<16x128xf32, #tpu.memory_space<vmem>>, vector<16x128xf32>,
    return
  }
  func.func @transform_0(%arg0: i32, %arg1: i32) -> (i32, i32) {
    %c0_i32 = arith.constant 0 : i32
    %c0_i32_0 = arith.constant 0 : i32
    return %arg0, %c0_i32 : i32, i32
  }
  func.func @transform_1(%arg0: i32, %arg1: i32) -> (i32, i32) {
    %c0_i32 = arith.constant 0 : i32
    %c0_i32_0 = arith.constant 0 : i32
    return %c0_i32, %arg1 : i32, i32
  }
  func.func @transform_2(%arg0: i32, %arg1: i32) -> (i32, i32) {
    %c0_i32 = arith.constant 0 : i32
    %c0_i32_0 = arith.constant 0 : i32
    return %arg0, %c0_i32 : i32, i32
  }
  func.func @transform_3(%arg0: i32, %arg1: i32) -> (i32, i32) {
    %c0_i32 = arith.constant 0 : i32
    return %arg0, %arg1 : i32, i32
  }
}

module attributes {stable_mosaic.version = 11 : i64} {
  func.func @_group_norm_kernel(%arg0: i32, %arg1: memref<4x4x2x64xf32, #tpu.memory_space<vmem>>, %arg2: memref<4x4x1x1xf32, #tpu.memory_space<vmem>>, %arg3: memref<4x4x1x1xf32, #tpu.memory_space<vmem>>, %arg4: memref<4x4x2x64xf32, #tpu.memory_space<vmem>>, %arg5: memref<4x4x1x1xf32, #tpu.memory_space<vmem>>, %arg6: memref<4x4x1x1xf32, #tpu.memory_space<vmem>>, %arg7: memref<4x4x2x64xf32, #tpu.memory_space<vmem>>) attributes {dimension_semantics = [#tpu.dimension_semantics<parallel>], iteration_bounds = array<i64: 2>, scalar_prefetch = 0 : i64, scratch_operands = 0 : i64, tpu.core_type = #tpu.core_type<tc>, window_params = [{transform_indices = @transform_0, window_bounds = array<i64: 4, 4, 2, 64>}, {transform_indices = @transform_1, window_bounds = array<i64: 4, 4, 1, 1>}, {transform_indices = @transform_2, window_bounds = array<i64: 4, 4, 1, 1>}, {transform_indices = @transform_3, window_bounds = array<i64: 4, 4, 2, 64>}, {transform_indices = @transform_4, window_bounds = array<i64: 4, 4, 1, 1>}, {transform_indices = @transform_5, window_bounds = array<i64: 4, 4, 1, 1>}, {transform_indices = @transform_6, window_bounds = array<i64: 4, 4, 2, 64>}]} {
    %c0 = arith.constant 0 : index
    %c0_0 = arith.constant 0 : index
    %c0_1 = arith.constant 0 : index
    %c0_2 = arith.constant 0 : index
    %0 = vector.load %arg1[%c0, %c0_0, %c0_1, %c0_2] : memref<4x4x2x64xf32, #tpu.memory_space<vmem>>, vector<4x4x2x64xf32>
    %cst = arith.constant dense<0.000000e+00> : vector<4x4x2xf32>
    %1 = vector.multi_reduction <add>, %0, %cst [3] : vector<4x4x2x64xf32> to vector<4x4x2xf32>
    %2 = vector.shape_cast %1 : vector<4x4x2xf32> to vector<4x4x2x1xf32>
    %cst_3 = arith.constant 6.400000e+01 : f32
    %3 = vector.broadcast %cst_3 : f32 to vector<4x4x2x1xf32>
    %4 = arith.divf %2, %3 : vector<4x4x2x1xf32>
    %cst_4 = arith.constant dense<0.000000e+00> : vector<4x2x1xf32>
    %5 = vector.multi_reduction <add>, %4, %cst_4 [1] : vector<4x4x2x1xf32> to vector<4x2x1xf32>
    %6 = vector.shape_cast %5 : vector<4x2x1xf32> to vector<4x1x2x1xf32>
    %cst_5 = arith.constant 4.000000e+00 : f32
    %7 = vector.broadcast %cst_5 : f32 to vector<4x1x2x1xf32>
    %8 = arith.divf %6, %7 : vector<4x1x2x1xf32>
    %9 = vector.broadcast %8 : vector<4x1x2x1xf32> to vector<4x4x2x64xf32>
    %10 = arith.subf %0, %9 : vector<4x4x2x64xf32>
    %11 = arith.mulf %10, %10 : vector<4x4x2x64xf32>
    %cst_6 = arith.constant dense<0.000000e+00> : vector<4x4x2xf32>
    %12 = vector.multi_reduction <add>, %11, %cst_6 [3] : vector<4x4x2x64xf32> to vector<4x4x2xf32>
    %13 = vector.shape_cast %12 : vector<4x4x2xf32> to vector<4x4x2x1xf32>
    %cst_7 = arith.constant 6.400000e+01 : f32
    %14 = vector.broadcast %cst_7 : f32 to vector<4x4x2x1xf32>
    %15 = arith.divf %13, %14 : vector<4x4x2x1xf32>
    %cst_8 = arith.constant dense<0.000000e+00> : vector<4x2x1xf32>
    %16 = vector.multi_reduction <add>, %15, %cst_8 [1] : vector<4x4x2x1xf32> to vector<4x2x1xf32>
    %17 = vector.shape_cast %16 : vector<4x2x1xf32> to vector<4x1x2x1xf32>
    %cst_9 = arith.constant 4.000000e+00 : f32
    %18 = vector.broadcast %cst_9 : f32 to vector<4x1x2x1xf32>
    %19 = arith.divf %17, %18 : vector<4x1x2x1xf32>
    %cst_10 = arith.constant 9.99999974E-6 : f32
    %20 = vector.broadcast %cst_10 : f32 to vector<4x1x2x1xf32>
    %21 = arith.addf %19, %20 : vector<4x1x2x1xf32>
    %22 = math.rsqrt %21 : vector<4x1x2x1xf32>
    %23 = vector.broadcast %22 : vector<4x1x2x1xf32> to vector<4x4x2x64xf32>
    %24 = arith.mulf %10, %23 : vector<4x4x2x64xf32>
    %c0_11 = arith.constant 0 : index
    %c0_12 = arith.constant 0 : index
    %c0_13 = arith.constant 0 : index
    %c0_14 = arith.constant 0 : index
    %25 = vector.load %arg2[%c0_11, %c0_12, %c0_13, %c0_14] : memref<4x4x1x1xf32, #tpu.memory_space<vmem>>, vector<4x4x1x1xf32>
    %26 = vector.broadcast %25 : vector<4x4x1x1xf32> to vector<4x4x2x64xf32>
    %27 = arith.mulf %24, %26 : vector<4x4x2x64xf32>
    %c0_15 = arith.constant 0 : index
    %c0_16 = arith.constant 0 : index
    %c0_17 = arith.constant 0 : index
    %c0_18 = arith.constant 0 : index
    %28 = vector.load %arg3[%c0_15, %c0_16, %c0_17, %c0_18] : memref<4x4x1x1xf32, #tpu.memory_space<vmem>>, vector<4x4x1x1xf32>
    %29 = vector.broadcast %28 : vector<4x4x1x1xf32> to vector<4x4x2x64xf32>
    %30 = arith.addf %27, %29 : vector<4x4x2x64xf32>
    %c0_19 = arith.constant 0 : index
    %c0_20 = arith.constant 0 : index
    %c0_21 = arith.constant 0 : index
    %c0_22 = arith.constant 0 : index
    %31 = vector.load %arg4[%c0_19, %c0_20, %c0_21, %c0_22] : memref<4x4x2x64xf32, #tpu.memory_space<vmem>>, vector<4x4x2x64xf32>
    %32 = arith.addf %30, %31 : vector<4x4x2x64xf32>
    %c0_23 = arith.constant 0 : index
    %c0_24 = arith.constant 0 : index
    %c0_25 = arith.constant 0 : index
    %c0_26 = arith.constant 0 : index
    %33 = vector.load %arg5[%c0_23, %c0_24, %c0_25, %c0_26] : memref<4x4x1x1xf32, #tpu.memory_space<vmem>>, vector<4x4x1x1xf32>
    %34 = vector.broadcast %33 : vector<4x4x1x1xf32> to vector<4x4x2x64xf32>
    %35 = arith.mulf %32, %34 : vector<4x4x2x64xf32>
    %c0_27 = arith.constant 0 : index
    %c0_28 = arith.constant 0 : index
    %c0_29 = arith.constant 0 : index
    %c0_30 = arith.constant 0 : index
    %36 = vector.load %arg6[%c0_27, %c0_28, %c0_29, %c0_30] : memref<4x4x1x1xf32, #tpu.memory_space<vmem>>, vector<4x4x1x1xf32>
    %37 = vector.broadcast %36 : vector<4x4x1x1xf32> to vector<4x4x2x64xf32>
    %38 = arith.addf %35, %37 : vector<4x4x2x64xf32>
    %cst_31 = arith.constant 5.000000e-01 : f32
    %39 = vector.broadcast %cst_31 : f32 to vector<4x4x2x64xf32>
    %40 = arith.mulf %39, %38 : vector<4x4x2x64xf32>
    %cst_32 = arith.constant 0.707106769 : f32
    %41 = vector.broadcast %cst_32 : f32 to vector<4x4x2x64xf32>
    %42 = arith.mulf %38, %41 : vector<4x4x2x64xf32>
    %43 = math.erf %42 : vector<4x4x2x64xf32>
    %cst_33 = arith.constant 1.000000e+00 : f32
    %44 = vector.broadcast %cst_33 : f32 to vector<4x4x2x64xf32>
    %45 = arith.addf %44, %43 : vector<4x4x2x64xf32>
    %46 = arith.mulf %40, %45 : vector<4x4x2x64xf32>
    %c0_34 = arith.constant 0 : index
    %c0_35 = arith.constant 0 : index
    %c0_36 = arith.constant 0 : index
    %c0_37 = arith.constant 0 : index
    %47 = vector.load %arg7[%c0_34, %c0_35, %c0_36, %c0_37] : memref<4x4x2x64xf32, #tpu.memory_space<vmem>>, vector<4x4x2x64xf32>
    tpu.vector_store %arg7[%c0_34, %c0_35, %c0_36, %c0_37], %46 {strides = array<i32>} : memref<4x4x2x64xf32, #tpu.memory_space<vmem>>, vector<4x4x2x64xf32>,
    return
  }
  func.func @transform_0(%arg0: i32) -> (i32, i32, i32, i32) {
    %c0_i32 = arith.constant 0 : i32
    %c0_i32_0 = arith.constant 0 : i32
    %c0_i32_1 = arith.constant 0 : i32
    %c0_i32_2 = arith.constant 0 : i32
    return %arg0, %c0_i32, %c0_i32_0, %c0_i32_1 : i32, i32, i32, i32
  }
  func.func @transform_1(%arg0: i32) -> (i32, i32, i32, i32) {
    %c0_i32 = arith.constant 0 : i32
    %c0_i32_0 = arith.constant 0 : i32
    %c0_i32_1 = arith.constant 0 : i32
    %c0_i32_2 = arith.constant 0 : i32
    return %arg0, %c0_i32, %c0_i32_0, %c0_i32_1 : i32, i32, i32, i32
  }
  func.func @transform_2(%arg0: i32) -> (i32, i32, i32, i32) {
    %c0_i32 = arith.constant 0 : i32
    %c0_i32_0 = arith.constant 0 : i32
    %c0_i32_1 = arith.constant 0 : i32
    %c0_i32_2 = arith.constant 0 : i32
    return %arg0, %c0_i32, %c0_i32_0, %c0_i32_1 : i32, i32, i32, i32
  }
  func.func @transform_3(%arg0: i32) -> (i32, i32, i32, i32) {
    %c0_i32 = arith.constant 0 : i32
    %c0_i32_0 = arith.constant 0 : i32
    %c0_i32_1 = arith.constant 0 : i32
    %c0_i32_2 = arith.constant 0 : i32
    return %arg0, %c0_i32, %c0_i32_0, %c0_i32_1 : i32, i32, i32, i32
  }
  func.func @transform_4(%arg0: i32) -> (i32, i32, i32, i32) {
    %c0_i32 = arith.constant 0 : i32
    %c0_i32_0 = arith.constant 0 : i32
    %c0_i32_1 = arith.constant 0 : i32
    %c0_i32_2 = arith.constant 0 : i32
    return %arg0, %c0_i32, %c0_i32_0, %c0_i32_1 : i32, i32, i32, i32
  }
  func.func @transform_5(%arg0: i32) -> (i32, i32, i32, i32) {
    %c0_i32 = arith.constant 0 : i32
    %c0_i32_0 = arith.constant 0 : i32
    %c0_i32_1 = arith.constant 0 : i32
    %c0_i32_2 = arith.constant 0 : i32
    return %arg0, %c0_i32, %c0_i32_0, %c0_i32_1 : i32, i32, i32, i32
  }
  func.func @transform_6(%arg0: i32) -> (i32, i32, i32, i32) {
    %c0_i32 = arith.constant 0 : i32
    %c0_i32_0 = arith.constant 0 : i32
    %c0_i32_1 = arith.constant 0 : i32
    %c0_i32_2 = arith.constant 0 : i32
    return %arg0, %c0_i32, %c0_i32_0, %c0_i32_1 : i32, i32, i32, i32
  }
}

module attributes {stable_mosaic.version = 11 : i64} {
  func.func @_conv3x3_kernel(%arg0: i32, %arg1: memref<32x200xf32, #tpu.memory_space<vmem>>, %arg2: memref<9x8x32xbf16, #tpu.memory_space<vmem>>, %arg3: memref<8x1xf32, #tpu.memory_space<vmem>>, %arg4: memref<8x178xf32, #tpu.memory_space<vmem>>) attributes {dimension_semantics = [#tpu.dimension_semantics<parallel>], iteration_bounds = array<i64: 2>, scalar_prefetch = 0 : i64, scratch_operands = 0 : i64, tpu.core_type = #tpu.core_type<tc>, window_params = [{pipeline_mode = #tpu.pipeline_mode<synchronous>, transform_indices = @transform_0, window_bounds = array<i64: 32, 200>}, {transform_indices = @transform_1, window_bounds = array<i64: 9, 8, 32>}, {transform_indices = @transform_2, window_bounds = array<i64: 8, 1>}, {transform_indices = @transform_3, window_bounds = array<i64: 8, 178>}]} {
    %c0 = arith.constant 0 : index
    %c0_0 = arith.constant 0 : index
    %0 = vector.load %arg1[%c0, %c0_0] : memref<32x200xf32, #tpu.memory_space<vmem>>, vector<32x200xf32>
    %1 = arith.truncf %0 : vector<32x200xf32> to vector<32x200xbf16>
    %cst = arith.constant 0.000000e+00 : f32
    %2 = vector.broadcast %cst : f32 to vector<8x178xf32>
    %c0_1 = arith.constant 0 : index
    %c0_2 = arith.constant 0 : index
    %c0_3 = arith.constant 0 : index
    %3 = vector.load %arg2[%c0_1, %c0_2, %c0_3] : memref<9x8x32xbf16, #tpu.memory_space<vmem>>, vector<1x8x32xbf16>
    %4 = vector.shape_cast %3 : vector<1x8x32xbf16> to vector<8x32xbf16>
    %5 = vector.extract_strided_slice %1 {offsets = [0, 0], sizes = [32, 178], strides = [1, 1]} : vector<32x200xbf16> to vector<32x178xbf16>
    %cst_4 = arith.constant dense<0.000000e+00> : vector<8x178xf32>
    %6 = tpu.matmul %4, %5, %cst_4 {dimension_numbers = #tpu.dot_dimension_numbers<[1], [0], [0], [1], [0, 0, 1, 1], [], []>} : vector<8x32xbf16>, vector<32x178xbf16>, vector<8x178xf32> -> vector<8x178xf32>
    %7 = arith.addf %2, %6 : vector<8x178xf32>
    %c1 = arith.constant 1 : index
    %c0_5 = arith.constant 0 : index
    %c0_6 = arith.constant 0 : index
    %8 = vector.load %arg2[%c1, %c0_5, %c0_6] : memref<9x8x32xbf16, #tpu.memory_space<vmem>>, vector<1x8x32xbf16>
    %9 = vector.shape_cast %8 : vector<1x8x32xbf16> to vector<8x32xbf16>
    %10 = vector.extract_strided_slice %1 {offsets = [0, 1], sizes = [32, 178], strides = [1, 1]} : vector<32x200xbf16> to vector<32x178xbf16>
    %cst_7 = arith.constant dense<0.000000e+00> : vector<8x178xf32>
    %11 = tpu.matmul %9, %10, %cst_7 {dimension_numbers = #tpu.dot_dimension_numbers<[1], [0], [0], [1], [0, 0, 1, 1], [], []>} : vector<8x32xbf16>, vector<32x178xbf16>, vector<8x178xf32> -> vector<8x178xf32>
    %12 = arith.addf %7, %11 : vector<8x178xf32>
    %c2 = arith.constant 2 : index
    %c0_8 = arith.constant 0 : index
    %c0_9 = arith.constant 0 : index
    %13 = vector.load %arg2[%c2, %c0_8, %c0_9] : memref<9x8x32xbf16, #tpu.memory_space<vmem>>, vector<1x8x32xbf16>
    %14 = vector.shape_cast %13 : vector<1x8x32xbf16> to vector<8x32xbf16>
    %15 = vector.extract_strided_slice %1 {offsets = [0, 2], sizes = [32, 178], strides = [1, 1]} : vector<32x200xbf16> to vector<32x178xbf16>
    %cst_10 = arith.constant dense<0.000000e+00> : vector<8x178xf32>
    %16 = tpu.matmul %14, %15, %cst_10 {dimension_numbers = #tpu.dot_dimension_numbers<[1], [0], [0], [1], [0, 0, 1, 1], [], []>} : vector<8x32xbf16>, vector<32x178xbf16>, vector<8x178xf32> -> vector<8x178xf32>
    %17 = arith.addf %12, %16 : vector<8x178xf32>
    %c3 = arith.constant 3 : index
    %c0_11 = arith.constant 0 : index
    %c0_12 = arith.constant 0 : index
    %18 = vector.load %arg2[%c3, %c0_11, %c0_12] : memref<9x8x32xbf16, #tpu.memory_space<vmem>>, vector<1x8x32xbf16>
    %19 = vector.shape_cast %18 : vector<1x8x32xbf16> to vector<8x32xbf16>
    %20 = vector.extract_strided_slice %1 {offsets = [0, 10], sizes = [32, 178], strides = [1, 1]} : vector<32x200xbf16> to vector<32x178xbf16>
    %cst_13 = arith.constant dense<0.000000e+00> : vector<8x178xf32>
    %21 = tpu.matmul %19, %20, %cst_13 {dimension_numbers = #tpu.dot_dimension_numbers<[1], [0], [0], [1], [0, 0, 1, 1], [], []>} : vector<8x32xbf16>, vector<32x178xbf16>, vector<8x178xf32> -> vector<8x178xf32>
    %22 = arith.addf %17, %21 : vector<8x178xf32>
    %c4 = arith.constant 4 : index
    %c0_14 = arith.constant 0 : index
    %c0_15 = arith.constant 0 : index
    %23 = vector.load %arg2[%c4, %c0_14, %c0_15] : memref<9x8x32xbf16, #tpu.memory_space<vmem>>, vector<1x8x32xbf16>
    %24 = vector.shape_cast %23 : vector<1x8x32xbf16> to vector<8x32xbf16>
    %25 = vector.extract_strided_slice %1 {offsets = [0, 11], sizes = [32, 178], strides = [1, 1]} : vector<32x200xbf16> to vector<32x178xbf16>
    %cst_16 = arith.constant dense<0.000000e+00> : vector<8x178xf32>
    %26 = tpu.matmul %24, %25, %cst_16 {dimension_numbers = #tpu.dot_dimension_numbers<[1], [0], [0], [1], [0, 0, 1, 1], [], []>} : vector<8x32xbf16>, vector<32x178xbf16>, vector<8x178xf32> -> vector<8x178xf32>
    %27 = arith.addf %22, %26 : vector<8x178xf32>
    %c5 = arith.constant 5 : index
    %c0_17 = arith.constant 0 : index
    %c0_18 = arith.constant 0 : index
    %28 = vector.load %arg2[%c5, %c0_17, %c0_18] : memref<9x8x32xbf16, #tpu.memory_space<vmem>>, vector<1x8x32xbf16>
    %29 = vector.shape_cast %28 : vector<1x8x32xbf16> to vector<8x32xbf16>
    %30 = vector.extract_strided_slice %1 {offsets = [0, 12], sizes = [32, 178], strides = [1, 1]} : vector<32x200xbf16> to vector<32x178xbf16>
    %cst_19 = arith.constant dense<0.000000e+00> : vector<8x178xf32>
    %31 = tpu.matmul %29, %30, %cst_19 {dimension_numbers = #tpu.dot_dimension_numbers<[1], [0], [0], [1], [0, 0, 1, 1], [], []>} : vector<8x32xbf16>, vector<32x178xbf16>, vector<8x178xf32> -> vector<8x178xf32>
    %32 = arith.addf %27, %31 : vector<8x178xf32>
    %c6 = arith.constant 6 : index
    %c0_20 = arith.constant 0 : index
    %c0_21 = arith.constant 0 : index
    %33 = vector.load %arg2[%c6, %c0_20, %c0_21] : memref<9x8x32xbf16, #tpu.memory_space<vmem>>, vector<1x8x32xbf16>
    %34 = vector.shape_cast %33 : vector<1x8x32xbf16> to vector<8x32xbf16>
    %35 = vector.extract_strided_slice %1 {offsets = [0, 20], sizes = [32, 178], strides = [1, 1]} : vector<32x200xbf16> to vector<32x178xbf16>
    %cst_22 = arith.constant dense<0.000000e+00> : vector<8x178xf32>
    %36 = tpu.matmul %34, %35, %cst_22 {dimension_numbers = #tpu.dot_dimension_numbers<[1], [0], [0], [1], [0, 0, 1, 1], [], []>} : vector<8x32xbf16>, vector<32x178xbf16>, vector<8x178xf32> -> vector<8x178xf32>
    %37 = arith.addf %32, %36 : vector<8x178xf32>
    %c7 = arith.constant 7 : index
    %c0_23 = arith.constant 0 : index
    %c0_24 = arith.constant 0 : index
    %38 = vector.load %arg2[%c7, %c0_23, %c0_24] : memref<9x8x32xbf16, #tpu.memory_space<vmem>>, vector<1x8x32xbf16>
    %39 = vector.shape_cast %38 : vector<1x8x32xbf16> to vector<8x32xbf16>
    %40 = vector.extract_strided_slice %1 {offsets = [0, 21], sizes = [32, 178], strides = [1, 1]} : vector<32x200xbf16> to vector<32x178xbf16>
    %cst_25 = arith.constant dense<0.000000e+00> : vector<8x178xf32>
    %41 = tpu.matmul %39, %40, %cst_25 {dimension_numbers = #tpu.dot_dimension_numbers<[1], [0], [0], [1], [0, 0, 1, 1], [], []>} : vector<8x32xbf16>, vector<32x178xbf16>, vector<8x178xf32> -> vector<8x178xf32>
    %42 = arith.addf %37, %41 : vector<8x178xf32>
    %c8 = arith.constant 8 : index
    %c0_26 = arith.constant 0 : index
    %c0_27 = arith.constant 0 : index
    %43 = vector.load %arg2[%c8, %c0_26, %c0_27] : memref<9x8x32xbf16, #tpu.memory_space<vmem>>, vector<1x8x32xbf16>
    %44 = vector.shape_cast %43 : vector<1x8x32xbf16> to vector<8x32xbf16>
    %45 = vector.extract_strided_slice %1 {offsets = [0, 22], sizes = [32, 178], strides = [1, 1]} : vector<32x200xbf16> to vector<32x178xbf16>
    %cst_28 = arith.constant dense<0.000000e+00> : vector<8x178xf32>
    %46 = tpu.matmul %44, %45, %cst_28 {dimension_numbers = #tpu.dot_dimension_numbers<[1], [0], [0], [1], [0, 0, 1, 1], [], []>} : vector<8x32xbf16>, vector<32x178xbf16>, vector<8x178xf32> -> vector<8x178xf32>
    %47 = arith.addf %42, %46 : vector<8x178xf32>
    %c0_29 = arith.constant 0 : index
    %c0_30 = arith.constant 0 : index
    %48 = vector.load %arg3[%c0_29, %c0_30] : memref<8x1xf32, #tpu.memory_space<vmem>>, vector<8x1xf32>
    %49 = vector.broadcast %48 : vector<8x1xf32> to vector<8x178xf32>
    %50 = arith.addf %47, %49 : vector<8x178xf32>
    %c0_31 = arith.constant 0 : index
    %c0_32 = arith.constant 0 : index
    %51 = vector.load %arg4[%c0_31, %c0_32] : memref<8x178xf32, #tpu.memory_space<vmem>>, vector<8x178xf32>
    tpu.vector_store %arg4[%c0_31, %c0_32], %50 {strides = array<i32>} : memref<8x178xf32, #tpu.memory_space<vmem>>, vector<8x178xf32>,
    return
  }
  func.func @transform_0(%arg0: i32) -> (i32, i32) {
    %c0_i32 = arith.constant 0 : i32
    %c0_i32_0 = arith.constant 0 : i32
    %c0_i32_1 = arith.constant 0 : i32
    return %c0_i32, %c0_i32_0 : i32, i32
  }
  func.func @transform_1(%arg0: i32) -> (i32, i32, i32) {
    %c0_i32 = arith.constant 0 : i32
    %c0_i32_0 = arith.constant 0 : i32
    %c0_i32_1 = arith.constant 0 : i32
    return %c0_i32, %arg0, %c0_i32_0 : i32, i32, i32
  }
  func.func @transform_2(%arg0: i32) -> (i32, i32) {
    %c0_i32 = arith.constant 0 : i32
    %c0_i32_0 = arith.constant 0 : i32
    return %arg0, %c0_i32 : i32, i32
  }
  func.func @transform_3(%arg0: i32) -> (i32, i32) {
    %c0_i32 = arith.constant 0 : i32
    %c0_i32_0 = arith.constant 0 : i32
    return %arg0, %c0_i32 : i32, i32
  }
}

</mosaic_0001>

<bundles_post_ra>
// kernel: up_forward.16
= control target key start
LH: loop header
LB: loop body
LE: loop exit
PB: predicated region body
PF: predicated region fallthrough
CT: control target
= control target key end

     0   :  { %7 = vsyncpa [#allocation3], 0  ;;  %s580_s9 = smov 0   ;;  %s582_s10 = smov 0   ;;  %s654_s0 = inlined_call_operand.vmem [shape: f32[128,4], index: 0, kind: input, shape index: {}]   ;;  %s655_s1 = inlined_call_operand.hbm [shape: f32[4,8], index: 1, kind: input, shape index: {}]   ;;  %s656_s2 = inlined_call_operand.vmem [shape: f32[128,8], index: 2, kind: output, shape index: {}]  }
   0x1   :  { %s584_s11 = smov 0  }
   0x2 LB: > { %s428_s12 = sadd.s32 4294967295, %s562_s11   ;;  %s25_s13 = sadd.s32 1, %s558_s10  ;;  %s562_s11 = sphi %s584_s11, %s13_s11   ;;  %s558_s10 = sphi %s582_s10, %s660_s10   ;;  %s554_s9 = sphi %s580_s9, %s659_s9  }
   0x3   : > { %p27_p0 = scmp.ge.s32.totalorder %s25_s13, 2  ;;  %p430_p1 = scmp.ge.s32.totalorder %s562_s11, 1 }
   0x4   : > { %p110_p2 = scmp.lt.s32.totalorder %s562_s11, 3  ;;  %p605_p4 = scmp.eq.s32.totalorder %s428_s12, 0 }
   0x5   : > { %s662_s13 = smov (%p27_p0, %s25_s13), 0  ;;  %s564_s16 = smov [#allocation2]  }
   0x6   : > { %p601_p3 = pnand %p430_p1, %p110_p2  ;;  %s125_s17 = sshll.u32 %s564_s16, 4  ;;  %s126_s17 = int_to_ptr.vmem [resolvable:$true] %s125_s17 }
   0x7   : > { %s521_s18 = scalar_lea.vmem %s126_s17, 64  ;;  %p529_p11 = scmp.lt.s32.totalorder %s126_s17, %s126_s17 }
   0x8   : > { %p479_p5 = pneg %p601_p3  ;;  %p522_p8 = scmp.ne.s32.totalorder %s126_s17, %s521_s18 }
   0x9   : > { %p530_p12 = scmp.lt.s32.totalorder %s521_s18, %s521_s18 }
   0xa   : > { %p480_p6 = pnand %p605_p4, %p479_p5 }
   0xb   : > { %p531_p13 = por %p530_p12, %p529_p11 }
   0xc   : > { %p512_p7 = pneg %p480_p6 }
   0xe   : > { %p524_p9 = pnand %p522_p8, %p512_p7 }
  0x10   : > { %p525_p10 = pneg %p524_p9 }
  0x12   : > { %p532_p0 = pnand %p531_p13, %p525_p10 }
  0x14   : > { %535 = shalt.err (!%p532_p0)
}
  0x15   : > { %482 = dma.hbm_to_vmem [thread:$0]  (!%p480_p6), %s655_s1, 64, %s126_s17, [#allocation3]  }
  0x16   : > { %147 = sbr.rel (%p601_p3) target bundleno = 237 (0xed), region = 28 }
  0x1b   : > { %549 = dma.done.wait (%p605_p4), [#allocation3], 64  }
  0x1c   : > { %551 = vsyncadd (%p605_p4), [#allocation3], 4294967232  ;;  %s435_s21 = sshll.u32 %s554_s9, 3  ;;  %vm221_vm0 = vcmask 1043456   ;;  %v195_v0 = vld [vmem:[#allocation2] sm:$0xf] }
  0x1d   : > { %p173_p1 = scmp.lt.s32.totalorder %s435_s21, 15  ;;  %vm196_vm1 = vcmask 31744   ;;  %459 = vmatprep.subr.msk.mxu0 %vm221_vm0, %v195_v0  ;;  %473 = vmatprep.subr.msk.mxu1 %vm221_vm0, %v195_v0  ;;  %vm330_vm2 = vcmask 64512  }
  0x1e   : > { %460 = vmatpush3.msk.msra.mxu0 %vm221_vm0, %v195_v0  ;;  %474 = vmatpush3.msk.msra.mxu1 %vm221_vm0, %v195_v0 }
  0x1f   : > { %s664_s21 = smov (!%p173_p1, %s435_s21), 15 }
  0x20   : > { %s436_s22 = sshll.u32 %s664_s21, 3 }
  0x21   : > { %s176_s25 = scalar_lea.vmem %s654_s0, %s436_s22  ;;  %s185_s28 = scalar_lea.vmem %s656_s2, %s436_s22 }
  0x22   : > { %v187_v1 = vld [vmem:[%s176_s25] sm:$0xff]  ;;  %v188_v3 = vld [vmem:[%s176_s25 + $0x8] sm:$0xff]  ;;  %v189_v5 = vld [vmem:[%s176_s25 + $0x10] sm:$0xff] }
  0x23   : > { %v191_v2 = vld [vmem:[%s176_s25 + $0x20] sm:$0xff]  ;;  %v192_v4 = vld [vmem:[%s176_s25 + $0x28] sm:$0xff]  ;;  %v193_v6 = vld [vmem:[%s176_s25 + $0x30] sm:$0xff]  ;;  %461 = vmatprep.mubr.msk.f32.mxu0 %vm196_vm1, %v187_v1 }
  0x24   : > { %467 = vmatprep.mubr.msk.f32.mxu1 %vm196_vm1, %v191_v2  ;;  %462 = vmatmul.mubr.msk.f32.vlgmr.msra.gmra.mxu0 %vm196_vm1, %v188_v3  ;;  %v190_v7 = vld [vmem:[%s176_s25 + $0x18] sm:$0xff] }
  0x25   : > { %468 = vmatmul.mubr.msk.f32.vlgmr.msra.gmra.mxu1 %vm196_vm1, %v192_v4  ;;  %464 = vmatprep.mubr.msk.f32.mxu0 %vm196_vm1, %v189_v5  ;;  %v194_v8 = vld [vmem:[%s176_s25 + $0x38] sm:$0xff] }
  0x26   : > { %470 = vmatprep.mubr.msk.f32.mxu1 %vm196_vm1, %v193_v6 }
  0x28   : > { %465 = vmatmul.mubr.msk.f32.gmra.mxu0 %vm196_vm1, %v190_v7 }
  0x29   : > { %471 = vmatmul.mubr.msk.f32.gmra.mxu1 %vm196_vm1, %v194_v8 }
  0xe4   : > { %v463_v9 = vpop.f32.mrf.mxu0 }
  0xe5   : > { %v469_v10 = vpop.f32.mrf.mxu1  ;;  %332 = vst.msk [vmem:[%s185_s28 + $0x8] sm:$0xff] %vm330_vm2, %v463_v9 }
  0xe6   : > { %336 = vst.msk [vmem:[%s185_s28 + $0x28] sm:$0xff] %vm330_vm2, %v469_v10  ;;  %v291_v11 = vpop.f32.mrf.mxu0 }
  0xe7   : > { %v311_v12 = vpop.f32.mrf.mxu1  ;;  %331 = vst.msk [vmem:[%s185_s28] sm:$0xff] %vm330_vm2, %v291_v11 }
  0xe8   : > { %335 = vst.msk [vmem:[%s185_s28 + $0x20] sm:$0xff] %vm330_vm2, %v311_v12  ;;  %v466_v13 = vpop.f32.mrf.mxu0 }
  0xe9   : > { %v472_v14 = vpop.f32.mrf.mxu1  ;;  %334 = vst.msk [vmem:[%s185_s28 + $0x18] sm:$0xff] %vm330_vm2, %v466_v13 }
  0xea   : > { %338 = vst.msk [vmem:[%s185_s28 + $0x38] sm:$0xff] %vm330_vm2, %v472_v14  ;;  %v301_v15 = vpop.f32.mrf.mxu0 }
  0xeb   : > { %v321_v16 = vpop.f32.mrf.mxu1  ;;  %333 = vst.msk [vmem:[%s185_s28 + $0x10] sm:$0xff] %vm330_vm2, %v301_v15 }
  0xec   : > { %337 = vst.msk [vmem:[%s185_s28 + $0x30] sm:$0xff] %vm330_vm2, %v321_v16 }
  0xed PF: > { %s13_s11 = sadd.s32 1, %s562_s11   ;;  %s659_s9 = smov %s558_s10 }
  0xee   : > { %p10_p2 = scmp.ge.s32.totalorder %s13_s11, 4   ;;  %s660_s10 = smov %s662_s13 }
  0xf0   :  { %12 = sbr.rel (!%p10_p2) target bundleno = 2 (0x2), region = 64 }
  0xf5   :  { %367 = vsyncpa [#allocation3], 1 }
  0xf6   :  { %369 = vsyncpa [#allocation3 + $0x1], 1 }

// kernel: up_forward.17
= control target key start
LH: loop header
LB: loop body
LE: loop exit
PB: predicated region body
PF: predicated region fallthrough
CT: control target
= control target key end

     0   :  { %s643_s9 = smov 0   ;;  %s645_s10 = smov 0   ;;  %s736_s0 = inlined_call_operand.vmem [shape: f32[256,4], index: 0, kind: input, shape index: {}]   ;;  %s737_s1 = inlined_call_operand.vmem [shape: f32[4,8], index: 1, kind: input, shape index: {}]   ;;  %s738_s2 = inlined_call_operand.vmem [shape: f32[256,8], index: 2, kind: output, shape index: {}]  }
   0x1   :  { %s647_s11 = smov 0  }
   0x2 LB: > { %s24_s12 = sadd.s32 1, %s622_s10  ;;  %p511_p0 = scmp.ge.s32.totalorder %s626_s11, 1  ;;  %s626_s11 = sphi %s647_s11, %s12_s11   ;;  %s622_s10 = sphi %s645_s10, %s740_s10   ;;  %s618_s9 = sphi %s643_s9, %s739_s9  }
   0x3   : > { %p26_p1 = scmp.ge.s32.totalorder %s24_s12, 2  ;;  %p136_p2 = scmp.lt.s32.totalorder %s626_s11, 3 }
   0x5   : > { %s742_s12 = smov (%p26_p1, %s24_s12), 0  ;;  %p137_p3 = pnand %p511_p0, %p136_p2 }
   0x6   : > { %s512_s15 = sshll.u32 (!%p137_p3), %s618_s9, 4 }
   0x7   : > { %140 = sbr.rel (%p137_p3) target bundleno = 226 (0xe2), region = 28  ;;  %p166_p4 = scmp.lt.s32.totalorder (!%p137_p3), %s512_s15, 31 }
   0xc   : > { %v200_v0 = vld [vmem:[%s737_s1] sm:$0xf]  ;;  %vm250_vm0 = vcmask 1043456   ;;  %s744_s15 = smov (!%p166_p4, %s512_s15), 31  ;;  %vm201_vm1 = vcmask 31744   ;;  %vm399_vm2 = vcmask 64512  }
   0xd   : > { %552 = vmatprep.subr.msk.mxu0 %vm250_vm0, %v200_v0  ;;  %578 = vmatprep.subr.msk.mxu1 %vm250_vm0, %v200_v0  ;;  %s513_s16 = sshll.u32 %s744_s15, 3 }
   0xe   : > { %553 = vmatpush3.msk.msra.mxu0 %vm250_vm0, %v200_v0  ;;  %579 = vmatpush3.msk.msra.mxu1 %vm250_vm0, %v200_v0  ;;  %s169_s19 = scalar_lea.vmem %s736_s0, %s513_s16  ;;  %s693_s22 = scalar_lea.vmem %s738_s2, %s513_s16 }
   0xf   : > { %v184_v1 = vld [vmem:[%s169_s19] sm:$0xff]  ;;  %v185_v3 = vld [vmem:[%s169_s19 + $0x8] sm:$0xff]  ;;  %v186_v5 = vld [vmem:[%s169_s19 + $0x10] sm:$0xff] }
  0x10   : > { %v192_v2 = vld [vmem:[%s169_s19 + $0x40] sm:$0xff]  ;;  %554 = vmatprep.mubr.msk.f32.mxu0 %vm201_vm1, %v184_v1  ;;  %v193_v4 = vld [vmem:[%s169_s19 + $0x48] sm:$0xff]  ;;  %v194_v6 = vld [vmem:[%s169_s19 + $0x50] sm:$0xff] }
  0x11   : > { %566 = vmatprep.mubr.msk.f32.mxu1 %vm201_vm1, %v192_v2  ;;  %555 = vmatmul.mubr.msk.f32.vlgmr.msra.gmra.mxu0 %vm201_vm1, %v185_v3  ;;  %v187_v7 = vld [vmem:[%s169_s19 + $0x18] sm:$0xff]  ;;  %v188_v9 = vld [vmem:[%s169_s19 + $0x20] sm:$0xff]  ;;  %v189_v11 = vld [vmem:[%s169_s19 + $0x28] sm:$0xff] }
  0x12   : > { %567 = vmatmul.mubr.msk.f32.vlgmr.msra.gmra.mxu1 %vm201_vm1, %v193_v4  ;;  %557 = vmatprep.mubr.msk.f32.mxu0 %vm201_vm1, %v186_v5  ;;  %v195_v8 = vld [vmem:[%s169_s19 + $0x58] sm:$0xff]  ;;  %v196_v10 = vld [vmem:[%s169_s19 + $0x60] sm:$0xff]  ;;  %v197_v12 = vld [vmem:[%s169_s19 + $0x68] sm:$0xff] }
  0x13   : > { %569 = vmatprep.mubr.msk.f32.mxu1 %vm201_vm1, %v194_v6  ;;  %v190_v13 = vld [vmem:[%s169_s19 + $0x30] sm:$0xff]  ;;  %v191_v15 = vld [vmem:[%s169_s19 + $0x38] sm:$0xff] }
  0x14   : > { %v198_v14 = vld [vmem:[%s169_s19 + $0x70] sm:$0xff]  ;;  %v199_v16 = vld [vmem:[%s169_s19 + $0x78] sm:$0xff] }
  0x15   : > { %558 = vmatmul.mubr.msk.f32.gmra.mxu0 %vm201_vm1, %v187_v7 }
  0x16   : > { %570 = vmatmul.mubr.msk.f32.gmra.mxu1 %vm201_vm1, %v195_v8  ;;  %560 = vmatprep.mubr.msk.f32.mxu0 %vm201_vm1, %v188_v9 }
  0x17   : > { %572 = vmatprep.mubr.msk.f32.mxu1 %vm201_vm1, %v196_v10 }
  0x19   : > { %561 = vmatmul.mubr.msk.f32.gmra.mxu0 %vm201_vm1, %v189_v11 }
  0x1a   : > { %573 = vmatmul.mubr.msk.f32.gmra.mxu1 %vm201_vm1, %v197_v12  ;;  %563 = vmatprep.mubr.msk.f32.mxu0 %vm201_vm1, %v190_v13 }
  0x1b   : > { %575 = vmatprep.mubr.msk.f32.mxu1 %vm201_vm1, %v198_v14 }
  0x1d   : > { %564 = vmatmul.mubr.msk.f32.gmra.mxu0 %vm201_vm1, %v191_v15 }
  0x1e   : > { %576 = vmatmul.mubr.msk.f32.gmra.mxu1 %vm201_vm1, %v199_v16 }
  0xd1   : > { %v556_v17 = vpop.f32.mrf.mxu0 }
  0xd2   : > { %v568_v18 = vpop.f32.mrf.mxu1  ;;  %401 = vst.msk [vmem:[%s693_s22 + $0x8] sm:$0xff] %vm399_vm2, %v556_v17 }
  0xd3   : > { %409 = vst.msk [vmem:[%s693_s22 + $0x48] sm:$0xff] %vm399_vm2, %v568_v18  ;;  %v320_v19 = vpop.f32.mrf.mxu0 }
  0xd4   : > { %v360_v20 = vpop.f32.mrf.mxu1  ;;  %400 = vst.msk [vmem:[%s693_s22] sm:$0xff] %vm399_vm2, %v320_v19 }
  0xd5   : > { %408 = vst.msk [vmem:[%s693_s22 + $0x40] sm:$0xff] %vm399_vm2, %v360_v20  ;;  %v559_v21 = vpop.f32.mrf.mxu0 }
  0xd6   : > { %v571_v22 = vpop.f32.mrf.mxu1  ;;  %403 = vst.msk [vmem:[%s693_s22 + $0x18] sm:$0xff] %vm399_vm2, %v559_v21 }
  0xd7   : > { %411 = vst.msk [vmem:[%s693_s22 + $0x58] sm:$0xff] %vm399_vm2, %v571_v22  ;;  %v330_v23 = vpop.f32.mrf.mxu0 }
  0xd8   : > { %v370_v24 = vpop.f32.mrf.mxu1  ;;  %402 = vst.msk [vmem:[%s693_s22 + $0x10] sm:$0xff] %vm399_vm2, %v330_v23 }
  0xd9   : > { %410 = vst.msk [vmem:[%s693_s22 + $0x50] sm:$0xff] %vm399_vm2, %v370_v24  ;;  %v562_v25 = vpop.f32.mrf.mxu0 }
  0xda   : > { %v574_v26 = vpop.f32.mrf.mxu1  ;;  %405 = vst.msk [vmem:[%s693_s22 + $0x28] sm:$0xff] %vm399_vm2, %v562_v25 }
  0xdb   : > { %413 = vst.msk [vmem:[%s693_s22 + $0x68] sm:$0xff] %vm399_vm2, %v574_v26  ;;  %v340_v27 = vpop.f32.mrf.mxu0 }
  0xdc   : > { %v380_v28 = vpop.f32.mrf.mxu1  ;;  %404 = vst.msk [vmem:[%s693_s22 + $0x20] sm:$0xff] %vm399_vm2, %v340_v27 }
  0xdd   : > { %412 = vst.msk [vmem:[%s693_s22 + $0x60] sm:$0xff] %vm399_vm2, %v380_v28  ;;  %v565_v29 = vpop.f32.mrf.mxu0 }
  0xde   : > { %v577_v30 = vpop.f32.mrf.mxu1  ;;  %407 = vst.msk [vmem:[%s693_s22 + $0x38] sm:$0xff] %vm399_vm2, %v565_v29 }
  0xdf   : > { %415 = vst.msk [vmem:[%s693_s22 + $0x78] sm:$0xff] %vm399_vm2, %v577_v30  ;;  %v350_v31 = vpop.f32.mrf.mxu0 }
  0xe0   : > { %v390_v32 = vpop.f32.mrf.mxu1  ;;  %406 = vst.msk [vmem:[%s693_s22 + $0x30] sm:$0xff] %vm399_vm2, %v350_v31 }
  0xe1   : > { %414 = vst.msk [vmem:[%s693_s22 + $0x70] sm:$0xff] %vm399_vm2, %v390_v32 }
  0xe2 PF: > { %s12_s11 = sadd.s32 1, %s626_s11   ;;  %s739_s9 = smov %s622_s10 }
  0xe3   : > { %p9_p5 = scmp.ge.s32.totalorder %s12_s11, 4   ;;  %s740_s10 = smov %s742_s12 }
  0xe5   :  { %11 = sbr.rel (!%p9_p5) target bundleno = 2 (0x2), region = 61 }

// kernel: up_forward.18
= control target key start
LH: loop header
LB: loop body
LE: loop exit
PB: predicated region body
PF: predicated region fallthrough
CT: control target
= control target key end

     0   :  { %s637_s9 = smov 0   ;;  %s639_s10 = smov 0   ;;  %s730_s0 = inlined_call_operand.vmem [shape: f32[256,8], index: 0, kind: input, shape index: {}]   ;;  %s731_s1 = inlined_call_operand.vmem [shape: f32[8,8], index: 1, kind: input, shape index: {}]   ;;  %s732_s2 = inlined_call_operand.vmem [shape: f32[256,8], index: 2, kind: output, shape index: {}]  }
   0x1   :  { %s641_s11 = smov 0  }
   0x2 LB: > { %s24_s12 = sadd.s32 1, %s616_s10  ;;  %p506_p0 = scmp.ge.s32.totalorder %s620_s11, 1  ;;  %s620_s11 = sphi %s641_s11, %s12_s11   ;;  %s616_s10 = sphi %s639_s10, %s734_s10   ;;  %s612_s9 = sphi %s637_s9, %s733_s9  }
   0x3   : > { %p26_p1 = scmp.ge.s32.totalorder %s24_s12, 2  ;;  %p136_p2 = scmp.lt.s32.totalorder %s620_s11, 3 }
   0x5   : > { %s736_s12 = smov (%p26_p1, %s24_s12), 0  ;;  %p137_p3 = pnand %p506_p0, %p136_p2 }
   0x6   : > { %s507_s15 = sshll.u32 (!%p137_p3), %s612_s9, 4 }
   0x7   : > { %140 = sbr.rel (%p137_p3) target bundleno = 226 (0xe2), region = 28  ;;  %p166_p4 = scmp.lt.s32.totalorder (!%p137_p3), %s507_s15, 31 }
   0xc   : > { %v200_v0 = vld [vmem:[%s731_s1] sm:$0xff]  ;;  %s738_s15 = smov (!%p166_p4, %s507_s15), 31  ;;  %vm201_vm0 = vcmask 64512  }
   0xd   : > { %546 = vmatprep.subr.mxu0 %v200_v0  ;;  %572 = vmatprep.subr.mxu1 %v200_v0  ;;  %s508_s16 = sshll.u32 %s738_s15, 3 }
   0xe   : > { %547 = vmatpush3.msra.mxu0 %v200_v0  ;;  %573 = vmatpush3.msra.mxu1 %v200_v0  ;;  %s169_s19 = scalar_lea.vmem %s730_s0, %s508_s16  ;;  %s687_s22 = scalar_lea.vmem %s732_s2, %s508_s16 }
   0xf   : > { %v184_v1 = vld [vmem:[%s169_s19] sm:$0xff]  ;;  %v185_v3 = vld [vmem:[%s169_s19 + $0x8] sm:$0xff]  ;;  %v186_v5 = vld [vmem:[%s169_s19 + $0x10] sm:$0xff] }
  0x10   : > { %v192_v2 = vld [vmem:[%s169_s19 + $0x40] sm:$0xff]  ;;  %548 = vmatprep.mubr.msk.f32.mxu0 %vm201_vm0, %v184_v1  ;;  %v193_v4 = vld [vmem:[%s169_s19 + $0x48] sm:$0xff]  ;;  %v194_v6 = vld [vmem:[%s169_s19 + $0x50] sm:$0xff] }
  0x11   : > { %560 = vmatprep.mubr.msk.f32.mxu1 %vm201_vm0, %v192_v2  ;;  %549 = vmatmul.mubr.msk.f32.vlgmr.msra.gmra.mxu0 %vm201_vm0, %v185_v3  ;;  %v187_v7 = vld [vmem:[%s169_s19 + $0x18] sm:$0xff]  ;;  %v188_v9 = vld [vmem:[%s169_s19 + $0x20] sm:$0xff]  ;;  %v189_v11 = vld [vmem:[%s169_s19 + $0x28] sm:$0xff] }
  0x12   : > { %561 = vmatmul.mubr.msk.f32.vlgmr.msra.gmra.mxu1 %vm201_vm0, %v193_v4  ;;  %551 = vmatprep.mubr.msk.f32.mxu0 %vm201_vm0, %v186_v5  ;;  %v195_v8 = vld [vmem:[%s169_s19 + $0x58] sm:$0xff]  ;;  %v196_v10 = vld [vmem:[%s169_s19 + $0x60] sm:$0xff]  ;;  %v197_v12 = vld [vmem:[%s169_s19 + $0x68] sm:$0xff] }
  0x13   : > { %563 = vmatprep.mubr.msk.f32.mxu1 %vm201_vm0, %v194_v6  ;;  %v190_v13 = vld [vmem:[%s169_s19 + $0x30] sm:$0xff]  ;;  %v191_v15 = vld [vmem:[%s169_s19 + $0x38] sm:$0xff] }
  0x14   : > { %v198_v14 = vld [vmem:[%s169_s19 + $0x70] sm:$0xff]  ;;  %v199_v16 = vld [vmem:[%s169_s19 + $0x78] sm:$0xff] }
  0x15   : > { %552 = vmatmul.mubr.msk.f32.gmra.mxu0 %vm201_vm0, %v187_v7 }
  0x16   : > { %564 = vmatmul.mubr.msk.f32.gmra.mxu1 %vm201_vm0, %v195_v8  ;;  %554 = vmatprep.mubr.msk.f32.mxu0 %vm201_vm0, %v188_v9 }
  0x17   : > { %566 = vmatprep.mubr.msk.f32.mxu1 %vm201_vm0, %v196_v10 }
  0x19   : > { %555 = vmatmul.mubr.msk.f32.gmra.mxu0 %vm201_vm0, %v189_v11 }
  0x1a   : > { %567 = vmatmul.mubr.msk.f32.gmra.mxu1 %vm201_vm0, %v197_v12  ;;  %557 = vmatprep.mubr.msk.f32.mxu0 %vm201_vm0, %v190_v13 }
  0x1b   : > { %569 = vmatprep.mubr.msk.f32.mxu1 %vm201_vm0, %v198_v14 }
  0x1d   : > { %558 = vmatmul.mubr.msk.f32.gmra.mxu0 %vm201_vm0, %v191_v15 }
  0x1e   : > { %570 = vmatmul.mubr.msk.f32.gmra.mxu1 %vm201_vm0, %v199_v16 }
  0xd1   : > { %v550_v17 = vpop.f32.mrf.mxu0 }
  0xd2   : > { %v562_v18 = vpop.f32.mrf.mxu1  ;;  %396 = vst.msk [vmem:[%s687_s22 + $0x8] sm:$0xff] %vm201_vm0, %v550_v17 }
  0xd3   : > { %404 = vst.msk [vmem:[%s687_s22 + $0x48] sm:$0xff] %vm201_vm0, %v562_v18  ;;  %v316_v19 = vpop.f32.mrf.mxu0 }
  0xd4   : > { %v356_v20 = vpop.f32.mrf.mxu1  ;;  %395 = vst.msk [vmem:[%s687_s22] sm:$0xff] %vm201_vm0, %v316_v19 }
  0xd5   : > { %403 = vst.msk [vmem:[%s687_s22 + $0x40] sm:$0xff] %vm201_vm0, %v356_v20  ;;  %v553_v21 = vpop.f32.mrf.mxu0 }
  0xd6   : > { %v565_v22 = vpop.f32.mrf.mxu1  ;;  %398 = vst.msk [vmem:[%s687_s22 + $0x18] sm:$0xff] %vm201_vm0, %v553_v21 }
  0xd7   : > { %406 = vst.msk [vmem:[%s687_s22 + $0x58] sm:$0xff] %vm201_vm0, %v565_v22  ;;  %v326_v23 = vpop.f32.mrf.mxu0 }
  0xd8   : > { %v366_v24 = vpop.f32.mrf.mxu1  ;;  %397 = vst.msk [vmem:[%s687_s22 + $0x10] sm:$0xff] %vm201_vm0, %v326_v23 }
  0xd9   : > { %405 = vst.msk [vmem:[%s687_s22 + $0x50] sm:$0xff] %vm201_vm0, %v366_v24  ;;  %v556_v25 = vpop.f32.mrf.mxu0 }
  0xda   : > { %v568_v26 = vpop.f32.mrf.mxu1  ;;  %400 = vst.msk [vmem:[%s687_s22 + $0x28] sm:$0xff] %vm201_vm0, %v556_v25 }
  0xdb   : > { %408 = vst.msk [vmem:[%s687_s22 + $0x68] sm:$0xff] %vm201_vm0, %v568_v26  ;;  %v336_v27 = vpop.f32.mrf.mxu0 }
  0xdc   : > { %v376_v28 = vpop.f32.mrf.mxu1  ;;  %399 = vst.msk [vmem:[%s687_s22 + $0x20] sm:$0xff] %vm201_vm0, %v336_v27 }
  0xdd   : > { %407 = vst.msk [vmem:[%s687_s22 + $0x60] sm:$0xff] %vm201_vm0, %v376_v28  ;;  %v559_v29 = vpop.f32.mrf.mxu0 }
  0xde   : > { %v571_v30 = vpop.f32.mrf.mxu1  ;;  %402 = vst.msk [vmem:[%s687_s22 + $0x38] sm:$0xff] %vm201_vm0, %v559_v29 }
  0xdf   : > { %410 = vst.msk [vmem:[%s687_s22 + $0x78] sm:$0xff] %vm201_vm0, %v571_v30  ;;  %v346_v31 = vpop.f32.mrf.mxu0 }
  0xe0   : > { %v386_v32 = vpop.f32.mrf.mxu1  ;;  %401 = vst.msk [vmem:[%s687_s22 + $0x30] sm:$0xff] %vm201_vm0, %v346_v31 }
  0xe1   : > { %409 = vst.msk [vmem:[%s687_s22 + $0x70] sm:$0xff] %vm201_vm0, %v386_v32 }
  0xe2 PF: > { %s12_s11 = sadd.s32 1, %s620_s11   ;;  %s733_s9 = smov %s616_s10 }
  0xe3   : > { %p9_p5 = scmp.ge.s32.totalorder %s12_s11, 4   ;;  %s734_s10 = smov %s736_s12 }
  0xe5   :  { %11 = sbr.rel (!%p9_p5) target bundleno = 2 (0x2), region = 61 }

// kernel: up_forward.19
= control target key start
LH: loop header
LB: loop body
LE: loop exit
PB: predicated region body
PF: predicated region fallthrough
CT: control target
= control target key end

     0   :  { %s664_s12 = smov 0   ;;  %s666_s13 = smov 0   ;;  %s743_s0 = inlined_call_operand.vmem [shape: f32[16,200], index: 0, kind: input, shape index: {}]   ;;  %s744_s1 = inlined_call_operand.vmem [shape: f32[9,16,1], index: 1, kind: input, shape index: {}]   ;;  %s745_s2 = inlined_call_operand.vmem [shape: f32[16,1], index: 2, kind: input, shape index: {}]   ;;  %s746_s3 = inlined_call_operand.vmem [shape: f32[16,178], index: 3, kind: output, shape index: {}]  }
   0x1   :  { %s668_s14 = smov 0  }
   0x2 LB: > { %s551_s15 = sadd.s32 4294967295, %s633_s14   ;;  %s681_s16 = sadd.s32 1, %s633_s14   ;;  %s633_s14 = sphi %s668_s14, %s749_s14   ;;  %s629_s13 = sphi %s666_s13, %s748_s13   ;;  %s625_s12 = sphi %s664_s12, %s747_s12  }
   0x3   : > { %s43_s17 = ssub.s32 %s633_s14, %s681_s16  ;;  %s46_s18 = sadd.s32 1, %s629_s13 }
   0x4   : > { %p44_p0 = scmp.eq.s32.totalorder %s43_s17, 0  ;;  %p53_p1 = scmp.ne.s32.totalorder %s629_s13, %s625_s12 }
   0x5   : > { %p54_p2 = scmp.eq.s32.totalorder %s633_s14, 0  ;;  %p554_p4 = scmp.ge.s32.totalorder %s633_s14, 2 }
   0x6   : > { %s690_s19 = scalar_select %p44_p0, %s629_s13, %s46_s18  }
   0x7   : > { %p55_p3 = por %p54_p2, %p53_p1  ;;  %131 = sbr.rel (%p554_p4) target bundleno = 21 (0x15), region = 16 }
   0xc   : > { %142 = sbr.rel (!%p55_p3) target bundleno = 21 (0x15), region = 24  ;;  %s144_s20 = sand.u32 (%p55_p3), 1, %s629_s13  }
   0xd   : > { %s555_s21 = sshll.u32 (%p55_p3), %s633_s14, 3  ;;  %s574_s22 = smul.u32 (%p55_p3), 72, %s144_s20 }
   0xe   : > { %s148_s25 = scalar_lea.vmem (%p55_p3), %s744_s1, %s555_s21 }
   0xf   : > { %v193_v0 = vld [vmem:[%s148_s25] sm:$0xff] (%p55_p3)  ;;  %v195_v1 = vld [vmem:[%s148_s25 + $0x10] sm:$0xff] (%p55_p3)  ;;  %s146_s26 = scalar_lea.vmem (%p55_p3), [#allocation2], %s574_s22 }
  0x10   : > { %v197_v2 = vld [vmem:[%s148_s25 + $0x20] sm:$0xff] (%p55_p3)  ;;  %v199_v3 = vld [vmem:[%s148_s25 + $0x30] sm:$0xff] (%p55_p3)  ;;  %194 = vst [vmem:[%s146_s26] sm:$0xff] (%p55_p3), %v193_v0  ;;  %196 = vst [vmem:[%s146_s26 + $0x8] sm:$0xff] (%p55_p3), %v195_v1 }
  0x11   : > { %v201_v4 = vld [vmem:[%s148_s25 + $0x40] sm:$0xff]  ;;  %v203_v5 = vld [vmem:[%s148_s25 + $0x50] sm:$0xff]  ;;  %198 = vst [vmem:[%s146_s26 + $0x10] sm:$0xff] %v197_v2  ;;  %200 = vst [vmem:[%s146_s26 + $0x18] sm:$0xff] %v199_v3 }
  0x12   : > { %202 = vst [vmem:[%s146_s26 + $0x20] sm:$0xff] %v201_v4  ;;  %204 = vst [vmem:[%s146_s26 + $0x28] sm:$0xff] %v203_v5  ;;  %v205_v6 = vld [vmem:[%s148_s25 + $0x60] sm:$0xff]  ;;  %v207_v7 = vld [vmem:[%s148_s25 + $0x70] sm:$0xff] }
  0x13   : > { %v209_v8 = vld [vmem:[%s148_s25 + $0x80] sm:$0xff]  ;;  %206 = vst [vmem:[%s146_s26 + $0x30] sm:$0xff] %v205_v6  ;;  %208 = vst [vmem:[%s146_s26 + $0x38] sm:$0xff] %v207_v7 }
  0x14   : > { %210 = vst [vmem:[%s146_s26 + $0x40] sm:$0xff] %v209_v8 }
  0x15 PF: > { %p556_p5 = scmp.ge.s32.totalorder %s633_s14, 1  ;;  %p222_p6 = scmp.lt.s32.totalorder %s633_s14, 3 }
  0x17   : > { %p223_p7 = pnand %p556_p5, %p222_p6 }
  0x18   : > { %s229_s27 = sand.u32 (!%p223_p7), 1, %s625_s12   ;;  %p261_p8 = scmp.lt.s32.totalorder (!%p223_p7), %s551_s15, 1 }
  0x19   : > { %226 = sbr.rel (%p223_p7) target bundleno = 307 (0x133), region = 66  ;;  %s636_s11 = smov (!%p223_p7), 127  }
  0x1a   : > { %s575_s28 = smul.u32 (!%p223_p7), 72, %s229_s27  ;;  %s637_s12 = smov (!%p223_p7), 126  }
  0x1b   : > { %s638_s14 = smov (!%p223_p7), 118   ;;  %s639_s17 = smov (!%p223_p7), 117  }
  0x1c   : > { %s231_s29 = scalar_lea.vmem (!%p223_p7), [#allocation2], %s575_s28  ;;  %s640_s18 = smov (!%p223_p7), 116  }
  0x1d   : > { %s641_s20 = smov (!%p223_p7), 108   ;;  %s642_s21 = smov (!%p223_p7), 107  }
  0x1e   : > { %v635_v9 = vmov 0   ;;  %v564_v10 = vld [vmem:[%s231_s29 + $0x18] sm:$0xff]  ;;  %v562_v11 = vld [vmem:[%s231_s29 + $0x8] sm:$0xff]  ;;  %v565_v12 = vld [vmem:[%s231_s29 + $0x20] sm:$0xff]  ;;  %s751_s15 = smov (!%p261_p8, %s551_s15), 1  ;;  %s643_s22 = smov 106  }
  0x1f   : > { %610 = vset.pattern.permute.xlu1 %v635_v9  ;;  %609 = vset.pattern.permute.xlu0 %v635_v9  ;;  %v563_v13 = vld [vmem:[%s231_s29 + $0x10] sm:$0xff]  ;;  %v566_v15 = vld [vmem:[%s231_s29 + $0x28] sm:$0xff]  ;;  %s559_s30 = sshll.u32 %s751_s15, 3  ;;  %v569_v16 = vld [vmem:[%s231_s29 + $0x40] sm:$0xff]  ;;  %s572_s7 = sshll.u32 %s751_s15, 4  ;;  %vm302_vm0 = vcmask 1039360  }
  0x20   : > { %333 = vperm.xlu1 %610, %v564_v10   ;;  %291 = vperm.xlu0 %609, %v562_v11   ;;  %v567_v14 = vld [vmem:[%s231_s29 + $0x30] sm:$0xff]  ;;  %v568_v17 = vld [vmem:[%s231_s29 + $0x38] sm:$0xff]  ;;  %s269_s6 = scalar_lea.vmem %s745_s2, %s559_s30  ;;  %v277_v19 = vld [vmem:[%s231_s29] sm:$0xff]  ;;  %s265_s10 = scalar_lea.vmem %s743_s0, %s572_s7  ;;  %vm323_vm1 = vcmask 1031168   ;;  %vm344_vm2 = vcmask 965632   ;;  %vm365_vm3 = vcmask 957440  }
  0x21   : > { %v455_v18 = vld [vmem:[%s269_s6] sm:$0xff]  ;;  %v276_v21 = vld [vmem:[%s265_s10 + $0x8] sm:$0xff]  ;;  %vm386_vm4 = vcmask 949248   ;;  %vm407_vm5 = vcmask 883712   ;;  %vm428_vm6 = vcmask 875520   ;;  %vm449_vm7 = vcmask 867328   ;;  %s274_s25 = scalar_lea.vmem %s746_s3, %s572_s7 }
  0x22   : > { %v717_v20 = vld [vmem:[%s265_s10] sm:$0xff]  ;;  %vm464_vm8 = vcmask 408576  }
  0x24   : > { %354 = vperm.xlu1 %610, %v565_v12   ;;  %312 = vperm.xlu0 %609, %v563_v13  }
  0x28   : > { %396 = vperm.xlu1 %610, %v567_v14   ;;  %375 = vperm.xlu0 %609, %v566_v15  }
  0x2c   : > { %438 = vperm.xlu1 %610, %v569_v16   ;;  %417 = vperm.xlu0 %609, %v568_v17  }
  0x30   : > { %458 = vperm.xlu1 %610, %v455_v18   ;;  %280 = vperm.xlu0 %609, %v277_v19  }
  0x9b   : > { %v292_v22 = vpop.permute.xlu0 %291  ;;  %v334_v28 = vpop.permute.xlu1 %333 }
  0x9c   : > { %v294_v23 = vmul.f32 %v292_v22, %v717_v20  ;;  %v295_v24 = vmul.f32 %v292_v22, %v276_v21  ;;  %v336_v29 = vmul.f32 %v334_v28, %v717_v20  ;;  %v337_v30 = vmul.f32 %v334_v28, %v276_v21 }
  0x9e   : > { %298 = vrot.lane.b32.xlu1 %v294_v23, %s636_s11  ;;  %300 = vrot.lane.b32.xlu0 %v295_v24, %s636_s11 }
  0x9f   : > { %v313_v25 = vpop.permute.xlu0 %312  ;;  %v355_v31 = vpop.permute.xlu1 %354 }
  0xa0   : > { %v315_v26 = vmul.f32 %v313_v25, %v717_v20  ;;  %v316_v27 = vmul.f32 %v313_v25, %v276_v21  ;;  %v357_v32 = vmul.f32 %v355_v31, %v717_v20  ;;  %v358_v33 = vmul.f32 %v355_v31, %v276_v21 }
  0xa2   : > { %319 = vrot.lane.b32.xlu1 %v315_v26, %s637_s12  ;;  %321 = vrot.lane.b32.xlu0 %v316_v27, %s637_s12 }
  0xa3   : > { %v376_v34 = vpop.permute.xlu0 %375  ;;  %v397_v37 = vpop.permute.xlu1 %396 }
  0xa4   : > { %v378_v35 = vmul.f32 %v376_v34, %v717_v20  ;;  %v379_v36 = vmul.f32 %v376_v34, %v276_v21  ;;  %v399_v38 = vmul.f32 %v397_v37, %v717_v20  ;;  %v400_v39 = vmul.f32 %v397_v37, %v276_v21 }
  0xa6   : > { %340 = vrot.lane.b32.xlu1 %v336_v29, %s638_s14  ;;  %342 = vrot.lane.b32.xlu0 %v337_v30, %s638_s14 }
  0xa7   : > { %v418_v40 = vpop.permute.xlu0 %417  ;;  %v439_v43 = vpop.permute.xlu1 %438 }
  0xa8   : > { %v420_v41 = vmul.f32 %v418_v40, %v717_v20  ;;  %v421_v42 = vmul.f32 %v418_v40, %v276_v21  ;;  %v441_v44 = vmul.f32 %v439_v43, %v717_v20  ;;  %v442_v45 = vmul.f32 %v439_v43, %v276_v21 }
  0xaa   : > { %361 = vrot.lane.b32.xlu1 %v357_v32, %s639_s17  ;;  %363 = vrot.lane.b32.xlu0 %v358_v33, %s639_s17 }
  0xab   : > { %v459_v46 = vpop.permute.xlu1 %458  ;;  %v281_v47 = vpop.permute.xlu0 %280 }
  0xac   : > { %v284_v56 = vmul.f32 %v281_v47, %v276_v21  ;;  %v283_v58 = vmul.f32 %v281_v47, %v717_v20 }
  0xae   : > { %382 = vrot.lane.b32.xlu1 %v378_v35, %s640_s18  ;;  %384 = vrot.lane.b32.xlu0 %v379_v36, %s640_s18 }
  0xb2   : > { %403 = vrot.lane.b32.xlu1 %v399_v38, %s641_s20  ;;  %405 = vrot.lane.b32.xlu0 %v400_v39, %s641_s20 }
  0xb6   : > { %424 = vrot.lane.b32.xlu1 %v420_v41, %s642_s21  ;;  %426 = vrot.lane.b32.xlu0 %v421_v42, %s642_s21 }
  0xba   : > { %447 = vrot.lane.b32.xlu1 %v442_v45, %s643_s22  ;;  %445 = vrot.lane.b32.xlu0 %v441_v44, %s643_s22 }
 0x110   : > { %v299_v48 = vpop.permute.xlu1 %298  ;;  %v301_v49 = vpop.permute.xlu0 %300 }
 0x111   : > { %v303_v57 = vsel %vm302_vm0, %v299_v48, %v301_v49  ;;  %v307_v59 = vadd.f32 %v301_v49, %v284_v56 }
 0x112   : > { %v306_v61 = vadd.f32 %v303_v57, %v283_v58 }
 0x114   : > { %v320_v50 = vpop.permute.xlu1 %319  ;;  %v322_v51 = vpop.permute.xlu0 %321 }
 0x115   : > { %v324_v60 = vsel %vm323_vm1, %v320_v50, %v322_v51  ;;  %v328_v0 = vadd.f32 %v322_v51, %v307_v59 }
 0x116   : > { %v327_v2 = vadd.f32 %v324_v60, %v306_v61 }
 0x118   : > { %v341_v52 = vpop.permute.xlu1 %340  ;;  %v343_v53 = vpop.permute.xlu0 %342 }
 0x119   : > { %v345_v1 = vsel %vm344_vm2, %v341_v52, %v343_v53  ;;  %v349_v3 = vadd.f32 %v343_v53, %v328_v0 }
 0x11a   : > { %v348_v5 = vadd.f32 %v345_v1, %v327_v2 }
 0x11c   : > { %v362_v54 = vpop.permute.xlu1 %361  ;;  %v364_v55 = vpop.permute.xlu0 %363 }
 0x11d   : > { %v366_v4 = vsel %vm365_vm3, %v362_v54, %v364_v55  ;;  %v370_v8 = vadd.f32 %v364_v55, %v349_v3 }
 0x11e   : > { %v369_v10 = vadd.f32 %v366_v4, %v348_v5 }
 0x120   : > { %v383_v62 = vpop.permute.xlu1 %382  ;;  %v385_v63 = vpop.permute.xlu0 %384 }
 0x121   : > { %v387_v9 = vsel %vm386_vm4, %v383_v62, %v385_v63  ;;  %v391_v11 = vadd.f32 %v385_v63, %v370_v8 }
 0x122   : > { %v390_v13 = vadd.f32 %v387_v9, %v369_v10 }
 0x124   : > { %v404_v6 = vpop.permute.xlu1 %403  ;;  %v406_v7 = vpop.permute.xlu0 %405 }
 0x125   : > { %v408_v12 = vsel %vm407_vm5, %v404_v6, %v406_v7  ;;  %v412_v16 = vadd.f32 %v406_v7, %v391_v11 }
 0x126   : > { %v411_v18 = vadd.f32 %v408_v12, %v390_v13 }
 0x128   : > { %v425_v14 = vpop.permute.xlu1 %424  ;;  %v427_v15 = vpop.permute.xlu0 %426 }
 0x129   : > { %v429_v17 = vsel %vm428_vm6, %v425_v14, %v427_v15  ;;  %v433_v19 = vadd.f32 %v427_v15, %v412_v16 }
 0x12a   : > { %v432_v20 = vadd.f32 %v429_v17, %v411_v18 }
 0x12c   : > { %v448_v21 = vpop.permute.xlu1 %447  ;;  %v446_v22 = vpop.permute.xlu0 %445 }
 0x12d   : > { %v454_v23 = vadd.f32 %v448_v21, %v433_v19  ;;  %v450_v24 = vsel %vm449_vm7, %v446_v22, %v448_v21 }
 0x12e   : > { %v453_v25 = vadd.f32 %v450_v24, %v432_v20 }
 0x12f   : > { %v462_v26 = vadd.f32 %v459_v46, %v454_v23 }
 0x130   : > { %v461_v27 = vadd.f32 %v459_v46, %v453_v25 }
 0x131   : > { %465 = vst.msk [vmem:[%s274_s25 + $0x8] sm:$0xff] %vm464_vm8, %v462_v26 }
 0x132   : > { %463 = vst [vmem:[%s274_s25] sm:$0xff] %v461_v27 }
 0x133 PF: > { %p10_p9 = scmp.ge.s32.totalorder %s681_s16, 4   ;;  %s747_s12 = smov %s629_s13 }
 0x134   : > { %s748_s13 = smov %s690_s19  ;;  %s749_s14 = smov %s681_s16 }
 0x135   :  { %12 = sbr.rel (!%p10_p9) target bundleno = 2 (0x2), region = 119 }

// kernel: up_forward.21
= control target key start
LH: loop header
LB: loop body
LE: loop exit
PB: predicated region body
PF: predicated region fallthrough
CT: control target
= control target key end

     0   :  { %s749_s9 = smov 0   ;;  %s751_s10 = smov 0   ;;  %s878_s0 = inlined_call_operand.vmem [shape: f32[256,8], index: 0, kind: input, shape index: {}]   ;;  %s879_s1 = inlined_call_operand.vmem [shape: f32[8,8], index: 1, kind: input, shape index: {}]   ;;  %s880_s2 = inlined_call_operand.vmem [shape: f32[256,8], index: 2, kind: output, shape index: {}]  }
   0x1   :  { %s753_s11 = smov 0  }
   0x2 LB: > { %s24_s12 = sadd.s32 1, %s728_s10  ;;  %p586_p0 = scmp.ge.s32.totalorder %s732_s11, 1  ;;  %s732_s11 = sphi %s753_s11, %s12_s11   ;;  %s728_s10 = sphi %s751_s10, %s882_s10   ;;  %s724_s9 = sphi %s749_s9, %s881_s9  }
   0x3   : > { %p26_p1 = scmp.ge.s32.totalorder %s24_s12, 2  ;;  %p136_p2 = scmp.lt.s32.totalorder %s732_s11, 3 }
   0x5   : > { %s884_s12 = smov (%p26_p1, %s24_s12), 0  ;;  %p137_p3 = pnand %p586_p0, %p136_p2 }
   0x6   : > { %s587_s15 = sshll.u32 (!%p137_p3), %s724_s9, 4 }
   0x7   : > { %140 = sbr.rel (%p137_p3) target bundleno = 246 (0xf6), region = 28  ;;  %p166_p4 = scmp.lt.s32.totalorder (!%p137_p3), %s587_s15, 31 }
   0xc   : > { %v200_v0 = vld [vmem:[%s879_s1] sm:$0xff]  ;;  %s886_s15 = smov (!%p166_p4, %s587_s15), 31  ;;  %vm201_vm0 = vcmask 64512  }
   0xd   : > { %626 = vmatprep.subr.mxu0 %v200_v0  ;;  %652 = vmatprep.subr.mxu1 %v200_v0  ;;  %s588_s16 = sshll.u32 %s886_s15, 3 }
   0xe   : > { %627 = vmatpush3.msra.mxu0 %v200_v0  ;;  %653 = vmatpush3.msra.mxu1 %v200_v0  ;;  %s169_s19 = scalar_lea.vmem %s878_s0, %s588_s16  ;;  %s826_s22 = scalar_lea.vmem %s880_s2, %s588_s16 }
   0xf   : > { %v184_v1 = vld [vmem:[%s169_s19] sm:$0xff]  ;;  %v185_v3 = vld [vmem:[%s169_s19 + $0x8] sm:$0xff]  ;;  %v186_v5 = vld [vmem:[%s169_s19 + $0x10] sm:$0xff] }
  0x10   : > { %v192_v2 = vld [vmem:[%s169_s19 + $0x40] sm:$0xff]  ;;  %628 = vmatprep.mubr.msk.f32.mxu0 %vm201_vm0, %v184_v1  ;;  %v193_v4 = vld [vmem:[%s169_s19 + $0x48] sm:$0xff]  ;;  %v194_v6 = vld [vmem:[%s169_s19 + $0x50] sm:$0xff] }
  0x11   : > { %640 = vmatprep.mubr.msk.f32.mxu1 %vm201_vm0, %v192_v2  ;;  %629 = vmatmul.mubr.msk.f32.vlgmr.msra.gmra.mxu0 %vm201_vm0, %v185_v3  ;;  %v187_v7 = vld [vmem:[%s169_s19 + $0x18] sm:$0xff]  ;;  %v188_v9 = vld [vmem:[%s169_s19 + $0x20] sm:$0xff]  ;;  %v189_v11 = vld [vmem:[%s169_s19 + $0x28] sm:$0xff] }
  0x12   : > { %641 = vmatmul.mubr.msk.f32.vlgmr.msra.gmra.mxu1 %vm201_vm0, %v193_v4  ;;  %631 = vmatprep.mubr.msk.f32.mxu0 %vm201_vm0, %v186_v5  ;;  %v195_v8 = vld [vmem:[%s169_s19 + $0x58] sm:$0xff]  ;;  %v196_v10 = vld [vmem:[%s169_s19 + $0x60] sm:$0xff]  ;;  %v197_v12 = vld [vmem:[%s169_s19 + $0x68] sm:$0xff] }
  0x13   : > { %643 = vmatprep.mubr.msk.f32.mxu1 %vm201_vm0, %v194_v6  ;;  %v190_v13 = vld [vmem:[%s169_s19 + $0x30] sm:$0xff]  ;;  %v191_v15 = vld [vmem:[%s169_s19 + $0x38] sm:$0xff] }
  0x14   : > { %v198_v14 = vld [vmem:[%s169_s19 + $0x70] sm:$0xff]  ;;  %v199_v16 = vld [vmem:[%s169_s19 + $0x78] sm:$0xff] }
  0x15   : > { %632 = vmatmul.mubr.msk.f32.gmra.mxu0 %vm201_vm0, %v187_v7 }
  0x16   : > { %644 = vmatmul.mubr.msk.f32.gmra.mxu1 %vm201_vm0, %v195_v8  ;;  %634 = vmatprep.mubr.msk.f32.mxu0 %vm201_vm0, %v188_v9 }
  0x17   : > { %646 = vmatprep.mubr.msk.f32.mxu1 %vm201_vm0, %v196_v10 }
  0x19   : > { %635 = vmatmul.mubr.msk.f32.gmra.mxu0 %vm201_vm0, %v189_v11 }
  0x1a   : > { %647 = vmatmul.mubr.msk.f32.gmra.mxu1 %vm201_vm0, %v197_v12  ;;  %637 = vmatprep.mubr.msk.f32.mxu0 %vm201_vm0, %v190_v13 }
  0x1b   : > { %649 = vmatprep.mubr.msk.f32.mxu1 %vm201_vm0, %v198_v14 }
  0x1d   : > { %638 = vmatmul.mubr.msk.f32.gmra.mxu0 %vm201_vm0, %v191_v15 }
  0x1e   : > { %650 = vmatmul.mubr.msk.f32.gmra.mxu1 %vm201_vm0, %v199_v16 }
  0xd1   : > { %v630_v17 = vpop.f32.mrf.mxu0 }
  0xd2   : > { %v642_v18 = vpop.f32.mrf.mxu1  ;;  %v412_v19 = vmul.f32 0.70710677, %v630_v17  ;;  %v396_v51 = vmul.f32 0.5, %v630_v17 }
  0xd3   : > { %v420_v20 = vmul.f32 0.70710677, %v642_v18  ;;  %v316_v21 = vpop.f32.mrf.mxu0  ;;  %v404_v54 = vmul.f32 0.5, %v642_v18 }
  0xd4   : > { %v356_v22 = vpop.f32.mrf.mxu1  ;;  %678 = verf.f32 %v412_v19  ;;  %v411_v23 = vmul.f32 0.70710677, %v316_v21  ;;  %v395_v58 = vmul.f32 0.5, %v316_v21 }
  0xd5   : > { %680 = verf.f32 %v420_v20  ;;  %v419_v24 = vmul.f32 0.70710677, %v356_v22  ;;  %v633_v25 = vpop.f32.mrf.mxu0  ;;  %v403_v62 = vmul.f32 0.5, %v356_v22 }
  0xd6   : > { %v645_v26 = vpop.f32.mrf.mxu1  ;;  %682 = verf.f32 %v411_v23  ;;  %v414_v27 = vmul.f32 0.70710677, %v633_v25  ;;  %v398_v2 = vmul.f32 0.5, %v633_v25 }
  0xd7   : > { %684 = verf.f32 %v419_v24  ;;  %v422_v28 = vmul.f32 0.70710677, %v645_v26  ;;  %v326_v29 = vpop.f32.mrf.mxu0  ;;  %v406_v6 = vmul.f32 0.5, %v645_v26 }
  0xd8   : > { %v794_v30 = vpop.f32.mrf.mxu1  ;;  %686 = verf.f32 %v414_v27  ;;  %v413_v31 = vmul.f32 0.70710677, %v326_v29  ;;  %v397_v10 = vmul.f32 0.5, %v326_v29 }
  0xd9   : > { %688 = verf.f32 %v422_v28  ;;  %v421_v32 = vmul.f32 0.70710677, %v794_v30  ;;  %v797_v33 = vpop.f32.mrf.mxu0  ;;  %v405_v14 = vmul.f32 0.5, %v794_v30 }
  0xda   : > { %v799_v34 = vpop.f32.mrf.mxu1  ;;  %690 = verf.f32 %v413_v31  ;;  %v416_v35 = vmul.f32 0.70710677, %v797_v33  ;;  %v400_v18 = vmul.f32 0.5, %v797_v33 }
  0xdb   : > { %692 = verf.f32 %v421_v32  ;;  %v424_v36 = vmul.f32 0.70710677, %v799_v34  ;;  %v803_v37 = vpop.f32.mrf.mxu0  ;;  %v408_v22 = vmul.f32 0.5, %v799_v34 }
  0xdc   : > { %v805_v38 = vpop.f32.mrf.mxu1  ;;  %694 = verf.f32 %v416_v35  ;;  %v415_v39 = vmul.f32 0.70710677, %v803_v37  ;;  %v399_v26 = vmul.f32 0.5, %v803_v37 }
  0xdd   : > { %696 = verf.f32 %v424_v36  ;;  %v423_v40 = vmul.f32 0.70710677, %v805_v38  ;;  %v809_v41 = vpop.f32.mrf.mxu0  ;;  %v407_v30 = vmul.f32 0.5, %v805_v38 }
  0xde   : > { %v811_v42 = vpop.f32.mrf.mxu1  ;;  %698 = verf.f32 %v415_v39  ;;  %v418_v43 = vmul.f32 0.70710677, %v809_v41  ;;  %v402_v34 = vmul.f32 0.5, %v809_v41 }
  0xdf   : > { %700 = verf.f32 %v423_v40  ;;  %v426_v44 = vmul.f32 0.70710677, %v811_v42  ;;  %v815_v45 = vpop.f32.mrf.mxu0  ;;  %v410_v39 = vmul.f32 0.5, %v811_v42 }
  0xe0   : > { %v817_v46 = vpop.f32.mrf.mxu1  ;;  %702 = verf.f32 %v418_v43  ;;  %v417_v47 = vmul.f32 0.70710677, %v815_v45 }
  0xe1   : > { %v679_v48 = vpop.eup %678  ;;  %704 = verf.f32 %v426_v44  ;;  %v425_v49 = vmul.f32 0.70710677, %v817_v46  ;;  %v401_v44 = vmul.f32 0.5, %v815_v45 }
  0xe2   : > { %v681_v50 = vpop.eup %680  ;;  %v444_v52 = vadd.f32 1.0, %v679_v48  ;;  %706 = verf.f32 %v417_v47  ;;  %v409_v48 = vmul.f32 0.5, %v817_v46 }
  0xe3   : > { %v683_v53 = vpop.eup %682  ;;  %v452_v55 = vadd.f32 1.0, %v681_v50  ;;  %708 = verf.f32 %v425_v49 }
  0xe4   : > { %v685_v56 = vpop.eup %684  ;;  %v460_v57 = vmul.f32 %v444_v52, %v396_v51  ;;  %v443_v59 = vadd.f32 1.0, %v683_v53 }
  0xe5   : > { %v687_v60 = vpop.eup %686  ;;  %v468_v61 = vmul.f32 %v452_v55, %v404_v54  ;;  %v451_v63 = vadd.f32 1.0, %v685_v56 }
  0xe6   : > { %v689_v0 = vpop.eup %688  ;;  %476 = vst.msk [vmem:[%s826_s22 + $0x8] sm:$0xff] %vm201_vm0, %v460_v57  ;;  %v459_v1 = vmul.f32 %v443_v59, %v395_v58  ;;  %v446_v3 = vadd.f32 1.0, %v687_v60 }
  0xe7   : > { %v691_v4 = vpop.eup %690  ;;  %484 = vst.msk [vmem:[%s826_s22 + $0x48] sm:$0xff] %vm201_vm0, %v468_v61  ;;  %v467_v5 = vmul.f32 %v451_v63, %v403_v62  ;;  %v454_v7 = vadd.f32 1.0, %v689_v0 }
  0xe8   : > { %v693_v8 = vpop.eup %692  ;;  %475 = vst.msk [vmem:[%s826_s22] sm:$0xff] %vm201_vm0, %v459_v1  ;;  %v462_v9 = vmul.f32 %v446_v3, %v398_v2  ;;  %v445_v11 = vadd.f32 1.0, %v691_v4 }
  0xe9   : > { %v695_v12 = vpop.eup %694  ;;  %483 = vst.msk [vmem:[%s826_s22 + $0x40] sm:$0xff] %vm201_vm0, %v467_v5  ;;  %v470_v13 = vmul.f32 %v454_v7, %v406_v6  ;;  %v453_v15 = vadd.f32 1.0, %v693_v8 }
  0xea   : > { %v697_v16 = vpop.eup %696  ;;  %478 = vst.msk [vmem:[%s826_s22 + $0x18] sm:$0xff] %vm201_vm0, %v462_v9  ;;  %v461_v17 = vmul.f32 %v445_v11, %v397_v10  ;;  %v448_v19 = vadd.f32 1.0, %v695_v12 }
  0xeb   : > { %v699_v20 = vpop.eup %698  ;;  %486 = vst.msk [vmem:[%s826_s22 + $0x58] sm:$0xff] %vm201_vm0, %v470_v13  ;;  %v469_v21 = vmul.f32 %v453_v15, %v405_v14  ;;  %v456_v23 = vadd.f32 1.0, %v697_v16 }
  0xec   : > { %v701_v24 = vpop.eup %700  ;;  %477 = vst.msk [vmem:[%s826_s22 + $0x10] sm:$0xff] %vm201_vm0, %v461_v17  ;;  %v464_v25 = vmul.f32 %v448_v19, %v400_v18  ;;  %v447_v27 = vadd.f32 1.0, %v699_v20 }
  0xed   : > { %v703_v28 = vpop.eup %702  ;;  %485 = vst.msk [vmem:[%s826_s22 + $0x50] sm:$0xff] %vm201_vm0, %v469_v21  ;;  %v472_v29 = vmul.f32 %v456_v23, %v408_v22  ;;  %v455_v31 = vadd.f32 1.0, %v701_v24 }
  0xee   : > { %v705_v32 = vpop.eup %704  ;;  %480 = vst.msk [vmem:[%s826_s22 + $0x28] sm:$0xff] %vm201_vm0, %v464_v25  ;;  %v463_v33 = vmul.f32 %v447_v27, %v399_v26  ;;  %v450_v35 = vadd.f32 1.0, %v703_v28 }
  0xef   : > { %v707_v36 = vpop.eup %706  ;;  %488 = vst.msk [vmem:[%s826_s22 + $0x68] sm:$0xff] %vm201_vm0, %v472_v29  ;;  %v471_v37 = vmul.f32 %v455_v31, %v407_v30  ;;  %v458_v38 = vadd.f32 1.0, %v705_v32 }
  0xf0   : > { %v709_v40 = vpop.eup %708  ;;  %479 = vst.msk [vmem:[%s826_s22 + $0x20] sm:$0xff] %vm201_vm0, %v463_v33  ;;  %v466_v43 = vmul.f32 %v450_v35, %v402_v34  ;;  %v449_v47 = vadd.f32 1.0, %v707_v36 }
  0xf1   : > { %487 = vst.msk [vmem:[%s826_s22 + $0x60] sm:$0xff] %vm201_vm0, %v471_v37  ;;  %v474_v41 = vmul.f32 %v458_v38, %v410_v39  ;;  %v457_v49 = vadd.f32 1.0, %v709_v40 }
  0xf2   : > { %482 = vst.msk [vmem:[%s826_s22 + $0x38] sm:$0xff] %vm201_vm0, %v466_v43  ;;  %v465_v50 = vmul.f32 %v449_v47, %v401_v44 }
  0xf3   : > { %490 = vst.msk [vmem:[%s826_s22 + $0x78] sm:$0xff] %vm201_vm0, %v474_v41  ;;  %v473_v42 = vmul.f32 %v457_v49, %v409_v48 }
  0xf4   : > { %481 = vst.msk [vmem:[%s826_s22 + $0x30] sm:$0xff] %vm201_vm0, %v465_v50 }
  0xf5   : > { %489 = vst.msk [vmem:[%s826_s22 + $0x70] sm:$0xff] %vm201_vm0, %v473_v42 }
  0xf6 PF: > { %s12_s11 = sadd.s32 1, %s732_s11   ;;  %s881_s9 = smov %s728_s10 }
  0xf7   : > { %p9_p5 = scmp.ge.s32.totalorder %s12_s11, 4   ;;  %s882_s10 = smov %s884_s12 }
  0xf9   :  { %11 = sbr.rel (!%p9_p5) target bundleno = 2 (0x2), region = 61 }

// kernel: up_forward.20
= control target key start
LH: loop header
LB: loop body
LE: loop exit
PB: predicated region body
PF: predicated region fallthrough
CT: control target
= control target key end

     0   :  { %v933_v0 = vmov 0.0   ;;  %vm934_vm0 = vmmov 0   ;;  %v935_v6 = vmov 0   ;;  %vm67_vm1 = vcmask 130048   ;;  %s1147_s1 = inlined_call_operand.vmem [shape: f32[16,128], index: 1, kind: input, shape index: {}]   ;;  %s1148_s2 = inlined_call_operand.vmem [shape: bf16[16,16], index: 2, kind: input, shape index: {}]   ;;  %s1149_s0 = inlined_call_operand.vmem [shape: f32[16,128], index: 0, kind: input, shape index: {}]   ;;  %s1150_s7 = inlined_call_operand.vmem [shape: f32[16,1], index: 7, kind: input, shape index: {}]   ;;  %s1151_s6 = inlined_call_operand.vmem [shape: bf16[16,16], index: 6, kind: input, shape index: {}]   ;;  %s1152_s4 = inlined_call_operand.vmem [shape: bf16[16,16], index: 4, kind: input, shape index: {}]   ;;  %s1153_s8 = inlined_call_operand.vmem [shape: f32[32,16], index: 8, kind: input, shape index: {}]   ;;  %s1154_s3 = inlined_call_operand.vmem [shape: f32[16,1], index: 3, kind: input, shape index: {}]   ;;  %s1155_s5 = inlined_call_operand.vmem [shape: f32[16,1], index: 5, kind: input, shape index: {}]   ;;  %s1156_s10 = inlined_call_operand.vmem [shape: f32[32,32], index: 10, kind: input, shape index: {}]   ;;  %s1157_s9 = inlined_call_operand.vmem [shape: f32[32,1], index: 9, kind: input, shape index: {}]   ;;  %s1158_s11 = inlined_call_operand.vmem [shape: f32[32,1], index: 11, kind: input, shape index: {}]   ;;  %s1159_s12 = inlined_call_operand.vmem [shape: f32[16,128], index: 12, kind: output, shape index: {}]  }
   0x1   :  { %826 = vmatprep.subr.bf16.mxu0 %v933_v0  ;;  %v45_v1 = vld [vmem:[%s1147_s1] sm:$0xff]  ;;  %v46_v2 = vld [vmem:[%s1147_s1 + $0x8] sm:$0xff]  ;;  %828 = vmatprep.mubr.msk.bf16.mxu0 %vm934_vm0, %v933_v0  ;;  %vm254_vm2 = vcmask 523264   ;;  %vm535_vm3 = vcmask 1048064   ;;  %v240_v49 = vld [vmem:[%s1153_s8 + $0x10] sm:$0xff]  ;;  %vm369_vm4 = vcmask 261120  }
   0x2   :  { %v47_v3 = vpack.c.bf16 %v46_v2, %v45_v1  ;;  %v906_v4 = vld [vmem:[%s1148_s2] sm:$0xff]   ;;  %904 = vset.pattern.permute.xlu0 %v935_v6  ;;  %905 = vset.pattern.permute.xlu1 %v935_v6  ;;  %v43_v7 = vld [vmem:[%s1149_s0 + $0x8] sm:$0xff]  ;;  %v241_v50 = vld [vmem:[%s1153_s8 + $0x18] sm:$0xff] }
   0x3   :  { %v42_v5 = vld [vmem:[%s1149_s0] sm:$0xff]  ;;  %832 = vmatprep.subr.bf16.mxu1 %v933_v0  ;;  %834 = vmatprep.mubr.msk.bf16.mxu1 %vm934_vm0, %v933_v0  ;;  %v178_v9 = vld [vmem:[%s1150_s7 + $0x8] sm:$0xff]  ;;  %v244_v6 = vld [vmem:[%s1157_s9 + $0x10] sm:$0xff] }
   0x4   :  { %827 = vmatpush3.bf16.msra.mxu0 %v47_v3  ;;  %v44_v8 = vpack.c.bf16 %v43_v7, %v42_v5  ;;  %186 = vperm.xlu0 %904, %v178_v9   ;;  %v177_v10 = vld [vmem:[%s1150_s7] sm:$0xff]  ;;  %s936_s7 = smov 64   ;;  %v51_v41 = vld [vmem:[%s1154_s3 + $0x8] sm:$0xff]  ;;  %v245_v3 = vld [vmem:[%s1157_s9 + $0x18] sm:$0xff] }
   0x5   :  { %838 = vmatprep.subr.bf16.mxu0 %v933_v0  ;;  %v907_v11 = vld [vmem:[%s1151_s6] sm:$0xff]   ;;  %v115_v43 = vld [vmem:[%s1155_s5 + $0x8] sm:$0xff] }
   0x6   :  { %833 = vmatpush3.bf16.msra.mxu1 %v44_v8  ;;  %v908_v27 = vld [vmem:[%s1152_s4] sm:$0xff]   ;;  %v239_v48 = vld [vmem:[%s1153_s8 + $0x8] sm:$0xff] }
   0x7   :  { %829 = vmatmul.mubr.msk.bf16.vlgmr.msra.gmra.mxu0 %vm67_vm1, %v906_v4  ;;  %v238_v29 = vld [vmem:[%s1153_s8] sm:$0xff]  ;;  %v243_v4 = vld [vmem:[%s1157_s9 + $0x8] sm:$0xff] }
   0x8   :  { %839 = vmatpush3.bf16.msra.mxu0 %v44_v8  ;;  %840 = vmatprep.mubr.msk.bf16.mxu0 %vm934_vm0, %v933_v0  ;;  %v50_v36 = vld [vmem:[%s1154_s3] sm:$0xff]  ;;  %v248_v0 = vld [vmem:[%s1156_s10 + $0x10] sm:$0xff] }
   0x9   :  { %181 = vperm.xlu0 %904, %v177_v10   ;;  %835 = vmatmul.mubr.msk.bf16.vlgmr.msra.gmra.mxu1 %vm67_vm1, %v908_v27  ;;  %v114_v42 = vld [vmem:[%s1155_s5] sm:$0xff] }
   0xa   :  { %848 = vmatprep.mubr.msk.f32.mxu1 %vm67_vm1, %v238_v29  ;;  %v246_v62 = vld [vmem:[%s1156_s10] sm:$0xff] }
   0xb   :  { %v242_v8 = vld [vmem:[%s1157_s9] sm:$0xff] }
   0xf   :  { %841 = vmatmul.mubr.msk.bf16.vlgmr.msra.gmra.mxu0 %vm67_vm1, %v907_v11 }
  0x10   :  { %862 = vmatprep.mubr.msk.f32.mxu0 %vm369_vm4, %v246_v62 }
  0x7f   :  { %v187_v16 = vpop.permute.xlu0 %186 }
  0x84   :  { %v182_v21 = vpop.permute.xlu0 %181 }
  0xc7   :  { %v1031_v12 = vpop.f32.mrf.mxu0 }
  0xc9   :  { %v830_v13 = vpop.f32.mrf.mxu0  ;;  %v1076_v51 = vpop.f32.mrf.mxu1 }
  0xcb   :  { %v1033_v14 = vpop.f32.mrf.mxu0  ;;  %v836_v52 = vpop.f32.mrf.mxu1 }
  0xcd   :  { %v831_v15 = vpop.f32.mrf.mxu0  ;;  %v1078_v53 = vpop.f32.mrf.mxu1 }
  0xce   :  { %v247_v15 = vld [vmem:[%s1156_s10 + $0x8] sm:$0xff] }
  0xcf   :  { %v231_v17 = vpop.f32.mrf.mxu0  ;;  %v837_v54 = vpop.f32.mrf.mxu1 }
  0xd0   :  { %v232_v24 = vadd.f32 %v231_v17, %v182_v21 }
  0xd1   :  { %v842_v18 = vpop.f32.mrf.mxu0 }
  0xd2   :  { %v264_v26 = vsel %vm254_vm2, %v232_v24, -inf  ;;  %v255_v28 = vsel %vm254_vm2, %v232_v24, 0.0  ;;  %v536_v35 = vsel %vm535_vm3, %v232_v24, -inf }
  0xd3   :  { %v234_v19 = vpop.f32.mrf.mxu0 }
  0xd4   :  { %v235_v20 = vadd.f32 %v234_v19, %v187_v16  ;;  %v249_v16 = vld [vmem:[%s1156_s10 + $0x18] sm:$0xff] }
  0xd5   :  { %v843_v22 = vpop.f32.mrf.mxu0 }
  0xd6   :  { %523 = vrot.lane.b32.xlu1 %v235_v20, %s936_s7  ;;  %v258_v23 = vsel %vm254_vm2, %v235_v20, 0.0  ;;  %v267_v25 = vsel %vm254_vm2, %v235_v20, -inf  ;;  %v539_v33 = vsel %vm535_vm3, %v235_v20, -inf }
  0xd7   :  { %259 = vadd.xlane.f32.xlu0 %v258_v23 }
  0xda   :  { %521 = vrot.lane.b32.xlu1 %v232_v24, %s936_s7 }
  0xdb   :  { %268 = vmax.xlane.f32.xlu0 %v267_v25  ;;  %v251_v25 = vld [vmem:[%s1158_s11 + $0x8] sm:$0xff] }
  0xdf   :  { %265 = vmax.xlane.f32.xlu0 %v264_v26 }
  0xfe   :  { %256 = vadd.xlane.f32.xlu1 %v255_v28  ;;  %v250_v28 = vld [vmem:[%s1158_s11] sm:$0xff] }
 0x148   :  { %v524_v30 = vpop.permute.xlu1 %523 }
 0x149   :  { %v530_v31 = vsel %vm254_vm2, %v524_v30, 0.0 }
 0x14a   :  { %531 = vadd.xlane.f32.xlu1 %v530_v31 }
 0x14c   :  { %v522_v32 = vpop.permute.xlu1 %521 }
 0x14d   :  { %v527_v34 = vsel %vm254_vm2, %v522_v32, 0.0  ;;  %v252_v32 = vld [vmem:[%s1158_s11 + $0x10] sm:$0xff] }
 0x14e   :  { %540 = vmax.xlane.f32.xlu1 %v539_v33  ;;  %528 = vadd.xlane.f32.xlu0 %v527_v34 }
 0x152   :  { %537 = vmax.xlane.f32.xlu0 %v536_v35 }
 0x15f   :  { %54 = vperm.xlu1 %905, %v50_v36  }
 0x160   :  { %v260_v37 = vpop.xlane.xlu0 %259 }
 0x161   :  { %v263_v38 = vmul.f32 0.015625, %v260_v37 }
 0x163   :  { %118 = vperm.xlu1 %905, %v114_v42  }
 0x164   :  { %v269_v39 = vpop.xlane.xlu0 %268 }
 0x165   :  { %v271_v40 = vadd.f32 %v269_v39, %v263_v38 }
 0x167   :  { %844 = vmatprep.subr.mxu1 %v271_v40  ;;  %123 = vperm.xlu1 %905, %v115_v43  }
 0x168   :  { %59 = vperm.xlu0 %904, %v51_v41   ;;  %845 = vmatpush3.msra.mxu1 %v271_v40  ;;  %v266_v46 = vpop.xlane.xlu0 %265 }
 0x187   :  { %v257_v44 = vpop.xlane.xlu1 %256 }
 0x188   :  { %v262_v45 = vmul.f32 0.015625, %v257_v44 }
 0x18a   :  { %v270_v47 = vadd.f32 %v266_v46, %v262_v45 }
 0x18c   :  { %846 = vmatprep.subr.mxu1 %v270_v47 }
 0x18d   :  { %847 = vmatpush3.msra.mxu1 %v270_v47 }
 0x18e   :  { %849 = vmatmul.mubr.msk.f32.vlgmr.msra.gmra.mxu1 %vm67_vm1, %v239_v48 }
 0x18f   :  { %851 = vmatprep.mubr.msk.f32.mxu1 %vm67_vm1, %v240_v49 }
 0x192   :  { %852 = vmatmul.mubr.msk.f32.gmra.mxu1 %vm67_vm1, %v241_v50 }
 0x193   :  { %872 = vmatprep.mubr.msk.f32.mxu1 %vm67_vm1, %v238_v29  ;;  %v253_v29 = vld [vmem:[%s1158_s11 + $0x18] sm:$0xff] }
 0x1d3   :  { %v532_v55 = vpop.xlane.xlu1 %531 }
 0x1d4   :  { %v534_v56 = vmul.f32 0.015625, %v532_v55 }
 0x1d7   :  { %v541_v57 = vpop.xlane.xlu1 %540  ;;  %v529_v58 = vpop.xlane.xlu0 %528 }
 0x1d8   :  { %v543_v59 = vadd.f32 %v541_v57, %v534_v56  ;;  %v533_v60 = vmul.f32 0.015625, %v529_v58 }
 0x1da   :  { %868 = vmatprep.subr.mxu1 %v543_v59 }
 0x1db   :  { %v538_v61 = vpop.xlane.xlu0 %537  ;;  %869 = vmatpush3.msra.mxu1 %v543_v59 }
 0x1dc   :  { %v542_v63 = vadd.f32 %v538_v61, %v533_v60 }
 0x1de   :  { %870 = vmatprep.subr.mxu1 %v542_v63 }
 0x1df   :  { %871 = vmatpush3.msra.mxu1 %v542_v63 }
 0x1e0   :  { %873 = vmatmul.mubr.msk.f32.vlgmr.msra.gmra.mxu1 %vm67_vm1, %v239_v48 }
 0x1e1   :  { %875 = vmatprep.mubr.msk.f32.mxu1 %vm67_vm1, %v240_v49 }
 0x1e4   :  { %876 = vmatmul.mubr.msk.f32.gmra.mxu1 %vm67_vm1, %v241_v50 }
 0x1e5   :  { %889 = vmatprep.mubr.msk.f32.mxu1 %vm369_vm4, %v248_v0 }
 0x24e   :  { %v850_v1 = vpop.f32.mrf.mxu1 }
 0x24f   :  { %v356_v10 = vadd.f32 %v850_v1, %v243_v4 }
 0x250   :  { %v350_v2 = vpop.f32.mrf.mxu1 }
 0x251   :  { %v351_v13 = vadd.f32 %v350_v2, %v242_v8 }
 0x252   :  { %v853_v5 = vpop.f32.mrf.mxu1 }
 0x253   :  { %v366_v7 = vadd.f32 %v853_v5, %v245_v3 }
 0x254   :  { %v360_v9 = vpop.f32.mrf.mxu1 }
 0x255   :  { %v361_v11 = vadd.f32 %v360_v9, %v244_v6  ;;  %854 = vmatprep.subr.mxu0 %v366_v7 }
 0x256   :  { %855 = vmatpush3.msra.mxu0 %v366_v7 }
 0x257   :  { %856 = vmatprep.subr.mxu0 %v361_v11 }
 0x258   :  { %857 = vmatpush3.msra.mxu0 %v361_v11 }
 0x259   :  { %858 = vmatprep.subr.mxu0 %v356_v10 }
 0x25a   :  { %859 = vmatpush3.msra.mxu0 %v356_v10 }
 0x25b   :  { %860 = vmatprep.subr.mxu0 %v351_v13 }
 0x25c   :  { %861 = vmatpush3.msra.mxu0 %v351_v13 }
 0x25d   :  { %863 = vmatmul.mubr.msk.f32.vlgmr.msra.gmra.mxu0 %vm369_vm4, %v247_v15 }
 0x25e   :  { %865 = vmatprep.mubr.msk.f32.mxu0 %vm369_vm4, %v248_v0 }
 0x261   :  { %866 = vmatmul.mubr.msk.f32.gmra.mxu0 %vm369_vm4, %v249_v16 }
 0x262   :  { %886 = vmatprep.mubr.msk.f32.mxu0 %vm369_vm4, %v246_v62 }
 0x2a0   :  { %v874_v17 = vpop.f32.mrf.mxu1 }
 0x2a1   :  { %v616_v23 = vadd.f32 %v874_v17, %v243_v4 }
 0x2a2   :  { %v610_v18 = vpop.f32.mrf.mxu1 }
 0x2a3   :  { %v611_v24 = vadd.f32 %v610_v18, %v242_v8 }
 0x2a4   :  { %v877_v19 = vpop.f32.mrf.mxu1 }
 0x2a5   :  { %v626_v20 = vadd.f32 %v877_v19, %v245_v3 }
 0x2a6   :  { %v620_v21 = vpop.f32.mrf.mxu1 }
 0x2a7   :  { %v621_v22 = vadd.f32 %v620_v21, %v244_v6  ;;  %878 = vmatprep.subr.mxu0 %v626_v20  ;;  %892 = vmatprep.subr.mxu1 %v626_v20 }
 0x2a8   :  { %879 = vmatpush3.msra.mxu0 %v626_v20  ;;  %896 = vmatpush3.msra.mxu1 %v626_v20 }
 0x2a9   :  { %880 = vmatprep.subr.mxu0 %v621_v22  ;;  %893 = vmatprep.subr.mxu1 %v621_v22 }
 0x2aa   :  { %881 = vmatpush3.msra.mxu0 %v621_v22  ;;  %897 = vmatpush3.msra.mxu1 %v621_v22 }
 0x2ab   :  { %882 = vmatprep.subr.mxu0 %v616_v23  ;;  %894 = vmatprep.subr.mxu1 %v616_v23 }
 0x2ac   :  { %883 = vmatpush3.msra.mxu0 %v616_v23  ;;  %898 = vmatpush3.msra.mxu1 %v616_v23 }
 0x2ad   :  { %884 = vmatprep.subr.mxu0 %v611_v24  ;;  %895 = vmatprep.subr.mxu1 %v611_v24 }
 0x2ae   :  { %885 = vmatpush3.msra.mxu0 %v611_v24  ;;  %899 = vmatpush3.msra.mxu1 %v611_v24 }
 0x2af   :  { %887 = vmatmul.mubr.msk.f32.vlgmr.msra.gmra.mxu0 %vm369_vm4, %v247_v15  ;;  %890 = vmatmul.mubr.msk.f32.vlgmr.msra.gmra.mxu1 %vm369_vm4, %v249_v16 }
 0x31d   :  { %v864_v26 = vpop.f32.mrf.mxu0 }
 0x31e   :  { %v454_v30 = vadd.f32 %v864_v26, %v251_v25 }
 0x31f   :  { %v448_v27 = vpop.f32.mrf.mxu0 }
 0x320   :  { %v449_v33 = vadd.f32 %v448_v27, %v250_v28 }
 0x321   :  { %v867_v31 = vpop.f32.mrf.mxu0 }
 0x322   :  { %v464_v34 = vadd.f32 %v867_v31, %v253_v29 }
 0x323   :  { %v458_v35 = vpop.f32.mrf.mxu0 }
 0x324   :  { %v468_v36 = vmax.f32 %v454_v30, %v464_v34  ;;  %v459_v37 = vadd.f32 %v458_v35, %v252_v32 }
 0x326   :  { %v470_v38 = vsub.f32 %v454_v30, %v468_v36  ;;  %v476_v39 = vsub.f32 %v464_v34, %v468_v36  ;;  %v467_v40 = vmax.f32 %v449_v33, %v459_v37 }
 0x328   :  { %v473_v41 = vmul.f32 1.442695, %v470_v38  ;;  %v479_v42 = vmul.f32 1.442695, %v476_v39  ;;  %v469_v43 = vsub.f32 %v449_v33, %v467_v40  ;;  %v475_v44 = vsub.f32 %v459_v37, %v467_v40 }
 0x32a   :  { %909 = vpow2.f32 %v473_v41  ;;  %v471_v45 = vmul.f32 1.442695, %v469_v43  ;;  %v477_v46 = vmul.f32 1.442695, %v475_v44 }
 0x32b   :  { %911 = vpow2.f32 %v479_v42 }
 0x32c   :  { %913 = vpow2.f32 %v471_v45 }
 0x32d   :  { %915 = vpow2.f32 %v477_v46 }
 0x337   :  { %v910_v47 = vpop.eup %909 }
 0x338   :  { %v912_v48 = vpop.eup %911 }
 0x339   :  { %v914_v49 = vpop.eup %913  ;;  %v482_v50 = vadd.f32 %v912_v48, %v910_v47 }
 0x33a   :  { %v916_v52 = vpop.eup %915 }
 0x33b   :  { %v481_v54 = vadd.f32 %v916_v52, %v914_v49  ;;  %917 = vrcp.f32 %v482_v50 }
 0x33d   :  { %919 = vrcp.f32 %v481_v54 }
 0x348   :  { %v918_v55 = vpop.eup %917 }
 0x349   :  { %v488_v56 = vmul.f32 %v918_v55, %v910_v47  ;;  %v502_v59 = vmul.f32 %v918_v55, %v912_v48 }
 0x34a   :  { %v920_v57 = vpop.eup %919 }
 0x34b   :  { %496 = vperm.xlu1 %905, %v488_v56   ;;  %v487_v58 = vmul.f32 %v920_v57, %v914_v49  ;;  %v501_v60 = vmul.f32 %v920_v57, %v916_v52 }
 0x34d   :  { %491 = vperm.xlu0 %904, %v487_v58  }
 0x34f   :  { %510 = vperm.xlu1 %905, %v502_v59  }
 0x351   :  { %505 = vperm.xlu0 %904, %v501_v60  }
 0x36f   :  { %v888_v61 = vpop.f32.mrf.mxu0  ;;  %v891_v62 = vpop.f32.mrf.mxu1 }
 0x370   :  { %v701_v63 = vadd.f32 %v888_v61, %v251_v25  ;;  %v711_v0 = vadd.f32 %v891_v62, %v253_v29  ;;  %v55_v29 = vpop.permute.xlu1 %54 }
 0x371   :  { %v695_v1 = vpop.f32.mrf.mxu0  ;;  %v705_v2 = vpop.f32.mrf.mxu1  ;;  %v106_v38 = vadd.f32 %v1031_v12, %v55_v29 }
 0x372   :  { %v715_v3 = vmax.f32 %v701_v63, %v711_v0  ;;  %v696_v4 = vadd.f32 %v695_v1, %v250_v28  ;;  %v706_v5 = vadd.f32 %v705_v2, %v252_v32  ;;  %v60_v32 = vpop.permute.xlu0 %59 }
 0x373   :  { %v109_v35 = vadd.f32 %v1033_v14, %v60_v32 }
 0x374   :  { %v717_v6 = vsub.f32 %v701_v63, %v715_v3  ;;  %v723_v7 = vsub.f32 %v711_v0, %v715_v3  ;;  %v714_v8 = vmax.f32 %v696_v4, %v706_v5  ;;  %v119_v30 = vpop.permute.xlu1 %118 }
 0x375   :  { %v169_v39 = vadd.f32 %v1076_v51, %v119_v30 }
 0x376   :  { %v720_v9 = vmul.f32 1.442695, %v717_v6  ;;  %v726_v10 = vmul.f32 1.442695, %v723_v7  ;;  %v716_v11 = vsub.f32 %v696_v4, %v714_v8  ;;  %v722_v13 = vsub.f32 %v706_v5, %v714_v8 }
 0x378   :  { %921 = vpow2.f32 %v720_v9  ;;  %v718_v15 = vmul.f32 1.442695, %v716_v11  ;;  %v724_v16 = vmul.f32 1.442695, %v722_v13  ;;  %v124_v31 = vpop.permute.xlu1 %123 }
 0x379   :  { %923 = vpow2.f32 %v726_v10  ;;  %v172_v36 = vadd.f32 %v1078_v53, %v124_v31 }
 0x37a   :  { %925 = vpow2.f32 %v718_v15 }
 0x37b   :  { %927 = vpow2.f32 %v724_v16 }
 0x385   :  { %v922_v17 = vpop.eup %921 }
 0x386   :  { %v924_v18 = vpop.eup %923 }
 0x387   :  { %v926_v19 = vpop.eup %925  ;;  %v729_v20 = vadd.f32 %v924_v18, %v922_v17 }
 0x388   :  { %v928_v21 = vpop.eup %927 }
 0x389   :  { %v728_v22 = vadd.f32 %v928_v21, %v926_v19  ;;  %929 = vrcp.f32 %v729_v20 }
 0x38b   :  { %931 = vrcp.f32 %v728_v22 }
 0x396   :  { %v930_v23 = vpop.eup %929 }
 0x397   :  { %v735_v24 = vmul.f32 %v930_v23, %v922_v17  ;;  %v749_v27 = vmul.f32 %v930_v23, %v924_v18 }
 0x398   :  { %v932_v25 = vpop.eup %931 }
 0x399   :  { %743 = vperm.xlu1 %905, %v735_v24   ;;  %v734_v26 = vmul.f32 %v932_v25, %v926_v19  ;;  %v748_v28 = vmul.f32 %v932_v25, %v928_v21 }
 0x39b   :  { %738 = vperm.xlu0 %904, %v734_v26  }
 0x39d   :  { %757 = vperm.xlu1 %905, %v749_v27  }
 0x39f   :  { %752 = vperm.xlu0 %904, %v748_v28  }
 0x3c6   :  { %v497_v33 = vpop.permute.xlu1 %496 }
 0x3c7   :  { %v500_v40 = vmul.f32 %v497_v33, %v109_v35 }
 0x3c8   :  { %v492_v34 = vpop.permute.xlu0 %491 }
 0x3c9   :  { %v499_v43 = vmul.f32 %v492_v34, %v106_v38 }
 0x3ca   :  { %v511_v37 = vpop.permute.xlu1 %510 }
 0x3cb   :  { %v514_v41 = vmul.f32 %v511_v37, %v172_v36 }
 0x3cc   :  { %v506_v42 = vpop.permute.xlu0 %505 }
 0x3cd   :  { %v516_v44 = vadd.f32 %v514_v41, %v500_v40  ;;  %v513_v45 = vmul.f32 %v506_v42, %v169_v39 }
 0x3cf   :  { %518 = vst.msk [vmem:[%s1159_s12 + $0x8] sm:$0xff] %vm254_vm2, %v516_v44  ;;  %v515_v46 = vadd.f32 %v513_v45, %v499_v43 }
 0x3d1   :  { %517 = vst.msk [vmem:[%s1159_s12] sm:$0xff] %vm254_vm2, %v515_v46 }
 0x414   :  { %v744_v12 = vpop.permute.xlu1 %743 }
 0x415   :  { %v747_v53 = vmul.f32 %v744_v12, %v109_v35 }
 0x416   :  { %v739_v14 = vpop.permute.xlu0 %738 }
 0x417   :  { %v746_v49 = vmul.f32 %v739_v14, %v106_v38 }
 0x418   :  { %v758_v51 = vpop.permute.xlu1 %757 }
 0x419   :  { %v761_v47 = vmul.f32 %v758_v51, %v172_v36 }
 0x41a   :  { %v753_v48 = vpop.permute.xlu0 %752 }
 0x41b   :  { %v763_v50 = vadd.f32 %v761_v47, %v747_v53  ;;  %v760_v52 = vmul.f32 %v753_v48, %v169_v39 }
 0x41d   :  { %765 = vst.msk [vmem:[%s1159_s12 + $0x8] sm:$0xff] %vm535_vm3, %v763_v50  ;;  %v762_v54 = vadd.f32 %v760_v52, %v746_v49 }
 0x41f   :  { %764 = vst.msk [vmem:[%s1159_s12] sm:$0xff] %vm535_vm3, %v762_v54 }

// kernel: up_forward.24
= control target key start
LH: loop header
LB: loop body
LE: loop exit
PB: predicated region body
PF: predicated region fallthrough
CT: control target
= control target key end

     0   :  { %s597_s15 = smov 0   ;;  %s599_s16 = smov 0   ;;  %s648_s0 = inlined_call_operand.vmem [shape: bf16[32,32], index: 0, kind: input, shape index: {}]   ;;  %s649_s1 = inlined_call_operand.vmem [shape: f32[32,128], index: 1, kind: input, shape index: {}]   ;;  %s650_s2 = inlined_call_operand.vmem [shape: f32[32,1], index: 2, kind: input, shape index: {}]   ;;  %s651_s3 = inlined_call_operand.vmem [shape: f32[32,128], index: 3, kind: input, shape index: {}]   ;;  %s652_s4 = inlined_call_operand.vmem [shape: f32[32,128], index: 4, kind: output, shape index: {}]  }
   0x1   :  { %s601_s17 = smov 0  }
   0x2 LB: > { %s26_s18 = sadd.s32 1, %s563_s16  ;;  %p492_p0 = scmp.ge.s32.totalorder %s567_s17, 1  ;;  %s567_s17 = sphi %s601_s17, %s14_s17   ;;  %s563_s16 = sphi %s599_s16, %s654_s16   ;;  %s559_s15 = sphi %s597_s15, %s653_s15  }
   0x3   : > { %p28_p1 = scmp.ge.s32.totalorder %s26_s18, 2  ;;  %p213_p2 = scmp.lt.s32.totalorder %s567_s17, 3 }
   0x5   : > { %s656_s18 = smov (%p28_p1, %s26_s18), 0  ;;  %p214_p3 = pnand %p492_p0, %p213_p2 }
   0x6   : > { %s493_s25 = sshll.u32 (!%p214_p3), %s559_s15, 1 }
   0x7   : > { %217 = sbr.rel (%p214_p3) target bundleno = 224 (0xe0), region = 36  ;;  %p260_p4 = scmp.lt.s32.totalorder (!%p214_p3), %s493_s25, 3 }
   0xc   : > { %v298_v0 = vld [vmem:[%s649_s1 + $0x10] sm:$0xff]  ;;  %v299_v1 = vld [vmem:[%s649_s1 + $0x18] sm:$0xff]  ;;  %v296_v2 = vld [vmem:[%s649_s1] sm:$0xff]  ;;  %v569_v3 = vmov 0.0   ;;  %vm570_vm0 = vmmov 0   ;;  %v571_v6 = vmov 0  }
   0xd   : > { %508 = vmatprep.subr.bf16.mxu0 %v569_v3  ;;  %v301_v4 = vpack.c.bf16 %v299_v1, %v298_v0  ;;  %v297_v5 = vld [vmem:[%s649_s1 + $0x8] sm:$0xff]  ;;  %512 = vmatprep.mubr.msk.bf16.mxu0 %vm570_vm0, %v569_v3  ;;  %s658_s25 = smov (!%p260_p4, %s493_s25), 3  ;;  %vm319_vm1 = vcmask 261120  }
   0xe   : > { %543 = vset.pattern.permute.xlu0 %v571_v6  ;;  %v300_v7 = vpack.c.bf16 %v297_v5, %v296_v2  ;;  %s494_s28 = sshll.u32 %s658_s25, 2  ;;  %s496_s29 = sshll.u32 %s658_s25, 3 }
   0xf   : > { %509 = vmatpush3.bf16.msra.mxu0 %v301_v4  ;;  %s263_s6 = scalar_lea.vmem %s648_s0, %s494_s28  ;;  %s273_s9 = scalar_lea.vmem %s650_s2, %s496_s29 }
  0x10   : > { %510 = vmatprep.subr.bf16.mxu0 %v569_v3  ;;  %v544_v8 = vld [vmem:[%s263_s6] sm:$0xff]   ;;  %v303_v10 = vld [vmem:[%s273_s9 + $0x8] sm:$0xff]  ;;  %s282_s12 = scalar_lea.vmem %s651_s3, %s496_s29  ;;  %s291_s15 = scalar_lea.vmem %s652_s4, %s496_s29 }
  0x11   : > { %v302_v9 = vld [vmem:[%s273_s9] sm:$0xff]  ;;  %v365_v19 = vld [vmem:[%s282_s12 + $0x8] sm:$0xff] }
  0x12   : > { %306 = vperm.xlu0 %543, %v302_v9   ;;  %v364_v13 = vld [vmem:[%s282_s12] sm:$0xff] }
  0x13   : > { %511 = vmatpush3.bf16.msra.mxu0 %v300_v7 }
  0x16   : > { %513 = vmatmul.mubr.msk.bf16.vlgmr.msra.gmra.mxu0 %vm319_vm1, %v544_v8  ;;  %311 = vperm.xlu0 %543, %v303_v10  }
  0x8d   : > { %v307_v11 = vpop.permute.xlu0 %306 }
  0x91   : > { %v312_v17 = vpop.permute.xlu0 %311 }
  0xd6   : > { %v357_v12 = vpop.f32.mrf.mxu0 }
  0xd7   : > { %v358_v14 = vadd.f32 %v357_v12, %v307_v11 }
  0xd8   : > { %v514_v15 = vpop.f32.mrf.mxu0 }
  0xd9   : > { %v366_v16 = vadd.f32 %v364_v13, %v358_v14 }
  0xda   : > { %v360_v18 = vpop.f32.mrf.mxu0 }
  0xdb   : > { %368 = vst [vmem:[%s291_s15] sm:$0xff] %v366_v16  ;;  %v361_v20 = vadd.f32 %v360_v18, %v312_v17 }
  0xdc   : > { %v515_v21 = vpop.f32.mrf.mxu0 }
  0xdd   : > { %v367_v22 = vadd.f32 %v365_v19, %v361_v20 }
  0xdf   : > { %369 = vst [vmem:[%s291_s15 + $0x8] sm:$0xff] %v367_v22 }
  0xe0 PF: > { %s14_s17 = sadd.s32 1, %s567_s17   ;;  %s653_s15 = smov %s563_s16 }
  0xe1   : > { %p11_p5 = scmp.ge.s32.totalorder %s14_s17, 4   ;;  %s654_s16 = smov %s656_s18 }
  0xe3   :  { %13 = sbr.rel (!%p11_p5) target bundleno = 2 (0x2), region = 75 }

// kernel: up_forward.25
= control target key start
LH: loop header
LB: loop body
LE: loop exit
PB: predicated region body
PF: predicated region fallthrough
CT: control target
= control target key end

     0   :  { %v93_v0 = vmov 0.0   ;;  %vm94_vm0 = vmmov 0   ;;  %v95_v6 = vmov 0   ;;  %vm28_vm1 = vcmask 261120   ;;  %s137_s1 = inlined_call_operand.vmem [shape: f32[32,128], index: 1, kind: input, shape index: {}]   ;;  %s138_s2 = inlined_call_operand.vmem [shape: f32[8,1], index: 2, kind: input, shape index: {}]   ;;  %s139_s0 = inlined_call_operand.vmem [shape: bf16[8,32], index: 0, kind: input, shape index: {}]   ;;  %s140_s3 = inlined_call_operand.vmem [shape: f32[8,128], index: 3, kind: output, shape index: {}]  }
   0x1   :  { %81 = vmatprep.subr.bf16.mxu0 %v93_v0  ;;  %v18_v1 = vld [vmem:[%s137_s1 + $0x10] sm:$0xff]  ;;  %v19_v2 = vld [vmem:[%s137_s1 + $0x18] sm:$0xff]  ;;  %v16_v3 = vld [vmem:[%s137_s1] sm:$0xff]  ;;  %85 = vmatprep.mubr.msk.bf16.mxu0 %vm94_vm0, %v93_v0 }
   0x2   :  { %v21_v4 = vpack.c.bf16 %v19_v2, %v18_v1  ;;  %v17_v5 = vld [vmem:[%s137_s1 + $0x8] sm:$0xff]  ;;  %92 = vset.pattern.permute.xlu0 %v95_v6  ;;  %v22_v7 = vld [vmem:[%s138_s2] sm:$0xff] }
   0x3   :  { %25 = vperm.xlu0 %92, %v22_v7   ;;  %v20_v8 = vpack.c.bf16 %v17_v5, %v16_v3  ;;  %v15_v9 = vld [vmem:[%s139_s0] sm:$0xf] }
   0x4   :  { %82 = vmatpush3.bf16.msra.mxu0 %v21_v4 }
   0x5   :  { %83 = vmatprep.subr.bf16.mxu0 %v93_v0 }
   0x8   :  { %84 = vmatpush3.bf16.msra.mxu0 %v20_v8 }
   0xb   :  { %86 = vmatmul.mubr.msk.bf16.vlgmr.msra.gmra.mxu0 %vm28_vm1, %v15_v9 }
  0x7e   :  { %v26_v10 = vpop.permute.xlu0 %25 }
  0xcb   :  { %v66_v11 = vpop.f32.mrf.mxu0 }
  0xcc   :  { %v67_v12 = vadd.f32 %v66_v11, %v26_v10 }
  0xcd   :  { %v87_v13 = vpop.f32.mrf.mxu0 }
  0xce   :  { %72 = vst [vmem:[%s140_s3] sm:$0xff] %v67_v12 }
  0xcf   :  { %v69_v14 = vpop.f32.mrf.mxu0 }
  0xd1   :  { %v88_v15 = vpop.f32.mrf.mxu0 }

// kernel: up_forward.23
= control target key start
LH: loop header
LB: loop body
LE: loop exit
PB: predicated region body
PF: predicated region fallthrough
CT: control target
= control target key end

     0   :  { %v961_v0 = vmov 0.0   ;;  %vm962_vm0 = vmmov 0   ;;  %v963_v6 = vmov 0   ;;  %vm67_vm1 = vcmask 130048   ;;  %s1175_s1 = inlined_call_operand.vmem [shape: f32[16,128], index: 1, kind: input, shape index: {}]   ;;  %s1176_s2 = inlined_call_operand.vmem [shape: bf16[16,16], index: 2, kind: input, shape index: {}]   ;;  %s1177_s0 = inlined_call_operand.vmem [shape: f32[16,128], index: 0, kind: input, shape index: {}]   ;;  %s1178_s7 = inlined_call_operand.vmem [shape: f32[16,1], index: 7, kind: input, shape index: {}]   ;;  %s1179_s6 = inlined_call_operand.vmem [shape: bf16[16,16], index: 6, kind: input, shape index: {}]   ;;  %s1180_s4 = inlined_call_operand.vmem [shape: bf16[16,16], index: 4, kind: input, shape index: {}]   ;;  %s1181_s8 = inlined_call_operand.vmem [shape: f32[32,16], index: 8, kind: input, shape index: {}]   ;;  %s1182_s3 = inlined_call_operand.vmem [shape: f32[16,1], index: 3, kind: input, shape index: {}]   ;;  %s1183_s5 = inlined_call_operand.vmem [shape: f32[16,1], index: 5, kind: input, shape index: {}]   ;;  %s1184_s10 = inlined_call_operand.vmem [shape: f32[32,32], index: 10, kind: input, shape index: {}]   ;;  %s1185_s9 = inlined_call_operand.vmem [shape: f32[32,1], index: 9, kind: input, shape index: {}]   ;;  %s1186_s11 = inlined_call_operand.vmem [shape: f32[32,1], index: 11, kind: input, shape index: {}]   ;;  %s1187_s12 = inlined_call_operand.vmem [shape: f32[16,128], index: 12, kind: output, shape index: {}]  }
   0x1   :  { %846 = vmatprep.subr.bf16.mxu0 %v961_v0  ;;  %v45_v1 = vld [vmem:[%s1175_s1] sm:$0xff]  ;;  %v46_v2 = vld [vmem:[%s1175_s1 + $0x8] sm:$0xff]  ;;  %848 = vmatprep.mubr.msk.bf16.mxu0 %vm962_vm0, %v961_v0  ;;  %vm254_vm2 = vcmask 523264   ;;  %vm545_vm3 = vcmask 1048064   ;;  %v240_v49 = vld [vmem:[%s1181_s8 + $0x10] sm:$0xff]  ;;  %vm369_vm4 = vcmask 261120  }
   0x2   :  { %v47_v3 = vpack.c.bf16 %v46_v2, %v45_v1  ;;  %v926_v4 = vld [vmem:[%s1176_s2] sm:$0xff]   ;;  %924 = vset.pattern.permute.xlu0 %v963_v6  ;;  %925 = vset.pattern.permute.xlu1 %v963_v6  ;;  %v43_v7 = vld [vmem:[%s1177_s0 + $0x8] sm:$0xff]  ;;  %v241_v50 = vld [vmem:[%s1181_s8 + $0x18] sm:$0xff] }
   0x3   :  { %v42_v5 = vld [vmem:[%s1177_s0] sm:$0xff]  ;;  %852 = vmatprep.subr.bf16.mxu1 %v961_v0  ;;  %854 = vmatprep.mubr.msk.bf16.mxu1 %vm962_vm0, %v961_v0  ;;  %v178_v9 = vld [vmem:[%s1178_s7 + $0x8] sm:$0xff]  ;;  %v244_v6 = vld [vmem:[%s1185_s9 + $0x10] sm:$0xff] }
   0x4   :  { %847 = vmatpush3.bf16.msra.mxu0 %v47_v3  ;;  %v44_v8 = vpack.c.bf16 %v43_v7, %v42_v5  ;;  %186 = vperm.xlu0 %924, %v178_v9   ;;  %v177_v10 = vld [vmem:[%s1178_s7] sm:$0xff]  ;;  %s964_s7 = smov 64   ;;  %v51_v41 = vld [vmem:[%s1182_s3 + $0x8] sm:$0xff]  ;;  %v245_v3 = vld [vmem:[%s1185_s9 + $0x18] sm:$0xff] }
   0x5   :  { %858 = vmatprep.subr.bf16.mxu0 %v961_v0  ;;  %v927_v11 = vld [vmem:[%s1179_s6] sm:$0xff]   ;;  %v115_v43 = vld [vmem:[%s1183_s5 + $0x8] sm:$0xff] }
   0x6   :  { %853 = vmatpush3.bf16.msra.mxu1 %v44_v8  ;;  %v928_v27 = vld [vmem:[%s1180_s4] sm:$0xff]   ;;  %v239_v48 = vld [vmem:[%s1181_s8 + $0x8] sm:$0xff] }
   0x7   :  { %849 = vmatmul.mubr.msk.bf16.vlgmr.msra.gmra.mxu0 %vm67_vm1, %v926_v4  ;;  %v238_v29 = vld [vmem:[%s1181_s8] sm:$0xff]  ;;  %v243_v4 = vld [vmem:[%s1185_s9 + $0x8] sm:$0xff] }
   0x8   :  { %859 = vmatpush3.bf16.msra.mxu0 %v44_v8  ;;  %860 = vmatprep.mubr.msk.bf16.mxu0 %vm962_vm0, %v961_v0  ;;  %v50_v36 = vld [vmem:[%s1182_s3] sm:$0xff]  ;;  %v248_v0 = vld [vmem:[%s1184_s10 + $0x10] sm:$0xff] }
   0x9   :  { %181 = vperm.xlu0 %924, %v177_v10   ;;  %855 = vmatmul.mubr.msk.bf16.vlgmr.msra.gmra.mxu1 %vm67_vm1, %v928_v27  ;;  %v114_v42 = vld [vmem:[%s1183_s5] sm:$0xff] }
   0xa   :  { %868 = vmatprep.mubr.msk.f32.mxu1 %vm67_vm1, %v238_v29  ;;  %v246_v62 = vld [vmem:[%s1184_s10] sm:$0xff] }
   0xb   :  { %v242_v8 = vld [vmem:[%s1185_s9] sm:$0xff] }
   0xf   :  { %861 = vmatmul.mubr.msk.bf16.vlgmr.msra.gmra.mxu0 %vm67_vm1, %v927_v11 }
  0x10   :  { %882 = vmatprep.mubr.msk.f32.mxu0 %vm369_vm4, %v246_v62 }
  0x7f   :  { %v187_v16 = vpop.permute.xlu0 %186 }
  0x84   :  { %v182_v21 = vpop.permute.xlu0 %181 }
  0xc7   :  { %v1059_v12 = vpop.f32.mrf.mxu0 }
  0xc9   :  { %v850_v13 = vpop.f32.mrf.mxu0  ;;  %v1104_v51 = vpop.f32.mrf.mxu1 }
  0xcb   :  { %v1061_v14 = vpop.f32.mrf.mxu0  ;;  %v856_v52 = vpop.f32.mrf.mxu1 }
  0xcd   :  { %v851_v15 = vpop.f32.mrf.mxu0  ;;  %v1106_v53 = vpop.f32.mrf.mxu1 }
  0xce   :  { %v247_v15 = vld [vmem:[%s1184_s10 + $0x8] sm:$0xff] }
  0xcf   :  { %v231_v17 = vpop.f32.mrf.mxu0  ;;  %v857_v54 = vpop.f32.mrf.mxu1 }
  0xd0   :  { %v232_v24 = vadd.f32 %v231_v17, %v182_v21 }
  0xd1   :  { %v862_v18 = vpop.f32.mrf.mxu0 }
  0xd2   :  { %v264_v26 = vsel %vm254_vm2, %v232_v24, -inf  ;;  %v255_v28 = vsel %vm254_vm2, %v232_v24, 0.0  ;;  %v546_v35 = vsel %vm545_vm3, %v232_v24, -inf }
  0xd3   :  { %v234_v19 = vpop.f32.mrf.mxu0 }
  0xd4   :  { %v235_v20 = vadd.f32 %v234_v19, %v187_v16  ;;  %v249_v16 = vld [vmem:[%s1184_s10 + $0x18] sm:$0xff] }
  0xd5   :  { %v863_v22 = vpop.f32.mrf.mxu0 }
  0xd6   :  { %533 = vrot.lane.b32.xlu1 %v235_v20, %s964_s7  ;;  %v258_v23 = vsel %vm254_vm2, %v235_v20, 0.0  ;;  %v267_v25 = vsel %vm254_vm2, %v235_v20, -inf  ;;  %v549_v33 = vsel %vm545_vm3, %v235_v20, -inf }
  0xd7   :  { %259 = vadd.xlane.f32.xlu0 %v258_v23 }
  0xda   :  { %531 = vrot.lane.b32.xlu1 %v232_v24, %s964_s7 }
  0xdb   :  { %268 = vmax.xlane.f32.xlu0 %v267_v25  ;;  %v251_v25 = vld [vmem:[%s1186_s11 + $0x8] sm:$0xff] }
  0xdf   :  { %265 = vmax.xlane.f32.xlu0 %v264_v26 }
  0xfe   :  { %256 = vadd.xlane.f32.xlu1 %v255_v28  ;;  %v250_v28 = vld [vmem:[%s1186_s11] sm:$0xff] }
 0x148   :  { %v534_v30 = vpop.permute.xlu1 %533 }
 0x149   :  { %v540_v31 = vsel %vm254_vm2, %v534_v30, 0.0 }
 0x14a   :  { %541 = vadd.xlane.f32.xlu1 %v540_v31 }
 0x14c   :  { %v532_v32 = vpop.permute.xlu1 %531 }
 0x14d   :  { %v537_v34 = vsel %vm254_vm2, %v532_v32, 0.0  ;;  %v252_v32 = vld [vmem:[%s1186_s11 + $0x10] sm:$0xff] }
 0x14e   :  { %550 = vmax.xlane.f32.xlu1 %v549_v33  ;;  %538 = vadd.xlane.f32.xlu0 %v537_v34 }
 0x152   :  { %547 = vmax.xlane.f32.xlu0 %v546_v35 }
 0x15f   :  { %54 = vperm.xlu1 %925, %v50_v36  }
 0x160   :  { %v260_v37 = vpop.xlane.xlu0 %259 }
 0x161   :  { %v263_v38 = vmul.f32 0.015625, %v260_v37 }
 0x163   :  { %118 = vperm.xlu1 %925, %v114_v42  }
 0x164   :  { %v269_v39 = vpop.xlane.xlu0 %268 }
 0x165   :  { %v271_v40 = vadd.f32 %v269_v39, %v263_v38 }
 0x167   :  { %864 = vmatprep.subr.mxu1 %v271_v40  ;;  %123 = vperm.xlu1 %925, %v115_v43  }
 0x168   :  { %59 = vperm.xlu0 %924, %v51_v41   ;;  %865 = vmatpush3.msra.mxu1 %v271_v40  ;;  %v266_v46 = vpop.xlane.xlu0 %265 }
 0x187   :  { %v257_v44 = vpop.xlane.xlu1 %256 }
 0x188   :  { %v262_v45 = vmul.f32 0.015625, %v257_v44 }
 0x18a   :  { %v270_v47 = vadd.f32 %v266_v46, %v262_v45 }
 0x18c   :  { %866 = vmatprep.subr.mxu1 %v270_v47 }
 0x18d   :  { %867 = vmatpush3.msra.mxu1 %v270_v47 }
 0x18e   :  { %869 = vmatmul.mubr.msk.f32.vlgmr.msra.gmra.mxu1 %vm67_vm1, %v239_v48 }
 0x18f   :  { %871 = vmatprep.mubr.msk.f32.mxu1 %vm67_vm1, %v240_v49 }
 0x192   :  { %872 = vmatmul.mubr.msk.f32.gmra.mxu1 %vm67_vm1, %v241_v50 }
 0x193   :  { %892 = vmatprep.mubr.msk.f32.mxu1 %vm67_vm1, %v238_v29  ;;  %v253_v29 = vld [vmem:[%s1186_s11 + $0x18] sm:$0xff] }
 0x1d3   :  { %v542_v55 = vpop.xlane.xlu1 %541 }
 0x1d4   :  { %v544_v56 = vmul.f32 0.015625, %v542_v55 }
 0x1d7   :  { %v551_v57 = vpop.xlane.xlu1 %550  ;;  %v539_v58 = vpop.xlane.xlu0 %538 }
 0x1d8   :  { %v553_v59 = vadd.f32 %v551_v57, %v544_v56  ;;  %v543_v60 = vmul.f32 0.015625, %v539_v58 }
 0x1da   :  { %888 = vmatprep.subr.mxu1 %v553_v59 }
 0x1db   :  { %v548_v61 = vpop.xlane.xlu0 %547  ;;  %889 = vmatpush3.msra.mxu1 %v553_v59 }
 0x1dc   :  { %v552_v63 = vadd.f32 %v548_v61, %v543_v60 }
 0x1de   :  { %890 = vmatprep.subr.mxu1 %v552_v63 }
 0x1df   :  { %891 = vmatpush3.msra.mxu1 %v552_v63 }
 0x1e0   :  { %893 = vmatmul.mubr.msk.f32.vlgmr.msra.gmra.mxu1 %vm67_vm1, %v239_v48 }
 0x1e1   :  { %895 = vmatprep.mubr.msk.f32.mxu1 %vm67_vm1, %v240_v49 }
 0x1e4   :  { %896 = vmatmul.mubr.msk.f32.gmra.mxu1 %vm67_vm1, %v241_v50 }
 0x1e5   :  { %909 = vmatprep.mubr.msk.f32.mxu1 %vm369_vm4, %v248_v0 }
 0x24e   :  { %v870_v1 = vpop.f32.mrf.mxu1 }
 0x24f   :  { %v356_v10 = vadd.f32 %v870_v1, %v243_v4 }
 0x250   :  { %v350_v2 = vpop.f32.mrf.mxu1 }
 0x251   :  { %v351_v13 = vadd.f32 %v350_v2, %v242_v8 }
 0x252   :  { %v873_v5 = vpop.f32.mrf.mxu1 }
 0x253   :  { %v366_v7 = vadd.f32 %v873_v5, %v245_v3 }
 0x254   :  { %v360_v9 = vpop.f32.mrf.mxu1 }
 0x255   :  { %v361_v11 = vadd.f32 %v360_v9, %v244_v6  ;;  %874 = vmatprep.subr.mxu0 %v366_v7 }
 0x256   :  { %875 = vmatpush3.msra.mxu0 %v366_v7 }
 0x257   :  { %876 = vmatprep.subr.mxu0 %v361_v11 }
 0x258   :  { %877 = vmatpush3.msra.mxu0 %v361_v11 }
 0x259   :  { %878 = vmatprep.subr.mxu0 %v356_v10 }
 0x25a   :  { %879 = vmatpush3.msra.mxu0 %v356_v10 }
 0x25b   :  { %880 = vmatprep.subr.mxu0 %v351_v13 }
 0x25c   :  { %881 = vmatpush3.msra.mxu0 %v351_v13 }
 0x25d   :  { %883 = vmatmul.mubr.msk.f32.vlgmr.msra.gmra.mxu0 %vm369_vm4, %v247_v15 }
 0x25e   :  { %885 = vmatprep.mubr.msk.f32.mxu0 %vm369_vm4, %v248_v0 }
 0x261   :  { %886 = vmatmul.mubr.msk.f32.gmra.mxu0 %vm369_vm4, %v249_v16 }
 0x262   :  { %906 = vmatprep.mubr.msk.f32.mxu0 %vm369_vm4, %v246_v62 }
 0x2a0   :  { %v894_v17 = vpop.f32.mrf.mxu1 }
 0x2a1   :  { %v626_v23 = vadd.f32 %v894_v17, %v243_v4 }
 0x2a2   :  { %v620_v18 = vpop.f32.mrf.mxu1 }
 0x2a3   :  { %v621_v24 = vadd.f32 %v620_v18, %v242_v8 }
 0x2a4   :  { %v897_v19 = vpop.f32.mrf.mxu1 }
 0x2a5   :  { %v636_v20 = vadd.f32 %v897_v19, %v245_v3 }
 0x2a6   :  { %v630_v21 = vpop.f32.mrf.mxu1 }
 0x2a7   :  { %v631_v22 = vadd.f32 %v630_v21, %v244_v6  ;;  %898 = vmatprep.subr.mxu0 %v636_v20  ;;  %912 = vmatprep.subr.mxu1 %v636_v20 }
 0x2a8   :  { %899 = vmatpush3.msra.mxu0 %v636_v20  ;;  %916 = vmatpush3.msra.mxu1 %v636_v20 }
 0x2a9   :  { %900 = vmatprep.subr.mxu0 %v631_v22  ;;  %913 = vmatprep.subr.mxu1 %v631_v22 }
 0x2aa   :  { %901 = vmatpush3.msra.mxu0 %v631_v22  ;;  %917 = vmatpush3.msra.mxu1 %v631_v22 }
 0x2ab   :  { %902 = vmatprep.subr.mxu0 %v626_v23  ;;  %914 = vmatprep.subr.mxu1 %v626_v23 }
 0x2ac   :  { %903 = vmatpush3.msra.mxu0 %v626_v23  ;;  %918 = vmatpush3.msra.mxu1 %v626_v23 }
 0x2ad   :  { %904 = vmatprep.subr.mxu0 %v621_v24  ;;  %915 = vmatprep.subr.mxu1 %v621_v24 }
 0x2ae   :  { %905 = vmatpush3.msra.mxu0 %v621_v24  ;;  %919 = vmatpush3.msra.mxu1 %v621_v24 }
 0x2af   :  { %907 = vmatmul.mubr.msk.f32.vlgmr.msra.gmra.mxu0 %vm369_vm4, %v247_v15  ;;  %910 = vmatmul.mubr.msk.f32.vlgmr.msra.gmra.mxu1 %vm369_vm4, %v249_v16 }
 0x31d   :  { %v884_v26 = vpop.f32.mrf.mxu0 }
 0x31e   :  { %v454_v30 = vadd.f32 %v884_v26, %v251_v25 }
 0x31f   :  { %v448_v27 = vpop.f32.mrf.mxu0 }
 0x320   :  { %v449_v33 = vadd.f32 %v448_v27, %v250_v28 }
 0x321   :  { %v887_v31 = vpop.f32.mrf.mxu0 }
 0x322   :  { %v464_v34 = vadd.f32 %v887_v31, %v253_v29 }
 0x323   :  { %v458_v35 = vpop.f32.mrf.mxu0 }
 0x324   :  { %v468_v36 = vmax.f32 %v454_v30, %v464_v34  ;;  %v459_v37 = vadd.f32 %v458_v35, %v252_v32 }
 0x326   :  { %v470_v38 = vsub.f32 %v454_v30, %v468_v36  ;;  %v476_v39 = vsub.f32 %v464_v34, %v468_v36  ;;  %v467_v40 = vmax.f32 %v449_v33, %v459_v37 }
 0x328   :  { %v473_v41 = vmul.f32 1.442695, %v470_v38  ;;  %v479_v42 = vmul.f32 1.442695, %v476_v39  ;;  %v469_v43 = vsub.f32 %v449_v33, %v467_v40  ;;  %v475_v44 = vsub.f32 %v459_v37, %v467_v40 }
 0x32a   :  { %929 = vpow2.f32 %v473_v41  ;;  %v471_v45 = vmul.f32 1.442695, %v469_v43  ;;  %v477_v46 = vmul.f32 1.442695, %v475_v44 }
 0x32b   :  { %931 = vpow2.f32 %v479_v42 }
 0x32c   :  { %933 = vpow2.f32 %v471_v45 }
 0x32d   :  { %935 = vpow2.f32 %v477_v46 }
 0x337   :  { %v930_v47 = vpop.eup %929 }
 0x338   :  { %v932_v48 = vpop.eup %931 }
 0x339   :  { %v934_v49 = vpop.eup %933  ;;  %v482_v50 = vadd.f32 %v932_v48, %v930_v47 }
 0x33a   :  { %v936_v52 = vpop.eup %935 }
 0x33b   :  { %v481_v54 = vadd.f32 %v936_v52, %v934_v49  ;;  %937 = vrcp.f32 %v482_v50 }
 0x33d   :  { %939 = vrcp.f32 %v481_v54 }
 0x348   :  { %v938_v55 = vpop.eup %937 }
 0x349   :  { %v488_v56 = vmul.f32 %v938_v55, %v930_v47  ;;  %v502_v59 = vmul.f32 %v938_v55, %v932_v48 }
 0x34a   :  { %v940_v57 = vpop.eup %939 }
 0x34b   :  { %496 = vperm.xlu1 %925, %v488_v56   ;;  %v487_v58 = vmul.f32 %v940_v57, %v934_v49  ;;  %v501_v60 = vmul.f32 %v940_v57, %v936_v52 }
 0x34d   :  { %491 = vperm.xlu0 %924, %v487_v58  }
 0x34f   :  { %510 = vperm.xlu1 %925, %v502_v59  }
 0x351   :  { %505 = vperm.xlu0 %924, %v501_v60  }
 0x36f   :  { %v908_v61 = vpop.f32.mrf.mxu0  ;;  %v911_v62 = vpop.f32.mrf.mxu1 }
 0x370   :  { %v711_v63 = vadd.f32 %v908_v61, %v251_v25  ;;  %v721_v0 = vadd.f32 %v911_v62, %v253_v29  ;;  %v55_v29 = vpop.permute.xlu1 %54 }
 0x371   :  { %v705_v1 = vpop.f32.mrf.mxu0  ;;  %v715_v2 = vpop.f32.mrf.mxu1  ;;  %v106_v38 = vadd.f32 %v1059_v12, %v55_v29 }
 0x372   :  { %v725_v3 = vmax.f32 %v711_v63, %v721_v0  ;;  %v706_v4 = vadd.f32 %v705_v1, %v250_v28  ;;  %v716_v5 = vadd.f32 %v715_v2, %v252_v32  ;;  %v60_v32 = vpop.permute.xlu0 %59 }
 0x373   :  { %v109_v35 = vadd.f32 %v1061_v14, %v60_v32 }
 0x374   :  { %v727_v6 = vsub.f32 %v711_v63, %v725_v3  ;;  %v733_v7 = vsub.f32 %v721_v0, %v725_v3  ;;  %v724_v8 = vmax.f32 %v706_v4, %v716_v5  ;;  %v119_v30 = vpop.permute.xlu1 %118 }
 0x375   :  { %v169_v39 = vadd.f32 %v1104_v51, %v119_v30 }
 0x376   :  { %v730_v9 = vmul.f32 1.442695, %v727_v6  ;;  %v736_v10 = vmul.f32 1.442695, %v733_v7  ;;  %v726_v11 = vsub.f32 %v706_v4, %v724_v8  ;;  %v732_v13 = vsub.f32 %v716_v5, %v724_v8 }
 0x378   :  { %941 = vpow2.f32 %v730_v9  ;;  %v728_v15 = vmul.f32 1.442695, %v726_v11  ;;  %v734_v16 = vmul.f32 1.442695, %v732_v13  ;;  %v124_v31 = vpop.permute.xlu1 %123 }
 0x379   :  { %943 = vpow2.f32 %v736_v10  ;;  %v172_v36 = vadd.f32 %v1106_v53, %v124_v31 }
 0x37a   :  { %945 = vpow2.f32 %v728_v15 }
 0x37b   :  { %947 = vpow2.f32 %v734_v16 }
 0x385   :  { %v942_v17 = vpop.eup %941 }
 0x386   :  { %v944_v18 = vpop.eup %943 }
 0x387   :  { %v946_v19 = vpop.eup %945  ;;  %v739_v20 = vadd.f32 %v944_v18, %v942_v17 }
 0x388   :  { %v948_v21 = vpop.eup %947 }
 0x389   :  { %v738_v22 = vadd.f32 %v948_v21, %v946_v19  ;;  %949 = vrcp.f32 %v739_v20 }
 0x38b   :  { %951 = vrcp.f32 %v738_v22 }
 0x396   :  { %v950_v23 = vpop.eup %949 }
 0x397   :  { %v745_v24 = vmul.f32 %v950_v23, %v942_v17  ;;  %v759_v27 = vmul.f32 %v950_v23, %v944_v18 }
 0x398   :  { %v952_v25 = vpop.eup %951 }
 0x399   :  { %753 = vperm.xlu1 %925, %v745_v24   ;;  %v744_v26 = vmul.f32 %v952_v25, %v946_v19  ;;  %v758_v28 = vmul.f32 %v952_v25, %v948_v21 }
 0x39b   :  { %748 = vperm.xlu0 %924, %v744_v26  }
 0x39d   :  { %767 = vperm.xlu1 %925, %v759_v27  }
 0x39f   :  { %762 = vperm.xlu0 %924, %v758_v28  }
 0x3c6   :  { %v497_v33 = vpop.permute.xlu1 %496 }
 0x3c7   :  { %v500_v40 = vmul.f32 %v497_v33, %v109_v35 }
 0x3c8   :  { %v492_v34 = vpop.permute.xlu0 %491 }
 0x3c9   :  { %v499_v43 = vmul.f32 %v492_v34, %v106_v38 }
 0x3ca   :  { %v511_v37 = vpop.permute.xlu1 %510 }
 0x3cb   :  { %v514_v41 = vmul.f32 %v511_v37, %v172_v36 }
 0x3cc   :  { %v506_v42 = vpop.permute.xlu0 %505 }
 0x3cd   :  { %v516_v44 = vadd.f32 %v514_v41, %v500_v40  ;;  %v513_v45 = vmul.f32 %v506_v42, %v169_v39 }
 0x3cf   :  { %v520_v46 = vmul.f32 0.70710677, %v516_v44  ;;  %v515_v47 = vadd.f32 %v513_v45, %v499_v43  ;;  %v518_v14 = vmul.f32 0.5, %v516_v44 }
 0x3d1   :  { %953 = verf.f32 %v520_v46  ;;  %v519_v48 = vmul.f32 0.70710677, %v515_v47  ;;  %v517_v54 = vmul.f32 0.5, %v515_v47 }
 0x3d3   :  { %955 = verf.f32 %v519_v48 }
 0x3de   :  { %v954_v49 = vpop.eup %953 }
 0x3df   :  { %v524_v50 = vadd.f32 1.0, %v954_v49 }
 0x3e0   :  { %v956_v53 = vpop.eup %955 }
 0x3e1   :  { %v526_v52 = vmul.f32 %v524_v50, %v518_v14  ;;  %v523_v12 = vadd.f32 1.0, %v956_v53 }
 0x3e3   :  { %528 = vst.msk [vmem:[%s1187_s12 + $0x8] sm:$0xff] %vm254_vm2, %v526_v52  ;;  %v525_v51 = vmul.f32 %v523_v12, %v517_v54 }
 0x3e5   :  { %527 = vst.msk [vmem:[%s1187_s12] sm:$0xff] %vm254_vm2, %v525_v51 }
 0x414   :  { %v754_v55 = vpop.permute.xlu1 %753 }
 0x415   :  { %v757_v58 = vmul.f32 %v754_v55, %v109_v35 }
 0x416   :  { %v749_v56 = vpop.permute.xlu0 %748 }
 0x417   :  { %v756_v61 = vmul.f32 %v749_v56, %v106_v38 }
 0x418   :  { %v768_v57 = vpop.permute.xlu1 %767 }
 0x419   :  { %v771_v59 = vmul.f32 %v768_v57, %v172_v36 }
 0x41a   :  { %v763_v60 = vpop.permute.xlu0 %762 }
 0x41b   :  { %v773_v62 = vadd.f32 %v771_v59, %v757_v58  ;;  %v770_v63 = vmul.f32 %v763_v60, %v169_v39 }
 0x41d   :  { %v777_v0 = vmul.f32 0.70710677, %v773_v62  ;;  %v772_v1 = vadd.f32 %v770_v63, %v756_v61  ;;  %v775_v4 = vmul.f32 0.5, %v773_v62 }
 0x41f   :  { %957 = verf.f32 %v777_v0  ;;  %v776_v2 = vmul.f32 0.70710677, %v772_v1  ;;  %v774_v8 = vmul.f32 0.5, %v772_v1 }
 0x421   :  { %959 = verf.f32 %v776_v2 }
 0x42c   :  { %v958_v3 = vpop.eup %957 }
 0x42d   :  { %v781_v5 = vadd.f32 1.0, %v958_v3 }
 0x42e   :  { %v960_v6 = vpop.eup %959 }
 0x42f   :  { %v783_v7 = vmul.f32 %v781_v5, %v775_v4  ;;  %v780_v9 = vadd.f32 1.0, %v960_v6 }
 0x431   :  { %785 = vst.msk [vmem:[%s1187_s12 + $0x8] sm:$0xff] %vm545_vm3, %v783_v7  ;;  %v782_v10 = vmul.f32 %v780_v9, %v774_v8 }
 0x433   :  { %784 = vst.msk [vmem:[%s1187_s12] sm:$0xff] %vm545_vm3, %v782_v10 }

// kernel: up_forward.26
= control target key start
LH: loop header
LB: loop body
LE: loop exit
PB: predicated region body
PF: predicated region fallthrough
CT: control target
= control target key end

     0   :  { %s511_s12 = smov 0   ;;  %s567_s0 = inlined_call_operand.vmem [shape: f32[2,4,2,64], index: 0, kind: input, shape index: {}]   ;;  %s568_s1 = inlined_call_operand.vmem [shape: f32[2,4,1,1], index: 1, kind: input, shape index: {}]   ;;  %s569_s2 = inlined_call_operand.vmem [shape: f32[2,4,1,1], index: 2, kind: input, shape index: {}]   ;;  %s570_s3 = inlined_call_operand.vmem [shape: f32[2,4,2,64], index: 3, kind: output, shape index: {}]  }
   0x1 LB: > { %s446_s13 = sadd.s32 4294967295, %s488_s12   ;;  %p450_p0 = scmp.ge.s32.totalorder %s488_s12, 1  ;;  %s488_s12 = sphi %s511_s12, %s13_s12  }
   0x2   : > { %p155_p1 = scmp.lt.s32.totalorder %s488_s12, 3 }
   0x4   : > { %p156_p2 = pnand %p450_p0, %p155_p1 }
   0x5   : > { %p187_p3 = scmp.lt.s32.totalorder (!%p156_p2), %s446_s13, 1 }
   0x6   : > { %159 = sbr.rel (%p156_p2) target bundleno = 416 (0x1a0), region = 32 }
   0xb   : > { %s572_s13 = smov (!%p187_p3, %s446_s13), 1  ;;  %vm209_vm0 = vcmask 517120   ;;  %v490_v8 = vmov 0   ;;  %vm227_vm1 = vcmask 1041408  }
   0xc   : > { %s467_s14 = sshll.u32 %s572_s13, 3  ;;  %479 = vset.pattern.permute.xlu1 %v490_v8  ;;  %478 = vset.pattern.permute.xlu0 %v490_v8  ;;  %s453_s18 = sshll.u32 %s572_s13, 2 }
   0xd   : > { %s191_s17 = scalar_lea.vmem %s567_s0, %s467_s14  ;;  %s195_s21 = scalar_lea.vmem %s568_s1, %s453_s18 }
   0xe   : > { %v205_v0 = vld [vmem:[%s191_s17] sm:$0x3]  ;;  %v207_v1 = vld [vmem:[%s191_s17 + $0x4] sm:$0x3]  ;;  %v206_v2 = vld [vmem:[%s191_s17 + $0x2] sm:$0x3]  ;;  %s199_s24 = scalar_lea.vmem %s569_s2, %s453_s18  ;;  %s204_s27 = scalar_lea.vmem %s570_s3, %s467_s14 }
   0xf   : > { %v210_v3 = vsel %vm209_vm0, %v205_v0, 0.0  ;;  %v216_v4 = vsel %vm209_vm0, %v207_v1, 0.0  ;;  %v208_v5 = vld [vmem:[%s191_s17 + $0x6] sm:$0x3]  ;;  %v213_v6 = vsel %vm209_vm0, %v206_v2, 0.0 }
  0x10   : > { %211 = vadd.xlane.f32.xlu0 %v210_v3  ;;  %217 = vadd.xlane.f32.xlu1 %v216_v4  ;;  %v219_v7 = vsel %vm209_vm0, %v208_v5, 0.0  ;;  %v458_v34 = vld [vmem:[%s195_s21 + $0x1] ss:$0 sm:$0xff]  ;;  %v459_v35 = vld [vmem:[%s195_s21 + $0x2] ss:$0 sm:$0xff] }
  0x11   : > { %v460_v36 = vld [vmem:[%s195_s21 + $0x3] ss:$0 sm:$0xff]  ;;  %v457_v37 = vld [vmem:[%s195_s21] ss:$0 sm:$0xff]  ;;  %v462_v39 = vld [vmem:[%s199_s24 + $0x1] ss:$0 sm:$0xff] }
  0x12   : > { %v461_v38 = vld [vmem:[%s199_s24] ss:$0 sm:$0xff]  ;;  %v463_v40 = vld [vmem:[%s199_s24 + $0x2] ss:$0 sm:$0xff]  ;;  %v464_v44 = vld [vmem:[%s199_s24 + $0x3] ss:$0 sm:$0xff] }
  0x14   : > { %214 = vadd.xlane.f32.xlu0 %v213_v6  ;;  %220 = vadd.xlane.f32.xlu1 %v219_v7 }
  0x99   : > { %v212_v9 = vpop.xlane.xlu0 %211  ;;  %v218_v10 = vpop.xlane.xlu1 %217 }
  0x9a   : > { %v223_v11 = vmul.f32 0.015625, %v212_v9  ;;  %v225_v14 = vmul.f32 0.015625, %v218_v10 }
  0x9c   : > { %v228_v17 = vsel %vm227_vm1, %v223_v11, 0.0  ;;  %v231_v20 = vsel %vm227_vm1, %v225_v14, 0.0 }
  0x9d   : > { %v215_v12 = vpop.xlane.xlu0 %214  ;;  %v221_v13 = vpop.xlane.xlu1 %220 }
  0x9e   : > { %v224_v15 = vmul.f32 0.015625, %v215_v12  ;;  %v226_v16 = vmul.f32 0.015625, %v221_v13 }
  0xa0   : > { %v229_v18 = vsel %vm227_vm1, %v224_v15, 0.0  ;;  %v233_v21 = vsel %vm227_vm1, %v226_v16, 0.0 }
  0xa1   : > { %v230_v19 = vadd.f32 %v229_v18, %v228_v17 }
  0xa3   : > { %v232_v22 = vadd.f32 %v231_v20, %v230_v19 }
  0xa5   : > { %v234_v23 = vadd.f32 %v233_v21, %v232_v22 }
  0xa7   : > { %v236_v24 = vmul.f32 0.25, %v234_v23 }
  0xa9   : > { %v238_v25 = vsub.f32 %v206_v2, %v236_v24  ;;  %v535_v26 = vsub.f32 %v205_v0, %v236_v24  ;;  %v239_v27 = vsub.f32 %v207_v1, %v236_v24  ;;  %v240_v41 = vsub.f32 %v208_v5, %v236_v24 }
  0xab   : > { %v242_v28 = vmul.f32 %v238_v25, %v238_v25  ;;  %v241_v29 = vmul.f32 %v535_v26, %v535_v26  ;;  %v243_v32 = vmul.f32 %v239_v27, %v239_v27  ;;  %v244_v42 = vmul.f32 %v240_v41, %v240_v41 }
  0xad   : > { %v248_v30 = vsel %vm209_vm0, %v242_v28, 0.0  ;;  %v245_v31 = vsel %vm209_vm0, %v241_v29, 0.0  ;;  %v251_v33 = vsel %vm209_vm0, %v243_v32, 0.0  ;;  %v254_v43 = vsel %vm209_vm0, %v244_v42, 0.0 }
  0xae   : > { %249 = vadd.xlane.f32.xlu1 %v248_v30  ;;  %246 = vadd.xlane.f32.xlu0 %v245_v31 }
  0xb2   : > { %252 = vadd.xlane.f32.xlu0 %v251_v33 }
  0xbf   : > { %304 = vperm.xlu1 %479, %v458_v34  }
  0xc3   : > { %308 = vperm.xlu1 %479, %v459_v35  }
  0xc7   : > { %312 = vperm.xlu1 %479, %v460_v36  }
  0xc8   : > { %300 = vperm.xlu0 %478, %v457_v37  }
  0xcb   : > { %344 = vperm.xlu1 %479, %v461_v38  }
  0xcf   : > { %348 = vperm.xlu1 %479, %v462_v39  }
  0xd3   : > { %352 = vperm.xlu1 %479, %v463_v40  }
  0xf7   : > { %255 = vadd.xlane.f32.xlu1 %v254_v43 }
 0x108   : > { %356 = vperm.xlu1 %479, %v464_v44  }
 0x137   : > { %v250_v45 = vpop.xlane.xlu1 %249  ;;  %v247_v50 = vpop.xlane.xlu0 %246 }
 0x138   : > { %v258_v53 = vmul.f32 0.015625, %v250_v45  ;;  %v257_v54 = vmul.f32 0.015625, %v247_v50 }
 0x13a   : > { %v262_v57 = vsel %vm227_vm1, %v258_v53, 0.0  ;;  %v261_v58 = vsel %vm227_vm1, %v257_v54, 0.0 }
 0x13b   : > { %v305_v46 = vpop.permute.xlu1 %304  ;;  %v253_v52 = vpop.xlane.xlu0 %252  ;;  %v263_v60 = vadd.f32 %v262_v57, %v261_v58 }
 0x13c   : > { %v259_v55 = vmul.f32 0.015625, %v253_v52 }
 0x13e   : > { %v264_v59 = vsel %vm227_vm1, %v259_v55, 0.0 }
 0x13f   : > { %v309_v47 = vpop.permute.xlu1 %308  ;;  %v265_v63 = vadd.f32 %v264_v59, %v263_v60 }
 0x143   : > { %v313_v48 = vpop.permute.xlu1 %312  ;;  %v301_v5 = vpop.permute.xlu0 %300 }
 0x147   : > { %v345_v49 = vpop.permute.xlu1 %344 }
 0x14b   : > { %v349_v51 = vpop.permute.xlu1 %348 }
 0x14f   : > { %v353_v56 = vpop.permute.xlu1 %352 }
 0x180   : > { %v256_v61 = vpop.xlane.xlu1 %255 }
 0x181   : > { %v260_v62 = vmul.f32 0.015625, %v256_v61 }
 0x183   : > { %v266_v0 = vsel %vm227_vm1, %v260_v62, 0.0 }
 0x184   : > { %v267_v1 = vadd.f32 %v266_v0, %v265_v63  ;;  %v357_v14 = vpop.permute.xlu1 %356 }
 0x186   : > { %v268_v2 = vmul.f32 0.25, %v267_v1 }
 0x188   : > { %v269_v3 = vadd.f32 1e-05, %v268_v2 }
 0x18a   : > { %480 = vrsqrt.f32 %v269_v3 }
 0x197   : > { %v481_v4 = vpop.eup %480 }
 0x198   : > { %v272_v6 = vmul.f32 %v481_v4, %v238_v25  ;;  %v273_v7 = vmul.f32 %v481_v4, %v239_v27  ;;  %v274_v8 = vmul.f32 %v481_v4, %v240_v41  ;;  %v271_v9 = vmul.f32 %v481_v4, %v535_v26 }
 0x19a   : > { %v316_v10 = vmul.f32 %v305_v46, %v272_v6  ;;  %v317_v11 = vmul.f32 %v309_v47, %v273_v7  ;;  %v318_v12 = vmul.f32 %v313_v48, %v274_v8  ;;  %v315_v13 = vmul.f32 %v301_v5, %v271_v9 }
 0x19c   : > { %v360_v15 = vadd.f32 %v349_v51, %v316_v10  ;;  %v361_v16 = vadd.f32 %v353_v56, %v317_v11  ;;  %v362_v17 = vadd.f32 %v357_v14, %v318_v12  ;;  %v359_v18 = vadd.f32 %v345_v49, %v315_v13 }
 0x19e   : > { %364 = vst.msk [vmem:[%s204_s27 + $0x2] sm:$0x3] %vm209_vm0, %v360_v15  ;;  %365 = vst.msk [vmem:[%s204_s27 + $0x4] sm:$0x3] %vm209_vm0, %v361_v16 }
 0x19f   : > { %366 = vst.msk [vmem:[%s204_s27 + $0x6] sm:$0x3] %vm209_vm0, %v362_v17  ;;  %363 = vst.msk [vmem:[%s204_s27] sm:$0x3] %vm209_vm0, %v359_v18 }
 0x1a0 PF: > { %s13_s12 = sadd.s32 1, %s488_s12  }
 0x1a1   : > { %p10_p4 = scmp.ge.s32.totalorder %s13_s12, 4  }
 0x1a3   :  { %12 = sbr.rel (!%p10_p4) target bundleno = 1 (0x1), region = 68 }

// kernel: up_forward.28
= control target key start
LH: loop header
LB: loop body
LE: loop exit
PB: predicated region body
PF: predicated region fallthrough
CT: control target
= control target key end

     0   :  { %s539_s12 = smov 0   ;;  %s595_s0 = inlined_call_operand.vmem [shape: f32[2,4,2,64], index: 0, kind: input, shape index: {}]   ;;  %s596_s1 = inlined_call_operand.vmem [shape: f32[2,4,1,1], index: 1, kind: input, shape index: {}]   ;;  %s597_s2 = inlined_call_operand.vmem [shape: f32[2,4,1,1], index: 2, kind: input, shape index: {}]   ;;  %s598_s3 = inlined_call_operand.vmem [shape: f32[2,4,2,64], index: 3, kind: output, shape index: {}]  }
   0x1 LB: > { %s466_s13 = sadd.s32 4294967295, %s516_s12   ;;  %p470_p0 = scmp.ge.s32.totalorder %s516_s12, 1  ;;  %s516_s12 = sphi %s539_s12, %s13_s12  }
   0x2   : > { %p155_p1 = scmp.lt.s32.totalorder %s516_s12, 3 }
   0x4   : > { %p156_p2 = pnand %p470_p0, %p155_p1 }
   0x5   : > { %p187_p3 = scmp.lt.s32.totalorder (!%p156_p2), %s466_s13, 1 }
   0x6   : > { %159 = sbr.rel (%p156_p2) target bundleno = 438 (0x1b6), region = 32 }
   0xb   : > { %s600_s13 = smov (!%p187_p3, %s466_s13), 1  ;;  %vm209_vm0 = vcmask 517120   ;;  %v518_v8 = vmov 0   ;;  %vm227_vm1 = vcmask 1041408  }
   0xc   : > { %s487_s14 = sshll.u32 %s600_s13, 3  ;;  %499 = vset.pattern.permute.xlu1 %v518_v8  ;;  %498 = vset.pattern.permute.xlu0 %v518_v8  ;;  %s473_s18 = sshll.u32 %s600_s13, 2 }
   0xd   : > { %s191_s17 = scalar_lea.vmem %s595_s0, %s487_s14  ;;  %s195_s21 = scalar_lea.vmem %s596_s1, %s473_s18 }
   0xe   : > { %v205_v0 = vld [vmem:[%s191_s17] sm:$0x3]  ;;  %v207_v1 = vld [vmem:[%s191_s17 + $0x4] sm:$0x3]  ;;  %v206_v2 = vld [vmem:[%s191_s17 + $0x2] sm:$0x3]  ;;  %s199_s24 = scalar_lea.vmem %s597_s2, %s473_s18  ;;  %s204_s27 = scalar_lea.vmem %s598_s3, %s487_s14 }
   0xf   : > { %v210_v3 = vsel %vm209_vm0, %v205_v0, 0.0  ;;  %v216_v4 = vsel %vm209_vm0, %v207_v1, 0.0  ;;  %v208_v5 = vld [vmem:[%s191_s17 + $0x6] sm:$0x3]  ;;  %v213_v6 = vsel %vm209_vm0, %v206_v2, 0.0 }
  0x10   : > { %211 = vadd.xlane.f32.xlu0 %v210_v3  ;;  %217 = vadd.xlane.f32.xlu1 %v216_v4  ;;  %v219_v7 = vsel %vm209_vm0, %v208_v5, 0.0  ;;  %v478_v34 = vld [vmem:[%s195_s21 + $0x1] ss:$0 sm:$0xff]  ;;  %v479_v35 = vld [vmem:[%s195_s21 + $0x2] ss:$0 sm:$0xff] }
  0x11   : > { %v480_v36 = vld [vmem:[%s195_s21 + $0x3] ss:$0 sm:$0xff]  ;;  %v477_v37 = vld [vmem:[%s195_s21] ss:$0 sm:$0xff]  ;;  %v482_v39 = vld [vmem:[%s199_s24 + $0x1] ss:$0 sm:$0xff] }
  0x12   : > { %v481_v38 = vld [vmem:[%s199_s24] ss:$0 sm:$0xff]  ;;  %v483_v40 = vld [vmem:[%s199_s24 + $0x2] ss:$0 sm:$0xff]  ;;  %v484_v44 = vld [vmem:[%s199_s24 + $0x3] ss:$0 sm:$0xff] }
  0x14   : > { %214 = vadd.xlane.f32.xlu0 %v213_v6  ;;  %220 = vadd.xlane.f32.xlu1 %v219_v7 }
  0x99   : > { %v212_v9 = vpop.xlane.xlu0 %211  ;;  %v218_v10 = vpop.xlane.xlu1 %217 }
  0x9a   : > { %v223_v11 = vmul.f32 0.015625, %v212_v9  ;;  %v225_v14 = vmul.f32 0.015625, %v218_v10 }
  0x9c   : > { %v228_v17 = vsel %vm227_vm1, %v223_v11, 0.0  ;;  %v231_v20 = vsel %vm227_vm1, %v225_v14, 0.0 }
  0x9d   : > { %v215_v12 = vpop.xlane.xlu0 %214  ;;  %v221_v13 = vpop.xlane.xlu1 %220 }
  0x9e   : > { %v224_v15 = vmul.f32 0.015625, %v215_v12  ;;  %v226_v16 = vmul.f32 0.015625, %v221_v13 }
  0xa0   : > { %v229_v18 = vsel %vm227_vm1, %v224_v15, 0.0  ;;  %v233_v21 = vsel %vm227_vm1, %v226_v16, 0.0 }
  0xa1   : > { %v230_v19 = vadd.f32 %v229_v18, %v228_v17 }
  0xa3   : > { %v232_v22 = vadd.f32 %v231_v20, %v230_v19 }
  0xa5   : > { %v234_v23 = vadd.f32 %v233_v21, %v232_v22 }
  0xa7   : > { %v236_v24 = vmul.f32 0.25, %v234_v23 }
  0xa9   : > { %v238_v25 = vsub.f32 %v206_v2, %v236_v24  ;;  %v563_v26 = vsub.f32 %v205_v0, %v236_v24  ;;  %v239_v27 = vsub.f32 %v207_v1, %v236_v24  ;;  %v240_v41 = vsub.f32 %v208_v5, %v236_v24 }
  0xab   : > { %v242_v28 = vmul.f32 %v238_v25, %v238_v25  ;;  %v241_v29 = vmul.f32 %v563_v26, %v563_v26  ;;  %v243_v32 = vmul.f32 %v239_v27, %v239_v27  ;;  %v244_v42 = vmul.f32 %v240_v41, %v240_v41 }
  0xad   : > { %v248_v30 = vsel %vm209_vm0, %v242_v28, 0.0  ;;  %v245_v31 = vsel %vm209_vm0, %v241_v29, 0.0  ;;  %v251_v33 = vsel %vm209_vm0, %v243_v32, 0.0  ;;  %v254_v43 = vsel %vm209_vm0, %v244_v42, 0.0 }
  0xae   : > { %249 = vadd.xlane.f32.xlu1 %v248_v30  ;;  %246 = vadd.xlane.f32.xlu0 %v245_v31 }
  0xb2   : > { %252 = vadd.xlane.f32.xlu0 %v251_v33 }
  0xbf   : > { %304 = vperm.xlu1 %499, %v478_v34  }
  0xc3   : > { %308 = vperm.xlu1 %499, %v479_v35  }
  0xc7   : > { %312 = vperm.xlu1 %499, %v480_v36  }
  0xc8   : > { %300 = vperm.xlu0 %498, %v477_v37  }
  0xcb   : > { %344 = vperm.xlu1 %499, %v481_v38  }
  0xcf   : > { %348 = vperm.xlu1 %499, %v482_v39  }
  0xd3   : > { %352 = vperm.xlu1 %499, %v483_v40  }
  0xf7   : > { %255 = vadd.xlane.f32.xlu1 %v254_v43 }
 0x108   : > { %356 = vperm.xlu1 %499, %v484_v44  }
 0x137   : > { %v250_v45 = vpop.xlane.xlu1 %249  ;;  %v247_v50 = vpop.xlane.xlu0 %246 }
 0x138   : > { %v258_v53 = vmul.f32 0.015625, %v250_v45  ;;  %v257_v54 = vmul.f32 0.015625, %v247_v50 }
 0x13a   : > { %v262_v57 = vsel %vm227_vm1, %v258_v53, 0.0  ;;  %v261_v58 = vsel %vm227_vm1, %v257_v54, 0.0 }
 0x13b   : > { %v305_v46 = vpop.permute.xlu1 %304  ;;  %v253_v52 = vpop.xlane.xlu0 %252  ;;  %v263_v60 = vadd.f32 %v262_v57, %v261_v58 }
 0x13c   : > { %v259_v55 = vmul.f32 0.015625, %v253_v52 }
 0x13e   : > { %v264_v59 = vsel %vm227_vm1, %v259_v55, 0.0 }
 0x13f   : > { %v309_v47 = vpop.permute.xlu1 %308  ;;  %v265_v63 = vadd.f32 %v264_v59, %v263_v60 }
 0x143   : > { %v313_v48 = vpop.permute.xlu1 %312  ;;  %v301_v5 = vpop.permute.xlu0 %300 }
 0x147   : > { %v345_v49 = vpop.permute.xlu1 %344 }
 0x14b   : > { %v349_v51 = vpop.permute.xlu1 %348 }
 0x14f   : > { %v353_v56 = vpop.permute.xlu1 %352 }
 0x180   : > { %v256_v61 = vpop.xlane.xlu1 %255 }
 0x181   : > { %v260_v62 = vmul.f32 0.015625, %v256_v61 }
 0x183   : > { %v266_v0 = vsel %vm227_vm1, %v260_v62, 0.0 }
 0x184   : > { %v267_v1 = vadd.f32 %v266_v0, %v265_v63  ;;  %v357_v14 = vpop.permute.xlu1 %356 }
 0x186   : > { %v268_v2 = vmul.f32 0.25, %v267_v1 }
 0x188   : > { %v269_v3 = vadd.f32 1e-05, %v268_v2 }
 0x18a   : > { %500 = vrsqrt.f32 %v269_v3 }
 0x197   : > { %v501_v4 = vpop.eup %500 }
 0x198   : > { %v272_v6 = vmul.f32 %v501_v4, %v238_v25  ;;  %v273_v7 = vmul.f32 %v501_v4, %v239_v27  ;;  %v274_v8 = vmul.f32 %v501_v4, %v240_v41  ;;  %v271_v9 = vmul.f32 %v501_v4, %v563_v26 }
 0x19a   : > { %v316_v10 = vmul.f32 %v305_v46, %v272_v6  ;;  %v317_v11 = vmul.f32 %v309_v47, %v273_v7  ;;  %v318_v12 = vmul.f32 %v313_v48, %v274_v8  ;;  %v315_v13 = vmul.f32 %v301_v5, %v271_v9 }
 0x19c   : > { %v360_v15 = vadd.f32 %v349_v51, %v316_v10  ;;  %v361_v16 = vadd.f32 %v353_v56, %v317_v11  ;;  %v362_v17 = vadd.f32 %v357_v14, %v318_v12  ;;  %v359_v18 = vadd.f32 %v345_v49, %v315_v13 }
 0x19e   : > { %v368_v19 = vmul.f32 0.70710677, %v360_v15  ;;  %v369_v20 = vmul.f32 0.70710677, %v361_v16  ;;  %v370_v21 = vmul.f32 0.70710677, %v362_v17 }
 0x19f   : > { %v367_v22 = vmul.f32 0.70710677, %v359_v18  ;;  %v364_v25 = vmul.f32 0.5, %v360_v15  ;;  %v365_v28 = vmul.f32 0.5, %v361_v16  ;;  %v366_v32 = vmul.f32 0.5, %v362_v17 }
 0x1a0   : > { %502 = verf.f32 %v368_v19  ;;  %v363_v35 = vmul.f32 0.5, %v359_v18 }
 0x1a1   : > { %504 = verf.f32 %v369_v20 }
 0x1a2   : > { %506 = verf.f32 %v370_v21 }
 0x1a3   : > { %508 = verf.f32 %v367_v22 }
 0x1ad   : > { %v503_v23 = vpop.eup %502 }
 0x1ae   : > { %v505_v24 = vpop.eup %504  ;;  %v376_v26 = vadd.f32 1.0, %v503_v23 }
 0x1af   : > { %v507_v27 = vpop.eup %506  ;;  %v377_v29 = vadd.f32 1.0, %v505_v24 }
 0x1b0   : > { %v509_v30 = vpop.eup %508  ;;  %v380_v31 = vmul.f32 %v376_v26, %v364_v25  ;;  %v378_v33 = vadd.f32 1.0, %v507_v27 }
 0x1b1   : > { %v381_v34 = vmul.f32 %v377_v29, %v365_v28  ;;  %v375_v36 = vadd.f32 1.0, %v509_v30 }
 0x1b2   : > { %384 = vst.msk [vmem:[%s204_s27 + $0x2] sm:$0x3] %vm209_vm0, %v380_v31  ;;  %v382_v37 = vmul.f32 %v378_v33, %v366_v32 }
 0x1b3   : > { %385 = vst.msk [vmem:[%s204_s27 + $0x4] sm:$0x3] %vm209_vm0, %v381_v34  ;;  %v379_v38 = vmul.f32 %v375_v36, %v363_v35 }
 0x1b4   : > { %386 = vst.msk [vmem:[%s204_s27 + $0x6] sm:$0x3] %vm209_vm0, %v382_v37 }
 0x1b5   : > { %383 = vst.msk [vmem:[%s204_s27] sm:$0x3] %vm209_vm0, %v379_v38 }
 0x1b6 PF: > { %s13_s12 = sadd.s32 1, %s516_s12  }
 0x1b7   : > { %p10_p4 = scmp.ge.s32.totalorder %s13_s12, 4  }
 0x1b9   :  { %12 = sbr.rel (!%p10_p4) target bundleno = 1 (0x1), region = 68 }

// kernel: up_forward.29
= control target key start
LH: loop header
LB: loop body
LE: loop exit
PB: predicated region body
PF: predicated region fallthrough
CT: control target
= control target key end

     0   :  { %s508_s12 = smov 0   ;;  %s510_s13 = smov 0   ;;  %s547_s0 = inlined_call_operand.vmem [shape: bf16[32,8], index: 0, kind: input, shape index: {}]   ;;  %s548_s1 = inlined_call_operand.vmem [shape: f32[8,128], index: 1, kind: input, shape index: {}]   ;;  %s549_s2 = inlined_call_operand.vmem [shape: f32[32,1], index: 2, kind: input, shape index: {}]   ;;  %s550_s3 = inlined_call_operand.vmem [shape: f32[32,128], index: 3, kind: output, shape index: {}]  }
   0x1   :  { %s512_s14 = smov 0  }
   0x2 LB: > { %s25_s15 = sadd.s32 1, %s479_s13  ;;  %p413_p0 = scmp.ge.s32.totalorder %s483_s14, 1  ;;  %s483_s14 = sphi %s512_s14, %s13_s14   ;;  %s479_s13 = sphi %s510_s13, %s552_s13   ;;  %s475_s12 = sphi %s508_s12, %s551_s12  }
   0x3   : > { %p27_p1 = scmp.ge.s32.totalorder %s25_s15, 2  ;;  %p172_p2 = scmp.lt.s32.totalorder %s483_s14, 3 }
   0x5   : > { %s554_s15 = smov (%p27_p1, %s25_s15), 0  ;;  %p173_p3 = pnand %p413_p0, %p172_p2 }
   0x6   : > { %s414_s18 = sshll.u32 (!%p173_p3), %s475_s12, 1 }
   0x7   : > { %176 = sbr.rel (%p173_p3) target bundleno = 219 (0xdb), region = 32  ;;  %p209_p4 = scmp.lt.s32.totalorder (!%p173_p3), %s414_s18, 3 }
   0xc   : > { %v236_v0 = vld [vmem:[%s548_s1] sm:$0xff]  ;;  %vm259_vm0 = vcmask 1043456   ;;  %v485_v1 = vmov 0.0   ;;  %vm486_vm1 = vmmov 0   ;;  %v487_v3 = vmov 0   ;;  %s556_s18 = smov (!%p209_p4, %s414_s18), 3 }
   0xd   : > { %426 = vmatprep.subr.bf16.mxu0 %v485_v1  ;;  %v237_v2 = vpack.c.bf16 %v236_v0, %v236_v0  ;;  %428 = vmatprep.mubr.msk.bf16.mxu0 %vm486_vm1, %v485_v1  ;;  %s415_s19 = sshll.u32 %s556_s18, 2  ;;  %s417_s20 = sshll.u32 %s556_s18, 3  ;;  %vm255_vm2 = vcmask 64512  }
   0xe   : > { %459 = vset.pattern.permute.xlu0 %v487_v3  ;;  %s212_s23 = scalar_lea.vmem %s547_s0, %s415_s19  ;;  %s222_s26 = scalar_lea.vmem %s549_s2, %s417_s20 }
   0xf   : > { %v261_v4 = vsel %vm259_vm0, %v237_v2, 0  ;;  %v460_v5 = vld [vmem:[%s212_s23] sm:$0xff]   ;;  %v239_v7 = vld [vmem:[%s222_s26 + $0x8] sm:$0xff]  ;;  %s231_s29 = scalar_lea.vmem %s550_s3, %s417_s20 }
  0x10   : > { %427 = vmatpush3.bf16.msra.mxu0 %v261_v4  ;;  %v238_v6 = vld [vmem:[%s222_s26] sm:$0xff] }
  0x11   : > { %242 = vperm.xlu0 %459, %v238_v6  }
  0x13   : > { %429 = vmatmul.mubr.msk.bf16.vlgmr.msra.gmra.mxu0 %vm255_vm2, %v460_v5 }
  0x15   : > { %247 = vperm.xlu0 %459, %v239_v7  }
  0x8c   : > { %v243_v8 = vpop.permute.xlu0 %242 }
  0x90   : > { %v248_v12 = vpop.permute.xlu0 %247 }
  0xd3   : > { %v297_v9 = vpop.f32.mrf.mxu0 }
  0xd4   : > { %v298_v10 = vadd.f32 %v297_v9, %v243_v8 }
  0xd5   : > { %v430_v11 = vpop.f32.mrf.mxu0 }
  0xd6   : > { %304 = vst [vmem:[%s231_s29] sm:$0xff] %v298_v10 }
  0xd7   : > { %v300_v13 = vpop.f32.mrf.mxu0 }
  0xd8   : > { %v301_v14 = vadd.f32 %v300_v13, %v248_v12 }
  0xd9   : > { %v431_v15 = vpop.f32.mrf.mxu0 }
  0xda   : > { %305 = vst [vmem:[%s231_s29 + $0x8] sm:$0xff] %v301_v14 }
  0xdb PF: > { %s13_s14 = sadd.s32 1, %s483_s14   ;;  %s551_s12 = smov %s479_s13 }
  0xdc   : > { %p10_p5 = scmp.ge.s32.totalorder %s13_s14, 4   ;;  %s552_s13 = smov %s554_s15 }
  0xde   :  { %12 = sbr.rel (!%p10_p5) target bundleno = 2 (0x2), region = 68 }

// kernel: up_forward.30
= control target key start
LH: loop header
LB: loop body
LE: loop exit
PB: predicated region body
PF: predicated region fallthrough
CT: control target
= control target key end

     0   :  { %s1777_s21 = smov 0   ;;  %s2350_s0 = inlined_call_operand.vmem [shape: f32[8,4,2,64], index: 0, kind: input, shape index: {}]   ;;  %s2351_s1 = inlined_call_operand.vmem [shape: f32[8,4,1,1], index: 1, kind: input, shape index: {}]   ;;  %s2352_s2 = inlined_call_operand.vmem [shape: f32[8,4,1,1], index: 2, kind: input, shape index: {}]   ;;  %s2353_s3 = inlined_call_operand.vmem [shape: f32[8,4,2,64], index: 3, kind: input, shape index: {}]   ;;  %s2354_s4 = inlined_call_operand.vmem [shape: f32[8,4,1,1], index: 4, kind: input, shape index: {}]   ;;  %s2355_s5 = inlined_call_operand.vmem [shape: f32[8,4,1,1], index: 5, kind: input, shape index: {}]   ;;  %s2356_s6 = inlined_call_operand.vmem [shape: f32[8,4,2,64], index: 6, kind: output, shape index: {}]  }
   0x1 LB: > { %s1591_s22 = sadd.s32 4294967295, %s1739_s21   ;;  %p1595_p0 = scmp.ge.s32.totalorder %s1739_s21, 1  ;;  %s1739_s21 = sphi %s1777_s21, %s16_s21  }
   0x2   : > { %p270_p1 = scmp.lt.s32.totalorder %s1739_s21, 3 }
   0x4   : > { %p271_p2 = pnand %p1595_p0, %p270_p1 }
   0x6   : > { %274 = sbr.rel (%p271_p2) target bundleno = 426 (0x1aa), region = 44 }
   0xb   : > { %s1596_s23 = sshll.u32 %s1591_s22, 2  ;;  %v1741_v0 = vmov 0   ;;  %vm389_vm0 = vcmask 517120   ;;  %vm455_vm1 = vcmask 1041408  }
   0xc   : > { %p329_p3 = scmp.lt.s32.totalorder %s1596_s23, 7  ;;  %1692 = vset.pattern.permute.xlu1 %v1741_v0  ;;  %1691 = vset.pattern.permute.xlu0 %v1741_v0 }
   0xe   : > { %s2383_s23 = smov (!%p329_p3, %s1596_s23), 7 }
   0xf   : > { %s1788_s24 = sshll.u32 %s2383_s23, 3  ;;  %s1877_s28 = sshll.u32 %s2383_s23, 2 }
  0x10   : > { %s1794_s27 = scalar_lea.vmem %s2350_s0, %s1788_s24  ;;  %s1883_s7 = scalar_lea.vmem %s2351_s1, %s1877_s28 }
  0x11   : > { %v1797_v1 = vld [vmem:[%s1794_s27 + $0x4] sm:$0x3]  ;;  %v1800_v2 = vld [vmem:[%s1794_s27] sm:$0x3]  ;;  %v1803_v3 = vld [vmem:[%s1794_s27 + $0x6] sm:$0x3]  ;;  %s1900_s10 = scalar_lea.vmem %s2352_s2, %s1877_s28  ;;  %s1922_s13 = scalar_lea.vmem %s2354_s4, %s1877_s28 }
  0x12   : > { %v396_v4 = vsel %vm389_vm0, %v1797_v1, 0.0  ;;  %v390_v5 = vsel %vm389_vm0, %v1800_v2, 0.0  ;;  %v1810_v6 = vld [vmem:[%s1794_s27 + $0x2] sm:$0x3]  ;;  %v399_v7 = vsel %vm389_vm0, %v1803_v3, 0.0  ;;  %s2076_s16 = scalar_lea.vmem %s2355_s5, %s1877_s28  ;;  %s2183_s19 = scalar_lea.vmem %s2353_s3, %s1788_s24 }
  0x13   : > { %397 = vadd.xlane.f32.xlu1 %v396_v4  ;;  %391 = vadd.xlane.f32.xlu0 %v390_v5  ;;  %v393_v8 = vsel %vm389_vm0, %v1810_v6, 0.0  ;;  %v1817_v9 = vld [vmem:[%s1794_s27 + $0xa] sm:$0x3]  ;;  %v1820_v10 = vld [vmem:[%s1794_s27 + $0x8] sm:$0x3]  ;;  %s2276_s23 = scalar_lea.vmem %s2356_s6, %s1788_s24 }
  0x14   : > { %v405_v11 = vsel %vm389_vm0, %v1817_v9, 0.0  ;;  %v402_v12 = vsel %vm389_vm0, %v1820_v10, 0.0  ;;  %v1827_v13 = vld [vmem:[%s1794_s27 + $0xe] sm:$0x3]  ;;  %v1830_v14 = vld [vmem:[%s1794_s27 + $0xc] sm:$0x3] }
  0x15   : > { %v411_v15 = vsel %vm389_vm0, %v1827_v13, 0.0  ;;  %v408_v16 = vsel %vm389_vm0, %v1830_v14, 0.0  ;;  %v1837_v17 = vld [vmem:[%s1794_s27 + $0x12] sm:$0x3]  ;;  %v1840_v18 = vld [vmem:[%s1794_s27 + $0x10] sm:$0x3] }
  0x16   : > { %v417_v19 = vsel %vm389_vm0, %v1837_v17, 0.0  ;;  %v414_v20 = vsel %vm389_vm0, %v1840_v18, 0.0  ;;  %v1847_v21 = vld [vmem:[%s1794_s27 + $0x16] sm:$0x3]  ;;  %v1850_v22 = vld [vmem:[%s1794_s27 + $0x14] sm:$0x3] }
  0x17   : > { %400 = vadd.xlane.f32.xlu1 %v399_v7  ;;  %394 = vadd.xlane.f32.xlu0 %v393_v8  ;;  %v423_v23 = vsel %vm389_vm0, %v1847_v21, 0.0  ;;  %v420_v24 = vsel %vm389_vm0, %v1850_v22, 0.0  ;;  %v1857_v25 = vld [vmem:[%s1794_s27 + $0x1a] sm:$0x3]  ;;  %v1860_v26 = vld [vmem:[%s1794_s27 + $0x18] sm:$0x3] }
  0x18   : > { %v429_v27 = vsel %vm389_vm0, %v1857_v25, 0.0  ;;  %v426_v28 = vsel %vm389_vm0, %v1860_v26, 0.0  ;;  %v1867_v29 = vld [vmem:[%s1794_s27 + $0x1e] sm:$0x3]  ;;  %v1870_v30 = vld [vmem:[%s1794_s27 + $0x1c] sm:$0x3] }
  0x19   : > { %v435_v31 = vsel %vm389_vm0, %v1867_v29, 0.0  ;;  %v432_v32 = vsel %vm389_vm0, %v1870_v30, 0.0  ;;  %v1614_v33 = vld [vmem:[%s1883_s7 + $0x1] ss:$0 sm:$0xff]  ;;  %v1615_v34 = vld [vmem:[%s1883_s7 + $0x2] ss:$0 sm:$0xff] }
  0x1a   : > { %v1613_v35 = vld [vmem:[%s1883_s7] ss:$0 sm:$0xff]  ;;  %v1616_v36 = vld [vmem:[%s1883_s7 + $0x3] ss:$0 sm:$0xff]  ;;  %v1622_v37 = vld [vmem:[%s1883_s7 + $0x9] ss:$0 sm:$0xff] }
  0x1b   : > { %406 = vadd.xlane.f32.xlu1 %v405_v11  ;;  %403 = vadd.xlane.f32.xlu0 %v402_v12  ;;  %v1617_v38 = vld [vmem:[%s1883_s7 + $0x4] ss:$0 sm:$0xff]  ;;  %v1624_v39 = vld [vmem:[%s1883_s7 + $0xb] ss:$0 sm:$0xff]  ;;  %v1618_v40 = vld [vmem:[%s1883_s7 + $0x5] ss:$0 sm:$0xff] }
  0x1c   : > { %v1626_v41 = vld [vmem:[%s1883_s7 + $0xd] ss:$0 sm:$0xff]  ;;  %v1619_v42 = vld [vmem:[%s1883_s7 + $0x6] ss:$0 sm:$0xff]  ;;  %v1628_v43 = vld [vmem:[%s1883_s7 + $0xf] ss:$0 sm:$0xff] }
  0x1d   : > { %v1620_v44 = vld [vmem:[%s1883_s7 + $0x7] ss:$0 sm:$0xff]  ;;  %v1630_v45 = vld [vmem:[%s1900_s10 + $0x1] ss:$0 sm:$0xff]  ;;  %v1621_v46 = vld [vmem:[%s1883_s7 + $0x8] ss:$0 sm:$0xff] }
  0x1e   : > { %v1632_v47 = vld [vmem:[%s1900_s10 + $0x3] ss:$0 sm:$0xff]  ;;  %v1623_v48 = vld [vmem:[%s1883_s7 + $0xa] ss:$0 sm:$0xff]  ;;  %v1634_v49 = vld [vmem:[%s1900_s10 + $0x5] ss:$0 sm:$0xff] }
  0x1f   : > { %412 = vadd.xlane.f32.xlu1 %v411_v15  ;;  %409 = vadd.xlane.f32.xlu0 %v408_v16  ;;  %v1625_v50 = vld [vmem:[%s1883_s7 + $0xc] ss:$0 sm:$0xff]  ;;  %v1636_v51 = vld [vmem:[%s1900_s10 + $0x7] ss:$0 sm:$0xff]  ;;  %v1627_v52 = vld [vmem:[%s1883_s7 + $0xe] ss:$0 sm:$0xff] }
  0x20   : > { %v1638_v53 = vld [vmem:[%s1900_s10 + $0x9] ss:$0 sm:$0xff]  ;;  %v1629_v54 = vld [vmem:[%s1900_s10] ss:$0 sm:$0xff]  ;;  %v1640_v55 = vld [vmem:[%s1900_s10 + $0xb] ss:$0 sm:$0xff] }
  0x21   : > { %v1631_v56 = vld [vmem:[%s1900_s10 + $0x2] ss:$0 sm:$0xff]  ;;  %v1642_v57 = vld [vmem:[%s1900_s10 + $0xd] ss:$0 sm:$0xff]  ;;  %v1633_v58 = vld [vmem:[%s1900_s10 + $0x4] ss:$0 sm:$0xff] }
  0x22   : > { %v1644_v59 = vld [vmem:[%s1900_s10 + $0xf] ss:$0 sm:$0xff]  ;;  %v1635_v60 = vld [vmem:[%s1900_s10 + $0x6] ss:$0 sm:$0xff]  ;;  %v1646_v61 = vld [vmem:[%s1922_s13 + $0x1] ss:$0 sm:$0xff] }
  0x23   : > { %418 = vadd.xlane.f32.xlu1 %v417_v19  ;;  %415 = vadd.xlane.f32.xlu0 %v414_v20  ;;  %v1637_v62 = vld [vmem:[%s1900_s10 + $0x8] ss:$0 sm:$0xff]  ;;  %v1648_v63 = vld [vmem:[%s1922_s13 + $0x3] ss:$0 sm:$0xff]  ;;  %v1639_v0 = vld [vmem:[%s1900_s10 + $0xa] ss:$0 sm:$0xff] }
  0x24   : > { %v1641_v4 = vld [vmem:[%s1900_s10 + $0xc] ss:$0 sm:$0xff]  ;;  %v1643_v5 = vld [vmem:[%s1900_s10 + $0xe] ss:$0 sm:$0xff]  ;;  %v1645_v7 = vld [vmem:[%s1922_s13] ss:$0 sm:$0xff] }
  0x25   : > { %v1647_v8 = vld [vmem:[%s1922_s13 + $0x2] ss:$0 sm:$0xff]  ;;  %v1649_v11 = vld [vmem:[%s1922_s13 + $0x4] ss:$0 sm:$0xff] }
  0x27   : > { %424 = vadd.xlane.f32.xlu1 %v423_v23  ;;  %421 = vadd.xlane.f32.xlu0 %v420_v24 }
  0x2b   : > { %430 = vadd.xlane.f32.xlu1 %v429_v27  ;;  %427 = vadd.xlane.f32.xlu0 %v426_v28 }
  0x2f   : > { %436 = vadd.xlane.f32.xlu1 %v435_v31  ;;  %433 = vadd.xlane.f32.xlu0 %v432_v32 }
  0x40   : > { %742 = vperm.xlu1 %1692, %v1614_v33  }
  0x44   : > { %746 = vperm.xlu1 %1692, %v1615_v34  }
  0x45   : > { %738 = vperm.xlu0 %1691, %v1613_v35  }
  0x48   : > { %750 = vperm.xlu1 %1692, %v1616_v36  }
  0x49   : > { %774 = vperm.xlu0 %1691, %v1622_v37  }
  0x4c   : > { %754 = vperm.xlu1 %1692, %v1617_v38  }
  0x4d   : > { %782 = vperm.xlu0 %1691, %v1624_v39  }
  0x50   : > { %758 = vperm.xlu1 %1692, %v1618_v40  }
  0x51   : > { %790 = vperm.xlu0 %1691, %v1626_v41  }
  0x54   : > { %762 = vperm.xlu1 %1692, %v1619_v42  }
  0x55   : > { %798 = vperm.xlu0 %1691, %v1628_v43  }
  0x58   : > { %766 = vperm.xlu1 %1692, %v1620_v44  }
  0x59   : > { %918 = vperm.xlu0 %1691, %v1630_v45  }
  0x5c   : > { %770 = vperm.xlu1 %1692, %v1621_v46  }
  0x5d   : > { %926 = vperm.xlu0 %1691, %v1632_v47  }
  0x60   : > { %778 = vperm.xlu1 %1692, %v1623_v48  }
  0x61   : > { %934 = vperm.xlu0 %1691, %v1634_v49  }
  0x64   : > { %786 = vperm.xlu1 %1692, %v1625_v50  }
  0x65   : > { %942 = vperm.xlu0 %1691, %v1636_v51  }
  0x68   : > { %794 = vperm.xlu1 %1692, %v1627_v52  }
  0x69   : > { %950 = vperm.xlu0 %1691, %v1638_v53  }
  0x6c   : > { %914 = vperm.xlu1 %1692, %v1629_v54  }
  0x6d   : > { %958 = vperm.xlu0 %1691, %v1640_v55  }
  0x70   : > { %922 = vperm.xlu1 %1692, %v1631_v56  }
  0x71   : > { %966 = vperm.xlu0 %1691, %v1642_v57  }
  0x74   : > { %930 = vperm.xlu1 %1692, %v1633_v58  }
  0x75   : > { %974 = vperm.xlu0 %1691, %v1644_v59  }
  0x78   : > { %938 = vperm.xlu1 %1692, %v1635_v60  }
  0x79   : > { %1126 = vperm.xlu0 %1691, %v1646_v61  }
  0x7c   : > { %946 = vperm.xlu1 %1692, %v1637_v62  }
  0x7d   : > { %1134 = vperm.xlu0 %1691, %v1648_v63  }
  0x80   : > { %954 = vperm.xlu1 %1692, %v1639_v0  }
  0x84   : > { %962 = vperm.xlu1 %1692, %v1641_v4  }
  0x88   : > { %970 = vperm.xlu1 %1692, %v1643_v5  }
  0x8c   : > { %1122 = vperm.xlu1 %1692, %v1645_v7  }
  0x90   : > { %1130 = vperm.xlu1 %1692, %v1647_v8  }
  0x94   : > { %1138 = vperm.xlu1 %1692, %v1649_v11  }
  0x9c   : > { %v398_v12 = vpop.xlane.xlu1 %397  ;;  %v392_v15 = vpop.xlane.xlu0 %391 }
  0x9d   : > { %v439_v16 = vmul.f32 0.015625, %v392_v15  ;;  %v441_v23 = vmul.f32 0.015625, %v398_v12 }
  0x9f   : > { %v456_v27 = vsel %vm455_vm1, %v439_v16, 0.0  ;;  %v459_v35 = vsel %vm455_vm1, %v441_v23, 0.0 }
  0xa0   : > { %v401_v19 = vpop.xlane.xlu1 %400  ;;  %v395_v20 = vpop.xlane.xlu0 %394 }
  0xa1   : > { %v440_v24 = vmul.f32 0.015625, %v395_v20  ;;  %v442_v28 = vmul.f32 0.015625, %v401_v19 }
  0xa3   : > { %v457_v31 = vsel %vm455_vm1, %v440_v24, 0.0  ;;  %v461_v39 = vsel %vm455_vm1, %v442_v28, 0.0 }
  0xa4   : > { %v458_v32 = vadd.f32 %v457_v31, %v456_v27  ;;  %v407_v33 = vpop.xlane.xlu1 %406  ;;  %v404_v34 = vpop.xlane.xlu0 %403 }
  0xa5   : > { %v444_v36 = vmul.f32 0.015625, %v407_v33  ;;  %v443_v37 = vmul.f32 0.015625, %v404_v34 }
  0xa6   : > { %v460_v38 = vadd.f32 %v459_v35, %v458_v32 }
  0xa7   : > { %v464_v40 = vsel %vm455_vm1, %v444_v36, 0.0  ;;  %v463_v41 = vsel %vm455_vm1, %v443_v37, 0.0 }
  0xa8   : > { %v462_v42 = vadd.f32 %v461_v39, %v460_v38  ;;  %v465_v43 = vadd.f32 %v464_v40, %v463_v41  ;;  %v413_v44 = vpop.xlane.xlu1 %412  ;;  %v410_v45 = vpop.xlane.xlu0 %409 }
  0xa9   : > { %v446_v46 = vmul.f32 0.015625, %v413_v44  ;;  %v445_v47 = vmul.f32 0.015625, %v410_v45 }
  0xaa   : > { %v485_v48 = vmul.f32 0.25, %v462_v42 }
  0xab   : > { %v468_v49 = vsel %vm455_vm1, %v446_v46, 0.0  ;;  %v466_v50 = vsel %vm455_vm1, %v445_v47, 0.0 }
  0xac   : > { %v467_v51 = vadd.f32 %v466_v50, %v465_v43  ;;  %v419_v52 = vpop.xlane.xlu1 %418  ;;  %v416_v53 = vpop.xlane.xlu0 %415  ;;  %v1943_v54 = vsub.f32 %v1800_v2, %v485_v48  ;;  %v1946_v55 = vsub.f32 %v1797_v1, %v485_v48  ;;  %v1953_v62 = vsub.f32 %v1810_v6, %v485_v48 }
  0xad   : > { %v448_v56 = vmul.f32 0.015625, %v419_v52  ;;  %v447_v57 = vmul.f32 0.015625, %v416_v53  ;;  %v1962_v12 = vsub.f32 %v1803_v3, %v485_v48 }
  0xae   : > { %v469_v58 = vadd.f32 %v468_v49, %v467_v51  ;;  %v505_v59 = vmul.f32 %v1943_v54, %v1943_v54  ;;  %v507_v5 = vmul.f32 %v1946_v55, %v1946_v55  ;;  %v506_v16 = vmul.f32 %v1953_v62, %v1953_v62 }
  0xaf   : > { %v471_v60 = vsel %vm455_vm1, %v448_v56, 0.0  ;;  %v470_v61 = vsel %vm455_vm1, %v447_v57, 0.0  ;;  %v508_v32 = vmul.f32 %v1962_v12, %v1962_v12 }
  0xb0   : > { %v486_v63 = vmul.f32 0.25, %v469_v58  ;;  %v472_v0 = vadd.f32 %v471_v60, %v470_v61  ;;  %v425_v2 = vpop.xlane.xlu1 %424  ;;  %v422_v4 = vpop.xlane.xlu0 %421  ;;  %v521_v1 = vsel %vm389_vm0, %v505_v59, 0.0  ;;  %v527_v24 = vsel %vm389_vm0, %v507_v5, 0.0 }
  0xb1   : > { %v450_v7 = vmul.f32 0.015625, %v425_v2  ;;  %v449_v8 = vmul.f32 0.015625, %v422_v4  ;;  %522 = vadd.xlane.f32.xlu0 %v521_v1  ;;  %v524_v35 = vsel %vm389_vm0, %v506_v16, 0.0  ;;  %v530_v44 = vsel %vm389_vm0, %v508_v32, 0.0 }
  0xb2   : > { %v1959_v11 = vsub.f32 %v1820_v10, %v486_v63  ;;  %v1972_v10 = vsub.f32 %v1830_v14, %v486_v63  ;;  %v1980_v36 = vsub.f32 %v1817_v9, %v486_v63  ;;  %v1994_v48 = vsub.f32 %v1827_v13, %v486_v63 }
  0xb3   : > { %v475_v6 = vsel %vm455_vm1, %v450_v7, 0.0  ;;  %v473_v15 = vsel %vm455_vm1, %v449_v8, 0.0 }
  0xb4   : > { %v474_v19 = vadd.f32 %v473_v15, %v472_v0  ;;  %v431_v20 = vpop.xlane.xlu1 %430  ;;  %v428_v23 = vpop.xlane.xlu0 %427  ;;  %v509_v27 = vmul.f32 %v1959_v11, %v1959_v11  ;;  %v511_v41 = vmul.f32 %v1972_v10, %v1972_v10  ;;  %v510_v47 = vmul.f32 %v1980_v36, %v1980_v36 }
  0xb5   : > { %v452_v3 = vmul.f32 0.015625, %v431_v20  ;;  %v451_v28 = vmul.f32 0.015625, %v428_v23  ;;  %528 = vadd.xlane.f32.xlu0 %v527_v24  ;;  %v512_v13 = vmul.f32 %v1994_v48, %v1994_v48 }
  0xb6   : > { %v476_v31 = vadd.f32 %v475_v6, %v474_v19  ;;  %v533_v40 = vsel %vm389_vm0, %v509_v27, 0.0  ;;  %v539_v50 = vsel %vm389_vm0, %v511_v41, 0.0  ;;  %v536_v56 = vsel %vm389_vm0, %v510_v47, 0.0  ;;  %v1661_v41 = vld [vmem:[%s2076_s16] ss:$0 sm:$0xff] }
  0xb7   : > { %v478_v33 = vsel %vm455_vm1, %v452_v3, 0.0  ;;  %v477_v34 = vsel %vm455_vm1, %v451_v28, 0.0  ;;  %v542_v61 = vsel %vm389_vm0, %v512_v13, 0.0  ;;  %v1650_v3 = vld [vmem:[%s1922_s13 + $0x5] ss:$0 sm:$0xff] }
  0xb8   : > { %v487_v37 = vmul.f32 0.25, %v476_v31  ;;  %v479_v38 = vadd.f32 %v478_v33, %v477_v34  ;;  %v437_v14 = vpop.xlane.xlu1 %436  ;;  %525 = vadd.xlane.f32.xlu1 %v524_v35  ;;  %v434_v39 = vpop.xlane.xlu0 %433  ;;  %v1651_v31 = vld [vmem:[%s1922_s13 + $0x6] ss:$0 sm:$0xff]  ;;  %v1652_v33 = vld [vmem:[%s1922_s13 + $0x7] ss:$0 sm:$0xff] }
  0xb9   : > { %v454_v42 = vmul.f32 0.015625, %v437_v14  ;;  %v453_v43 = vmul.f32 0.015625, %v434_v39  ;;  %534 = vadd.xlane.f32.xlu0 %v533_v40  ;;  %v1653_v34 = vld [vmem:[%s1922_s13 + $0x8] ss:$0 sm:$0xff]  ;;  %v1655_v14 = vld [vmem:[%s1922_s13 + $0xa] ss:$0 sm:$0xff] }
  0xba   : > { %v1987_v45 = vsub.f32 %v1840_v18, %v487_v37  ;;  %v2000_v18 = vsub.f32 %v1850_v22, %v487_v37  ;;  %v2008_v57 = vsub.f32 %v1837_v17, %v487_v37  ;;  %v2020_v0 = vsub.f32 %v1847_v21, %v487_v37  ;;  %v1654_v37 = vld [vmem:[%s1922_s13 + $0x9] ss:$0 sm:$0xff]  ;;  %v1656_v39 = vld [vmem:[%s1922_s13 + $0xb] ss:$0 sm:$0xff]  ;;  %v1660_v13 = vld [vmem:[%s1922_s13 + $0xf] ss:$0 sm:$0xff] }
  0xbb   : > { %v482_v9 = vsel %vm455_vm1, %v454_v42, 0.0  ;;  %v480_v46 = vsel %vm455_vm1, %v453_v43, 0.0  ;;  %v1662_v43 = vld [vmem:[%s2076_s16 + $0x1] ss:$0 sm:$0xff] }
  0xbc   : > { %v481_v49 = vadd.f32 %v480_v46, %v479_v38  ;;  %531 = vadd.xlane.f32.xlu1 %v530_v44  ;;  %v513_v51 = vmul.f32 %v1987_v45, %v1987_v45  ;;  %v2002_v53 = vpop.permute.xlu1 %742  ;;  %v515_v22 = vmul.f32 %v2000_v18, %v2000_v18  ;;  %v514_v63 = vmul.f32 %v2008_v57, %v2008_v57  ;;  %v1663_v44 = vld [vmem:[%s2076_s16 + $0x2] ss:$0 sm:$0xff]  ;;  %v1664_v46 = vld [vmem:[%s2076_s16 + $0x3] ss:$0 sm:$0xff] }
  0xbd   : > { %540 = vadd.xlane.f32.xlu0 %v539_v50  ;;  %v516_v5 = vmul.f32 %v2020_v0, %v2020_v0  ;;  %v1658_v50 = vld [vmem:[%s1922_s13 + $0xd] ss:$0 sm:$0xff] }
  0xbe   : > { %v483_v52 = vadd.f32 %v482_v9, %v481_v49  ;;  %v545_v59 = vsel %vm389_vm0, %v513_v51, 0.0  ;;  %v551_v17 = vsel %vm389_vm0, %v515_v22, 0.0  ;;  %v1657_v49 = vld [vmem:[%s1922_s13 + $0xc] ss:$0 sm:$0xff]  ;;  %v1666_v22 = vld [vmem:[%s2076_s16 + $0x5] ss:$0 sm:$0xff] }
  0xbf   : > { %v554_v6 = vsel %vm389_vm0, %v516_v5, 0.0 }
  0xc0   : > { %v488_v58 = vmul.f32 0.25, %v483_v52  ;;  %537 = vadd.xlane.f32.xlu1 %v536_v56  ;;  %v2028_v1 = vpop.permute.xlu1 %746  ;;  %v2059_v28 = vpop.permute.xlu0 %738  ;;  %v1659_v52 = vld [vmem:[%s1922_s13 + $0xe] ss:$0 sm:$0xff] }
  0xc1   : > { %546 = vadd.xlane.f32.xlu0 %v545_v59 }
  0xc2   : > { %v2014_v60 = vsub.f32 %v1860_v26, %v488_v58  ;;  %v2026_v4 = vsub.f32 %v1870_v30, %v488_v58  ;;  %v548_v26 = vsel %vm389_vm0, %v514_v63, 0.0  ;;  %v2034_v21 = vsub.f32 %v1857_v25, %v488_v58  ;;  %v1667_v63 = vld [vmem:[%s2076_s16 + $0x6] ss:$0 sm:$0xff] }
  0xc3   : > { %v2045_v16 = vsub.f32 %v1867_v29, %v488_v58  ;;  %v1665_v58 = vld [vmem:[%s2076_s16 + $0x4] ss:$0 sm:$0xff] }
  0xc4   : > { %543 = vadd.xlane.f32.xlu1 %v542_v61  ;;  %v517_v2 = vmul.f32 %v2014_v60, %v2014_v60  ;;  %2360 = vst [vmem:[#allocation2_spill] sm:$0xff] %v2026_v4  ;;  %2361 = vst [vmem:[#allocation3_spill] sm:$0xff] %v2034_v21  ;;  %v519_v8 = vmul.f32 %v2026_v4, %v2026_v4  ;;  %v2039_v30 = vpop.permute.xlu1 %750  ;;  %v518_v15 = vmul.f32 %v2034_v21, %v2034_v21  ;;  %v2066_v35 = vpop.permute.xlu0 %774 }
  0xc5   : > { %552 = vadd.xlane.f32.xlu0 %v551_v17  ;;  %2362 = vst [vmem:[#allocation4_spill] sm:$0xff] %v2045_v16  ;;  %v520_v20 = vmul.f32 %v2045_v16, %v2045_v16  ;;  %v1668_v17 = vld [vmem:[%s2076_s16 + $0x7] ss:$0 sm:$0xff] }
  0xc6   : > { %v557_v7 = vsel %vm389_vm0, %v517_v2, 0.0  ;;  %v563_v25 = vsel %vm389_vm0, %v519_v8, 0.0  ;;  %v560_v19 = vsel %vm389_vm0, %v518_v15, 0.0  ;;  %v1671_v8 = vld [vmem:[%s2076_s16 + $0xa] ss:$0 sm:$0xff] }
  0xc7   : > { %v566_v24 = vsel %vm389_vm0, %v520_v20, 0.0  ;;  %v1672_v15 = vld [vmem:[%s2076_s16 + $0xb] ss:$0 sm:$0xff]  ;;  %v1674_v20 = vld [vmem:[%s2076_s16 + $0xd] ss:$0 sm:$0xff] }
  0xc8   : > { %549 = vadd.xlane.f32.xlu1 %v548_v26  ;;  %v2051_v23 = vpop.permute.xlu1 %754  ;;  %v2079_v40 = vpop.permute.xlu0 %782  ;;  %v1669_v26 = vld [vmem:[%s2076_s16 + $0x8] ss:$0 sm:$0xff] }
  0xc9   : > { %558 = vadd.xlane.f32.xlu0 %v557_v7  ;;  %v1670_v7 = vld [vmem:[%s2076_s16 + $0x9] ss:$0 sm:$0xff] }
  0xcc   : > { %555 = vadd.xlane.f32.xlu1 %v554_v6  ;;  %v2054_v29 = vpop.permute.xlu1 %758  ;;  %v2086_v9 = vpop.permute.xlu0 %790 }
  0xcd   : > { %564 = vadd.xlane.f32.xlu0 %v563_v25  ;;  %2363 = vst [vmem:[#allocation5_spill] sm:$0xff] %v2086_v9 }
  0xd0   : > { %561 = vadd.xlane.f32.xlu1 %v560_v19  ;;  %v2056_v27 = vpop.permute.xlu1 %762  ;;  %v2093_v51 = vpop.permute.xlu0 %798  ;;  %v1673_v19 = vld [vmem:[%s2076_s16 + $0xc] ss:$0 sm:$0xff] }
  0xd1   : > { %2365 = vst [vmem:[#allocation7_spill] sm:$0xff] %v2093_v51 }
  0xd4   : > { %567 = vadd.xlane.f32.xlu1 %v566_v24  ;;  %v2062_v32 = vpop.permute.xlu1 %766  ;;  %v2100_v59 = vpop.permute.xlu0 %918 }
  0xd8   : > { %v2069_v38 = vpop.permute.xlu1 %770  ;;  %v2107_v2 = vpop.permute.xlu0 %926 }
  0xdc   : > { %v2082_v42 = vpop.permute.xlu1 %778  ;;  %v2114_v6 = vpop.permute.xlu0 %934 }
  0xe0   : > { %v2089_v47 = vpop.permute.xlu1 %786  ;;  %v2121_v24 = vpop.permute.xlu0 %942 }
  0xe1   : > { %2364 = vst [vmem:[#allocation6_spill] sm:$0xff] %v2089_v47 }
  0xe3   : > { %1142 = vperm.xlu0 %1691, %v1650_v3   ;;  %v1675_v3 = vld [vmem:[%s2076_s16 + $0xe] ss:$0 sm:$0xff] }
  0xe4   : > { %v2096_v56 = vpop.permute.xlu1 %794 }
  0xe5   : > { %1146 = vperm.xlu1 %1692, %v1651_v31   ;;  %2366 = vst [vmem:[#allocation8_spill] sm:$0xff] %v2096_v56 }
  0xe7   : > { %1150 = vperm.xlu0 %1691, %v1652_v33   ;;  %v1676_v33 = vld [vmem:[%s2076_s16 + $0xf] ss:$0 sm:$0xff] }
  0xe8   : > { %v2103_v61 = vpop.permute.xlu1 %914 }
  0xe9   : > { %1154 = vperm.xlu1 %1692, %v1653_v34   ;;  %v2127_v34 = vpop.permute.xlu0 %950 }
  0xeb   : > { %1158 = vperm.xlu0 %1691, %v1654_v37  }
  0xec   : > { %v2110_v5 = vpop.permute.xlu1 %922 }
  0xed   : > { %1162 = vperm.xlu1 %1692, %v1655_v14   ;;  %v2131_v14 = vpop.permute.xlu0 %958 }
  0xef   : > { %1166 = vperm.xlu0 %1691, %v1656_v39  }
  0xf0   : > { %v2117_v25 = vpop.permute.xlu1 %930 }
  0xf1   : > { %1298 = vperm.xlu1 %1692, %v1661_v41   ;;  %v2135_v41 = vpop.permute.xlu0 %966 }
  0xf2   : > { %2367 = vst [vmem:[#allocation9_spill] sm:$0xff] %v2135_v41 }
  0xf3   : > { %1302 = vperm.xlu0 %1691, %v1662_v43  }
  0xf4   : > { %v2124_v31 = vpop.permute.xlu1 %938 }
  0xf5   : > { %1306 = vperm.xlu1 %1692, %v1663_v44   ;;  %v2139_v44 = vpop.permute.xlu0 %974 }
  0xf6   : > { %2369 = vst [vmem:[#allocation11_spill] sm:$0xff] %v2139_v44 }
  0xf7   : > { %1310 = vperm.xlu0 %1691, %v1664_v46  }
  0xf8   : > { %v2129_v37 = vpop.permute.xlu1 %946 }
  0xf9   : > { %1170 = vperm.xlu1 %1692, %v1657_v49   ;;  %v2143_v49 = vpop.permute.xlu0 %1126 }
  0xfb   : > { %1174 = vperm.xlu0 %1691, %v1658_v50  }
  0xfc   : > { %v2133_v39 = vpop.permute.xlu1 %954 }
  0xfd   : > { %1178 = vperm.xlu1 %1692, %v1659_v52   ;;  %v2147_v52 = vpop.permute.xlu0 %1134 }
  0xff   : > { %1182 = vperm.xlu0 %1691, %v1660_v13  }
 0x100   : > { %v2137_v43 = vpop.permute.xlu1 %962 }
 0x101   : > { %1314 = vperm.xlu1 %1692, %v1665_v58   ;;  %2368 = vst [vmem:[#allocation10_spill] sm:$0xff] %v2137_v43 }
 0x103   : > { %1318 = vperm.xlu0 %1691, %v1666_v22  }
 0x104   : > { %v2141_v46 = vpop.permute.xlu1 %970 }
 0x105   : > { %1322 = vperm.xlu1 %1692, %v1667_v63   ;;  %2370 = vst [vmem:[#allocation12_spill] sm:$0xff] %v2141_v46 }
 0x107   : > { %1326 = vperm.xlu0 %1691, %v1668_v17  }
 0x108   : > { %v2145_v50 = vpop.permute.xlu1 %1122 }
 0x109   : > { %1330 = vperm.xlu1 %1692, %v1669_v26  }
 0x10b   : > { %1334 = vperm.xlu0 %1691, %v1670_v7  }
 0x10c   : > { %v2149_v13 = vpop.permute.xlu1 %1130 }
 0x10d   : > { %1338 = vperm.xlu1 %1692, %v1671_v8  }
 0x10f   : > { %1342 = vperm.xlu0 %1691, %v1672_v15  }
 0x110   : > { %v2151_v22 = vpop.permute.xlu1 %1138 }
 0x111   : > { %1346 = vperm.xlu1 %1692, %v1673_v19  }
 0x113   : > { %1350 = vperm.xlu0 %1691, %v1674_v20  }
 0x115   : > { %1354 = vperm.xlu1 %1692, %v1675_v3  }
 0x117   : > { %1358 = vperm.xlu0 %1691, %v1676_v33  }
 0x13a   : > { %v523_v58 = vpop.xlane.xlu0 %522 }
 0x13b   : > { %v569_v17 = vmul.f32 0.015625, %v523_v58 }
 0x13d   : > { %v585_v19 = vsel %vm455_vm1, %v569_v17, 0.0 }
 0x13e   : > { %v529_v63 = vpop.xlane.xlu0 %528 }
 0x13f   : > { %v571_v7 = vmul.f32 0.015625, %v529_v63 }
 0x141   : > { %v526_v26 = vpop.xlane.xlu1 %525  ;;  %v588_v44 = vsel %vm455_vm1, %v571_v7, 0.0 }
 0x142   : > { %v570_v8 = vmul.f32 0.015625, %v526_v26  ;;  %v535_v15 = vpop.xlane.xlu0 %534 }
 0x143   : > { %v573_v56 = vmul.f32 0.015625, %v535_v15 }
 0x144   : > { %v586_v20 = vsel %vm455_vm1, %v570_v8, 0.0 }
 0x145   : > { %v587_v3 = vadd.f32 %v586_v20, %v585_v19  ;;  %v532_v33 = vpop.xlane.xlu1 %531  ;;  %v592_v17 = vsel %vm455_vm1, %v573_v56, 0.0 }
 0x146   : > { %v572_v46 = vmul.f32 0.015625, %v532_v33  ;;  %v541_v51 = vpop.xlane.xlu0 %540 }
 0x147   : > { %v589_v41 = vadd.f32 %v588_v44, %v587_v3  ;;  %v575_v9 = vmul.f32 0.015625, %v541_v51 }
 0x148   : > { %v590_v43 = vsel %vm455_vm1, %v572_v46, 0.0 }
 0x149   : > { %v591_v16 = vadd.f32 %v590_v43, %v589_v41  ;;  %v538_v58 = vpop.xlane.xlu1 %537  ;;  %v595_v7 = vsel %vm455_vm1, %v575_v9, 0.0 }
 0x14a   : > { %v574_v63 = vmul.f32 0.015625, %v538_v58  ;;  %v547_v26 = vpop.xlane.xlu0 %546 }
 0x14b   : > { %v613_v4 = vmul.f32 0.25, %v591_v16  ;;  %v577_v46 = vmul.f32 0.015625, %v547_v26 }
 0x14c   : > { %v593_v8 = vsel %vm455_vm1, %v574_v63, 0.0 }
 0x14d   : > { %v617_v19 = vadd.f32 1e-05, %v613_v4  ;;  %v594_v20 = vadd.f32 %v593_v8, %v592_v17  ;;  %v544_v47 = vpop.xlane.xlu1 %543  ;;  %v599_v56 = vsel %vm455_vm1, %v577_v46, 0.0 }
 0x14e   : > { %v576_v33 = vmul.f32 0.015625, %v544_v47  ;;  %v553_v44 = vpop.xlane.xlu0 %552 }
 0x14f   : > { %1693 = vrsqrt.f32 %v617_v19  ;;  %v596_v15 = vadd.f32 %v595_v7, %v594_v20  ;;  %v579_v3 = vmul.f32 0.015625, %v553_v44 }
 0x150   : > { %v597_v41 = vsel %vm455_vm1, %v576_v33, 0.0 }
 0x151   : > { %v598_v51 = vadd.f32 %v597_v41, %v596_v15  ;;  %v550_v43 = vpop.xlane.xlu1 %549  ;;  %v602_v9 = vsel %vm455_vm1, %v579_v3, 0.0 }
 0x152   : > { %v578_v16 = vmul.f32 0.015625, %v550_v43  ;;  %v559_v58 = vpop.xlane.xlu0 %558 }
 0x153   : > { %v614_v63 = vmul.f32 0.25, %v598_v51  ;;  %v581_v7 = vmul.f32 0.015625, %v559_v58 }
 0x154   : > { %v600_v4 = vsel %vm455_vm1, %v578_v16, 0.0 }
 0x155   : > { %v601_v17 = vadd.f32 %v600_v4, %v599_v56  ;;  %v556_v8 = vpop.xlane.xlu1 %555  ;;  %v618_v26 = vadd.f32 1e-05, %v614_v63  ;;  %v606_v51 = vsel %vm455_vm1, %v581_v7, 0.0 }
 0x156   : > { %v580_v47 = vmul.f32 0.015625, %v556_v8  ;;  %v565_v20 = vpop.xlane.xlu0 %564 }
 0x157   : > { %v603_v19 = vadd.f32 %v602_v9, %v601_v17  ;;  %v583_v41 = vmul.f32 0.015625, %v565_v20  ;;  %1695 = vrsqrt.f32 %v618_v26 }
 0x158   : > { %v604_v33 = vsel %vm455_vm1, %v580_v47, 0.0 }
 0x159   : > { %v605_v15 = vadd.f32 %v604_v33, %v603_v19  ;;  %v562_v44 = vpop.xlane.xlu1 %561  ;;  %v609_v17 = vsel %vm455_vm1, %v583_v41, 0.0 }
 0x15a   : > { %v582_v43 = vmul.f32 0.015625, %v562_v44 }
 0x15b   : > { %v615_v21 = vmul.f32 0.25, %v605_v15 }
 0x15c   : > { %v1694_v46 = vpop.eup %1693  ;;  %v607_v16 = vsel %vm455_vm1, %v582_v43, 0.0 }
 0x15d   : > { %v619_v56 = vadd.f32 1e-05, %v615_v21  ;;  %v608_v3 = vadd.f32 %v607_v16, %v606_v51  ;;  %v568_v4 = vpop.xlane.xlu1 %567  ;;  %v625_v63 = vmul.f32 %v1694_v46, %v1943_v54  ;;  %v626_v58 = vmul.f32 %v1694_v46, %v1953_v62 }
 0x15e   : > { %v584_v8 = vmul.f32 0.015625, %v568_v4  ;;  %v2170_v9 = vpop.permute.xlu0 %1142  ;;  %v627_v19 = vmul.f32 %v1694_v46, %v1946_v55  ;;  %v628_v26 = vmul.f32 %v1694_v46, %v1962_v12  ;;  %v994_v46 = vld [vmem:[%s2183_s19 + $0x2] sm:$0x3] }
 0x15f   : > { %v610_v47 = vadd.f32 %v609_v17, %v608_v3  ;;  %1697 = vrsqrt.f32 %v619_v56  ;;  %v801_v21 = vmul.f32 %v2059_v28, %v625_v63  ;;  %v802_v54 = vmul.f32 %v2002_v53, %v626_v58  ;;  %v993_v53 = vld [vmem:[%s2183_s19] sm:$0x3]  ;;  %v995_v3 = vld [vmem:[%s2183_s19 + $0x4] sm:$0x3] }
 0x160   : > { %v611_v20 = vsel %vm455_vm1, %v584_v8, 0.0  ;;  %v803_v62 = vmul.f32 %v2028_v1, %v627_v19  ;;  %v804_v15 = vmul.f32 %v2039_v30, %v628_v26  ;;  %v996_v30 = vld [vmem:[%s2183_s19 + $0x6] sm:$0x3] }
 0x161   : > { %v612_v7 = vadd.f32 %v611_v20, %v610_v47  ;;  %v2176_v33 = vpop.permute.xlu1 %1146  ;;  %v977_v12 = vadd.f32 %v2103_v61, %v801_v21  ;;  %v978_v41 = vadd.f32 %v2100_v59, %v802_v54 }
 0x162   : > { %v2185_v55 = vpop.permute.xlu0 %1150  ;;  %v979_v51 = vadd.f32 %v2110_v5, %v803_v62  ;;  %v980_v1 = vadd.f32 %v2107_v2, %v804_v15 }
 0x163   : > { %v616_v28 = vmul.f32 0.25, %v612_v7  ;;  %v1009_v56 = vadd.f32 %v993_v53, %v977_v12  ;;  %v1010_v61 = vadd.f32 %v994_v46, %v978_v41 }
 0x164   : > { %v1696_v4 = vpop.eup %1695  ;;  %v1011_v17 = vadd.f32 %v995_v3, %v979_v51  ;;  %v1012_v8 = vadd.f32 %v996_v30, %v980_v1 }
 0x165   : > { %v2190_v44 = vpop.permute.xlu1 %1154  ;;  %v620_v16 = vadd.f32 1e-05, %v616_v28  ;;  %v1185_v59 = vmul.f32 %v2145_v50, %v1009_v56  ;;  %v629_v47 = vmul.f32 %v1696_v4, %v1959_v11  ;;  %v630_v19 = vmul.f32 %v1696_v4, %v1980_v36  ;;  %v998_v56 = vld [vmem:[%s2183_s19 + $0xa] sm:$0x3] }
 0x166   : > { %v2194_v43 = vpop.permute.xlu0 %1158  ;;  %v631_v20 = vmul.f32 %v1696_v4, %v1972_v10  ;;  %v1186_v21 = vmul.f32 %v2143_v49, %v1010_v61  ;;  %v632_v26 = vmul.f32 %v1696_v4, %v1994_v48  ;;  %v1187_v50 = vmul.f32 %v2149_v13, %v1011_v17  ;;  %v1000_v4 = vld [vmem:[%s2183_s19 + $0xe] sm:$0x3] }
 0x167   : > { %1699 = vrsqrt.f32 %v620_v16  ;;  %v1188_v12 = vmul.f32 %v2147_v52, %v1012_v8  ;;  %v805_v11 = vmul.f32 %v2051_v23, %v629_v47  ;;  %v806_v36 = vmul.f32 %v2054_v29, %v630_v19  ;;  %v1001_v8 = vld [vmem:[%s2183_s19 + $0x10] sm:$0x3] }
 0x168   : > { %v807_v10 = vmul.f32 %v2056_v27, %v631_v20  ;;  %v808_v48 = vmul.f32 %v2062_v32, %v632_v26 }
 0x169   : > { %v2200_v63 = vpop.permute.xlu1 %1162  ;;  %v981_v32 = vadd.f32 %v2117_v25, %v805_v11  ;;  %v982_v46 = vadd.f32 %v2114_v6, %v806_v36 }
 0x16a   : > { %v2203_v58 = vpop.permute.xlu0 %1166  ;;  %v984_v3 = vadd.f32 %v2121_v24, %v808_v48 }
 0x16b   : > { %v1014_v17 = vadd.f32 %v998_v56, %v982_v46 }
 0x16c   : > { %v1698_v5 = vpop.eup %1697 }
 0x16d   : > { %v1299_v2 = vpop.permute.xlu1 %1298  ;;  %v633_v28 = vmul.f32 %v1698_v5, %v1987_v45  ;;  %v634_v41 = vmul.f32 %v1698_v5, %v2008_v57  ;;  %v635_v52 = vmul.f32 %v1698_v5, %v2000_v18  ;;  %v636_v23 = vmul.f32 %v1698_v5, %v2020_v0  ;;  %v997_v18 = vld [vmem:[%s2183_s19 + $0x8] sm:$0x3]  ;;  %v999_v0 = vld [vmem:[%s2183_s19 + $0xc] sm:$0x3] }
 0x16e   : > { %v1361_v7 = vadd.f32 %v1299_v2, %v1185_v59  ;;  %v1303_v54 = vpop.permute.xlu0 %1302  ;;  %v983_v57 = vadd.f32 %v2124_v31, %v807_v10  ;;  %v1013_v30 = vadd.f32 %v997_v18, %v981_v32  ;;  %v1016_v5 = vadd.f32 %v1000_v4, %v984_v3  ;;  %v1003_v2 = vld [vmem:[%s2183_s19 + $0x14] sm:$0x3] }
 0x16f   : > { %v1362_v62 = vadd.f32 %v1303_v54, %v1186_v21  ;;  %v809_v27 = vmul.f32 %v2069_v38, %v633_v28  ;;  %v810_v25 = vmul.f32 %v2066_v35, %v634_v41  ;;  %v811_v6 = vmul.f32 %v2082_v42, %v635_v52  ;;  %v1004_v21 = vld [vmem:[%s2183_s19 + $0x16] sm:$0x3] }
 0x170   : > { %v1393_v15 = vmul.f32 0.70710677, %v1361_v7  ;;  %v812_v31 = vmul.f32 %v2079_v40, %v636_v23  ;;  %v1015_v59 = vadd.f32 %v999_v0, %v983_v57  ;;  %v1189_v54 = vmul.f32 %v2151_v22, %v1013_v30  ;;  %v2374_v23 = vld [vmem:[#allocation5_spill] sm:$0xff]  ;;  %v2375_v32 = vld [vmem:[#allocation4_spill] sm:$0xff] }
 0x171   : > { %v1394_v53 = vmul.f32 0.70710677, %v1362_v62  ;;  %v1307_v49 = vpop.permute.xlu1 %1306  ;;  %v985_v61 = vadd.f32 %v2129_v37, %v809_v27  ;;  %v986_v42 = vadd.f32 %v2127_v34, %v810_v25  ;;  %v987_v40 = vadd.f32 %v2133_v39, %v811_v6  ;;  %v1002_v37 = vld [vmem:[%s2183_s19 + $0x12] sm:$0x3] }
 0x172   : > { %v2219_v45 = vadd.f32 %v1307_v49, %v1187_v50  ;;  %v1311_v13 = vpop.permute.xlu0 %1310  ;;  %1701 = verf.f32 %v1393_v15  ;;  %v988_v19 = vadd.f32 %v2131_v14, %v812_v31  ;;  %v1190_v28 = vmul.f32 %v2170_v9, %v1014_v17  ;;  %v2376_v31 = vld [vmem:[#allocation10_spill] sm:$0xff]  ;;  %v2377_v30 = vld [vmem:[#allocation8_spill] sm:$0xff] }
 0x173   : > { %v2223_v29 = vadd.f32 %v1311_v13, %v1188_v12  ;;  %1703 = verf.f32 %v1394_v53  ;;  %v1017_v20 = vadd.f32 %v1001_v8, %v985_v61  ;;  %v1191_v50 = vmul.f32 %v2176_v33, %v1015_v59  ;;  %v2371_v12 = vld [vmem:[#allocation3_spill] sm:$0xff]  ;;  %v2372_v33 = vld [vmem:[#allocation6_spill] sm:$0xff]  ;;  %v1005_v8 = vld [vmem:[%s2183_s19 + $0x18] sm:$0x3] }
 0x174   : > { %v1395_v51 = vmul.f32 0.70710677, %v2219_v45  ;;  %v1700_v24 = vpop.eup %1699  ;;  %v1192_v34 = vmul.f32 %v2185_v55, %v1016_v5  ;;  %v1377_v39 = vmul.f32 0.5, %v1361_v7  ;;  %v1378_v10 = vmul.f32 0.5, %v1362_v62  ;;  %v2373_v13 = vld [vmem:[#allocation2_spill] sm:$0xff] }
 0x175   : > { %v2230_v16 = vpop.permute.xlu1 %1170  ;;  %v1396_v1 = vmul.f32 0.70710677, %v2223_v29  ;;  %v637_v26 = vmul.f32 %v1700_v24, %v2014_v60  ;;  %v638_v11 = vmul.f32 %v1700_v24, %v2371_v12  ;;  %v1018_v53 = vadd.f32 %v1002_v37, %v986_v42  ;;  %v2379_v42 = vld [vmem:[#allocation7_spill] sm:$0xff] }
 0x176   : > { %v2237_v38 = vpop.permute.xlu0 %1174  ;;  %1705 = verf.f32 %v1395_v51  ;;  %v1019_v49 = vadd.f32 %v1003_v2, %v987_v40  ;;  %v1020_v60 = vadd.f32 %v1004_v21, %v988_v19  ;;  %v1193_v9 = vmul.f32 %v2190_v44, %v1017_v20  ;;  %v1006_v21 = vld [vmem:[%s2183_s19 + $0x1a] sm:$0x3] }
 0x177   : > { %1707 = verf.f32 %v1396_v1  ;;  %v813_v41 = vmul.f32 %v2372_v33, %v637_v26  ;;  %v639_v52 = vmul.f32 %v1700_v24, %v2373_v13  ;;  %v814_v27 = vmul.f32 %v2374_v23, %v638_v11  ;;  %v1008_v33 = vld [vmem:[%s2183_s19 + $0x1e] sm:$0x3] }
 0x178   : > { %v640_v46 = vmul.f32 %v1700_v24, %v2375_v32  ;;  %v1379_v18 = vmul.f32 0.5, %v2219_v45  ;;  %v1194_v3 = vmul.f32 %v2194_v43, %v1018_v53  ;;  %v2378_v43 = vld [vmem:[#allocation9_spill] sm:$0xff]  ;;  %v1380_v37 = vmul.f32 0.5, %v2223_v29 }
 0x179   : > { %v2245_v47 = vpop.permute.xlu1 %1178  ;;  %v989_v61 = vadd.f32 %v2376_v31, %v813_v41  ;;  %v815_v24 = vmul.f32 %v2377_v30, %v639_v52  ;;  %v990_v5 = vadd.f32 %v2378_v43, %v814_v27  ;;  %v1007_v53 = vld [vmem:[%s2183_s19 + $0x1c] sm:$0x3] }
 0x17a   : > { %v2247_v35 = vpop.permute.xlu0 %1182  ;;  %v816_v40 = vmul.f32 %v2379_v42, %v640_v46 }
 0x17d   : > { %v1315_v36 = vpop.permute.xlu1 %1314 }
 0x17e   : > { %v2261_v14 = vadd.f32 %v1315_v36, %v1189_v54  ;;  %v1319_v15 = vpop.permute.xlu0 %1318  ;;  %v1021_v36 = vadd.f32 %v1005_v8, %v989_v61 }
 0x17f   : > { %v2263_v48 = vadd.f32 %v1319_v15, %v1190_v28  ;;  %v1702_v22 = vpop.eup %1701  ;;  %v1195_v28 = vmul.f32 %v2200_v63, %v1019_v49  ;;  %v1022_v15 = vadd.f32 %v1006_v21, %v990_v5 }
 0x180   : > { %v1397_v55 = vmul.f32 0.70710677, %v2261_v14  ;;  %v1704_v7 = vpop.eup %1703  ;;  %v1425_v62 = vadd.f32 1.0, %v1702_v22  ;;  %v2381_v22 = vld [vmem:[#allocation11_spill] sm:$0xff] }
 0x181   : > { %v1398_v57 = vmul.f32 0.70710677, %v2263_v48  ;;  %v1323_v51 = vpop.permute.xlu1 %1322  ;;  %v1426_v44 = vadd.f32 1.0, %v1704_v7  ;;  %v1198_v7 = vmul.f32 %v2237_v38, %v1022_v15  ;;  %v1382_v38 = vmul.f32 0.5, %v2263_v48 }
 0x182   : > { %1709 = verf.f32 %v1397_v55  ;;  %v2279_v56 = vadd.f32 %v1323_v51, %v1191_v50  ;;  %v1327_v0 = vpop.permute.xlu0 %1326  ;;  %v1441_v1 = vmul.f32 %v1425_v62, %v1377_v39  ;;  %v1197_v55 = vmul.f32 %v2230_v16, %v1021_v36 }
 0x183   : > { %1711 = verf.f32 %v1398_v57  ;;  %v2282_v4 = vadd.f32 %v1327_v0, %v1192_v34  ;;  %v1706_v25 = vpop.eup %1705  ;;  %v1442_v6 = vmul.f32 %v1426_v44, %v1378_v10  ;;  %v2380_v34 = vld [vmem:[#allocation12_spill] sm:$0xff]  ;;  %v1196_v10 = vmul.f32 %v2203_v58, %v1020_v60 }
 0x184   : > { %v1399_v45 = vmul.f32 0.70710677, %v2279_v56  ;;  %v1708_v17 = vpop.eup %1707  ;;  %1457 = vst.msk [vmem:[%s2276_s23] sm:$0x3] %vm389_vm0, %v1441_v1  ;;  %v1427_v59 = vadd.f32 1.0, %v1706_v25  ;;  %v991_v39 = vadd.f32 %v2380_v34, %v815_v24  ;;  %v1381_v0 = vmul.f32 0.5, %v2261_v14 }
 0x185   : > { %v1400_v19 = vmul.f32 0.70710677, %v2282_v4  ;;  %v1331_v20 = vpop.permute.xlu1 %1330  ;;  %1458 = vst.msk [vmem:[%s2276_s23 + $0x2] sm:$0x3] %vm389_vm0, %v1442_v6  ;;  %v1428_v2 = vadd.f32 1.0, %v1708_v17  ;;  %v1384_v8 = vmul.f32 0.5, %v2282_v4 }
 0x186   : > { %1713 = verf.f32 %v1399_v45  ;;  %v2297_v26 = vadd.f32 %v1331_v20, %v1193_v9  ;;  %v1335_v54 = vpop.permute.xlu0 %1334  ;;  %v1443_v50 = vmul.f32 %v1427_v59, %v1379_v18  ;;  %v992_v9 = vadd.f32 %v2381_v22, %v816_v40 }
 0x187   : > { %1715 = verf.f32 %v1400_v19  ;;  %v2300_v12 = vadd.f32 %v1335_v54, %v1194_v3  ;;  %v1444_v11 = vmul.f32 %v1428_v2, %v1380_v37  ;;  %v1023_v58 = vadd.f32 %v1007_v53, %v991_v39 }
 0x188   : > { %v1401_v29 = vmul.f32 0.70710677, %v2297_v26  ;;  %1459 = vst.msk [vmem:[%s2276_s23 + $0x4] sm:$0x3] %vm389_vm0, %v1443_v50  ;;  %v1024_v62 = vadd.f32 %v1008_v33, %v992_v9 }
 0x189   : > { %v1402_v63 = vmul.f32 0.70710677, %v2300_v12  ;;  %v1339_v49 = vpop.permute.xlu1 %1338  ;;  %1460 = vst.msk [vmem:[%s2276_s23 + $0x6] sm:$0x3] %vm389_vm0, %v1444_v11  ;;  %v1199_v18 = vmul.f32 %v2245_v47, %v1023_v58  ;;  %v1386_v2 = vmul.f32 0.5, %v2300_v12 }
 0x18a   : > { %1717 = verf.f32 %v1401_v29  ;;  %v1371_v41 = vadd.f32 %v1339_v49, %v1195_v28  ;;  %v1343_v13 = vpop.permute.xlu0 %1342  ;;  %v1200_v1 = vmul.f32 %v2247_v35, %v1024_v62  ;;  %v1383_v35 = vmul.f32 0.5, %v2279_v56 }
 0x18b   : > { %1719 = verf.f32 %v1402_v63  ;;  %v1372_v52 = vadd.f32 %v1343_v13, %v1196_v10  ;;  %v1385_v56 = vmul.f32 0.5, %v2297_v26 }
 0x18c   : > { %v1403_v60 = vmul.f32 0.70710677, %v1371_v41  ;;  %v1387_v11 = vmul.f32 0.5, %v1371_v41 }
 0x18d   : > { %v1404_v23 = vmul.f32 0.70710677, %v1372_v52  ;;  %v1347_v27 = vpop.permute.xlu1 %1346  ;;  %v1388_v34 = vmul.f32 0.5, %v1372_v52 }
 0x18e   : > { %1721 = verf.f32 %v1403_v60  ;;  %v1373_v32 = vadd.f32 %v1347_v27, %v1197_v55  ;;  %v1351_v46 = vpop.permute.xlu0 %1350 }
 0x18f   : > { %v1710_v57 = vpop.eup %1709  ;;  %1723 = verf.f32 %v1404_v23  ;;  %v1374_v51 = vadd.f32 %v1351_v46, %v1198_v7 }
 0x190   : > { %v1712_v44 = vpop.eup %1711  ;;  %v1429_v3 = vadd.f32 1.0, %v1710_v57  ;;  %v1405_v16 = vmul.f32 0.70710677, %v1373_v32  ;;  %v1389_v15 = vmul.f32 0.5, %v1373_v32 }
 0x191   : > { %v1430_v25 = vadd.f32 1.0, %v1712_v44  ;;  %v1406_v6 = vmul.f32 0.70710677, %v1374_v51  ;;  %v1355_v31 = vpop.permute.xlu1 %1354  ;;  %v1390_v22 = vmul.f32 0.5, %v1374_v51 }
 0x192   : > { %v1445_v61 = vmul.f32 %v1429_v3, %v1381_v0  ;;  %1725 = verf.f32 %v1405_v16  ;;  %v1375_v30 = vadd.f32 %v1355_v31, %v1199_v18  ;;  %v1359_v24 = vpop.permute.xlu0 %1358 }
 0x193   : > { %v1714_v45 = vpop.eup %1713  ;;  %v1446_v17 = vmul.f32 %v1430_v25, %v1382_v38  ;;  %1727 = verf.f32 %v1406_v6  ;;  %v1376_v47 = vadd.f32 %v1359_v24, %v1200_v1 }
 0x194   : > { %v1716_v14 = vpop.eup %1715  ;;  %1461 = vst.msk [vmem:[%s2276_s23 + $0x8] sm:$0x3] %vm389_vm0, %v1445_v61  ;;  %v1431_v48 = vadd.f32 1.0, %v1714_v45  ;;  %v1407_v59 = vmul.f32 0.70710677, %v1375_v30  ;;  %v1391_v13 = vmul.f32 0.5, %v1375_v30 }
 0x195   : > { %1462 = vst.msk [vmem:[%s2276_s23 + $0xa] sm:$0x3] %vm389_vm0, %v1446_v17  ;;  %v1432_v43 = vadd.f32 1.0, %v1716_v14  ;;  %v1408_v5 = vmul.f32 0.70710677, %v1376_v47  ;;  %v1392_v55 = vmul.f32 0.5, %v1376_v47 }
 0x196   : > { %v1447_v42 = vmul.f32 %v1431_v48, %v1383_v35  ;;  %1729 = verf.f32 %v1407_v59 }
 0x197   : > { %v1718_v40 = vpop.eup %1717  ;;  %v1448_v19 = vmul.f32 %v1432_v43, %v1384_v8  ;;  %1731 = verf.f32 %v1408_v5 }
 0x198   : > { %v1720_v20 = vpop.eup %1719  ;;  %1463 = vst.msk [vmem:[%s2276_s23 + $0xc] sm:$0x3] %vm389_vm0, %v1447_v42  ;;  %v1433_v37 = vadd.f32 1.0, %v1718_v40 }
 0x199   : > { %1464 = vst.msk [vmem:[%s2276_s23 + $0xe] sm:$0x3] %vm389_vm0, %v1448_v19  ;;  %v1434_v4 = vadd.f32 1.0, %v1720_v20 }
 0x19a   : > { %v1449_v21 = vmul.f32 %v1433_v37, %v1385_v56 }
 0x19b   : > { %v1722_v54 = vpop.eup %1721  ;;  %v1450_v28 = vmul.f32 %v1434_v4, %v1386_v2 }
 0x19c   : > { %v1724_v50 = vpop.eup %1723  ;;  %1465 = vst.msk [vmem:[%s2276_s23 + $0x10] sm:$0x3] %vm389_vm0, %v1449_v21  ;;  %v1435_v36 = vadd.f32 1.0, %v1722_v54 }
 0x19d   : > { %1466 = vst.msk [vmem:[%s2276_s23 + $0x12] sm:$0x3] %vm389_vm0, %v1450_v28  ;;  %v1436_v26 = vadd.f32 1.0, %v1724_v50 }
 0x19e   : > { %v1451_v39 = vmul.f32 %v1435_v36, %v1387_v11 }
 0x19f   : > { %v1726_v29 = vpop.eup %1725  ;;  %v1452_v12 = vmul.f32 %v1436_v26, %v1388_v34 }
 0x1a0   : > { %v1728_v10 = vpop.eup %1727  ;;  %1467 = vst.msk [vmem:[%s2276_s23 + $0x14] sm:$0x3] %vm389_vm0, %v1451_v39  ;;  %v1437_v53 = vadd.f32 1.0, %v1726_v29 }
 0x1a1   : > { %1468 = vst.msk [vmem:[%s2276_s23 + $0x16] sm:$0x3] %vm389_vm0, %v1452_v12  ;;  %v1438_v9 = vadd.f32 1.0, %v1728_v10 }
 0x1a2   : > { %v1453_v63 = vmul.f32 %v1437_v53, %v1389_v15 }
 0x1a3   : > { %v1730_v49 = vpop.eup %1729  ;;  %v1454_v33 = vmul.f32 %v1438_v9, %v1390_v22 }
 0x1a4   : > { %v1732_v41 = vpop.eup %1731  ;;  %1469 = vst.msk [vmem:[%s2276_s23 + $0x18] sm:$0x3] %vm389_vm0, %v1453_v63  ;;  %v1439_v52 = vadd.f32 1.0, %v1730_v49 }
 0x1a5   : > { %1470 = vst.msk [vmem:[%s2276_s23 + $0x1a] sm:$0x3] %vm389_vm0, %v1454_v33  ;;  %v1440_v58 = vadd.f32 1.0, %v1732_v41 }
 0x1a6   : > { %v1455_v60 = vmul.f32 %v1439_v52, %v1391_v13 }
 0x1a7   : > { %v1456_v7 = vmul.f32 %v1440_v58, %v1392_v55 }
 0x1a8   : > { %1471 = vst.msk [vmem:[%s2276_s23 + $0x1c] sm:$0x3] %vm389_vm0, %v1455_v60 }
 0x1a9   : > { %1472 = vst.msk [vmem:[%s2276_s23 + $0x1e] sm:$0x3] %vm389_vm0, %v1456_v7 }
 0x1aa PF: > { %s16_s21 = sadd.s32 1, %s1739_s21  }
 0x1ab   : > { %p13_p4 = scmp.ge.s32.totalorder %s16_s21, 4  }
 0x1ad   :  { %15 = sbr.rel (!%p13_p4) target bundleno = 1 (0x1), region = 89 }

// kernel: up_forward.27
= control target key start
LH: loop header
LB: loop body
LE: loop exit
PB: predicated region body
PF: predicated region fallthrough
CT: control target
= control target key end

     0   :  { %s2756_s12 = smov 0   ;;  %s3972_s0 = inlined_call_operand.vmem [shape: f32[2,4,200], index: 0, kind: input, shape index: {}]   ;;  %s3973_s1 = inlined_call_operand.vmem [shape: f32[2,4,4,9], index: 1, kind: input, shape index: {}]   ;;  %s3974_s2 = inlined_call_operand.vmem [shape: f32[2,4,1], index: 2, kind: input, shape index: {}]   ;;  %s3975_s3 = inlined_call_operand.vmem [shape: f32[2,4,178], index: 3, kind: output, shape index: {}]  }
   0x1 LB: > { %s2600_s13 = sadd.s32 4294967295, %s2717_s12   ;;  %p2604_p0 = scmp.ge.s32.totalorder %s2717_s12, 1  ;;  %s2717_s12 = sphi %s2756_s12, %s13_s12  }
   0x2   : > { %p156_p1 = scmp.lt.s32.totalorder %s2717_s12, 3 }
   0x4   : > { %p157_p2 = pnand %p2604_p0, %p156_p1 }
   0x6   : > { %160 = sbr.rel (%p157_p2) target bundleno = 1674 (0x68a), region = 32 }
   0xb   : > { %p189_p3 = scmp.lt.s32.totalorder %s2600_s13, 1  ;;  %v3978_v0 = vmov 0   ;;  %v3977_v5 = vmov 1   ;;  %v3992_v6 = vmov 2   ;;  %v3990_v7 = vmov 3   ;;  %s2728_s22 = smov 127  }
   0xc   : > { %2661 = vset.pattern.permute.xlu1 %v3978_v0  ;;  %2660 = vset.pattern.permute.xlu0 %v3978_v0  ;;  %v3988_v8 = vmov 4   ;;  %v3986_v9 = vmov 5   ;;  %v3984_v10 = vmov 6   ;;  %v3982_v11 = vmov 7   ;;  %s2729_s23 = smov 126   ;;  %s2730_s24 = smov 118  }
   0xd   : > { %s4142_s13 = smov (!%p189_p3, %s2600_s13), 1  ;;  %v3976_v12 = vlaneseq  ;;  %v3980_v14 = vmov 8   ;;  %s2731_s25 = smov 117   ;;  %vm273_vm0 = vcmask 1039360   ;;  %vm338_vm1 = vcmask 1031168  }
   0xe   : > { %s2633_s14 = sshll.u32 %s4142_s13, 4  ;;  %s2632_s18 = sshll.u32 %s4142_s13, 3  ;;  %vm403_vm2 = vcmask 965632   ;;  %vm468_vm3 = vcmask 957440   ;;  %vm533_vm4 = vcmask 949248   ;;  %vm598_vm5 = vcmask 883712  }
   0xf   : > { %s2772_s17 = scalar_lea.vmem %s3973_s1, %s2633_s14  ;;  %v215_v16 = vshrl.u32 %v3976_v12, 7  ;;  %s2822_s21 = scalar_lea.vmem %s3972_s0, %s2632_s18  ;;  %vm663_vm6 = vcmask 875520   ;;  %vm728_vm7 = vcmask 867328  }
  0x10   : > { %v2775_v1 = vld [vmem:[%s2772_s17 + $0x8] sm:$0x1]  ;;  %v2779_v2 = vld [vmem:[%s2772_s17 + $0xc] sm:$0x1]  ;;  %v209_v3 = vld [vmem:[%s2772_s17] sm:$0x1]  ;;  %s207_s9 = scalar_lea.vmem %s3975_s3, %s2632_s18 }
  0x11   : > { %238 = vperm.xlu1 %2661, %v2775_v1   ;;  %212 = vperm.xlu0 %2660, %v209_v3   ;;  %v2612_v4 = vld [vmem:[%s2772_s17 + $0x4] sm:$0x1]  ;;  %v2824_v19 = vsub.s32 0, %v215_v16  ;;  %v2843_v32 = vld [vmem:[%s2772_s17 + $0x1] sm:$0x1]  ;;  %s2732_s26 = smov 116  }
  0x12   : > { %v2829_v22 = vld [vmem:[%s2822_s21] ss:$4 sm:$0x3]  ;;  %v2849_v35 = vld [vmem:[%s2772_s17 + $0x9] sm:$0x1]  ;;  %s2733_s27 = smov 108  }
  0x13   : > { %v2855_v39 = vld [vmem:[%s2772_s17 + $0xd] sm:$0x1]  ;;  %s2734_s28 = smov 107   ;;  %s2735_s29 = smov 106  }
  0x14   : > { %s2609_s30 = sshll.u32 %s4142_s13, 2 }
  0x15   : > { %251 = vperm.xlu1 %2661, %v2779_v2   ;;  %225 = vperm.xlu0 %2660, %v2612_v4   ;;  %s202_s6 = scalar_lea.vmem %s3974_s2, %s2609_s30 }
  0x19   : > { %2663 = vset.pattern.permute.xlu1 %v3977_v5  ;;  %2662 = vset.pattern.permute.xlu0 %v3977_v5 }
  0x1a   : > { %278 = vperm.xlu1 %2663, %v2612_v4   ;;  %261 = vperm.xlu0 %2662, %v209_v3  }
  0x1e   : > { %294 = vperm.xlu1 %2663, %v2775_v1  }
  0x22   : > { %310 = vperm.xlu1 %2663, %v2779_v2  }
  0x26   : > { %2664 = vset.pattern.permute.xlu1 %v3992_v6 }
  0x27   : > { %326 = vperm.xlu1 %2664, %v209_v3  }
  0x2b   : > { %343 = vperm.xlu1 %2664, %v2612_v4  }
  0x2f   : > { %359 = vperm.xlu1 %2664, %v2775_v1  }
  0x33   : > { %375 = vperm.xlu1 %2664, %v2779_v2  }
  0x37   : > { %2665 = vset.pattern.permute.xlu1 %v3990_v7 }
  0x38   : > { %391 = vperm.xlu1 %2665, %v209_v3  }
  0x3c   : > { %408 = vperm.xlu1 %2665, %v2612_v4  }
  0x40   : > { %424 = vperm.xlu1 %2665, %v2775_v1  }
  0x44   : > { %440 = vperm.xlu1 %2665, %v2779_v2  }
  0x48   : > { %2666 = vset.pattern.permute.xlu1 %v3988_v8 }
  0x49   : > { %456 = vperm.xlu1 %2666, %v209_v3  }
  0x4d   : > { %473 = vperm.xlu1 %2666, %v2612_v4  }
  0x51   : > { %489 = vperm.xlu1 %2666, %v2775_v1  }
  0x55   : > { %505 = vperm.xlu1 %2666, %v2779_v2  }
  0x59   : > { %2667 = vset.pattern.permute.xlu1 %v3986_v9 }
  0x5a   : > { %521 = vperm.xlu1 %2667, %v209_v3  }
  0x5e   : > { %538 = vperm.xlu1 %2667, %v2612_v4  }
  0x62   : > { %554 = vperm.xlu1 %2667, %v2775_v1  }
  0x66   : > { %570 = vperm.xlu1 %2667, %v2779_v2  }
  0x6a   : > { %2668 = vset.pattern.permute.xlu1 %v3984_v10 }
  0x6b   : > { %586 = vperm.xlu1 %2668, %v209_v3  }
  0x6f   : > { %603 = vperm.xlu1 %2668, %v2612_v4  }
  0x73   : > { %619 = vperm.xlu1 %2668, %v2775_v1  }
  0x77   : > { %635 = vperm.xlu1 %2668, %v2779_v2  }
  0x7b   : > { %2669 = vset.pattern.permute.xlu1 %v3982_v11 }
  0x7c   : > { %651 = vperm.xlu1 %2669, %v209_v3  }
  0x80   : > { %668 = vperm.xlu1 %2669, %v2612_v4  }
  0x84   : > { %684 = vperm.xlu1 %2669, %v2775_v1  }
  0x88   : > { %700 = vperm.xlu1 %2669, %v2779_v2  }
  0x8c   : > { %v2806_v13 = vpop.permute.xlu1 %238  ;;  %2670 = vset.pattern.permute.xlu1 %v3980_v14  ;;  %v2809_v15 = vpop.permute.xlu0 %212 }
  0x8d   : > { %716 = vperm.xlu1 %2670, %v209_v3  }
  0x90   : > { %v2812_v17 = vpop.permute.xlu1 %251  ;;  %v2815_v18 = vpop.permute.xlu0 %225 }
  0x91   : > { %733 = vperm.xlu1 %2670, %v2612_v4   ;;  %4037 = vst [vmem:[#allocation2_spill] sm:$0xff] %v2815_v18  ;;  %v3223_v18 = vld [vmem:[%s2822_s21 + $0x2] ss:$4 sm:$0x3] }
  0x92   : > { %4060 = vst [vmem:[#allocation25_spill] sm:$0xff] %v3223_v18 }
  0x95   : > { %v279_v20 = vpop.permute.xlu1 %278  ;;  %749 = vperm.xlu1 %2670, %v2775_v1   ;;  %v262_v24 = vpop.permute.xlu0 %261 }
  0x96   : > { %v283_v21 = vrot.slane %v279_v20, %v2824_v19  ;;  %v266_v26 = vrot.slane %v262_v24, %v2824_v19 }
  0x98   : > { %v285_v23 = vmul.f32 %v283_v21, %v2829_v22  ;;  %v268_v28 = vmul.f32 %v266_v26, %v2829_v22 }
  0x99   : > { %v295_v25 = vpop.permute.xlu1 %294  ;;  %765 = vperm.xlu1 %2670, %v2779_v2  }
  0x9a   : > { %v299_v27 = vrot.slane %v295_v25, %v2824_v19  ;;  %287 = vrot.lane.b32.xlu0 %v285_v23, %s2728_s22 }
  0x9c   : > { %v301_v29 = vmul.f32 %v299_v27, %v2829_v22 }
  0x9d   : > { %v311_v30 = vpop.permute.xlu1 %310  ;;  %270 = vrot.lane.b32.xlu1 %v268_v28, %s2728_s22 }
  0x9e   : > { %v315_v31 = vrot.slane %v311_v30, %v2824_v19  ;;  %303 = vrot.lane.b32.xlu0 %v301_v29, %s2728_s22  ;;  %2671 = vset.pattern.permute.xlu1 %v3978_v0 }
  0xa0   : > { %v317_v33 = vmul.f32 %v315_v31, %v2829_v22 }
  0xa1   : > { %785 = vperm.xlu1 %2671, %v2843_v32  }
  0xa2   : > { %v327_v34 = vpop.permute.xlu1 %326  ;;  %319 = vrot.lane.b32.xlu0 %v317_v33, %s2728_s22 }
  0xa3   : > { %v331_v36 = vrot.slane %v327_v34, %v2824_v19 }
  0xa5   : > { %v333_v37 = vmul.f32 %v331_v36, %v2829_v22  ;;  %809 = vperm.xlu1 %2671, %v2849_v35  }
  0xa6   : > { %v344_v38 = vpop.permute.xlu1 %343 }
  0xa7   : > { %v348_v40 = vrot.slane %v344_v38, %v2824_v19  ;;  %335 = vrot.lane.b32.xlu0 %v333_v37, %s2729_s23 }
  0xa9   : > { %v350_v41 = vmul.f32 %v348_v40, %v2829_v22  ;;  %821 = vperm.xlu1 %2671, %v2855_v39  }
  0xaa   : > { %v360_v42 = vpop.permute.xlu1 %359 }
  0xab   : > { %v364_v43 = vrot.slane %v360_v42, %v2824_v19  ;;  %352 = vrot.lane.b32.xlu0 %v350_v41, %s2729_s23 }
  0xad   : > { %v366_v44 = vmul.f32 %v364_v43, %v2829_v22  ;;  %2672 = vset.pattern.permute.xlu1 %v3977_v5 }
  0xae   : > { %v376_v45 = vpop.permute.xlu1 %375 }
  0xaf   : > { %v380_v46 = vrot.slane %v376_v45, %v2824_v19  ;;  %368 = vrot.lane.b32.xlu0 %v366_v44, %s2729_s23 }
  0xb1   : > { %v382_v47 = vmul.f32 %v380_v46, %v2829_v22 }
  0xb3   : > { %v392_v48 = vpop.permute.xlu1 %391  ;;  %384 = vrot.lane.b32.xlu0 %v382_v47, %s2729_s23 }
  0xb4   : > { %v396_v49 = vrot.slane %v392_v48, %v2824_v19 }
  0xb6   : > { %v398_v50 = vmul.f32 %v396_v49, %v2829_v22 }
  0xb7   : > { %v409_v51 = vpop.permute.xlu1 %408 }
  0xb8   : > { %v413_v52 = vrot.slane %v409_v51, %v2824_v19  ;;  %400 = vrot.lane.b32.xlu0 %v398_v50, %s2730_s24 }
  0xba   : > { %v415_v53 = vmul.f32 %v413_v52, %v2829_v22 }
  0xbb   : > { %v425_v54 = vpop.permute.xlu1 %424 }
  0xbc   : > { %v429_v55 = vrot.slane %v425_v54, %v2824_v19  ;;  %417 = vrot.lane.b32.xlu0 %v415_v53, %s2730_s24 }
  0xbe   : > { %v431_v56 = vmul.f32 %v429_v55, %v2829_v22 }
  0xbf   : > { %v441_v57 = vpop.permute.xlu1 %440 }
  0xc0   : > { %v445_v58 = vrot.slane %v441_v57, %v2824_v19  ;;  %433 = vrot.lane.b32.xlu0 %v431_v56, %s2730_s24 }
  0xc2   : > { %v447_v59 = vmul.f32 %v445_v58, %v2829_v22 }
  0xc4   : > { %v457_v60 = vpop.permute.xlu1 %456  ;;  %449 = vrot.lane.b32.xlu0 %v447_v59, %s2730_s24 }
  0xc5   : > { %v461_v61 = vrot.slane %v457_v60, %v2824_v19 }
  0xc7   : > { %v463_v62 = vmul.f32 %v461_v61, %v2829_v22 }
  0xc8   : > { %v474_v63 = vpop.permute.xlu1 %473 }
  0xc9   : > { %v478_v1 = vrot.slane %v474_v63, %v2824_v19  ;;  %465 = vrot.lane.b32.xlu0 %v463_v62, %s2731_s25 }
  0xcb   : > { %v480_v2 = vmul.f32 %v478_v1, %v2829_v22 }
  0xcc   : > { %v490_v3 = vpop.permute.xlu1 %489 }
  0xcd   : > { %v494_v4 = vrot.slane %v490_v3, %v2824_v19  ;;  %482 = vrot.lane.b32.xlu0 %v480_v2, %s2731_s25 }
  0xcf   : > { %v496_v16 = vmul.f32 %v494_v4, %v2829_v22 }
  0xd0   : > { %v506_v20 = vpop.permute.xlu1 %505 }
  0xd1   : > { %v510_v21 = vrot.slane %v506_v20, %v2824_v19  ;;  %498 = vrot.lane.b32.xlu0 %v496_v16, %s2731_s25 }
  0xd3   : > { %v512_v23 = vmul.f32 %v510_v21, %v2829_v22 }
  0xd5   : > { %v522_v24 = vpop.permute.xlu1 %521  ;;  %514 = vrot.lane.b32.xlu0 %v512_v23, %s2731_s25 }
  0xd6   : > { %v526_v25 = vrot.slane %v522_v24, %v2824_v19 }
  0xd8   : > { %v528_v26 = vmul.f32 %v526_v25, %v2829_v22 }
  0xd9   : > { %v539_v27 = vpop.permute.xlu1 %538 }
  0xda   : > { %v543_v28 = vrot.slane %v539_v27, %v2824_v19  ;;  %530 = vrot.lane.b32.xlu0 %v528_v26, %s2732_s26 }
  0xdc   : > { %v545_v29 = vmul.f32 %v543_v28, %v2829_v22 }
  0xdd   : > { %v555_v30 = vpop.permute.xlu1 %554 }
  0xde   : > { %v559_v31 = vrot.slane %v555_v30, %v2824_v19  ;;  %547 = vrot.lane.b32.xlu0 %v545_v29, %s2732_s26 }
  0xe0   : > { %v561_v33 = vmul.f32 %v559_v31, %v2829_v22 }
  0xe1   : > { %v571_v34 = vpop.permute.xlu1 %570 }
  0xe2   : > { %v575_v36 = vrot.slane %v571_v34, %v2824_v19  ;;  %563 = vrot.lane.b32.xlu0 %v561_v33, %s2732_s26 }
  0xe4   : > { %v577_v37 = vmul.f32 %v575_v36, %v2829_v22 }
  0xe6   : > { %v587_v38 = vpop.permute.xlu1 %586  ;;  %579 = vrot.lane.b32.xlu0 %v577_v37, %s2732_s26 }
  0xe7   : > { %v591_v40 = vrot.slane %v587_v38, %v2824_v19 }
  0xe9   : > { %v593_v41 = vmul.f32 %v591_v40, %v2829_v22 }
  0xea   : > { %v604_v42 = vpop.permute.xlu1 %603 }
  0xeb   : > { %v608_v43 = vrot.slane %v604_v42, %v2824_v19  ;;  %595 = vrot.lane.b32.xlu0 %v593_v41, %s2733_s27 }
  0xed   : > { %v610_v44 = vmul.f32 %v608_v43, %v2829_v22 }
  0xee   : > { %v620_v45 = vpop.permute.xlu1 %619 }
  0xef   : > { %v624_v46 = vrot.slane %v620_v45, %v2824_v19  ;;  %612 = vrot.lane.b32.xlu0 %v610_v44, %s2733_s27 }
  0xf1   : > { %v626_v47 = vmul.f32 %v624_v46, %v2829_v22 }
  0xf2   : > { %v636_v48 = vpop.permute.xlu1 %635 }
  0xf3   : > { %v640_v49 = vrot.slane %v636_v48, %v2824_v19  ;;  %628 = vrot.lane.b32.xlu0 %v626_v47, %s2733_s27 }
  0xf5   : > { %v642_v50 = vmul.f32 %v640_v49, %v2829_v22 }
  0xf7   : > { %v652_v51 = vpop.permute.xlu1 %651  ;;  %644 = vrot.lane.b32.xlu0 %v642_v50, %s2733_s27 }
  0xf8   : > { %v656_v52 = vrot.slane %v652_v51, %v2824_v19 }
  0xfa   : > { %v658_v53 = vmul.f32 %v656_v52, %v2829_v22 }
  0xfb   : > { %v669_v54 = vpop.permute.xlu1 %668 }
  0xfc   : > { %v673_v55 = vrot.slane %v669_v54, %v2824_v19  ;;  %660 = vrot.lane.b32.xlu0 %v658_v53, %s2734_s28 }
  0xfe   : > { %v675_v56 = vmul.f32 %v673_v55, %v2829_v22 }
  0xff   : > { %v685_v57 = vpop.permute.xlu1 %684 }
 0x100   : > { %v689_v58 = vrot.slane %v685_v57, %v2824_v19  ;;  %677 = vrot.lane.b32.xlu0 %v675_v56, %s2734_s28 }
 0x102   : > { %v691_v59 = vmul.f32 %v689_v58, %v2829_v22 }
 0x103   : > { %v701_v60 = vpop.permute.xlu1 %700 }
 0x104   : > { %v705_v61 = vrot.slane %v701_v60, %v2824_v19  ;;  %693 = vrot.lane.b32.xlu0 %v691_v59, %s2734_s28 }
 0x106   : > { %v707_v62 = vmul.f32 %v705_v61, %v2829_v22 }
 0x108   : > { %v717_v63 = vpop.permute.xlu1 %716  ;;  %709 = vrot.lane.b32.xlu0 %v707_v62, %s2734_s28  ;;  %v3006_v62 = vld [vmem:[%s2822_s21 + $0x1] ss:$4 sm:$0x3] }
 0x109   : > { %v721_v1 = vrot.slane %v717_v63, %v2824_v19 }
 0x10b   : > { %v723_v2 = vmul.f32 %v721_v1, %v2829_v22  ;;  %v2616_v1 = vld [vmem:[%s2772_s17 + $0x5] sm:$0x1] }
 0x10c   : > { %v734_v3 = vpop.permute.xlu1 %733  ;;  %v2931_v4 = vpop.permute.xlu0 %287 }
 0x10d   : > { %4038 = vst [vmem:[#allocation3_spill] sm:$0xff] %v2931_v4  ;;  %v738_v16 = vrot.slane %v734_v3, %v2824_v19  ;;  %725 = vrot.lane.b32.xlu0 %v723_v2, %s2735_s29 }
 0x10f   : > { %v740_v20 = vmul.f32 %v738_v16, %v2829_v22 }
 0x110   : > { %v750_v21 = vpop.permute.xlu1 %749  ;;  %v2936_v23 = vpop.permute.xlu0 %303 }
 0x111   : > { %v754_v24 = vrot.slane %v750_v21, %v2824_v19  ;;  %742 = vrot.lane.b32.xlu0 %v740_v20, %s2735_s29 }
 0x113   : > { %v756_v25 = vmul.f32 %v754_v24, %v2829_v22 }
 0x114   : > { %v766_v26 = vpop.permute.xlu1 %765  ;;  %v2941_v27 = vpop.permute.xlu0 %319 }
 0x115   : > { %v770_v28 = vrot.slane %v766_v26, %v2824_v19  ;;  %758 = vrot.lane.b32.xlu0 %v756_v25, %s2735_s29 }
 0x117   : > { %v772_v29 = vmul.f32 %v770_v28, %v2829_v22 }
 0x118   : > { %v3035_v2 = vpop.permute.xlu1 %270 }
 0x119   : > { %774 = vrot.lane.b32.xlu0 %v772_v29, %s2735_s29  ;;  %v2947_v30 = vpop.permute.xlu0 %335 }
 0x11c   : > { %v3037_v3 = vpop.permute.xlu1 %785 }
 0x11d   : > { %831 = vperm.xlu0 %2662, %v2843_v32   ;;  %v2950_v31 = vpop.permute.xlu0 %352 }
 0x11e   : > { %4039 = vst [vmem:[#allocation4_spill] sm:$0xff] %v2950_v31 }
 0x120   : > { %v3040_v16 = vpop.permute.xlu1 %809 }
 0x121   : > { %v2952_v33 = vpop.permute.xlu0 %368 }
 0x124   : > { %v3044_v20 = vpop.permute.xlu1 %821 }
 0x125   : > { %v2954_v34 = vpop.permute.xlu0 %384 }
 0x12a   : > { %v2956_v36 = vpop.permute.xlu0 %400 }
 0x12e   : > { %v2958_v37 = vpop.permute.xlu0 %417 }
 0x12f   : > { %4040 = vst [vmem:[#allocation5_spill] sm:$0xff] %v2958_v37 }
 0x132   : > { %v2960_v38 = vpop.permute.xlu0 %433 }
 0x136   : > { %v2962_v40 = vpop.permute.xlu0 %449 }
 0x13b   : > { %v2964_v22 = vpop.permute.xlu0 %465 }
 0x13f   : > { %v2966_v41 = vpop.permute.xlu0 %482 }
 0x140   : > { %4041 = vst [vmem:[#allocation6_spill] sm:$0xff] %v2966_v41 }
 0x143   : > { %v2968_v42 = vpop.permute.xlu0 %498 }
 0x147   : > { %v2970_v43 = vpop.permute.xlu0 %514 }
 0x14c   : > { %v2972_v44 = vpop.permute.xlu0 %530 }
 0x150   : > { %v2974_v45 = vpop.permute.xlu0 %547 }
 0x151   : > { %4042 = vst [vmem:[#allocation7_spill] sm:$0xff] %v2974_v45 }
 0x154   : > { %v2976_v46 = vpop.permute.xlu0 %563 }
 0x158   : > { %v2978_v47 = vpop.permute.xlu0 %579 }
 0x15d   : > { %v2980_v48 = vpop.permute.xlu0 %595 }
 0x161   : > { %v2982_v49 = vpop.permute.xlu0 %612 }
 0x162   : > { %4043 = vst [vmem:[#allocation8_spill] sm:$0xff] %v2982_v49 }
 0x165   : > { %v2984_v50 = vpop.permute.xlu0 %628 }
 0x169   : > { %v2986_v51 = vpop.permute.xlu0 %644 }
 0x16e   : > { %v2988_v52 = vpop.permute.xlu0 %660 }
 0x172   : > { %v2990_v53 = vpop.permute.xlu0 %677 }
 0x173   : > { %4044 = vst [vmem:[#allocation9_spill] sm:$0xff] %v2990_v53 }
 0x176   : > { %v2992_v54 = vpop.permute.xlu0 %693 }
 0x17a   : > { %v2994_v55 = vpop.permute.xlu0 %709 }
 0x17f   : > { %v2996_v56 = vpop.permute.xlu0 %725 }
 0x183   : > { %v2998_v57 = vpop.permute.xlu0 %742 }
 0x184   : > { %4045 = vst [vmem:[#allocation10_spill] sm:$0xff] %v2998_v57 }
 0x187   : > { %v3000_v58 = vpop.permute.xlu0 %758 }
 0x18b   : > { %v3002_v59 = vpop.permute.xlu0 %774 }
 0x198   : > { %v832_v60 = vpop.permute.xlu0 %831 }
 0x199   : > { %v836_v61 = vrot.slane %v832_v60, %v2824_v19 }
 0x19b   : > { %v838_v63 = vmul.f32 %v3006_v62, %v836_v61 }
 0x19d   : > { %840 = vrot.lane.b32.xlu1 %v838_v63, %s2728_s22 }
 0x1a1   : > { %847 = vperm.xlu1 %2672, %v2616_v1  }
 0x1a5   : > { %863 = vperm.xlu1 %2672, %v2849_v35  }
 0x1a9   : > { %879 = vperm.xlu1 %2672, %v2855_v39  }
 0x1ad   : > { %2673 = vset.pattern.permute.xlu1 %v3992_v6 }
 0x1ae   : > { %895 = vperm.xlu1 %2673, %v2843_v32  }
 0x1b2   : > { %911 = vperm.xlu1 %2673, %v2616_v1  }
 0x1b6   : > { %927 = vperm.xlu1 %2673, %v2849_v35  }
 0x1ba   : > { %943 = vperm.xlu1 %2673, %v2855_v39  }
 0x1be   : > { %2674 = vset.pattern.permute.xlu1 %v3990_v7 }
 0x1bf   : > { %959 = vperm.xlu1 %2674, %v2843_v32  }
 0x1c3   : > { %975 = vperm.xlu1 %2674, %v2616_v1  }
 0x1c7   : > { %991 = vperm.xlu1 %2674, %v2849_v35  }
 0x1cb   : > { %1007 = vperm.xlu1 %2674, %v2855_v39  }
 0x1cf   : > { %2675 = vset.pattern.permute.xlu1 %v3988_v8 }
 0x1d0   : > { %1023 = vperm.xlu1 %2675, %v2843_v32  }
 0x1d4   : > { %1039 = vperm.xlu1 %2675, %v2616_v1  }
 0x1d8   : > { %1055 = vperm.xlu1 %2675, %v2849_v35  }
 0x1dc   : > { %1071 = vperm.xlu1 %2675, %v2855_v39  }
 0x1e0   : > { %2676 = vset.pattern.permute.xlu1 %v3986_v9 }
 0x1e1   : > { %1087 = vperm.xlu1 %2676, %v2843_v32  }
 0x1e5   : > { %1103 = vperm.xlu1 %2676, %v2616_v1  }
 0x1e9   : > { %1119 = vperm.xlu1 %2676, %v2849_v35  }
 0x1ed   : > { %1135 = vperm.xlu1 %2676, %v2855_v39  }
 0x1f1   : > { %2677 = vset.pattern.permute.xlu1 %v3984_v10 }
 0x1f2   : > { %1151 = vperm.xlu1 %2677, %v2843_v32  }
 0x1f6   : > { %1167 = vperm.xlu1 %2677, %v2616_v1  }
 0x1fa   : > { %1183 = vperm.xlu1 %2677, %v2849_v35  }
 0x1fe   : > { %1199 = vperm.xlu1 %2677, %v2855_v39  }
 0x202   : > { %2678 = vset.pattern.permute.xlu1 %v3982_v11 }
 0x203   : > { %1215 = vperm.xlu1 %2678, %v2843_v32  }
 0x207   : > { %1231 = vperm.xlu1 %2678, %v2616_v1  }
 0x20b   : > { %1247 = vperm.xlu1 %2678, %v2849_v35  }
 0x20f   : > { %1263 = vperm.xlu1 %2678, %v2855_v39   ;;  %v3047_v21 = vpop.permute.xlu1 %840 }
 0x213   : > { %2679 = vset.pattern.permute.xlu1 %v3980_v14 }
 0x214   : > { %1279 = vperm.xlu1 %2679, %v2843_v32   ;;  %v3056_v32 = vld [vmem:[%s2772_s17 + $0x2] sm:$0x1] }
 0x218   : > { %1295 = vperm.xlu1 %2679, %v2616_v1  }
 0x21c   : > { %1311 = vperm.xlu1 %2679, %v2849_v35   ;;  %v848_v24 = vpop.permute.xlu1 %847 }
 0x21d   : > { %v852_v25 = vrot.slane %v848_v24, %v2824_v19 }
 0x21f   : > { %v854_v26 = vmul.f32 %v3006_v62, %v852_v25  ;;  %v3071_v25 = vld [vmem:[%s2772_s17 + $0xe] sm:$0x1] }
 0x220   : > { %1327 = vperm.xlu1 %2679, %v2855_v39   ;;  %v864_v28 = vpop.permute.xlu1 %863  ;;  %v3064_v39 = vld [vmem:[%s2772_s17 + $0xa] sm:$0x1] }
 0x221   : > { %v868_v29 = vrot.slane %v864_v28, %v2824_v19  ;;  %856 = vrot.lane.b32.xlu0 %v854_v26, %s2728_s22 }
 0x223   : > { %v870_v60 = vmul.f32 %v3006_v62, %v868_v29 }
 0x224   : > { %v880_v61 = vpop.permute.xlu1 %879  ;;  %2680 = vset.pattern.permute.xlu1 %v3978_v0 }
 0x225   : > { %v884_v35 = vrot.slane %v880_v61, %v2824_v19  ;;  %872 = vrot.lane.b32.xlu0 %v870_v60, %s2728_s22  ;;  %1347 = vperm.xlu1 %2680, %v3056_v32  }
 0x227   : > { %v886_v63 = vmul.f32 %v3006_v62, %v884_v35 }
 0x229   : > { %888 = vrot.lane.b32.xlu0 %v886_v63, %s2728_s22  ;;  %v896_v1 = vpop.permute.xlu1 %895  ;;  %1371 = vperm.xlu1 %2680, %v3064_v39  }
 0x22a   : > { %v900_v24 = vrot.slane %v896_v1, %v2824_v19 }
 0x22c   : > { %v902_v26 = vmul.f32 %v3006_v62, %v900_v24 }
 0x22d   : > { %v912_v28 = vpop.permute.xlu1 %911  ;;  %1383 = vperm.xlu1 %2680, %v3071_v25  }
 0x22e   : > { %v916_v29 = vrot.slane %v912_v28, %v2824_v19  ;;  %904 = vrot.lane.b32.xlu0 %v902_v26, %s2729_s23 }
 0x230   : > { %v918_v60 = vmul.f32 %v3006_v62, %v916_v29 }
 0x231   : > { %v928_v61 = vpop.permute.xlu1 %927  ;;  %2681 = vset.pattern.permute.xlu1 %v3977_v5 }
 0x232   : > { %v932_v35 = vrot.slane %v928_v61, %v2824_v19  ;;  %920 = vrot.lane.b32.xlu0 %v918_v60, %s2729_s23 }
 0x234   : > { %v934_v63 = vmul.f32 %v3006_v62, %v932_v35 }
 0x235   : > { %v944_v1 = vpop.permute.xlu1 %943 }
 0x236   : > { %v948_v24 = vrot.slane %v944_v1, %v2824_v19  ;;  %936 = vrot.lane.b32.xlu0 %v934_v63, %s2729_s23 }
 0x238   : > { %v950_v28 = vmul.f32 %v3006_v62, %v948_v24 }
 0x23a   : > { %952 = vrot.lane.b32.xlu0 %v950_v28, %s2729_s23  ;;  %v960_v26 = vpop.permute.xlu1 %959 }
 0x23b   : > { %v964_v29 = vrot.slane %v960_v26, %v2824_v19 }
 0x23d   : > { %v966_v12 = vmul.f32 %v3006_v62, %v964_v29 }
 0x23e   : > { %v976_v5 = vpop.permute.xlu1 %975 }
 0x23f   : > { %v980_v61 = vrot.slane %v976_v5, %v2824_v19  ;;  %968 = vrot.lane.b32.xlu0 %v966_v12, %s2730_s24 }
 0x241   : > { %v982_v60 = vmul.f32 %v3006_v62, %v980_v61 }
 0x242   : > { %v992_v35 = vpop.permute.xlu1 %991 }
 0x243   : > { %v996_v1 = vrot.slane %v992_v35, %v2824_v19  ;;  %984 = vrot.lane.b32.xlu0 %v982_v60, %s2730_s24 }
 0x245   : > { %v998_v63 = vmul.f32 %v3006_v62, %v996_v1 }
 0x246   : > { %v1008_v24 = vpop.permute.xlu1 %1007 }
 0x247   : > { %v1012_v28 = vrot.slane %v1008_v24, %v2824_v19  ;;  %1000 = vrot.lane.b32.xlu0 %v998_v63, %s2730_s24 }
 0x249   : > { %v1014_v26 = vmul.f32 %v3006_v62, %v1012_v28 }
 0x24b   : > { %1016 = vrot.lane.b32.xlu0 %v1014_v26, %s2730_s24  ;;  %v1024_v5 = vpop.permute.xlu1 %1023 }
 0x24c   : > { %v1028_v12 = vrot.slane %v1024_v5, %v2824_v19 }
 0x24e   : > { %v1030_v29 = vmul.f32 %v3006_v62, %v1028_v12 }
 0x24f   : > { %v1040_v61 = vpop.permute.xlu1 %1039 }
 0x250   : > { %v1044_v35 = vrot.slane %v1040_v61, %v2824_v19  ;;  %1032 = vrot.lane.b32.xlu0 %v1030_v29, %s2731_s25 }
 0x252   : > { %v1046_v60 = vmul.f32 %v3006_v62, %v1044_v35 }
 0x253   : > { %v1056_v1 = vpop.permute.xlu1 %1055 }
 0x254   : > { %v1060_v24 = vrot.slane %v1056_v1, %v2824_v19  ;;  %1048 = vrot.lane.b32.xlu0 %v1046_v60, %s2731_s25 }
 0x256   : > { %v1062_v63 = vmul.f32 %v3006_v62, %v1060_v24 }
 0x257   : > { %v1072_v28 = vpop.permute.xlu1 %1071 }
 0x258   : > { %v1076_v26 = vrot.slane %v1072_v28, %v2824_v19  ;;  %1064 = vrot.lane.b32.xlu0 %v1062_v63, %s2731_s25 }
 0x25a   : > { %v1078_v5 = vmul.f32 %v3006_v62, %v1076_v26 }
 0x25c   : > { %1080 = vrot.lane.b32.xlu0 %v1078_v5, %s2731_s25  ;;  %v1088_v12 = vpop.permute.xlu1 %1087 }
 0x25d   : > { %v1092_v29 = vrot.slane %v1088_v12, %v2824_v19 }
 0x25f   : > { %v1094_v61 = vmul.f32 %v3006_v62, %v1092_v29 }
 0x260   : > { %v1104_v35 = vpop.permute.xlu1 %1103 }
 0x261   : > { %v1108_v1 = vrot.slane %v1104_v35, %v2824_v19  ;;  %1096 = vrot.lane.b32.xlu0 %v1094_v61, %s2732_s26 }
 0x263   : > { %v1110_v60 = vmul.f32 %v3006_v62, %v1108_v1 }
 0x264   : > { %v1120_v24 = vpop.permute.xlu1 %1119 }
 0x265   : > { %v1124_v28 = vrot.slane %v1120_v24, %v2824_v19  ;;  %1112 = vrot.lane.b32.xlu0 %v1110_v60, %s2732_s26 }
 0x267   : > { %v1126_v63 = vmul.f32 %v3006_v62, %v1124_v28 }
 0x268   : > { %v1136_v26 = vpop.permute.xlu1 %1135 }
 0x269   : > { %v1140_v5 = vrot.slane %v1136_v26, %v2824_v19  ;;  %1128 = vrot.lane.b32.xlu0 %v1126_v63, %s2732_s26 }
 0x26b   : > { %v1142_v12 = vmul.f32 %v3006_v62, %v1140_v5 }
 0x26d   : > { %1144 = vrot.lane.b32.xlu0 %v1142_v12, %s2732_s26  ;;  %v1152_v29 = vpop.permute.xlu1 %1151 }
 0x26e   : > { %v1156_v61 = vrot.slane %v1152_v29, %v2824_v19 }
 0x270   : > { %v1158_v35 = vmul.f32 %v3006_v62, %v1156_v61 }
 0x271   : > { %v1168_v1 = vpop.permute.xlu1 %1167 }
 0x272   : > { %v1172_v24 = vrot.slane %v1168_v1, %v2824_v19  ;;  %1160 = vrot.lane.b32.xlu0 %v1158_v35, %s2733_s27 }
 0x274   : > { %v1174_v60 = vmul.f32 %v3006_v62, %v1172_v24 }
 0x275   : > { %v1184_v28 = vpop.permute.xlu1 %1183 }
 0x276   : > { %v1188_v26 = vrot.slane %v1184_v28, %v2824_v19  ;;  %1176 = vrot.lane.b32.xlu0 %v1174_v60, %s2733_s27 }
 0x278   : > { %v1190_v63 = vmul.f32 %v3006_v62, %v1188_v26 }
 0x279   : > { %v1200_v5 = vpop.permute.xlu1 %1199 }
 0x27a   : > { %v1204_v12 = vrot.slane %v1200_v5, %v2824_v19  ;;  %1192 = vrot.lane.b32.xlu0 %v1190_v63, %s2733_s27 }
 0x27c   : > { %v1206_v29 = vmul.f32 %v3006_v62, %v1204_v12 }
 0x27e   : > { %1208 = vrot.lane.b32.xlu0 %v1206_v29, %s2733_s27  ;;  %v1216_v61 = vpop.permute.xlu1 %1215 }
 0x27f   : > { %v1220_v35 = vrot.slane %v1216_v61, %v2824_v19 }
 0x281   : > { %v1222_v1 = vmul.f32 %v3006_v62, %v1220_v35 }
 0x282   : > { %v1232_v24 = vpop.permute.xlu1 %1231 }
 0x283   : > { %v1236_v28 = vrot.slane %v1232_v24, %v2824_v19  ;;  %1224 = vrot.lane.b32.xlu0 %v1222_v1, %s2734_s28 }
 0x285   : > { %v1238_v60 = vmul.f32 %v3006_v62, %v1236_v28 }
 0x286   : > { %v1248_v26 = vpop.permute.xlu1 %1247 }
 0x287   : > { %v1252_v5 = vrot.slane %v1248_v26, %v2824_v19  ;;  %1240 = vrot.lane.b32.xlu0 %v1238_v60, %s2734_s28 }
 0x289   : > { %v1254_v63 = vmul.f32 %v3006_v62, %v1252_v5 }
 0x28a   : > { %v1264_v12 = vpop.permute.xlu1 %1263 }
 0x28b   : > { %v1268_v29 = vrot.slane %v1264_v12, %v2824_v19  ;;  %1256 = vrot.lane.b32.xlu0 %v1254_v63, %s2734_s28 }
 0x28d   : > { %v1270_v61 = vmul.f32 %v3006_v62, %v1268_v29 }
 0x28f   : > { %1272 = vrot.lane.b32.xlu0 %v1270_v61, %s2734_s28  ;;  %v1280_v35 = vpop.permute.xlu1 %1279 }
 0x290   : > { %v1284_v1 = vrot.slane %v1280_v35, %v2824_v19 }
 0x292   : > { %v1286_v24 = vmul.f32 %v3006_v62, %v1284_v1 }
 0x293   : > { %v3148_v28 = vpop.permute.xlu0 %856  ;;  %v1296_v26 = vpop.permute.xlu1 %1295 }
 0x294   : > { %4046 = vst [vmem:[#allocation11_spill] sm:$0xff] %v3148_v28  ;;  %v1300_v60 = vrot.slane %v1296_v26, %v2824_v19  ;;  %1288 = vrot.lane.b32.xlu0 %v1286_v24, %s2735_s29 }
 0x296   : > { %v1302_v5 = vmul.f32 %v3006_v62, %v1300_v60 }
 0x297   : > { %v3153_v12 = vpop.permute.xlu0 %872  ;;  %v1312_v63 = vpop.permute.xlu1 %1311 }
 0x298   : > { %v1316_v29 = vrot.slane %v1312_v63, %v2824_v19  ;;  %1304 = vrot.lane.b32.xlu0 %v1302_v5, %s2735_s29 }
 0x29a   : > { %v1318_v61 = vmul.f32 %v3006_v62, %v1316_v29 }
 0x29b   : > { %v3158_v35 = vpop.permute.xlu0 %888  ;;  %v1328_v1 = vpop.permute.xlu1 %1327 }
 0x29c   : > { %v1332_v0 = vrot.slane %v1328_v1, %v2824_v19  ;;  %1320 = vrot.lane.b32.xlu0 %v1318_v61, %s2735_s29 }
 0x29e   : > { %v1334_v24 = vmul.f32 %v3006_v62, %v1332_v0 }
 0x2a0   : > { %v3163_v26 = vpop.permute.xlu0 %904  ;;  %1336 = vrot.lane.b32.xlu0 %v1334_v24, %s2735_s29 }
 0x2a4   : > { %v3166_v60 = vpop.permute.xlu0 %920  ;;  %1393 = vperm.xlu0 %2662, %v3056_v32  }
 0x2a5   : > { %4047 = vst [vmem:[#allocation12_spill] sm:$0xff] %v3166_v60 }
 0x2a8   : > { %v3169_v5 = vpop.permute.xlu0 %936 }
 0x2ac   : > { %v3171_v63 = vpop.permute.xlu0 %952 }
 0x2b1   : > { %v3173_v29 = vpop.permute.xlu0 %968 }
 0x2b5   : > { %v3175_v14 = vpop.permute.xlu0 %984 }
 0x2b6   : > { %4048 = vst [vmem:[#allocation13_spill] sm:$0xff] %v3175_v14 }
 0x2b9   : > { %v3177_v1 = vpop.permute.xlu0 %1000 }
 0x2bd   : > { %v3179_v61 = vpop.permute.xlu0 %1016 }
 0x2c2   : > { %v3181_v0 = vpop.permute.xlu0 %1032 }
 0x2c6   : > { %v3183_v11 = vpop.permute.xlu0 %1048 }
 0x2c7   : > { %4049 = vst [vmem:[#allocation14_spill] sm:$0xff] %v3183_v11 }
 0x2ca   : > { %v3185_v24 = vpop.permute.xlu0 %1064 }
 0x2ce   : > { %v3187_v10 = vpop.permute.xlu0 %1080 }
 0x2d3   : > { %v3189_v9 = vpop.permute.xlu0 %1096 }
 0x2d7   : > { %v3191_v8 = vpop.permute.xlu0 %1112 }
 0x2d8   : > { %4050 = vst [vmem:[#allocation15_spill] sm:$0xff] %v3191_v8 }
 0x2db   : > { %v3193_v7 = vpop.permute.xlu0 %1128 }
 0x2df   : > { %v3195_v6 = vpop.permute.xlu0 %1144 }
 0x2e4   : > { %v3197_v14 = vpop.permute.xlu0 %1160 }
 0x2e5   : > { %4051 = vst [vmem:[#allocation16_spill] sm:$0xff] %v3197_v14 }
 0x2e8   : > { %v3199_v60 = vpop.permute.xlu0 %1176 }
 0x2e9   : > { %4052 = vst [vmem:[#allocation17_spill] sm:$0xff] %v3199_v60 }
 0x2ec   : > { %v3201_v28 = vpop.permute.xlu0 %1192 }
 0x2f0   : > { %v3203_v11 = vpop.permute.xlu0 %1208 }
 0x2f5   : > { %v3205_v57 = vpop.permute.xlu0 %1224 }
 0x2f6   : > { %4053 = vst [vmem:[#allocation18_spill] sm:$0xff] %v3205_v57 }
 0x2f9   : > { %v3207_v53 = vpop.permute.xlu0 %1240 }
 0x2fa   : > { %4054 = vst [vmem:[#allocation19_spill] sm:$0xff] %v3207_v53  ;;  %v2620_v53 = vld [vmem:[%s2772_s17 + $0x6] sm:$0x1] }
 0x2fd   : > { %v3209_v49 = vpop.permute.xlu0 %1256 }
 0x301   : > { %v3211_v8 = vpop.permute.xlu0 %1272 }
 0x302   : > { %4055 = vst [vmem:[#allocation20_spill] sm:$0xff] %v3211_v8 }
 0x306   : > { %v3213_v45 = vpop.permute.xlu0 %1288 }
 0x307   : > { %4056 = vst [vmem:[#allocation21_spill] sm:$0xff] %v3213_v45 }
 0x30a   : > { %v3215_v41 = vpop.permute.xlu0 %1304 }
 0x30b   : > { %4057 = vst [vmem:[#allocation22_spill] sm:$0xff] %v3215_v41  ;;  %v4061_v41 = vmov 2  }
 0x30e   : > { %v3217_v37 = vpop.permute.xlu0 %1320 }
 0x30f   : > { %4058 = vst [vmem:[#allocation23_spill] sm:$0xff] %v3217_v37 }
 0x312   : > { %v3219_v60 = vpop.permute.xlu0 %1336 }
 0x313   : > { %4059 = vst [vmem:[#allocation24_spill] sm:$0xff] %v3219_v60 }
 0x31f   : > { %v1394_v31 = vpop.permute.xlu0 %1393 }
 0x320   : > { %v1398_v4 = vrot.slane %v1394_v31, %v2824_v19  ;;  %v4062_v31 = vmov 3  }
 0x322   : > { %v1400_v57 = vmul.f32 %v3223_v18, %v1398_v4  ;;  %v4063_v4 = vmov 4  }
 0x324   : > { %1402 = vrot.lane.b32.xlu1 %v1400_v57, %s2728_s22  ;;  %v4064_v57 = vmov 5  }
 0x328   : > { %1409 = vperm.xlu1 %2681, %v2620_v53  }
 0x32c   : > { %1425 = vperm.xlu1 %2681, %v3064_v39  }
 0x330   : > { %1441 = vperm.xlu1 %2681, %v3071_v25  }
 0x334   : > { %2682 = vset.pattern.permute.xlu1 %v4061_v41  ;;  %v4066_v41 = vmov 7  }
 0x335   : > { %1457 = vperm.xlu1 %2682, %v3056_v32  }
 0x339   : > { %1473 = vperm.xlu1 %2682, %v2620_v53  }
 0x33d   : > { %1489 = vperm.xlu1 %2682, %v3064_v39  }
 0x341   : > { %1505 = vperm.xlu1 %2682, %v3071_v25  }
 0x345   : > { %2683 = vset.pattern.permute.xlu1 %v4062_v31  ;;  %v4065_v31 = vmov 6  }
 0x346   : > { %1521 = vperm.xlu1 %2683, %v3056_v32  }
 0x34a   : > { %1537 = vperm.xlu1 %2683, %v2620_v53  }
 0x34e   : > { %1553 = vperm.xlu1 %2683, %v3064_v39  }
 0x352   : > { %1569 = vperm.xlu1 %2683, %v3071_v25  }
 0x356   : > { %2684 = vset.pattern.permute.xlu1 %v4063_v4 }
 0x357   : > { %1585 = vperm.xlu1 %2684, %v3056_v32  }
 0x35b   : > { %1601 = vperm.xlu1 %2684, %v2620_v53  }
 0x35f   : > { %1617 = vperm.xlu1 %2684, %v3064_v39  }
 0x363   : > { %1633 = vperm.xlu1 %2684, %v3071_v25  }
 0x367   : > { %2685 = vset.pattern.permute.xlu1 %v4064_v57  ;;  %v3252_v57 = vpop.permute.xlu1 %1347 }
 0x368   : > { %1649 = vperm.xlu1 %2685, %v3056_v32   ;;  %4067 = vst [vmem:[#allocation26_spill] sm:$0xff] %v3252_v57 }
 0x36b   : > { %v3255_v45 = vpop.permute.xlu1 %1371 }
 0x36c   : > { %1665 = vperm.xlu1 %2685, %v2620_v53   ;;  %4068 = vst [vmem:[#allocation27_spill] sm:$0xff] %v3255_v45 }
 0x36f   : > { %v3259_v60 = vpop.permute.xlu1 %1383 }
 0x370   : > { %1681 = vperm.xlu1 %2685, %v3064_v39   ;;  %4070 = vst [vmem:[#allocation28_spill] sm:$0xff] %v3259_v60  ;;  %v4073_v60 = vmov 0  }
 0x374   : > { %1697 = vperm.xlu1 %2685, %v3071_v25  }
 0x378   : > { %2686 = vset.pattern.permute.xlu1 %v4065_v31  ;;  %v4069_v31 = vmov 8  }
 0x379   : > { %1713 = vperm.xlu1 %2686, %v3056_v32  }
 0x37d   : > { %1729 = vperm.xlu1 %2686, %v2620_v53  }
 0x381   : > { %1745 = vperm.xlu1 %2686, %v3064_v39  }
 0x385   : > { %1761 = vperm.xlu1 %2686, %v3071_v25  }
 0x389   : > { %2687 = vset.pattern.permute.xlu1 %v4066_v41 }
 0x38a   : > { %1777 = vperm.xlu1 %2687, %v3056_v32  }
 0x38e   : > { %1793 = vperm.xlu1 %2687, %v2620_v53  }
 0x392   : > { %1809 = vperm.xlu1 %2687, %v3064_v39  }
 0x396   : > { %1825 = vperm.xlu1 %2687, %v3071_v25   ;;  %v3262_v8 = vpop.permute.xlu1 %1402 }
 0x397   : > { %4071 = vst [vmem:[#allocation29_spill] sm:$0xff] %v3262_v8 }
 0x39a   : > { %2688 = vset.pattern.permute.xlu1 %v4069_v31 }
 0x39b   : > { %1841 = vperm.xlu1 %2688, %v3056_v32   ;;  %v3271_v32 = vld [vmem:[%s2772_s17 + $0x3] sm:$0x1] }
 0x39c   : > { %4072 = vst [vmem:[#allocation30_spill] sm:$0xff] %v3271_v32 }
 0x39f   : > { %1857 = vperm.xlu1 %2688, %v2620_v53  }
 0x3a3   : > { %1873 = vperm.xlu1 %2688, %v3064_v39   ;;  %v1410_v41 = vpop.permute.xlu1 %1409 }
 0x3a4   : > { %v1414_v57 = vrot.slane %v1410_v41, %v2824_v19  ;;  %v3279_v41 = vld [vmem:[%s2772_s17 + $0xb] sm:$0x1] }
 0x3a5   : > { %4074 = vst [vmem:[#allocation31_spill] sm:$0xff] %v3279_v41 }
 0x3a6   : > { %v1416_v14 = vmul.f32 %v3223_v18, %v1414_v57 }
 0x3a7   : > { %1889 = vperm.xlu1 %2688, %v3071_v25   ;;  %v1426_v45 = vpop.permute.xlu1 %1425 }
 0x3a8   : > { %v1430_v31 = vrot.slane %v1426_v45, %v2824_v19  ;;  %1418 = vrot.lane.b32.xlu0 %v1416_v14, %s2728_s22 }
 0x3aa   : > { %v1432_v53 = vmul.f32 %v3223_v18, %v1430_v31  ;;  %v3286_v31 = vld [vmem:[%s2772_s17 + $0xf] sm:$0x1] }
 0x3ab   : > { %v1442_v8 = vpop.permute.xlu1 %1441  ;;  %2689 = vset.pattern.permute.xlu1 %v4073_v60  ;;  %4075 = vst [vmem:[#allocation32_spill] sm:$0xff] %v3286_v31 }
 0x3ac   : > { %v1446_v39 = vrot.slane %v1442_v8, %v2824_v19  ;;  %1434 = vrot.lane.b32.xlu0 %v1432_v53, %s2728_s22  ;;  %1909 = vperm.xlu1 %2689, %v3271_v32  }
 0x3ae   : > { %v1448_v25 = vmul.f32 %v3223_v18, %v1446_v39 }
 0x3b0   : > { %1450 = vrot.lane.b32.xlu0 %v1448_v25, %s2728_s22  ;;  %v1458_v14 = vpop.permute.xlu1 %1457  ;;  %1933 = vperm.xlu1 %2689, %v3279_v41   ;;  %v4076_v25 = vmov 1  }
 0x3b1   : > { %v1462_v45 = vrot.slane %v1458_v14, %v2824_v19 }
 0x3b3   : > { %v1464_v57 = vmul.f32 %v3223_v18, %v1462_v45 }
 0x3b4   : > { %v1474_v8 = vpop.permute.xlu1 %1473  ;;  %1945 = vperm.xlu1 %2689, %v3286_v31  }
 0x3b5   : > { %v1478_v53 = vrot.slane %v1474_v8, %v2824_v19  ;;  %1466 = vrot.lane.b32.xlu0 %v1464_v57, %s2729_s23 }
 0x3b7   : > { %v1480_v39 = vmul.f32 %v3223_v18, %v1478_v53 }
 0x3b8   : > { %v1490_v60 = vpop.permute.xlu1 %1489  ;;  %2690 = vset.pattern.permute.xlu1 %v4076_v25 }
 0x3b9   : > { %v1494_v41 = vrot.slane %v1490_v60, %v2824_v19  ;;  %1482 = vrot.lane.b32.xlu0 %v1480_v39, %s2729_s23 }
 0x3bb   : > { %v1496_v14 = vmul.f32 %v3223_v18, %v1494_v41 }
 0x3bc   : > { %v1506_v37 = vpop.permute.xlu1 %1505 }
 0x3bd   : > { %v1510_v45 = vrot.slane %v1506_v37, %v2824_v19  ;;  %1498 = vrot.lane.b32.xlu0 %v1496_v14, %s2729_s23 }
 0x3bf   : > { %v1512_v8 = vmul.f32 %v3223_v18, %v1510_v45 }
 0x3c1   : > { %1514 = vrot.lane.b32.xlu0 %v1512_v8, %s2729_s23  ;;  %v1522_v57 = vpop.permute.xlu1 %1521 }
 0x3c2   : > { %v1526_v53 = vrot.slane %v1522_v57, %v2824_v19 }
 0x3c4   : > { %v1528_v25 = vmul.f32 %v3223_v18, %v1526_v53 }
 0x3c5   : > { %v1538_v31 = vpop.permute.xlu1 %1537 }
 0x3c6   : > { %v1542_v60 = vrot.slane %v1538_v31, %v2824_v19  ;;  %1530 = vrot.lane.b32.xlu0 %v1528_v25, %s2730_s24 }
 0x3c8   : > { %v1544_v41 = vmul.f32 %v3223_v18, %v1542_v60 }
 0x3c9   : > { %v1554_v39 = vpop.permute.xlu1 %1553 }
 0x3ca   : > { %v1558_v37 = vrot.slane %v1554_v39, %v2824_v19  ;;  %1546 = vrot.lane.b32.xlu0 %v1544_v41, %s2730_s24 }
 0x3cc   : > { %v1560_v14 = vmul.f32 %v3223_v18, %v1558_v37 }
 0x3cd   : > { %v1570_v45 = vpop.permute.xlu1 %1569 }
 0x3ce   : > { %v1574_v8 = vrot.slane %v1570_v45, %v2824_v19  ;;  %1562 = vrot.lane.b32.xlu0 %v1560_v14, %s2730_s24 }
 0x3d0   : > { %v1576_v57 = vmul.f32 %v3223_v18, %v1574_v8 }
 0x3d2   : > { %1578 = vrot.lane.b32.xlu0 %v1576_v57, %s2730_s24  ;;  %v1586_v31 = vpop.permute.xlu1 %1585 }
 0x3d3   : > { %v1590_v53 = vrot.slane %v1586_v31, %v2824_v19 }
 0x3d5   : > { %v1592_v25 = vmul.f32 %v3223_v18, %v1590_v53 }
 0x3d6   : > { %v1602_v60 = vpop.permute.xlu1 %1601 }
 0x3d7   : > { %v1606_v39 = vrot.slane %v1602_v60, %v2824_v19  ;;  %1594 = vrot.lane.b32.xlu0 %v1592_v25, %s2731_s25 }
 0x3d9   : > { %v1608_v41 = vmul.f32 %v3223_v18, %v1606_v39 }
 0x3da   : > { %v1618_v37 = vpop.permute.xlu1 %1617 }
 0x3db   : > { %v1622_v45 = vrot.slane %v1618_v37, %v2824_v19  ;;  %1610 = vrot.lane.b32.xlu0 %v1608_v41, %s2731_s25 }
 0x3dd   : > { %v1624_v14 = vmul.f32 %v3223_v18, %v1622_v45 }
 0x3de   : > { %v1634_v8 = vpop.permute.xlu1 %1633 }
 0x3df   : > { %v1638_v57 = vrot.slane %v1634_v8, %v2824_v19  ;;  %1626 = vrot.lane.b32.xlu0 %v1624_v14, %s2731_s25 }
 0x3e1   : > { %v1640_v31 = vmul.f32 %v3223_v18, %v1638_v57 }
 0x3e3   : > { %1642 = vrot.lane.b32.xlu0 %v1640_v31, %s2731_s25  ;;  %v1650_v53 = vpop.permute.xlu1 %1649 }
 0x3e4   : > { %v1654_v25 = vrot.slane %v1650_v53, %v2824_v19 }
 0x3e6   : > { %v1656_v60 = vmul.f32 %v3223_v18, %v1654_v25 }
 0x3e7   : > { %v1666_v39 = vpop.permute.xlu1 %1665 }
 0x3e8   : > { %v1670_v37 = vrot.slane %v1666_v39, %v2824_v19  ;;  %1658 = vrot.lane.b32.xlu0 %v1656_v60, %s2732_s26 }
 0x3ea   : > { %v1672_v41 = vmul.f32 %v3223_v18, %v1670_v37 }
 0x3eb   : > { %v1682_v45 = vpop.permute.xlu1 %1681 }
 0x3ec   : > { %v1686_v8 = vrot.slane %v1682_v45, %v2824_v19  ;;  %1674 = vrot.lane.b32.xlu0 %v1672_v41, %s2732_s26 }
 0x3ee   : > { %v1688_v14 = vmul.f32 %v3223_v18, %v1686_v8 }
 0x3ef   : > { %v1698_v57 = vpop.permute.xlu1 %1697 }
 0x3f0   : > { %v1702_v31 = vrot.slane %v1698_v57, %v2824_v19  ;;  %1690 = vrot.lane.b32.xlu0 %v1688_v14, %s2732_s26 }
 0x3f2   : > { %v1704_v53 = vmul.f32 %v3223_v18, %v1702_v31 }
 0x3f4   : > { %1706 = vrot.lane.b32.xlu0 %v1704_v53, %s2732_s26  ;;  %v1714_v25 = vpop.permute.xlu1 %1713 }
 0x3f5   : > { %v1718_v60 = vrot.slane %v1714_v25, %v2824_v19 }
 0x3f7   : > { %v1720_v39 = vmul.f32 %v3223_v18, %v1718_v60 }
 0x3f8   : > { %v1730_v37 = vpop.permute.xlu1 %1729 }
 0x3f9   : > { %v1734_v45 = vrot.slane %v1730_v37, %v2824_v19  ;;  %1722 = vrot.lane.b32.xlu0 %v1720_v39, %s2733_s27 }
 0x3fb   : > { %v1736_v41 = vmul.f32 %v3223_v18, %v1734_v45 }
 0x3fc   : > { %v1746_v8 = vpop.permute.xlu1 %1745 }
 0x3fd   : > { %v1750_v57 = vrot.slane %v1746_v8, %v2824_v19  ;;  %1738 = vrot.lane.b32.xlu0 %v1736_v41, %s2733_s27 }
 0x3ff   : > { %v1752_v14 = vmul.f32 %v3223_v18, %v1750_v57 }
 0x400   : > { %v1762_v31 = vpop.permute.xlu1 %1761 }
 0x401   : > { %v1766_v53 = vrot.slane %v1762_v31, %v2824_v19  ;;  %1754 = vrot.lane.b32.xlu0 %v1752_v14, %s2733_s27 }
 0x403   : > { %v1768_v25 = vmul.f32 %v3223_v18, %v1766_v53 }
 0x405   : > { %1770 = vrot.lane.b32.xlu0 %v1768_v25, %s2733_s27  ;;  %v1778_v60 = vpop.permute.xlu1 %1777 }
 0x406   : > { %v1782_v39 = vrot.slane %v1778_v60, %v2824_v19 }
 0x408   : > { %v1784_v37 = vmul.f32 %v3223_v18, %v1782_v39 }
 0x409   : > { %v1794_v45 = vpop.permute.xlu1 %1793 }
 0x40a   : > { %v1798_v8 = vrot.slane %v1794_v45, %v2824_v19  ;;  %1786 = vrot.lane.b32.xlu0 %v1784_v37, %s2734_s28 }
 0x40c   : > { %v1800_v41 = vmul.f32 %v3223_v18, %v1798_v8 }
 0x40d   : > { %v1810_v57 = vpop.permute.xlu1 %1809 }
 0x40e   : > { %v1814_v31 = vrot.slane %v1810_v57, %v2824_v19  ;;  %1802 = vrot.lane.b32.xlu0 %v1800_v41, %s2734_s28 }
 0x410   : > { %v1816_v14 = vmul.f32 %v3223_v18, %v1814_v31 }
 0x411   : > { %v1826_v53 = vpop.permute.xlu1 %1825 }
 0x412   : > { %v1830_v25 = vrot.slane %v1826_v53, %v2824_v19  ;;  %1818 = vrot.lane.b32.xlu0 %v1816_v14, %s2734_s28 }
 0x414   : > { %v1832_v60 = vmul.f32 %v3223_v18, %v1830_v25 }
 0x416   : > { %1834 = vrot.lane.b32.xlu0 %v1832_v60, %s2734_s28  ;;  %v1842_v39 = vpop.permute.xlu1 %1841 }
 0x417   : > { %v1846_v37 = vrot.slane %v1842_v39, %v2824_v19 }
 0x419   : > { %v1848_v45 = vmul.f32 %v3223_v18, %v1846_v37 }
 0x41a   : > { %v3363_v8 = vpop.permute.xlu0 %1418  ;;  %v1858_v57 = vpop.permute.xlu1 %1857 }
 0x41b   : > { %4077 = vst [vmem:[#allocation33_spill] sm:$0xff] %v3363_v8  ;;  %v1862_v41 = vrot.slane %v1858_v57, %v2824_v19  ;;  %1850 = vrot.lane.b32.xlu0 %v1848_v45, %s2735_s29 }
 0x41d   : > { %v1864_v31 = vmul.f32 %v3223_v18, %v1862_v41 }
 0x41e   : > { %v3368_v53 = vpop.permute.xlu0 %1434  ;;  %v1874_v14 = vpop.permute.xlu1 %1873 }
 0x41f   : > { %4078 = vst [vmem:[#allocation34_spill] sm:$0xff] %v3368_v53  ;;  %v1878_v25 = vrot.slane %v1874_v14, %v2824_v19  ;;  %1866 = vrot.lane.b32.xlu0 %v1864_v31, %s2735_s29 }
 0x421   : > { %v1880_v60 = vmul.f32 %v3223_v18, %v1878_v25 }
 0x422   : > { %v3373_v39 = vpop.permute.xlu0 %1450  ;;  %v1890_v37 = vpop.permute.xlu1 %1889 }
 0x423   : > { %4079 = vst [vmem:[#allocation35_spill] sm:$0xff] %v3373_v39  ;;  %v1894_v8 = vrot.slane %v1890_v37, %v2824_v19  ;;  %1882 = vrot.lane.b32.xlu0 %v1880_v60, %s2735_s29  ;;  %v272_v60 = vrot.slane %v3035_v2, 1 }
 0x425   : > { %v1896_v45 = vmul.f32 %v3223_v18, %v1894_v8  ;;  %v243_v8 = vrot.slane %v2806_v13, %v2824_v19  ;;  %v274_v13 = vsel %vm273_vm0, %v3035_v2, %v272_v60  ;;  %v386_v2 = vrot.slane %v2954_v34, 1 }
 0x426   : > { %v435_v60 = vrot.slane %v2960_v38, 1  ;;  %v516_v18 = vrot.slane %v2970_v43, 1 }
 0x427   : > { %v3378_v57 = vpop.permute.xlu0 %1466  ;;  %1898 = vrot.lane.b32.xlu0 %v1896_v45, %s2735_s29  ;;  %v256_v45 = vrot.slane %v2812_v17, %v2824_v19 }
 0x428   : > { %4080 = vst [vmem:[#allocation36_spill] sm:$0xff] %v3378_v57  ;;  %v3403_v57 = vld [vmem:[%s2822_s21] ss:$4 sm:$0x3] }
 0x429   : > { %4086 = vst [vmem:[#allocation42_spill] sm:$0xff] %v3403_v57 }
 0x42b   : > { %v3381_v41 = vpop.permute.xlu0 %1482  ;;  %1955 = vperm.xlu0 %2662, %v3271_v32   ;;  %v305_v32 = vrot.slane %v2936_v23, 1 }
 0x42c   : > { %4081 = vst [vmem:[#allocation37_spill] sm:$0xff] %v3381_v41  ;;  %v217_v41 = vrot.slane %v2809_v15, %v2824_v19  ;;  %v258_v15 = vmul.f32 %v3403_v57, %v256_v45 }
 0x42e   : > { %v219_v39 = vmul.f32 %v3403_v57, %v217_v41 }
 0x42f   : > { %v3384_v31 = vpop.permute.xlu0 %1498  ;;  %2693 = vset.pattern.permute.xlu0 %v4063_v4  ;;  %v321_v4 = vrot.slane %v2941_v27, 1 }
 0x430   : > { %4082 = vst [vmem:[#allocation38_spill] sm:$0xff] %v3384_v31  ;;  %v306_v31 = vsel %vm273_vm0, %v2936_v23, %v305_v32  ;;  %v276_v53 = vadd.f32 %v274_v13, %v219_v39  ;;  %v500_v23 = vrot.slane %v2968_v42, 1  ;;  %v387_v39 = vsel %vm338_vm1, %v2954_v34, %v386_v2 }
 0x431   : > { %v630_v34 = vrot.slane %v2984_v50, 1 }
 0x433   : > { %v3387_v14 = vpop.permute.xlu0 %1514 }
 0x434   : > { %4083 = vst [vmem:[#allocation39_spill] sm:$0xff] %v3387_v14  ;;  %v370_v14 = vrot.slane %v2952_v33, 1 }
 0x436   : > { %v371_v41 = vsel %vm338_vm1, %v2952_v33, %v370_v14  ;;  %v565_v33 = vrot.slane %v2976_v46, 1 }
 0x438   : > { %v3389_v25 = vpop.permute.xlu0 %1530 }
 0x439   : > { %4084 = vst [vmem:[#allocation40_spill] sm:$0xff] %v3389_v25  ;;  %v245_v25 = vmul.f32 %v3403_v57, %v243_v8  ;;  %v322_v8 = vsel %vm273_vm0, %v2941_v27, %v321_v4  ;;  %v402_v57 = vrot.slane %v2956_v36, 1 }
 0x43a   : > { %v324_v4 = vadd.f32 %v322_v8, %v258_v15  ;;  %v501_v15 = vsel %vm468_vm3, %v2968_v42, %v500_v23  ;;  %v566_v42 = vsel %vm533_vm4, %v2976_v46, %v565_v33  ;;  %v760_v46 = vrot.slane %v3000_v58, 1 }
 0x43b   : > { %v308_v27 = vadd.f32 %v306_v31, %v245_v25  ;;  %v532_v31 = vrot.slane %v2972_v44, 1  ;;  %v404_v25 = vsel %vm403_vm2, %v2956_v36, %v402_v57  ;;  %v597_v57 = vrot.slane %v2980_v48, 1 }
 0x43c   : > { %v3394_v37 = vpop.permute.xlu0 %1546  ;;  %v389_v8 = vadd.f32 %v387_v39, %v324_v4  ;;  %v662_v4 = vrot.slane %v2988_v52, 1 }
 0x43d   : > { %4085 = vst [vmem:[#allocation41_spill] sm:$0xff] %v3394_v37  ;;  %v337_v37 = vrot.slane %v2947_v30, 1  ;;  %v373_v13 = vadd.f32 %v371_v41, %v308_v27  ;;  %v695_v41 = vrot.slane %v2992_v54, 1  ;;  %v517_v27 = vsel %vm468_vm3, %v2970_v43, %v516_v18 }
 0x43e   : > { %v599_v18 = vsel %vm598_vm5, %v2980_v48, %v597_v57  ;;  %v761_v48 = vsel %vm728_vm7, %v3000_v58, %v760_v46  ;;  %v874_v58 = vrot.slane %v3153_v12, 1 }
 0x43f   : > { %v339_v45 = vsel %vm338_vm1, %v2947_v30, %v337_v37  ;;  %v436_v30 = vsel %vm403_vm2, %v2960_v38, %v435_v60  ;;  %v467_v37 = vrot.slane %v2964_v22, 1  ;;  %v814_v38 = vrot.slane %v3040_v16, %v2824_v19 }
 0x440   : > { %v3410_v17 = vpop.permute.xlu0 %1562  ;;  %v341_v14 = vadd.f32 %v339_v45, %v276_v53  ;;  %v438_v2 = vadd.f32 %v436_v30, %v373_v13  ;;  %v581_v60 = vrot.slane %v2978_v47, 1  ;;  %v696_v43 = vsel %vm663_vm6, %v2992_v54, %v695_v41 }
 0x441   : > { %4087 = vst [vmem:[#allocation43_spill] sm:$0xff] %v3410_v17  ;;  %v451_v17 = vrot.slane %v2962_v40, 1  ;;  %v469_v36 = vsel %vm468_vm3, %v2964_v22, %v467_v37  ;;  %v646_v22 = vrot.slane %v2986_v51, 1 }
 0x442   : > { %v406_v16 = vadd.f32 %v404_v25, %v341_v14  ;;  %v503_v23 = vadd.f32 %v501_v15, %v438_v2  ;;  %v582_v33 = vsel %vm533_vm4, %v2978_v47, %v581_v60  ;;  %v664_v47 = vsel %vm663_vm6, %v2988_v52, %v662_v4 }
 0x443   : > { %v452_v53 = vsel %vm403_vm2, %v2962_v40, %v451_v17  ;;  %v534_v40 = vsel %vm533_vm4, %v2972_v44, %v532_v31  ;;  %v631_v17 = vsel %vm598_vm5, %v2984_v50, %v630_v34  ;;  %v711_v44 = vrot.slane %v2994_v55, 1 }
 0x444   : > { %v3426_v32 = vpop.permute.xlu0 %1578  ;;  %v454_v39 = vadd.f32 %v452_v53, %v389_v8  ;;  %v471_v30 = vadd.f32 %v469_v36, %v406_v16  ;;  %v568_v37 = vadd.f32 %v566_v42, %v503_v23  ;;  %v727_v50 = vrot.slane %v2996_v56, 1 }
 0x445   : > { %v647_v15 = vsel %vm598_vm5, %v2986_v51, %v646_v22  ;;  %v776_v34 = vrot.slane %v3002_v59, 1  ;;  %v790_v53 = vrot.slane %v3037_v3, %v2824_v19  ;;  %v712_v36 = vsel %vm663_vm6, %v2994_v55, %v711_v44 }
 0x446   : > { %v519_v13 = vadd.f32 %v517_v27, %v454_v39  ;;  %v536_v31 = vadd.f32 %v534_v40, %v471_v30  ;;  %v633_v25 = vadd.f32 %v631_v17, %v568_v37  ;;  %v729_v51 = vsel %vm728_vm7, %v2996_v56, %v727_v50 }
 0x447   : > { %v816_v52 = vmul.f32 %v3006_v62, %v814_v38  ;;  %v826_v16 = vrot.slane %v3044_v20, %v2824_v19  ;;  %v777_v3 = vsel %vm728_vm7, %v3002_v59, %v776_v34  ;;  %v842_v23 = vrot.slane %v3047_v21, 1 }
 0x448   : > { %v584_v54 = vadd.f32 %v582_v33, %v519_v13  ;;  %v601_v8 = vadd.f32 %v599_v18, %v536_v31  ;;  %v698_v2 = vadd.f32 %v696_v43, %v633_v25  ;;  %v938_v55 = vrot.slane %v3169_v5, 1 }
 0x449   : > { %v3447_v45 = vpop.permute.xlu0 %1594  ;;  %v792_v56 = vmul.f32 %v3006_v62, %v790_v53  ;;  %v890_v38 = vrot.slane %v3158_v35, 1  ;;  %v875_v22 = vsel %vm273_vm0, %v3153_v12, %v874_v58  ;;  %v906_v20 = vrot.slane %v3163_v26, 1 }
 0x44a   : > { %v649_v42 = vadd.f32 %v647_v15, %v584_v54  ;;  %v666_v57 = vadd.f32 %v664_v47, %v601_v8  ;;  %v763_v41 = vadd.f32 %v761_v48, %v698_v2  ;;  %v1002_v4 = vrot.slane %v3177_v1, 1 }
 0x44b   : > { %v828_v39 = vmul.f32 %v3006_v62, %v826_v16  ;;  %v843_v30 = vsel %vm273_vm0, %v3047_v21, %v842_v23  ;;  %v939_v37 = vsel %vm338_vm1, %v3169_v5, %v938_v55  ;;  %v954_v33 = vrot.slane %v3171_v63, 1  ;;  %v4088_v16 = vld [vmem:[#allocation23_spill] sm:$0xff] }
 0x44c   : > { %v714_v27 = vadd.f32 %v712_v36, %v649_v42  ;;  %v731_v40 = vadd.f32 %v729_v51, %v666_v57  ;;  %v817_v59 = vadd.f32 %v816_v52, %v763_v41  ;;  %v1066_v18 = vrot.slane %v3185_v24, 1 }
 0x44d   : > { %v3466_v14 = vpop.permute.xlu0 %1610  ;;  %v891_v44 = vsel %vm273_vm0, %v3158_v35, %v890_v38  ;;  %v907_v50 = vsel %vm338_vm1, %v3163_v26, %v906_v20  ;;  %v1003_v62 = vsel %vm403_vm2, %v3177_v1, %v1002_v4  ;;  %v1018_v21 = vrot.slane %v3179_v61, 1  ;;  %v4090_v38 = vld [vmem:[#allocation16_spill] sm:$0xff] }
 0x44e   : > { %v779_v46 = vadd.f32 %v777_v3, %v714_v27  ;;  %v793_v43 = vadd.f32 %v792_v56, %v731_v40  ;;  %v877_v12 = vadd.f32 %v875_v22, %v817_v59  ;;  %v1130_v13 = vrot.slane %v3193_v7, 1  ;;  %v4091_v22 = vld [vmem:[#allocation20_spill] sm:$0xff] }
 0x44f   : > { %v970_v47 = vrot.slane %v3173_v29, 1  ;;  %v955_v35 = vsel %vm338_vm1, %v3171_v63, %v954_v33  ;;  %v1067_v26 = vsel %vm468_vm3, %v3185_v24, %v1066_v18  ;;  %v1082_v48 = vrot.slane %v3187_v10, 1  ;;  %v4093_v18 = vld [vmem:[#allocation24_spill] sm:$0xff] }
 0x450   : > { %v829_v31 = vadd.f32 %v828_v39, %v779_v46  ;;  %v845_v25 = vadd.f32 %v843_v30, %v793_v43  ;;  %v941_v15 = vadd.f32 %v939_v37, %v877_v12  ;;  %v1194_v1 = vrot.slane %v3201_v28, 1  ;;  %v4092_v37 = vld [vmem:[#allocation18_spill] sm:$0xff] }
 0x451   : > { %v3483_v60 = vpop.permute.xlu0 %1626  ;;  %v1034_v2 = vrot.slane %v3181_v0, 1  ;;  %v1019_v53 = vsel %vm403_vm2, %v3179_v61, %v1018_v21  ;;  %v1131_v36 = vsel %vm533_vm4, %v3193_v7, %v1130_v13  ;;  %v1146_v63 = vrot.slane %v3195_v6, 1  ;;  %v4095_v13 = vld [vmem:[#allocation21_spill] sm:$0xff] }
 0x452   : > { %v893_v34 = vadd.f32 %v891_v44, %v829_v31  ;;  %v909_v54 = vadd.f32 %v907_v50, %v845_v25  ;;  %v1005_v8 = vadd.f32 %v1003_v62, %v941_v15  ;;  %v1258_v51 = vrot.slane %v3209_v49, 1  ;;  %v4094_v50 = vld [vmem:[#allocation25_spill] sm:$0xff]  ;;  %v4096_v31 = vld [vmem:[#allocation34_spill] sm:$0xff] }
 0x453   : > { %v971_v58 = vsel %vm403_vm2, %v3173_v29, %v970_v47  ;;  %v1098_v57 = vrot.slane %v3189_v9, 1  ;;  %v1083_v41 = vsel %vm468_vm3, %v3187_v10, %v1082_v48  ;;  %v1195_v61 = vsel %vm598_vm5, %v3201_v28, %v1194_v1  ;;  %v4089_v29 = vld [vmem:[#allocation27_spill] sm:$0xff]  ;;  %v4097_v48 = vld [vmem:[#allocation28_spill] sm:$0xff] }
 0x454   : > { %v957_v52 = vadd.f32 %v955_v35, %v893_v34  ;;  %v1069_v42 = vadd.f32 %v1067_v26, %v1005_v8  ;;  %v1210_v7 = vrot.slane %v3203_v11, 1  ;;  %v1322_v3 = vrot.slane %v4088_v16, 1  ;;  %v4098_v8 = vld [vmem:[#allocation38_spill] sm:$0xff] }
 0x455   : > { %v3499_v17 = vpop.permute.xlu0 %1642  ;;  %v1035_v55 = vsel %vm468_vm3, %v3181_v0, %v1034_v2  ;;  %v1376_v40 = vrot.slane %v4089_v29, %v2824_v19  ;;  %v1147_v56 = vsel %vm533_vm4, %v3195_v6, %v1146_v63  ;;  %v1162_v10 = vrot.slane %v4090_v38, 1  ;;  %v4099_v63 = vld [vmem:[#allocation26_spill] sm:$0xff]  ;;  %v4102_v29 = vld [vmem:[#allocation39_spill] sm:$0xff] }
 0x456   : > { %v1021_v23 = vadd.f32 %v1019_v53, %v957_v52  ;;  %v1133_v27 = vadd.f32 %v1131_v36, %v1069_v42  ;;  %v1259_v28 = vsel %vm663_vm6, %v3209_v49, %v1258_v51  ;;  %v1274_v20 = vrot.slane %v4091_v22, 1  ;;  %v4100_v42 = vld [vmem:[#allocation35_spill] sm:$0xff] }
 0x457   : > { %v973_v59 = vadd.f32 %v971_v58, %v909_v54  ;;  %v1099_v0 = vsel %vm533_vm4, %v3189_v9, %v1098_v57  ;;  %v1211_v30 = vsel %vm598_vm5, %v3203_v11, %v1210_v7  ;;  %v1226_v33 = vrot.slane %v4092_v37, 1 }
 0x458   : > { %v1085_v46 = vadd.f32 %v1083_v41, %v1021_v23  ;;  %v1197_v39 = vadd.f32 %v1195_v61, %v1133_v27  ;;  %v1323_v6 = vsel %vm728_vm7, %v4088_v16, %v1322_v3  ;;  %v1338_v43 = vrot.slane %v4093_v18, 1  ;;  %v4101_v41 = vld [vmem:[#allocation43_spill] sm:$0xff] }
 0x459   : > { %v1037_v49 = vadd.f32 %v1035_v55, %v973_v59  ;;  %v1378_v62 = vmul.f32 %v4094_v50, %v1376_v40  ;;  %v1163_v21 = vsel %vm598_vm5, %v4090_v38, %v1162_v10  ;;  %v1275_v9 = vsel %vm663_vm6, %v4091_v22, %v1274_v20 }
 0x45a   : > { %v3520_v5 = vpop.permute.xlu0 %1658  ;;  %v1149_v12 = vadd.f32 %v1147_v56, %v1085_v46  ;;  %v1261_v44 = vadd.f32 %v1259_v28, %v1197_v39  ;;  %v1290_v11 = vrot.slane %v4095_v13, 1  ;;  %v1436_v25 = vrot.slane %v4096_v31, 1  ;;  %v4103_v28 = vld [vmem:[#allocation29_spill] sm:$0xff] }
 0x45b   : > { %v1101_v47 = vadd.f32 %v1099_v0, %v1037_v49  ;;  %v1388_v1 = vrot.slane %v4097_v48, %v2824_v19  ;;  %v1227_v34 = vsel %vm663_vm6, %v4092_v37, %v1226_v33  ;;  %v1339_v54 = vsel %vm728_vm7, %v4093_v18, %v1338_v43  ;;  %v4104_v37 = vld [vmem:[#allocation36_spill] sm:$0xff] }
 0x45c   : > { %v1213_v35 = vadd.f32 %v1211_v30, %v1149_v12  ;;  %v1325_v26 = vadd.f32 %v1323_v6, %v1261_v44  ;;  %v1500_v2 = vrot.slane %v4098_v8, 1  ;;  %v1352_v51 = vrot.slane %v4099_v63, %v2824_v19 }
 0x45d   : > { %v1165_v53 = vadd.f32 %v1163_v21, %v1101_v47  ;;  %v1291_v52 = vsel %vm728_vm7, %v4095_v13, %v1290_v11  ;;  %v1437_v58 = vsel %vm273_vm0, %v4096_v31, %v1436_v25  ;;  %v1452_v57 = vrot.slane %v4100_v42, 1 }
 0x45e   : > { %v3536_v24 = vpop.permute.xlu0 %1674  ;;  %v1277_v36 = vadd.f32 %v1275_v9, %v1213_v35  ;;  %v1564_v61 = vrot.slane %v4101_v41, 1  ;;  %v1379_v16 = vadd.f32 %v1378_v62, %v1325_v26  ;;  %v1390_v23 = vmul.f32 %v4094_v50, %v1388_v1  ;;  %v4105_v62 = vld [vmem:[#allocation40_spill] sm:$0xff] }
 0x45f   : > { %v1229_v7 = vadd.f32 %v1227_v34, %v1165_v53  ;;  %v1501_v27 = vsel %vm338_vm1, %v4098_v8, %v1500_v2  ;;  %v1516_v40 = vrot.slane %v4102_v29, 1  ;;  %v1628_v56 = vrot.slane %v3483_v60, 1 }
 0x460   : > { %v1341_v3 = vadd.f32 %v1339_v54, %v1277_v36  ;;  %v1354_v10 = vmul.f32 %v4094_v50, %v1352_v51  ;;  %v1404_v22 = vrot.slane %v4103_v28, 1  ;;  %v1439_v20 = vadd.f32 %v1437_v58, %v1379_v16 }
 0x461   : > { %v1293_v38 = vadd.f32 %v1291_v52, %v1229_v7  ;;  %v1453_v59 = vsel %vm273_vm0, %v4100_v42, %v1452_v57  ;;  %v1565_v46 = vsel %vm403_vm2, %v4101_v41, %v1564_v61  ;;  %v1580_v0 = vrot.slane %v3426_v32, 1 }
 0x462   : > { %v1691_v4 = vpop.permute.xlu0 %1690  ;;  %v1391_v30 = vadd.f32 %v1390_v23, %v1341_v3  ;;  %v1468_v33 = vrot.slane %v4104_v37, 1  ;;  %v1503_v6 = vadd.f32 %v1501_v27, %v1439_v20  ;;  %v1517_v43 = vsel %vm338_vm1, %v4102_v29, %v1516_v40 }
 0x463   : > { %v1692_v39 = vrot.slane %v1691_v4, 1  ;;  %v1629_v49 = vsel %vm468_vm3, %v3483_v60, %v1628_v56  ;;  %v1644_v12 = vrot.slane %v3499_v17, 1  ;;  %v1405_v44 = vsel %vm273_vm0, %v4103_v28, %v1404_v22 }
 0x464   : > { %v1455_v50 = vadd.f32 %v1453_v59, %v1391_v30  ;;  %v1532_v21 = vrot.slane %v4105_v62, 1  ;;  %v1567_v9 = vadd.f32 %v1565_v46, %v1503_v6  ;;  %v1355_v13 = vadd.f32 %v1354_v10, %v1293_v38  ;;  %v1910_v46 = vpop.permute.xlu1 %1909  ;;  %v3636_v30 = vld [vmem:[%s2822_s21 + $0x3] ss:$4 sm:$0x3] }
 0x465   : > { %v1581_v11 = vsel %vm403_vm2, %v3426_v32, %v1580_v0  ;;  %v1693_v31 = vsel %vm533_vm4, %v1691_v4, %v1692_v39  ;;  %v1469_v47 = vsel %vm338_vm1, %v4104_v37, %v1468_v33  ;;  %v1596_v35 = vrot.slane %v3447_v45, 1 }
 0x466   : > { %v1707_v15 = vpop.permute.xlu0 %1706  ;;  %v1519_v60 = vadd.f32 %v1517_v43, %v1455_v50  ;;  %v1631_v26 = vadd.f32 %v1629_v49, %v1567_v9  ;;  %v1407_v1 = vadd.f32 %v1405_v44, %v1355_v13  ;;  %v1645_v34 = vsel %vm468_vm3, %v3499_v17, %v1644_v12 }
 0x467   : > { %v1708_v25 = vrot.slane %v1707_v15, 1  ;;  %v1533_v8 = vsel %vm403_vm2, %v4105_v62, %v1532_v21  ;;  %v1660_v4 = vrot.slane %v3520_v5, 1  ;;  %v1597_v51 = vsel %vm468_vm3, %v3447_v45, %v1596_v35 }
 0x468   : > { %v1583_v32 = vadd.f32 %v1581_v11, %v1519_v60  ;;  %v1695_v2 = vadd.f32 %v1693_v31, %v1631_v26  ;;  %v1471_v53 = vadd.f32 %v1469_v47, %v1407_v1  ;;  %v1914_v39 = vrot.slane %v1910_v46, %v2824_v19  ;;  %v1934_v12 = vpop.permute.xlu1 %1933 }
 0x469   : > { %v1709_v36 = vsel %vm533_vm4, %v1707_v15, %v1708_v25  ;;  %v1661_v61 = vsel %vm533_vm4, %v3520_v5, %v1660_v4  ;;  %v1938_v21 = vrot.slane %v1934_v12, %v2824_v19  ;;  %v4107_v4 = vld [vmem:[#allocation32_spill] sm:$0xff] }
 0x46a   : > { %v1647_v52 = vadd.f32 %v1645_v34, %v1583_v32  ;;  %v1535_v57 = vadd.f32 %v1533_v8, %v1471_v53  ;;  %v1916_v43 = vmul.f32 %v3636_v30, %v1914_v39  ;;  %v3654_v8 = vld [vmem:[%s2772_s17 + $0x7] sm:$0x1]  ;;  %v4106_v32 = vld [vmem:[#allocation31_spill] sm:$0xff] }
 0x46b   : > { %v1723_v55 = vpop.permute.xlu0 %1722  ;;  %v1940_v11 = vmul.f32 %v3636_v30, %v1938_v21  ;;  %v4109_v53 = vld [vmem:[#allocation30_spill] sm:$0xff] }
 0x46c   : > { %v1724_v58 = vrot.slane %v1723_v55, 1  ;;  %v1711_v7 = vadd.f32 %v1709_v36, %v1647_v52  ;;  %v1599_v16 = vadd.f32 %v1597_v51, %v1535_v57  ;;  %v4110_v36 = vmov 3   ;;  %v3687_v57 = vpop.permute.xlu1 %1945 }
 0x46d   : > { %v4112_v51 = vmov 5   ;;  %v4113_v52 = vmov 6  }
 0x46e   : > { %v1725_v15 = vsel %vm598_vm5, %v1723_v55, %v1724_v58  ;;  %v1663_v27 = vadd.f32 %v1661_v61, %v1599_v16  ;;  %v4114_v58 = vmov 7  }
 0x46f   : > { %v3600_v18 = vpop.permute.xlu0 %1738 }
 0x470   : > { %v1727_v40 = vadd.f32 %v1725_v15, %v1663_v27 }
 0x473   : > { %v1755_v48 = vpop.permute.xlu0 %1754 }
 0x474   : > { %v1756_v54 = vrot.slane %v1755_v48, 1 }
 0x476   : > { %v1757_v63 = vsel %vm598_vm5, %v1755_v48, %v1756_v54 }
 0x477   : > { %v1759_v42 = vadd.f32 %v1757_v63, %v1695_v2  ;;  %v1771_v17 = vpop.permute.xlu0 %1770  ;;  %v4108_v2 = vmov 2   ;;  %v4111_v63 = vmov 4  }
 0x478   : > { %v1772_v41 = vrot.slane %v1771_v17, 1 }
 0x47a   : > { %v1773_v3 = vsel %vm598_vm5, %v1771_v17, %v1772_v41  ;;  %v4116_v17 = vmov 0  }
 0x47b   : > { %v1775_v23 = vadd.f32 %v1773_v3, %v1711_v7 }
 0x47c   : > { %v1787_v29 = vpop.permute.xlu0 %1786 }
 0x47d   : > { %v1788_v45 = vrot.slane %v1787_v29, 1 }
 0x47f   : > { %v1789_v56 = vsel %vm663_vm6, %v1787_v29, %v1788_v45 }
 0x480   : > { %v1791_v38 = vadd.f32 %v1789_v56, %v1727_v40  ;;  %v3630_v10 = vpop.permute.xlu0 %1802 }
 0x484   : > { %v1819_v28 = vpop.permute.xlu0 %1818 }
 0x485   : > { %v1820_v22 = vrot.slane %v1819_v28, 1 }
 0x487   : > { %v1821_v5 = vsel %vm663_vm6, %v1819_v28, %v1820_v22 }
 0x488   : > { %v1823_v20 = vadd.f32 %v1821_v5, %v1759_v42  ;;  %v1835_v59 = vpop.permute.xlu0 %1834  ;;  %v4115_v42 = vmov 8  }
 0x489   : > { %v1836_v0 = vrot.slane %v1835_v59, 1 }
 0x48b   : > { %v1837_v55 = vsel %vm663_vm6, %v1835_v59, %v1836_v0 }
 0x48c   : > { %v1839_v37 = vadd.f32 %v1837_v55, %v1775_v23 }
 0x48d   : > { %v1851_v33 = vpop.permute.xlu0 %1850 }
 0x48e   : > { %v1852_v6 = vrot.slane %v1851_v33, 1 }
 0x490   : > { %v1853_v49 = vsel %vm728_vm7, %v1851_v33, %v1852_v6 }
 0x491   : > { %v1855_v44 = vadd.f32 %v1853_v49, %v1791_v38  ;;  %v3640_v50 = vpop.permute.xlu0 %1866 }
 0x493   : > { %v1917_v62 = vadd.f32 %v1916_v43, %v1855_v44 }
 0x495   : > { %v1883_v9 = vpop.permute.xlu0 %1882 }
 0x496   : > { %v1884_v13 = vrot.slane %v1883_v9, 1 }
 0x498   : > { %v1885_v31 = vsel %vm728_vm7, %v1883_v9, %v1884_v13 }
 0x499   : > { %v1887_v25 = vadd.f32 %v1885_v31, %v1823_v20  ;;  %v1899_v47 = vpop.permute.xlu0 %1898 }
 0x49a   : > { %v1900_v60 = vrot.slane %v1899_v47, 1 }
 0x49b   : > { %v3645_v35 = vadd.f32 %v1940_v11, %v1887_v25 }
 0x49c   : > { %v1901_v26 = vsel %vm728_vm7, %v1899_v47, %v1900_v60 }
 0x49d   : > { %v3648_v48 = vadd.f32 %v1901_v26, %v1839_v37 }
 0x4a6   : > { %v1956_v1 = vpop.permute.xlu0 %1955 }
 0x4a7   : > { %v1960_v34 = vrot.slane %v1956_v1, %v2824_v19 }
 0x4a9   : > { %v1962_v54 = vmul.f32 %v3636_v30, %v1960_v34  ;;  %v2706_v34 = vld [vmem:[%s2772_s17 + $0x3] sm:$0x1] }
 0x4ab   : > { %1964 = vrot.lane.b32.xlu1 %v1962_v54, %s2728_s22  ;;  %v2707_v54 = vld [vmem:[%s2772_s17 + $0x5] sm:$0x1] }
 0x4af   : > { %1971 = vperm.xlu1 %2690, %v3654_v8  }
 0x4b3   : > { %1987 = vperm.xlu1 %2690, %v4106_v32  }
 0x4b7   : > { %2003 = vperm.xlu1 %2690, %v4107_v4  }
 0x4bb   : > { %2691 = vset.pattern.permute.xlu1 %v4108_v2 }
 0x4bc   : > { %2019 = vperm.xlu1 %2691, %v4109_v53  }
 0x4c0   : > { %2035 = vperm.xlu1 %2691, %v3654_v8  }
 0x4c4   : > { %2051 = vperm.xlu1 %2691, %v4106_v32  }
 0x4c8   : > { %2067 = vperm.xlu1 %2691, %v4107_v4  }
 0x4cc   : > { %2692 = vset.pattern.permute.xlu1 %v4110_v36 }
 0x4cd   : > { %2083 = vperm.xlu1 %2692, %v4109_v53  }
 0x4d1   : > { %2099 = vperm.xlu1 %2692, %v3654_v8  }
 0x4d5   : > { %2115 = vperm.xlu1 %2692, %v4106_v32  }
 0x4d9   : > { %2131 = vperm.xlu1 %2692, %v4107_v4  }
 0x4dd   : > { %2694 = vset.pattern.permute.xlu1 %v4111_v63 }
 0x4de   : > { %2163 = vperm.xlu1 %2694, %v3654_v8  }
 0x4e2   : > { %2179 = vperm.xlu1 %2694, %v4106_v32  }
 0x4e6   : > { %2695 = vset.pattern.permute.xlu1 %v4112_v51 }
 0x4e7   : > { %2211 = vperm.xlu1 %2695, %v4109_v53  }
 0x4eb   : > { %2243 = vperm.xlu1 %2695, %v4106_v32  }
 0x4ef   : > { %2259 = vperm.xlu1 %2695, %v4107_v4  }
 0x4f3   : > { %2698 = vset.pattern.permute.xlu1 %v4113_v52 }
 0x4f4   : > { %2291 = vperm.xlu1 %2698, %v3654_v8  }
 0x4f8   : > { %2307 = vperm.xlu1 %2698, %v4106_v32  }
 0x4fc   : > { %2699 = vset.pattern.permute.xlu1 %v4114_v58 }
 0x4fd   : > { %2339 = vperm.xlu1 %2699, %v4109_v53  }
 0x501   : > { %2371 = vperm.xlu1 %2699, %v4106_v32  }
 0x505   : > { %2387 = vperm.xlu1 %2699, %v4107_v4  }
 0x509   : > { %2702 = vset.pattern.permute.xlu1 %v4115_v42 }
 0x50a   : > { %2419 = vperm.xlu1 %2702, %v3654_v8  }
 0x50e   : > { %2435 = vperm.xlu1 %2702, %v4106_v32   ;;  %v2708_v32 = vld [vmem:[%s2772_s17 + $0x6] sm:$0x1] }
 0x512   : > { %2704 = vset.pattern.permute.xlu1 %v4116_v17 }
 0x51d   : > { %v1965_v41 = vpop.permute.xlu1 %1964 }
 0x51e   : > { %v1966_v61 = vrot.slane %v1965_v41, 1 }
 0x520   : > { %v1967_v7 = vsel %vm273_vm0, %v1965_v41, %v1966_v61 }
 0x521   : > { %v3690_v16 = vadd.f32 %v1967_v7, %v1917_v62 }
 0x52a   : > { %v1972_v3 = vpop.permute.xlu1 %1971 }
 0x52b   : > { %v1976_v15 = vrot.slane %v1972_v3, %v2824_v19 }
 0x52d   : > { %v1978_v23 = vmul.f32 %v3636_v30, %v1976_v15 }
 0x52e   : > { %v1988_v27 = vpop.permute.xlu1 %1987 }
 0x52f   : > { %v1992_v29 = vrot.slane %v1988_v27, %v2824_v19  ;;  %1980 = vrot.lane.b32.xlu0 %v1978_v23, %s2728_s22 }
 0x531   : > { %v1994_v45 = vmul.f32 %v3636_v30, %v1992_v29 }
 0x532   : > { %v2004_v40 = vpop.permute.xlu1 %2003 }
 0x533   : > { %v2008_v56 = vrot.slane %v2004_v40, %v2824_v19  ;;  %1996 = vrot.lane.b32.xlu0 %v1994_v45, %s2728_s22 }
 0x535   : > { %v2010_v38 = vmul.f32 %v3636_v30, %v2008_v56 }
 0x537   : > { %2012 = vrot.lane.b32.xlu0 %v2010_v38, %s2728_s22  ;;  %v2020_v28 = vpop.permute.xlu1 %2019 }
 0x538   : > { %v2024_v22 = vrot.slane %v2020_v28, %v2824_v19 }
 0x53a   : > { %v2026_v5 = vmul.f32 %v3636_v30, %v2024_v22 }
 0x53b   : > { %v2036_v20 = vpop.permute.xlu1 %2035 }
 0x53c   : > { %v2040_v59 = vrot.slane %v2036_v20, %v2824_v19  ;;  %2028 = vrot.lane.b32.xlu0 %v2026_v5, %s2729_s23 }
 0x53e   : > { %v2042_v46 = vmul.f32 %v3636_v30, %v2040_v59 }
 0x53f   : > { %v2052_v0 = vpop.permute.xlu1 %2051 }
 0x540   : > { %v2056_v55 = vrot.slane %v2052_v0, %v2824_v19  ;;  %2044 = vrot.lane.b32.xlu0 %v2042_v46, %s2729_s23 }
 0x542   : > { %v2058_v39 = vmul.f32 %v3636_v30, %v2056_v55 }
 0x543   : > { %v2068_v37 = vpop.permute.xlu1 %2067 }
 0x544   : > { %v2072_v33 = vrot.slane %v2068_v37, %v2824_v19  ;;  %2060 = vrot.lane.b32.xlu0 %v2058_v39, %s2729_s23 }
 0x546   : > { %v2074_v6 = vmul.f32 %v3636_v30, %v2072_v33 }
 0x548   : > { %2076 = vrot.lane.b32.xlu0 %v2074_v6, %s2729_s23  ;;  %v2084_v43 = vpop.permute.xlu1 %2083 }
 0x549   : > { %v2088_v49 = vrot.slane %v2084_v43, %v2824_v19 }
 0x54b   : > { %v2090_v12 = vmul.f32 %v3636_v30, %v2088_v49 }
 0x54c   : > { %v2100_v44 = vpop.permute.xlu1 %2099 }
 0x54d   : > { %v2104_v62 = vrot.slane %v2100_v44, %v2824_v19  ;;  %2092 = vrot.lane.b32.xlu0 %v2090_v12, %s2730_s24 }
 0x54f   : > { %v2106_v21 = vmul.f32 %v3636_v30, %v2104_v62 }
 0x550   : > { %v2116_v9 = vpop.permute.xlu1 %2115 }
 0x551   : > { %v2120_v13 = vrot.slane %v2116_v9, %v2824_v19  ;;  %2108 = vrot.lane.b32.xlu0 %v2106_v21, %s2730_s24 }
 0x553   : > { %v2122_v11 = vmul.f32 %v3636_v30, %v2120_v13 }
 0x554   : > { %v2132_v31 = vpop.permute.xlu1 %2131 }
 0x555   : > { %v2136_v25 = vrot.slane %v2132_v31, %v2824_v19  ;;  %2124 = vrot.lane.b32.xlu0 %v2122_v11, %s2730_s24 }
 0x557   : > { %v2138_v47 = vmul.f32 %v3636_v30, %v2136_v25 }
 0x559   : > { %2147 = vperm.xlu0 %2693, %v4109_v53   ;;  %2140 = vrot.lane.b32.xlu1 %v2138_v47, %s2730_s24  ;;  %v2164_v60 = vpop.permute.xlu1 %2163 }
 0x55a   : > { %v2168_v26 = vrot.slane %v2164_v60, %v2824_v19 }
 0x55c   : > { %v2170_v1 = vmul.f32 %v3636_v30, %v2168_v26 }
 0x55d   : > { %2195 = vperm.xlu0 %2693, %v4107_v4   ;;  %v2180_v38 = vpop.permute.xlu1 %2179 }
 0x55e   : > { %2172 = vrot.lane.b32.xlu1 %v2170_v1, %s2731_s25  ;;  %v2184_v49 = vrot.slane %v2180_v38, %v2824_v19 }
 0x560   : > { %v2186_v9 = vmul.f32 %v3636_v30, %v2184_v49 }
 0x561   : > { %2696 = vset.pattern.permute.xlu0 %v4112_v51 }
 0x562   : > { %2227 = vperm.xlu0 %2696, %v3654_v8   ;;  %v2212_v59 = vpop.permute.xlu1 %2211 }
 0x563   : > { %v2216_v13 = vrot.slane %v2212_v59, %v2824_v19 }
 0x565   : > { %v2218_v60 = vmul.f32 %v3636_v30, %v2216_v13 }
 0x566   : > { %2697 = vset.pattern.permute.xlu0 %v4113_v52  ;;  %v2244_v39 = vpop.permute.xlu1 %2243 }
 0x567   : > { %2275 = vperm.xlu0 %2697, %v4109_v53   ;;  %v1950_v53 = vrot.slane %v3687_v57, %v2824_v19  ;;  %v2248_v26 = vrot.slane %v2244_v39, %v2824_v19 }
 0x569   : > { %v1952_v51 = vmul.f32 %v3636_v30, %v1950_v53 }
 0x56a   : > { %v2260_v33 = vpop.permute.xlu1 %2259 }
 0x56b   : > { %2323 = vperm.xlu0 %2697, %v4107_v4   ;;  %v2264_v1 = vrot.slane %v2260_v33, %v2824_v19 }
 0x56f   : > { %2700 = vset.pattern.permute.xlu0 %v4114_v58  ;;  %v2292_v12 = vpop.permute.xlu1 %2291 }
 0x570   : > { %2355 = vperm.xlu0 %2700, %v3654_v8  }
 0x573   : > { %v2308_v31 = vpop.permute.xlu1 %2307 }
 0x574   : > { %2701 = vset.pattern.permute.xlu0 %v4115_v42 }
 0x575   : > { %2403 = vperm.xlu0 %2701, %v2706_v34  }
 0x578   : > { %v2340_v53 = vpop.permute.xlu1 %2339 }
 0x579   : > { %2451 = vperm.xlu0 %2701, %v4107_v4   ;;  %v2344_v38 = vrot.slane %v2340_v53, %v2824_v19 }
 0x57b   : > { %v2346_v49 = vmul.f32 %v3636_v30, %v2344_v38  ;;  %v4128_v38 = vld [vmem:[#allocation12_spill] sm:$0xff] }
 0x57d   : > { %2703 = vset.pattern.permute.xlu0 %v4116_v17  ;;  %v1953_v17 = vadd.f32 %v1952_v51, %v3648_v48  ;;  %v2296_v51 = vrot.slane %v2292_v12, %v2824_v19 }
 0x57e   : > { %797 = vperm.xlu0 %2703, %v2707_v54  }
 0x582   : > { %1359 = vperm.xlu0 %2703, %v2708_v32   ;;  %v2250_v32 = vmul.f32 %v3636_v30, %v2248_v26 }
 0x586   : > { %1921 = vperm.xlu0 %2703, %v3654_v8  }
 0x5a1   : > { %v3744_v2 = vpop.permute.xlu0 %1980 }
 0x5a5   : > { %v1997_v36 = vpop.permute.xlu0 %1996 }
 0x5a6   : > { %v1998_v63 = vrot.slane %v1997_v36, 1 }
 0x5a8   : > { %v1999_v52 = vsel %vm273_vm0, %v1997_v36, %v1998_v63  ;;  %v2266_v63 = vmul.f32 %v3636_v30, %v2264_v1 }
 0x5a9   : > { %v2001_v4 = vadd.f32 %v1999_v52, %v3645_v35  ;;  %v2013_v58 = vpop.permute.xlu0 %2012 }
 0x5aa   : > { %v2014_v42 = vrot.slane %v2013_v58, 1 }
 0x5ac   : > { %v2015_v41 = vsel %vm273_vm0, %v2013_v58, %v2014_v42 }
 0x5ad   : > { %v2017_v8 = vadd.f32 %v2015_v41, %v1953_v17  ;;  %v4118_v17 = vld [vmem:[#allocation3_spill] sm:$0xff] }
 0x5ae   : > { %v2029_v61 = vpop.permute.xlu0 %2028  ;;  %v289_v41 = vrot.slane %v4118_v17, 1 }
 0x5af   : > { %v2030_v7 = vrot.slane %v2029_v61, 1 }
 0x5b1   : > { %v2031_v3 = vsel %vm338_vm1, %v2029_v61, %v2030_v7  ;;  %v2298_v61 = vmul.f32 %v3636_v30, %v2296_v51 }
 0x5b2   : > { %v2033_v57 = vadd.f32 %v2031_v3, %v3690_v16  ;;  %v3755_v15 = vpop.permute.xlu0 %2044  ;;  %v4119_v3 = vld [vmem:[#allocation4_spill] sm:$0xff] }
 0x5b6   : > { %v2061_v23 = vpop.permute.xlu0 %2060 }
 0x5b7   : > { %v2062_v27 = vrot.slane %v2061_v23, 1 }
 0x5b9   : > { %v2063_v29 = vsel %vm338_vm1, %v2061_v23, %v2062_v27  ;;  %v2372_v23 = vpop.permute.xlu1 %2371  ;;  %v4120_v27 = vld [vmem:[#allocation42_spill] sm:$0xff] }
 0x5ba   : > { %v2065_v35 = vadd.f32 %v2063_v29, %v2001_v4  ;;  %v2077_v45 = vpop.permute.xlu0 %2076  ;;  %v4117_v4 = vld [vmem:[#allocation2_spill] sm:$0xff]  ;;  %v2376_v12 = vrot.slane %v2372_v23, %v2824_v19 }
 0x5bb   : > { %v2078_v40 = vrot.slane %v2077_v45, 1  ;;  %v230_v58 = vrot.slane %v4117_v4, %v2824_v19  ;;  %v2508_v23 = vld [vmem:[%s202_s6 + $0x3] sm:$0x1] }
 0x5bc   : > { %v2378_v1 = vmul.f32 %v3636_v30, %v2376_v12  ;;  %v4130_v12 = vld [vmem:[#allocation14_spill] sm:$0xff] }
 0x5bd   : > { %v2079_v48 = vsel %vm338_vm1, %v2077_v45, %v2078_v40  ;;  %v232_v29 = vmul.f32 %v4120_v27, %v230_v58  ;;  %v4121_v45 = vld [vmem:[#allocation5_spill] sm:$0xff]  ;;  %v4127_v27 = vld [vmem:[#allocation11_spill] sm:$0xff] }
 0x5be   : > { %v3759_v56 = vadd.f32 %v2079_v48, %v2017_v8  ;;  %v2312_v8 = vrot.slane %v2308_v31, %v2824_v19  ;;  %v419_v40 = vrot.slane %v4121_v45, 1 }
 0x5bf   : > { %v2093_v28 = vpop.permute.xlu0 %2092 }
 0x5c0   : > { %v2094_v22 = vrot.slane %v2093_v28, 1  ;;  %v2314_v48 = vmul.f32 %v3636_v30, %v2312_v8  ;;  %v420_v33 = vsel %vm403_vm2, %v4121_v45, %v419_v40  ;;  %v2709_v40 = vld [vmem:[%s2822_s21 + $0x1] ss:$4 sm:$0x3] }
 0x5c2   : > { %v2095_v5 = vsel %vm403_vm2, %v2093_v28, %v2094_v22 }
 0x5c3   : > { %v3762_v20 = vadd.f32 %v2095_v5, %v2033_v57  ;;  %v3764_v16 = vpop.permute.xlu0 %2108  ;;  %v354_v57 = vrot.slane %v4119_v3, 1 }
 0x5c5   : > { %v355_v59 = vsel %vm338_vm1, %v4119_v3, %v354_v57 }
 0x5c7   : > { %v2125_v46 = vpop.permute.xlu0 %2124 }
 0x5c8   : > { %v2126_v0 = vrot.slane %v2125_v46, 1 }
 0x5ca   : > { %v2127_v55 = vsel %vm403_vm2, %v2125_v46, %v2126_v0  ;;  %v4122_v46 = vld [vmem:[#allocation6_spill] sm:$0xff] }
 0x5cb   : > { %v3767_v37 = vadd.f32 %v2127_v55, %v2065_v35  ;;  %v290_v35 = vsel %vm273_vm0, %v4118_v17, %v289_v41  ;;  %v484_v0 = vrot.slane %v4122_v46, 1 }
 0x5cc   : > { %v292_v55 = vadd.f32 %v290_v35, %v232_v29  ;;  %v858_v29 = vrot.slane %v4127_v27, 1  ;;  %v2495_v35 = vld [vmem:[%s202_s6 + $0x2] sm:$0x1] }
 0x5cd   : > { %v485_v13 = vsel %vm468_vm3, %v4122_v46, %v484_v0 }
 0x5d4   : > { %v2148_v6 = vpop.permute.xlu0 %2147 }
 0x5d5   : > { %v2152_v43 = vrot.slane %v2148_v6, %v2824_v19  ;;  %v4123_v6 = vld [vmem:[#allocation7_spill] sm:$0xff] }
 0x5d7   : > { %v2154_v44 = vmul.f32 %v3636_v30, %v2152_v43  ;;  %v549_v43 = vrot.slane %v4123_v6, 1 }
 0x5d8   : > { %v2196_v62 = vpop.permute.xlu0 %2195 }
 0x5d9   : > { %v2200_v21 = vrot.slane %v2196_v62, %v2824_v19  ;;  %2156 = vrot.lane.b32.xlu0 %v2154_v44, %s2731_s25  ;;  %v2388_v44 = vpop.permute.xlu1 %2387  ;;  %v357_v62 = vadd.f32 %v355_v59, %v292_v55 }
 0x5db   : > { %v2202_v11 = vmul.f32 %v3636_v30, %v2200_v21  ;;  %v2392_v21 = vrot.slane %v2388_v44, %v2824_v19  ;;  %v1050_v44 = vrot.slane %v4130_v12, 1 }
 0x5dd   : > { %v2228_v25 = vpop.permute.xlu0 %2227  ;;  %2204 = vrot.lane.b32.xlu1 %v2202_v11, %s2731_s25  ;;  %2188 = vrot.lane.b32.xlu0 %v2186_v9, %s2731_s25  ;;  %v4124_v11 = vld [vmem:[#allocation8_spill] sm:$0xff]  ;;  %v2420_v58 = vpop.permute.xlu1 %2419 }
 0x5de   : > { %v2232_v47 = vrot.slane %v2228_v25, %v2824_v19  ;;  %v614_v31 = vrot.slane %v4124_v11, 1  ;;  %v422_v25 = vadd.f32 %v420_v33, %v357_v62  ;;  %v2424_v8 = vrot.slane %v2420_v58, %v2824_v19  ;;  %v4129_v33 = vld [vmem:[#allocation13_spill] sm:$0xff] }
 0x5e0   : > { %v2234_v34 = vmul.f32 %v3636_v30, %v2232_v47  ;;  %v550_v47 = vsel %vm533_vm4, %v4123_v6, %v549_v43  ;;  %v615_v53 = vsel %vm598_vm5, %v4124_v11, %v614_v31  ;;  %v986_v6 = vrot.slane %v4129_v33, 1  ;;  %v4131_v11 = vld [vmem:[#allocation15_spill] sm:$0xff] }
 0x5e1   : > { %2220 = vrot.lane.b32.xlu0 %v2218_v60, %s2732_s26  ;;  %v4125_v60 = vld [vmem:[#allocation9_spill] sm:$0xff]  ;;  %v1114_v31 = vrot.slane %v4131_v11, 1 }
 0x5e2   : > { %v2276_v54 = vpop.permute.xlu0 %2275  ;;  %2236 = vrot.lane.b32.xlu1 %v2234_v34, %s2732_s26  ;;  %v679_v26 = vrot.slane %v4125_v60, 1  ;;  %v487_v34 = vadd.f32 %v485_v13, %v422_v25  ;;  %v987_v13 = vsel %vm403_vm2, %v4129_v33, %v986_v6 }
 0x5e3   : > { %v2280_v36 = vrot.slane %v2276_v54, %v2824_v19  ;;  %v2394_v54 = vmul.f32 %v3636_v30, %v2392_v21 }
 0x5e4   : > { %v552_v51 = vadd.f32 %v550_v47, %v487_v34  ;;  %v680_v4 = vsel %vm663_vm6, %v4125_v60, %v679_v26  ;;  %v1051_v47 = vsel %vm468_vm3, %v4130_v12, %v1050_v44  ;;  %v4132_v60 = vld [vmem:[#allocation17_spill] sm:$0xff] }
 0x5e5   : > { %v2282_v52 = vmul.f32 %v3636_v30, %v2280_v36  ;;  %2252 = vrot.lane.b32.xlu0 %v2250_v32, %s2732_s26  ;;  %v4126_v36 = vld [vmem:[#allocation10_spill] sm:$0xff]  ;;  %v1178_v26 = vrot.slane %v4132_v60, 1 }
 0x5e6   : > { %v2324_v42 = vpop.permute.xlu0 %2323  ;;  %2268 = vrot.lane.b32.xlu1 %v2266_v63, %s2732_s26  ;;  %v744_v63 = vrot.slane %v4126_v36, 1  ;;  %v617_v17 = vadd.f32 %v615_v53, %v552_v51 }
 0x5e7   : > { %v2328_v7 = vrot.slane %v2324_v42, %v2824_v19  ;;  %v2482_v42 = vld [vmem:[%s202_s6 + $0x1] sm:$0x1]  ;;  %v1179_v51 = vsel %vm598_vm5, %v4132_v60, %v1178_v26  ;;  %v2110_v60 = vrot.slane %v3764_v16, 1 }
 0x5e8   : > { %v745_v41 = vsel %vm728_vm7, %v4126_v36, %v744_v63 }
 0x5e9   : > { %2284 = vrot.lane.b32.xlu0 %v2282_v52, %s2733_s27  ;;  %v2330_v22 = vmul.f32 %v3636_v30, %v2328_v7  ;;  %v2466_v52 = vld [vmem:[%s202_s6] sm:$0x1]  ;;  %v682_v7 = vadd.f32 %v680_v4, %v617_v17 }
 0x5ea   : > { %2300 = vrot.lane.b32.xlu1 %v2298_v61, %s2733_s27 }
 0x5eb   : > { %v2356_v28 = vpop.permute.xlu0 %2355  ;;  %v747_v45 = vadd.f32 %v745_v41, %v682_v7  ;;  %v2710_v41 = vld [vmem:[%s2822_s21 + $0x2] ss:$4 sm:$0x3]  ;;  %v4135_v7 = vld [vmem:[#allocation33_spill] sm:$0xff] }
 0x5ec   : > { %v2360_v5 = vrot.slane %v2356_v28, %v2824_v19  ;;  %v922_v28 = vrot.slane %v4128_v38, 1 }
 0x5ed   : > { %2316 = vrot.lane.b32.xlu0 %v2314_v48, %s2733_s27 }
 0x5ee   : > { %v2362_v39 = vmul.f32 %v3636_v30, %v2360_v5  ;;  %2332 = vrot.lane.b32.xlu1 %v2330_v22, %s2733_s27  ;;  %v2426_v22 = vmul.f32 %v3636_v30, %v2424_v8  ;;  %v2436_v5 = vpop.permute.xlu1 %2435 }
 0x5ef   : > { %v2440_v46 = vrot.slane %v2436_v5, %v2824_v19 }
 0x5f0   : > { %v2404_v9 = vpop.permute.xlu0 %2403 }
 0x5f1   : > { %2348 = vrot.lane.b32.xlu0 %v2346_v49, %s2734_s28  ;;  %v2408_v3 = vrot.slane %v2404_v9, %v2824_v19  ;;  %v923_v49 = vsel %vm338_vm1, %v4128_v38, %v922_v28  ;;  %v2442_v21 = vmul.f32 %v3636_v30, %v2440_v46  ;;  %v1612_v28 = vrot.slane %v3466_v14, 1 }
 0x5f2   : > { %2364 = vrot.lane.b32.xlu1 %v2362_v39, %s2734_s28  ;;  %v859_v39 = vsel %vm273_vm0, %v4127_v27, %v858_v29 }
 0x5f3   : > { %v2410_v0 = vmul.f32 %v3636_v30, %v2408_v3  ;;  %v1420_v3 = vrot.slane %v4135_v7, 1 }
 0x5f4   : > { %v2452_v32 = vpop.permute.xlu0 %2451 }
 0x5f5   : > { %2380 = vrot.lane.b32.xlu0 %v2378_v1, %s2734_s28  ;;  %v2456_v59 = vrot.slane %v2452_v32, %v2824_v19  ;;  %v4133_v32 = vld [vmem:[#allocation19_spill] sm:$0xff] }
 0x5f6   : > { %2396 = vrot.lane.b32.xlu1 %v2394_v54, %s2734_s28  ;;  %v1115_v54 = vsel %vm533_vm4, %v4131_v11, %v1114_v31  ;;  %v1242_v53 = vrot.slane %v4133_v32, 1  ;;  %v1982_v11 = vrot.slane %v3744_v2, 1 }
 0x5f7   : > { %v2458_v62 = vmul.f32 %v3636_v30, %v2456_v59  ;;  %v1676_v59 = vrot.slane %v3536_v24, 1 }
 0x5f9   : > { %v798_v61 = vpop.permute.xlu0 %797  ;;  %2469 = vperm.xlu0 %2703, %v2466_v52   ;;  %v4134_v52 = vld [vmem:[#allocation22_spill] sm:$0xff]  ;;  %v1677_v6 = vsel %vm533_vm4, %v3536_v24, %v1676_v59 }
 0x5fa   : > { %v802_v57 = vrot.slane %v798_v61, %v2824_v19  ;;  %2485 = vperm.xlu1 %2704, %v2482_v42   ;;  %v1306_v4 = vrot.slane %v4134_v52, 1  ;;  %v1243_v42 = vsel %vm663_vm6, %v4133_v32, %v1242_v53 }
 0x5fc   : > { %v804_v48 = vmul.f32 %v2709_v40, %v802_v57  ;;  %v1307_v61 = vsel %vm728_vm7, %v4134_v52, %v1306_v4 }
 0x5fd   : > { %2511 = vperm.xlu0 %2703, %v2508_v23   ;;  %v1360_v1 = vpop.permute.xlu0 %1359  ;;  %v4136_v23 = vld [vmem:[#allocation37_spill] sm:$0xff] }
 0x5fe   : > { %v805_v55 = vadd.f32 %v804_v48, %v747_v45  ;;  %2498 = vperm.xlu1 %2704, %v2495_v35   ;;  %v1364_v63 = vrot.slane %v1360_v1, %v2824_v19  ;;  %v1484_v27 = vrot.slane %v4136_v23, 1  ;;  %v1421_v35 = vsel %vm273_vm0, %v4135_v7, %v1420_v3  ;;  %v4137_v45 = vld [vmem:[#allocation41_spill] sm:$0xff] }
 0x5ff   : > { %v1548_v40 = vrot.slane %v4137_v45, 1 }
 0x600   : > { %v861_v43 = vadd.f32 %v859_v39, %v805_v55  ;;  %v1366_v8 = vmul.f32 %v2710_v41, %v1364_v63  ;;  %v1485_v38 = vsel %vm338_vm1, %v4136_v23, %v1484_v27  ;;  %v1740_v55 = vrot.slane %v3600_v18, 1 }
 0x601   : > { %2428 = vrot.lane.b32.xlu0 %v2426_v22, %s2735_s29  ;;  %v1549_v5 = vsel %vm403_vm2, %v4137_v45, %v1548_v40  ;;  %v1922_v39 = vpop.permute.xlu0 %1921 }
 0x602   : > { %v925_v9 = vadd.f32 %v923_v49, %v861_v43  ;;  %2412 = vrot.lane.b32.xlu1 %v2410_v0, %s2735_s29  ;;  %v1613_v0 = vsel %vm468_vm3, %v3466_v14, %v1612_v28  ;;  %v1804_v43 = vrot.slane %v3630_v10, 1  ;;  %v1926_v12 = vrot.slane %v1922_v39, %v2824_v19 }
 0x603   : > { %v1741_v44 = vsel %vm598_vm5, %v3600_v18, %v1740_v55  ;;  %v1983_v18 = vsel %vm273_vm0, %v3744_v2, %v1982_v11 }
 0x604   : > { %v989_v25 = vadd.f32 %v987_v13, %v925_v9  ;;  %v1805_v14 = vsel %vm663_vm6, %v3630_v10, %v1804_v43  ;;  %v1928_v13 = vmul.f32 %v3636_v30, %v1926_v12  ;;  %v2111_v30 = vsel %vm403_vm2, %v3764_v16, %v2110_v60 }
 0x605   : > { %2460 = vrot.lane.b32.xlu0 %v2458_v62, %s2735_s29  ;;  %v1868_v62 = vrot.slane %v3640_v50, 1 }
 0x606   : > { %v1053_v34 = vadd.f32 %v1051_v47, %v989_v25  ;;  %2444 = vrot.lane.b32.xlu1 %v2442_v21, %s2735_s29  ;;  %v2046_v25 = vrot.slane %v3755_v15, 1 }
 0x607   : > { %v1869_v24 = vsel %vm728_vm7, %v3640_v50, %v1868_v62 }
 0x608   : > { %v1117_v36 = vadd.f32 %v1115_v54, %v1053_v34  ;;  %v2047_v10 = vsel %vm338_vm1, %v3755_v15, %v2046_v25  ;;  %v2141_v34 = vpop.permute.xlu1 %2140 }
 0x60a   : > { %v1181_v58 = vadd.f32 %v1179_v51, %v1117_v36 }
 0x60c   : > { %v1245_v17 = vadd.f32 %v1243_v42, %v1181_v58  ;;  %v2173_v54 = vpop.permute.xlu1 %2172 }
 0x60d   : > { %v2174_v7 = vrot.slane %v2173_v54, 1 }
 0x60e   : > { %v1309_v57 = vadd.f32 %v1307_v61, %v1245_v17 }
 0x60f   : > { %v2175_v40 = vsel %vm468_vm3, %v2173_v54, %v2174_v7 }
 0x610   : > { %v1367_v29 = vadd.f32 %v1366_v8, %v1309_v57  ;;  %v2142_v8 = vrot.slane %v2141_v34, 1 }
 0x612   : > { %v1423_v48 = vadd.f32 %v1421_v35, %v1367_v29  ;;  %v2143_v29 = vsel %vm403_vm2, %v2141_v34, %v2142_v8  ;;  %v4138_v34 = vlaneseq }
 0x614   : > { %v1487_v22 = vadd.f32 %v1485_v38, %v1423_v48  ;;  %vm3940_vm8 = vcmp.lt.s32.totalorder %v4138_v34, 178 }
 0x616   : > { %v1551_v46 = vadd.f32 %v1549_v5, %v1487_v22 }
 0x618   : > { %v1615_v33 = vadd.f32 %v1613_v0, %v1551_v46  ;;  %v2145_v0 = vadd.f32 %v2143_v29, %v3759_v56 }
 0x61a   : > { %v1679_v49 = vadd.f32 %v1677_v6, %v1615_v33 }
 0x61c   : > { %v1743_v21 = vadd.f32 %v1741_v44, %v1679_v49 }
 0x61e   : > { %v1807_v9 = vadd.f32 %v1805_v14, %v1743_v21 }
 0x620   : > { %v1871_v31 = vadd.f32 %v1869_v24, %v1807_v9 }
 0x622   : > { %v1929_v47 = vadd.f32 %v1928_v13, %v1871_v31 }
 0x624   : > { %v1985_v26 = vadd.f32 %v1983_v18, %v1929_v47 }
 0x626   : > { %v2049_v1 = vadd.f32 %v2047_v10, %v1985_v26 }
 0x628   : > { %v2113_v50 = vadd.f32 %v2111_v30, %v2049_v1 }
 0x62a   : > { %v2177_v6 = vadd.f32 %v2175_v40, %v2113_v50 }
 0x64b   : > { %v2157_v32 = vpop.permute.xlu0 %2156 }
 0x64c   : > { %v2158_v16 = vrot.slane %v2157_v32, 1 }
 0x64e   : > { %v2159_v48 = vsel %vm468_vm3, %v2157_v32, %v2158_v16 }
 0x64f   : > { %v2189_v53 = vpop.permute.xlu0 %2188  ;;  %v2205_v36 = vpop.permute.xlu1 %2204  ;;  %v2161_v62 = vadd.f32 %v2159_v48, %v3762_v20 }
 0x650   : > { %v2190_v57 = vrot.slane %v2189_v53, 1  ;;  %v2206_v23 = vrot.slane %v2205_v36, 1 }
 0x652   : > { %v2191_v22 = vsel %vm468_vm3, %v2189_v53, %v2190_v57  ;;  %v2207_v5 = vsel %vm468_vm3, %v2205_v36, %v2206_v23 }
 0x653   : > { %v2221_v63 = vpop.permute.xlu0 %2220  ;;  %v2193_v21 = vadd.f32 %v2191_v22, %v3767_v37  ;;  %v2209_v14 = vadd.f32 %v2207_v5, %v2145_v0 }
 0x654   : > { %v2237_v51 = vpop.permute.xlu1 %2236  ;;  %v2222_v35 = vrot.slane %v2221_v63, 1 }
 0x655   : > { %v2238_v27 = vrot.slane %v2237_v51, 1 }
 0x656   : > { %v2223_v43 = vsel %vm533_vm4, %v2221_v63, %v2222_v35 }
 0x657   : > { %v2253_v52 = vpop.permute.xlu0 %2252  ;;  %v2239_v55 = vsel %vm533_vm4, %v2237_v51, %v2238_v27  ;;  %v2225_v25 = vadd.f32 %v2223_v43, %v2161_v62 }
 0x658   : > { %v2269_v2 = vpop.permute.xlu1 %2268  ;;  %v2254_v39 = vrot.slane %v2253_v52, 1  ;;  %v2241_v24 = vadd.f32 %v2239_v55, %v2177_v6 }
 0x659   : > { %v2270_v59 = vrot.slane %v2269_v2, 1 }
 0x65a   : > { %v2255_v47 = vsel %vm533_vm4, %v2253_v52, %v2254_v39 }
 0x65b   : > { %v2285_v4 = vpop.permute.xlu0 %2284  ;;  %v2271_v56 = vsel %vm533_vm4, %v2269_v2, %v2270_v59  ;;  %v2257_v36 = vadd.f32 %v2255_v47, %v2193_v21 }
 0x65c   : > { %v2301_v58 = vpop.permute.xlu1 %2300  ;;  %v2286_v46 = vrot.slane %v2285_v4, 1  ;;  %v2273_v30 = vadd.f32 %v2271_v56, %v2209_v14 }
 0x65d   : > { %v2302_v38 = vrot.slane %v2301_v58, 1 }
 0x65e   : > { %v2287_v11 = vsel %vm598_vm5, %v2285_v4, %v2286_v46 }
 0x65f   : > { %v2317_v42 = vpop.permute.xlu0 %2316  ;;  %v2303_v9 = vsel %vm598_vm5, %v2301_v58, %v2302_v38  ;;  %v2289_v50 = vadd.f32 %v2287_v11, %v2225_v25 }
 0x660   : > { %v2333_v17 = vpop.permute.xlu1 %2332  ;;  %v2318_v31 = vrot.slane %v2317_v42, 1  ;;  %v2305_v26 = vadd.f32 %v2303_v9, %v2241_v24 }
 0x661   : > { %v2334_v49 = vrot.slane %v2333_v17, 1 }
 0x662   : > { %v2319_v63 = vsel %vm598_vm5, %v2317_v42, %v2318_v31 }
 0x663   : > { %v2349_v41 = vpop.permute.xlu0 %2348  ;;  %v2335_v20 = vsel %vm598_vm5, %v2333_v17, %v2334_v49  ;;  %v2321_v57 = vadd.f32 %v2319_v63, %v2257_v36 }
 0x664   : > { %v2365_v15 = vpop.permute.xlu1 %2364  ;;  %v2350_v12 = vrot.slane %v2349_v41, 1  ;;  %v2337_v2 = vadd.f32 %v2335_v20, %v2273_v30 }
 0x665   : > { %v2366_v33 = vrot.slane %v2365_v15, 1 }
 0x666   : > { %v2351_v37 = vsel %vm663_vm6, %v2349_v41, %v2350_v12 }
 0x667   : > { %v2381_v61 = vpop.permute.xlu0 %2380  ;;  %v2367_v18 = vsel %vm663_vm6, %v2365_v15, %v2366_v33  ;;  %v2353_v4 = vadd.f32 %v2351_v37, %v2289_v50 }
 0x668   : > { %v2397_v3 = vpop.permute.xlu1 %2396  ;;  %v2382_v10 = vrot.slane %v2381_v61, 1  ;;  %v2369_v51 = vadd.f32 %v2367_v18, %v2305_v26 }
 0x669   : > { %v2398_v60 = vrot.slane %v2397_v3, 1 }
 0x66a   : > { %v2383_v41 = vsel %vm663_vm6, %v2381_v61, %v2382_v10 }
 0x66b   : > { %v2399_v58 = vsel %vm663_vm6, %v2397_v3, %v2398_v60  ;;  %v2385_v40 = vadd.f32 %v2383_v41, %v2321_v57 }
 0x66c   : > { %v2401_v29 = vadd.f32 %v2399_v58, %v2337_v2 }
 0x674   : > { %v3921_v45 = vpop.permute.xlu0 %2469 }
 0x675   : > { %v2486_v28 = vpop.permute.xlu1 %2485  ;;  %v2474_v42 = vrot.slane %v3921_v45, %v2824_v19 }
 0x676   : > { %v2490_v15 = vrot.slane %v2486_v28, %v2824_v19 }
 0x678   : > { %v2512_v44 = vpop.permute.xlu0 %2511 }
 0x679   : > { %v2499_v13 = vpop.permute.xlu1 %2498  ;;  %v2516_v28 = vrot.slane %v2512_v44, %v2824_v19 }
 0x67a   : > { %v2503_v5 = vrot.slane %v2499_v13, %v2824_v19 }
 0x67c   : > { %v2429_v1 = vpop.permute.xlu0 %2428 }
 0x67d   : > { %v2430_v32 = vrot.slane %v2429_v1, 1  ;;  %v2413_v53 = vpop.permute.xlu1 %2412 }
 0x67e   : > { %v2414_v52 = vrot.slane %v2413_v53, 1 }
 0x67f   : > { %v2431_v17 = vsel %vm728_vm7, %v2429_v1, %v2430_v32 }
 0x680   : > { %v2433_v8 = vadd.f32 %v2431_v17, %v2369_v51  ;;  %v2415_v7 = vsel %vm728_vm7, %v2413_v53, %v2414_v52  ;;  %v2461_v16 = vpop.permute.xlu0 %2460 }
 0x681   : > { %v2417_v3 = vadd.f32 %v2415_v7, %v2353_v4  ;;  %v2462_v23 = vrot.slane %v2461_v16, 1  ;;  %v2445_v27 = vpop.permute.xlu1 %2444 }
 0x682   : > { %v2492_v61 = vadd.f32 %v2490_v15, %v2433_v8  ;;  %v2446_v35 = vrot.slane %v2445_v27, 1 }
 0x683   : > { %v2476_v48 = vadd.f32 %v2474_v42, %v2417_v3  ;;  %v2463_v38 = vsel %vm728_vm7, %v2461_v16, %v2462_v23 }
 0x684   : > { %2627 = vst.msk [vmem:[%s207_s9 + $0x1] ss:$4 sm:$0x3] %vm3940_vm8, %v2492_v61  ;;  %v2465_v45 = vadd.f32 %v2463_v38, %v2401_v29  ;;  %v2447_v22 = vsel %vm728_vm7, %v2445_v27, %v2446_v35 }
 0x685   : > { %2481 = vst.msk [vmem:[%s207_s9] ss:$4 sm:$0x3] %vm3940_vm8, %v2476_v48  ;;  %v2449_v59 = vadd.f32 %v2447_v22, %v2385_v40 }
 0x686   : > { %v2518_v46 = vadd.f32 %v2516_v28, %v2465_v45 }
 0x687   : > { %v2505_v0 = vadd.f32 %v2503_v5, %v2449_v59 }
 0x688   : > { %2629 = vst.msk [vmem:[%s207_s9 + $0x3] ss:$4 sm:$0x3] %vm3940_vm8, %v2518_v46 }
 0x689   : > { %2628 = vst.msk [vmem:[%s207_s9 + $0x2] ss:$4 sm:$0x3] %vm3940_vm8, %v2505_v0 }
 0x68a PF: > { %s13_s12 = sadd.s32 1, %s2717_s12  }
 0x68b   : > { %p10_p4 = scmp.ge.s32.totalorder %s13_s12, 4  }
 0x68d   :  { %12 = sbr.rel (!%p10_p4) target bundleno = 1 (0x1), region = 77 }

// kernel: up_forward.31
= control target key start
LH: loop header
LB: loop body
LE: loop exit
PB: predicated region body
PF: predicated region fallthrough
CT: control target
= control target key end

     0   :  { %s1030_s12 = smov 0   ;;  %s1032_s13 = smov 0   ;;  %s1153_s0 = inlined_call_operand.vmem [shape: f32[32,200], index: 0, kind: input, shape index: {}]   ;;  %s1154_s1 = inlined_call_operand.vmem [shape: bf16[9,16,32], index: 1, kind: input, shape index: {}]   ;;  %s1155_s2 = inlined_call_operand.vmem [shape: f32[16,1], index: 2, kind: input, shape index: {}]   ;;  %s1156_s3 = inlined_call_operand.vmem [shape: f32[16,178], index: 3, kind: output, shape index: {}]  }
   0x1   :  { %s1034_s14 = smov 0  }
   0x2 LB: > { %s912_s15 = sadd.s32 4294967295, %s999_s14   ;;  %s1047_s16 = sadd.s32 1, %s999_s14   ;;  %s999_s14 = sphi %s1034_s14, %s1159_s14   ;;  %s995_s13 = sphi %s1032_s13, %s1158_s13   ;;  %s991_s12 = sphi %s1030_s12, %s1157_s12  }
   0x3   : > { %s38_s17 = ssub.s32 %s999_s14, %s1047_s16  ;;  %s41_s18 = sadd.s32 1, %s995_s13 }
   0x4   : > { %p39_p0 = scmp.eq.s32.totalorder %s38_s17, 0  ;;  %p48_p1 = scmp.ne.s32.totalorder %s995_s13, %s991_s12 }
   0x5   : > { %p49_p2 = scmp.eq.s32.totalorder %s999_s14, 0  ;;  %p915_p4 = scmp.ge.s32.totalorder %s999_s14, 2 }
   0x6   : > { %s1056_s19 = scalar_select %p39_p0, %s995_s13, %s41_s18  }
   0x7   : > { %p50_p3 = por %p49_p2, %p48_p1  ;;  %129 = sbr.rel (%p915_p4) target bundleno = 22 (0x16), region = 20 }
   0xc   : > { %132 = sbr.rel (!%p50_p3) target bundleno = 22 (0x16), region = 24  ;;  %s134_s20 = sand.u32 (%p50_p3), 1, %s995_s13  }
   0xd   : > { %s916_s21 = sshll.u32 (%p50_p3), %s999_s14, 2  ;;  %s941_s22 = smul.u32 (%p50_p3), 36, %s134_s20 }
   0xe   : > { %s138_s25 = scalar_lea.vmem (%p50_p3), %s1154_s1, %s916_s21 }
   0xf   : > { %v155_v0 = vld [vmem:[%s138_s25] sm:$0xf] (%p50_p3)  ;;  %v157_v1 = vld [vmem:[%s138_s25 + $0x8] sm:$0xf] (%p50_p3)  ;;  %v159_v2 = vld [vmem:[%s138_s25 + $0x10] sm:$0xf] (%p50_p3) }
  0x10   : > { %v161_v3 = vld [vmem:[%s138_s25 + $0x18] sm:$0xf] (%p50_p3)  ;;  %v163_v4 = vld [vmem:[%s138_s25 + $0x20] sm:$0xf] (%p50_p3)  ;;  %s136_s26 = scalar_lea.vmem (%p50_p3), [#allocation2], %s941_s22 }
  0x11   : > { %156 = vst [vmem:[%s136_s26] sm:$0xf] %v155_v0  ;;  %158 = vst [vmem:[%s136_s26 + $0x4] sm:$0xf] %v157_v1  ;;  %v165_v5 = vld [vmem:[%s138_s25 + $0x28] sm:$0xf] }
  0x12   : > { %160 = vst [vmem:[%s136_s26 + $0x8] sm:$0xf] %v159_v2  ;;  %162 = vst [vmem:[%s136_s26 + $0xc] sm:$0xf] %v161_v3  ;;  %v167_v6 = vld [vmem:[%s138_s25 + $0x30] sm:$0xf] }
  0x13   : > { %164 = vst [vmem:[%s136_s26 + $0x10] sm:$0xf] %v163_v4  ;;  %v169_v7 = vld [vmem:[%s138_s25 + $0x38] sm:$0xf]  ;;  %166 = vst [vmem:[%s136_s26 + $0x14] sm:$0xf] %v165_v5 }
  0x14   : > { %168 = vst [vmem:[%s136_s26 + $0x18] sm:$0xf] %v167_v6  ;;  %170 = vst [vmem:[%s136_s26 + $0x1c] sm:$0xf] %v169_v7  ;;  %v171_v8 = vld [vmem:[%s138_s25 + $0x40] sm:$0xf] }
  0x15   : > { %172 = vst [vmem:[%s136_s26 + $0x20] sm:$0xf] %v171_v8 }
  0x16 PF: > { %p917_p5 = scmp.ge.s32.totalorder %s999_s14, 1  ;;  %p220_p6 = scmp.lt.s32.totalorder %s999_s14, 3 }
  0x18   : > { %p221_p7 = pnand %p917_p5, %p220_p6 }
  0x19   : > { %s1001_s22 = smov (!%p221_p7), 127   ;;  %s227_s23 = sand.u32 (!%p221_p7), 1, %s991_s12  }
  0x1a   : > { %224 = sbr.rel (%p221_p7) target bundleno = 414 (0x19e), region = 69  ;;  %s1003_s26 = smov (!%p221_p7), 126  }
  0x1b   : > { %s942_s24 = smul.u32 (!%p221_p7), 36, %s227_s23  ;;  %s1004_s12 = smov (!%p221_p7), 118  }
  0x1c   : > { %s1005_s27 = smov (!%p221_p7), 117   ;;  %s1006_s28 = smov (!%p221_p7), 116  }
  0x1d   : > { %s1094_s25 = scalar_lea.vmem (!%p221_p7), [#allocation2], %s942_s24  ;;  %s1007_s29 = smov (!%p221_p7), 108  }
  0x1e   : > { %s1008_s30 = smov (!%p221_p7), 107   ;;  %s1009_s4 = smov (!%p221_p7), 106  }
  0x1f   : > { %v268_v9 = vld [vmem:[%s1153_s0 + $0x20] sm:$0xff]  ;;  %v270_v10 = vld [vmem:[%s1153_s0 + $0x30] sm:$0xff]  ;;  %v269_v14 = vld [vmem:[%s1153_s0 + $0x28] sm:$0xff]  ;;  %v1002_v20 = vmov 0   ;;  %vm298_vm0 = vcmask 261120   ;;  %p254_p8 = scmp.lt.s32.totalorder %s912_s15, 1 }
  0x20   : > { %v264_v11 = vld [vmem:[%s1153_s0] sm:$0xff]  ;;  %v274_v12 = vpack.c.bf16 %v270_v10, %v268_v9  ;;  %v266_v13 = vld [vmem:[%s1153_s0 + $0x10] sm:$0xff]  ;;  %v271_v15 = vld [vmem:[%s1153_s0 + $0x38] sm:$0xff]  ;;  %334 = vmatprep.mubr.bf16.mxu0 %v1002_v20  ;;  %378 = vmatprep.mubr.bf16.mxu1 %v1002_v20  ;;  %vm291_vm1 = vcmask 1039360   ;;  %vm397_vm2 = vcmask 1031168   ;;  %vm460_vm3 = vcmask 965632  }
  0x21   : > { %v272_v16 = vpack.c.bf16 %v266_v13, %v264_v11  ;;  %v275_v17 = vpack.c.bf16 %v271_v15, %v269_v14  ;;  %v265_v18 = vld [vmem:[%s1153_s0 + $0x8] sm:$0xff]  ;;  %v267_v19 = vld [vmem:[%s1153_s0 + $0x18] sm:$0xff]  ;;  %976 = vset.pattern.permute.xlu0 %v1002_v20  ;;  %v276_v22 = vld [vmem:[%s1094_s25] sm:$0xf]  ;;  %s1161_s15 = smov (!%p254_p8, %s912_s15), 1  ;;  %vm523_vm4 = vcmask 957440  }
  0x22   : > { %287 = vrot.lane.b32.xlu0 %v274_v12, %s1001_s22  ;;  %v273_v21 = vpack.c.bf16 %v267_v19, %v265_v18  ;;  %s918_s5 = sshll.u32 %s1161_s15, 3  ;;  %v921_v32 = vld [vmem:[%s1094_s25 + $0x4] sm:$0xf]  ;;  %v924_v40 = vld [vmem:[%s1094_s25 + $0x8] sm:$0xf]  ;;  %vm586_vm5 = vcmask 949248  }
  0x23   : > { %283 = vrot.lane.b32.xlu1 %v272_v16, %s1001_s22  ;;  %358 = vmatprep.subr.bf16.mxu1 %v275_v17  ;;  %s257_s8 = scalar_lea.vmem %s1155_s2, %s918_s5  ;;  %v926_v47 = vld [vmem:[%s1094_s25 + $0xc] sm:$0xf]  ;;  %v928_v51 = vld [vmem:[%s1094_s25 + $0x10] sm:$0xf]  ;;  %vm649_vm6 = vcmask 883712   ;;  %vm712_vm7 = vcmask 875520  }
  0x24   : > { %359 = vmatpush1.bf16.msra.mxu1 %v274_v12  ;;  %v828_v23 = vld [vmem:[%s257_s8] sm:$0xff]  ;;  %v930_v61 = vld [vmem:[%s1094_s25 + $0x14] sm:$0xf]  ;;  %v932_v1 = vld [vmem:[%s1094_s25 + $0x18] sm:$0xf]  ;;  %vm775_vm8 = vcmask 867328  }
  0x25   : > { %360 = vmatprep.subr.bf16.mxu1 %v273_v21  ;;  %v934_v11 = vld [vmem:[%s1094_s25 + $0x1c] sm:$0xf]  ;;  %v936_v15 = vld [vmem:[%s1094_s25 + $0x20] sm:$0xf]  ;;  %s940_s14 = sshll.u32 %s1161_s15, 4  ;;  %vm837_vm9 = vcmask 408576  }
  0x26   : > { %289 = vrot.lane.b32.xlu0 %v275_v17, %s1001_s22  ;;  %s262_s11 = scalar_lea.vmem %s1156_s3, %s940_s14 }
  0x27   : > { %285 = vrot.lane.b32.xlu1 %v273_v21, %s1001_s22 }
  0x28   : > { %361 = vmatpush1.bf16.msra.mxu1 %v272_v16 }
  0x2a   : > { %393 = vrot.lane.b32.xlu0 %v274_v12, %s1003_s26 }
  0x2b   : > { %395 = vrot.lane.b32.xlu1 %v275_v17, %s1003_s26  ;;  %923 = vmatmul.mubr.msk.bf16.vlgmr.msra.gmra.mxu1 %vm298_vm0, %v276_v22 }
  0x2c   : > { %502 = vmatprep.mubr.bf16.mxu1 %v1002_v20 }
  0x2e   : > { %389 = vrot.lane.b32.xlu0 %v272_v16, %s1003_s26 }
  0x2f   : > { %391 = vrot.lane.b32.xlu1 %v273_v21, %s1003_s26 }
  0x32   : > { %456 = vrot.lane.b32.xlu0 %v274_v12, %s1004_s12 }
  0x33   : > { %458 = vrot.lane.b32.xlu1 %v275_v17, %s1004_s12 }
  0x36   : > { %519 = vrot.lane.b32.xlu0 %v274_v12, %s1005_s27 }
  0x37   : > { %521 = vrot.lane.b32.xlu1 %v275_v17, %s1005_s27 }
  0x3a   : > { %452 = vrot.lane.b32.xlu0 %v272_v16, %s1004_s12 }
  0x3b   : > { %454 = vrot.lane.b32.xlu1 %v273_v21, %s1004_s12 }
  0x3e   : > { %515 = vrot.lane.b32.xlu0 %v272_v16, %s1005_s27 }
  0x3f   : > { %517 = vrot.lane.b32.xlu1 %v273_v21, %s1005_s27 }
  0x42   : > { %582 = vrot.lane.b32.xlu0 %v274_v12, %s1006_s28 }
  0x43   : > { %584 = vrot.lane.b32.xlu1 %v275_v17, %s1006_s28 }
  0x46   : > { %645 = vrot.lane.b32.xlu0 %v274_v12, %s1007_s29 }
  0x47   : > { %647 = vrot.lane.b32.xlu1 %v275_v17, %s1007_s29 }
  0x4a   : > { %578 = vrot.lane.b32.xlu0 %v272_v16, %s1006_s28 }
  0x4b   : > { %580 = vrot.lane.b32.xlu1 %v273_v21, %s1006_s28 }
  0x4e   : > { %641 = vrot.lane.b32.xlu0 %v272_v16, %s1007_s29 }
  0x4f   : > { %643 = vrot.lane.b32.xlu1 %v273_v21, %s1007_s29 }
  0x52   : > { %708 = vrot.lane.b32.xlu0 %v274_v12, %s1008_s30 }
  0x53   : > { %710 = vrot.lane.b32.xlu1 %v275_v17, %s1008_s30 }
  0x56   : > { %771 = vrot.lane.b32.xlu0 %v274_v12, %s1009_s4 }
  0x57   : > { %773 = vrot.lane.b32.xlu1 %v275_v17, %s1009_s4 }
  0x5a   : > { %704 = vrot.lane.b32.xlu0 %v272_v16, %s1008_s30 }
  0x5b   : > { %706 = vrot.lane.b32.xlu1 %v273_v21, %s1008_s30 }
  0x5e   : > { %767 = vrot.lane.b32.xlu0 %v272_v16, %s1009_s4 }
  0x5f   : > { %769 = vrot.lane.b32.xlu1 %v273_v21, %s1009_s4 }
  0x62   : > { %831 = vperm.xlu0 %976, %v828_v23  }
  0x94   : > { %v288_v24 = vpop.permute.xlu0 %287 }
  0x95   : > { %v284_v25 = vpop.permute.xlu1 %283 }
  0x98   : > { %v290_v26 = vpop.permute.xlu0 %289 }
  0x99   : > { %v286_v27 = vpop.permute.xlu1 %285  ;;  %314 = vmatprep.subr.bf16.mxu0 %v290_v26  ;;  %v293_v28 = vsel %vm291_vm1, %v288_v24, %v290_v26 }
  0x9a   : > { %315 = vmatpush1.bf16.msra.mxu0 %v293_v28  ;;  %v292_v31 = vsel %vm291_vm1, %v284_v25, %v286_v27 }
  0x9b   : > { %316 = vmatprep.subr.bf16.mxu0 %v286_v27 }
  0x9c   : > { %v394_v29 = vpop.permute.xlu0 %393 }
  0x9d   : > { %v396_v30 = vpop.permute.xlu1 %395 }
  0x9e   : > { %317 = vmatpush1.bf16.msra.mxu0 %v292_v31  ;;  %v399_v34 = vsel %vm397_vm2, %v394_v29, %v396_v30 }
  0x9f   : > { %419 = vmatprep.subr.bf16.mxu0 %v396_v30 }
  0xa0   : > { %v390_v33 = vpop.permute.xlu0 %389 }
  0xa1   : > { %v392_v35 = vpop.permute.xlu1 %391  ;;  %922 = vmatmul.mubr.msk.bf16.vlgmr.msra.gmra.mxu0 %vm298_vm0, %v921_v32 }
  0xa2   : > { %420 = vmatpush1.bf16.msra.mxu0 %v399_v34  ;;  %439 = vmatprep.mubr.bf16.mxu0 %v1002_v20  ;;  %v398_v37 = vsel %vm397_vm2, %v390_v33, %v392_v35 }
  0xa3   : > { %421 = vmatprep.subr.bf16.mxu0 %v392_v35 }
  0xa4   : > { %v457_v36 = vpop.permute.xlu0 %456 }
  0xa5   : > { %v459_v38 = vpop.permute.xlu1 %458 }
  0xa6   : > { %v462_v39 = vsel %vm460_vm3, %v457_v36, %v459_v38  ;;  %482 = vmatprep.subr.bf16.mxu1 %v459_v38  ;;  %422 = vmatpush1.bf16.msra.mxu0 %v398_v37 }
  0xa7   : > { %483 = vmatpush1.bf16.msra.mxu1 %v462_v39 }
  0xa8   : > { %v520_v41 = vpop.permute.xlu0 %519 }
  0xa9   : > { %v522_v42 = vpop.permute.xlu1 %521  ;;  %925 = vmatmul.mubr.msk.bf16.vlgmr.msra.gmra.mxu0 %vm298_vm0, %v924_v40 }
  0xaa   : > { %v525_v43 = vsel %vm523_vm4, %v520_v41, %v522_v42  ;;  %545 = vmatprep.subr.bf16.mxu0 %v522_v42  ;;  %565 = vmatprep.mubr.bf16.mxu0 %v1002_v20 }
  0xab   : > { %546 = vmatpush1.bf16.msra.mxu0 %v525_v43 }
  0xac   : > { %v453_v44 = vpop.permute.xlu0 %452 }
  0xad   : > { %v455_v45 = vpop.permute.xlu1 %454 }
  0xae   : > { %v461_v46 = vsel %vm460_vm3, %v453_v44, %v455_v45  ;;  %484 = vmatprep.subr.bf16.mxu1 %v455_v45 }
  0xaf   : > { %485 = vmatpush1.bf16.msra.mxu1 %v461_v46 }
  0xb0   : > { %v516_v48 = vpop.permute.xlu0 %515 }
  0xb1   : > { %v518_v49 = vpop.permute.xlu1 %517 }
  0xb2   : > { %v524_v50 = vsel %vm523_vm4, %v516_v48, %v518_v49  ;;  %547 = vmatprep.subr.bf16.mxu0 %v518_v49  ;;  %927 = vmatmul.mubr.msk.bf16.vlgmr.msra.gmra.mxu1 %vm298_vm0, %v926_v47 }
  0xb3   : > { %548 = vmatpush1.bf16.msra.mxu0 %v524_v50  ;;  %628 = vmatprep.mubr.bf16.mxu1 %v1002_v20 }
  0xb4   : > { %v583_v52 = vpop.permute.xlu0 %582 }
  0xb5   : > { %v585_v53 = vpop.permute.xlu1 %584 }
  0xb6   : > { %v588_v54 = vsel %vm586_vm5, %v583_v52, %v585_v53  ;;  %608 = vmatprep.subr.bf16.mxu1 %v585_v53  ;;  %929 = vmatmul.mubr.msk.bf16.vlgmr.msra.gmra.mxu0 %vm298_vm0, %v928_v51 }
  0xb7   : > { %609 = vmatpush1.bf16.msra.mxu1 %v588_v54  ;;  %691 = vmatprep.mubr.bf16.mxu0 %v1002_v20 }
  0xb8   : > { %v646_v55 = vpop.permute.xlu0 %645 }
  0xb9   : > { %v648_v56 = vpop.permute.xlu1 %647 }
  0xba   : > { %v651_v57 = vsel %vm649_vm6, %v646_v55, %v648_v56  ;;  %671 = vmatprep.subr.bf16.mxu0 %v648_v56 }
  0xbb   : > { %672 = vmatpush1.bf16.msra.mxu0 %v651_v57 }
  0xbc   : > { %v579_v58 = vpop.permute.xlu0 %578 }
  0xbd   : > { %v581_v59 = vpop.permute.xlu1 %580 }
  0xbe   : > { %v587_v60 = vsel %vm586_vm5, %v579_v58, %v581_v59  ;;  %610 = vmatprep.subr.bf16.mxu1 %v581_v59 }
  0xbf   : > { %611 = vmatpush1.bf16.msra.mxu1 %v587_v60 }
  0xc0   : > { %v642_v62 = vpop.permute.xlu0 %641 }
  0xc1   : > { %v644_v63 = vpop.permute.xlu1 %643 }
  0xc2   : > { %v650_v0 = vsel %vm649_vm6, %v642_v62, %v644_v63  ;;  %931 = vmatmul.mubr.msk.bf16.vlgmr.msra.gmra.mxu1 %vm298_vm0, %v930_v61  ;;  %673 = vmatprep.subr.bf16.mxu0 %v644_v63 }
  0xc3   : > { %674 = vmatpush1.bf16.msra.mxu0 %v650_v0  ;;  %754 = vmatprep.mubr.bf16.mxu1 %v1002_v20 }
  0xc4   : > { %v709_v2 = vpop.permute.xlu0 %708 }
  0xc5   : > { %v711_v3 = vpop.permute.xlu1 %710 }
  0xc6   : > { %v714_v4 = vsel %vm712_vm7, %v709_v2, %v711_v3  ;;  %933 = vmatmul.mubr.msk.bf16.vlgmr.msra.gmra.mxu0 %vm298_vm0, %v932_v1  ;;  %734 = vmatprep.subr.bf16.mxu1 %v711_v3 }
  0xc7   : > { %735 = vmatpush1.bf16.msra.mxu1 %v714_v4  ;;  %817 = vmatprep.mubr.bf16.mxu0 %v1002_v20 }
  0xc8   : > { %v772_v5 = vpop.permute.xlu0 %771 }
  0xc9   : > { %v774_v6 = vpop.permute.xlu1 %773 }
  0xca   : > { %v777_v7 = vsel %vm775_vm8, %v772_v5, %v774_v6  ;;  %797 = vmatprep.subr.bf16.mxu0 %v774_v6 }
  0xcb   : > { %798 = vmatpush1.bf16.msra.mxu0 %v777_v7 }
  0xcc   : > { %v705_v8 = vpop.permute.xlu0 %704 }
  0xcd   : > { %v707_v9 = vpop.permute.xlu1 %706 }
  0xce   : > { %v713_v10 = vsel %vm712_vm7, %v705_v8, %v707_v9  ;;  %736 = vmatprep.subr.bf16.mxu1 %v707_v9 }
  0xcf   : > { %737 = vmatpush1.bf16.msra.mxu1 %v713_v10 }
  0xd0   : > { %v768_v12 = vpop.permute.xlu0 %767 }
  0xd1   : > { %v770_v13 = vpop.permute.xlu1 %769 }
  0xd2   : > { %v776_v14 = vsel %vm775_vm8, %v768_v12, %v770_v13  ;;  %935 = vmatmul.mubr.msk.bf16.vlgmr.msra.gmra.mxu1 %vm298_vm0, %v934_v11  ;;  %799 = vmatprep.subr.bf16.mxu0 %v770_v13 }
  0xd3   : > { %800 = vmatpush1.bf16.msra.mxu0 %v776_v14 }
  0xd6   : > { %937 = vmatmul.mubr.msk.bf16.vlgmr.msra.gmra.mxu0 %vm298_vm0, %v936_v15 }
  0xdd   : > { %v832_v59 = vpop.permute.xlu0 %831 }
  0xeb   : > { %v380_v16 = vpop.f32.mrf.mxu1 }
  0xed   : > { %v382_v17 = vpop.f32.mrf.mxu1 }
  0xef   : > { %v384_v18 = vpop.f32.mrf.mxu1 }
  0xf1   : > { %v385_v19 = vpop.f32.mrf.mxu1 }
 0x161   : > { %v336_v20 = vpop.f32.mrf.mxu0 }
 0x162   : > { %v381_v37 = vadd.f32 %v380_v16, %v336_v20 }
 0x163   : > { %v338_v21 = vpop.f32.mrf.mxu0 }
 0x164   : > { %v383_v39 = vadd.f32 %v382_v17, %v338_v21 }
 0x165   : > { %v340_v22 = vpop.f32.mrf.mxu0 }
 0x167   : > { %v341_v23 = vpop.f32.mrf.mxu0 }
 0x169   : > { %v441_v24 = vpop.f32.mrf.mxu0 }
 0x16a   : > { %v448_v42 = vadd.f32 %v441_v24, %v381_v37 }
 0x16b   : > { %v443_v25 = vpop.f32.mrf.mxu0 }
 0x16c   : > { %v449_v45 = vadd.f32 %v443_v25, %v383_v39 }
 0x16d   : > { %v445_v26 = vpop.f32.mrf.mxu0 }
 0x16f   : > { %v446_v27 = vpop.f32.mrf.mxu0 }
 0x172   : > { %v504_v28 = vpop.f32.mrf.mxu1 }
 0x173   : > { %v511_v47 = vadd.f32 %v504_v28, %v448_v42 }
 0x174   : > { %v506_v29 = vpop.f32.mrf.mxu1 }
 0x175   : > { %v512_v49 = vadd.f32 %v506_v29, %v449_v45 }
 0x176   : > { %v567_v30 = vpop.f32.mrf.mxu0  ;;  %v508_v31 = vpop.f32.mrf.mxu1 }
 0x177   : > { %v574_v50 = vadd.f32 %v567_v30, %v511_v47 }
 0x178   : > { %v569_v32 = vpop.f32.mrf.mxu0  ;;  %v509_v33 = vpop.f32.mrf.mxu1 }
 0x179   : > { %v575_v51 = vadd.f32 %v569_v32, %v512_v49 }
 0x17a   : > { %v571_v34 = vpop.f32.mrf.mxu0 }
 0x17c   : > { %v572_v35 = vpop.f32.mrf.mxu0 }
 0x182   : > { %v630_v36 = vpop.f32.mrf.mxu1 }
 0x183   : > { %v637_v52 = vadd.f32 %v630_v36, %v574_v50 }
 0x184   : > { %v632_v38 = vpop.f32.mrf.mxu1 }
 0x185   : > { %v638_v54 = vadd.f32 %v632_v38, %v575_v51 }
 0x186   : > { %v693_v40 = vpop.f32.mrf.mxu0  ;;  %v634_v41 = vpop.f32.mrf.mxu1 }
 0x187   : > { %v700_v55 = vadd.f32 %v693_v40, %v637_v52 }
 0x188   : > { %v695_v43 = vpop.f32.mrf.mxu0  ;;  %v635_v44 = vpop.f32.mrf.mxu1 }
 0x189   : > { %v701_v57 = vadd.f32 %v695_v43, %v638_v54 }
 0x18a   : > { %v697_v46 = vpop.f32.mrf.mxu0 }
 0x18c   : > { %v698_v48 = vpop.f32.mrf.mxu0 }
 0x192   : > { %v756_v53 = vpop.f32.mrf.mxu1 }
 0x193   : > { %v763_v58 = vadd.f32 %v756_v53, %v700_v55 }
 0x194   : > { %v758_v56 = vpop.f32.mrf.mxu1 }
 0x195   : > { %v764_v62 = vadd.f32 %v758_v56, %v701_v57 }
 0x196   : > { %v760_v60 = vpop.f32.mrf.mxu1  ;;  %v819_v61 = vpop.f32.mrf.mxu0 }
 0x197   : > { %v826_v63 = vadd.f32 %v819_v61, %v763_v58 }
 0x198   : > { %v761_v0 = vpop.f32.mrf.mxu1  ;;  %v821_v1 = vpop.f32.mrf.mxu0 }
 0x199   : > { %v834_v2 = vadd.f32 %v832_v59, %v826_v63  ;;  %v827_v3 = vadd.f32 %v821_v1, %v764_v62 }
 0x19a   : > { %v823_v4 = vpop.f32.mrf.mxu0 }
 0x19b   : > { %836 = vst [vmem:[%s262_s11] sm:$0xff] %v834_v2  ;;  %v835_v5 = vadd.f32 %v832_v59, %v827_v3 }
 0x19c   : > { %v824_v6 = vpop.f32.mrf.mxu0 }
 0x19d   : > { %838 = vst.msk [vmem:[%s262_s11 + $0x8] sm:$0xff] %vm837_vm9, %v835_v5 }
 0x19e PF: > { %p10_p9 = scmp.ge.s32.totalorder %s1047_s16, 4   ;;  %s1157_s12 = smov %s995_s13 }
 0x19f   : > { %s1158_s13 = smov %s1056_s19  ;;  %s1159_s14 = smov %s1047_s16 }
 0x1a0   :  { %12 = sbr.rel (!%p10_p9) target bundleno = 2 (0x2), region = 119 }

</bundles_post_ra>
